<compile_context>
chip_gen: v6e
topology: v6e:2x2x1
jax: 0.10.0
libtpu: 0.0.40
codegen_flags: <defaults>
</compile_context>

<pallas_src>
import functools

import jax
import jax.numpy as jnp
from jax.experimental import pallas as pl
from jax.experimental.pallas import tpu as pltpu

LAYER_DIMS = [397, 1024, 512, 256, 128, 96]
TEMPERATURE = 1.0
LN_EPS = 1e-5
MASK_NEG = -1e30

D_IN = LAYER_DIMS[0]
D_OUT = LAYER_DIMS[-1]


def _round_up(v, m):
    return (v + m - 1) // m * m


D_IN_PAD = _round_up(D_IN, 128)    # 397 -> 512
D_OUT_PAD = _round_up(D_OUT, 128)  # 96  -> 128


# --------------------------------------------------------------------------
# Kernel
# --------------------------------------------------------------------------
def pt_kernel(
    x_ref, mb_ref,
    w0_ref, b0_ref, g0_ref, be0_ref,
    w1_ref, b1_ref, g1_ref, be1_ref,
    w2_ref, b2_ref, g2_ref, be2_ref,
    w3_ref, b3_ref, g3_ref, be3_ref,
    w4_ref, b4_ref,
    out_ref,
):
    h = x_ref[...]  # (TB, 512) bf16 (pad columns are zero)

    hidden = (
        (w0_ref, b0_ref, g0_ref, be0_ref),
        (w1_ref, b1_ref, g1_ref, be1_ref),
        (w2_ref, b2_ref, g2_ref, be2_ref),
        (w3_ref, b3_ref, g3_ref, be3_ref),
    )
    for w_ref, b_ref, g_ref, be_ref in hidden:
        # bf16 x bf16 -> f32 accumulate on the MXU
        z = jnp.dot(h, w_ref[...], preferred_element_type=jnp.float32) + b_ref[...]
        # LayerNorm, two-pass (centered) variance in f32
        inv_n = 1.0 / z.shape[-1]
        mu = jnp.sum(z, axis=-1, keepdims=True) * inv_n
        d = z - mu
        var = jnp.sum(d * d, axis=-1, keepdims=True) * inv_n
        z = d * jax.lax.rsqrt(var + LN_EPS) * g_ref[...] + be_ref[...]
        # ReLU, then bf16 for the next MXU pass
        h = jnp.maximum(z, 0.0).astype(jnp.bfloat16)

    # Final Linear (output padded 96 -> 128; pad weights/bias are zero)
    logits = jnp.dot(h, w4_ref[...], preferred_element_type=jnp.float32) + b4_ref[...]
    if TEMPERATURE != 1.0:  # compile-time constant; skip dead divide
        logits = logits * (1.0 / TEMPERATURE)

    # masked_fill(mask == 0, -inf) + softmax(dim=1), realized as an additive
    # bias (0 for legal, -1e30 for illegal / pad columns).
    masked = logits + mb_ref[...].astype(jnp.float32)
    m = jnp.max(masked, axis=-1, keepdims=True)
    e = jnp.exp(masked - m)
    denom = jnp.sum(e, axis=-1, keepdims=True)
    r = pl.reciprocal(denom, approx=True)
    r = r * (2.0 - denom * r)  # one Newton step -> ~f32-accurate reciprocal
    out_ref[...] = e * r


# --------------------------------------------------------------------------
# Host-side preparation (done ONCE per parameter set)
# --------------------------------------------------------------------------
def prepare_params(params):
    """Pad to lane multiples, cast weights to bf16, reshape 1-D params to (1, N)."""
    flat = []
    n_layers = len(params)
    for i, p in enumerate(params):
        if i < n_layers - 1:
            w, b, g, be = p
        else:
            w, b = p
            g = be = None
        k, m = w.shape
        kp, mp = _round_up(k, 128), _round_up(m, 128)
        w_p = jnp.zeros((kp, mp), jnp.float32).at[:k, :m].set(w).astype(jnp.bfloat16)
        b_p = jnp.zeros((1, mp), jnp.float32).at[0, :m].set(b)
        flat.extend([w_p, b_p])
        if g is not None:
            flat.extend([jnp.asarray(g, jnp.float32).reshape(1, -1),
                         jnp.asarray(be, jnp.float32).reshape(1, -1)])
    return tuple(flat)


def _choose_tb(batch):
    """Batch-tile size: even number of grid steps when possible (v7x megacore),
    tile depth capped near 512 for large batches, 16-aligned (bf16 sublanes)."""
    bp8 = _round_up(batch, 8)
    if bp8 <= 8:
        return 8
    steps = 2 * max(1, -(-bp8 // 1024))   # even step count, tiles <= ~512
    return _round_up(-(-bp8 // steps), 16)


# --------------------------------------------------------------------------
# Jitted forward: pad(x)->bf16, mask->additive bf16 bias, pallas_call, slice
# --------------------------------------------------------------------------
@functools.partial(jax.jit, static_argnames=("tb", "buffered_params"))
def _pt_forward_impl(x, mask, flat, tb, buffered_params):
    batch = x.shape[0]
    bp = _round_up(max(batch, tb), tb)

    # Input: pad 397 -> 512, pad batch, cast to bf16 (fused into the jit).
    x_p = jnp.zeros((bp, D_IN_PAD), jnp.bfloat16).at[:batch, :D_IN].set(
        x.astype(jnp.bfloat16))
    # Additive mask bias: 0 for legal, MASK_NEG for illegal; pad rows/columns
    # are fully masked so they never receive probability mass.
    mb = jnp.where(mask == 0, MASK_NEG, 0.0).astype(jnp.bfloat16)
    mb_p = jnp.full((bp, D_OUT_PAD), MASK_NEG, jnp.bfloat16).at[
        :batch, :D_OUT].set(mb)

    grid = (bp // tb,)
    x_spec = pl.BlockSpec((tb, D_IN_PAD), lambda i: (i, 0))
    mb_spec = pl.BlockSpec((tb, D_OUT_PAD), lambda i: (i, 0))
    out_spec = pl.BlockSpec((tb, D_OUT_PAD), lambda i: (i, 0))
    # Weights/biases/LN params: full-array blocks, constant index map ->
    # VMEM-resident across batch tiles; single-buffered when supported.
    pipe = {"pipeline_mode": pl.Buffered(1)} if buffered_params else {}
    param_specs = [pl.BlockSpec(p.shape, lambda i: (0, 0), **pipe) for p in flat]

    vmem_limit = (48 << 20) if tb >= 384 else (32 << 20)
    out = pl.pallas_call(
        pt_kernel,
        out_shape=jax.ShapeDtypeStruct((bp, D_OUT_PAD), jnp.float32),
        grid=grid,
        in_specs=[x_spec, mb_spec] + param_specs,
        out_specs=out_spec,
        compiler_params=pltpu.CompilerParams(
            dimension_semantics=("parallel",),
            vmem_limit_bytes=vmem_limit,
        ),
    )(x_p, mb_p, *flat)
    return out[:batch, :D_OUT]


class PTForward:
    """Forward-pass wrapper: pads/casts parameters once and reuses them."""

    def __init__(self, params):
        self.flat = prepare_params(params)
        self._buffered_ok = True

    def __call__(self, x, mask):
        """x: (B, 397) f32; mask: (B, 96) (0 = illegal). Returns (B, 96) probs."""
        tb = _choose_tb(x.shape[0])
        if self._buffered_ok:
            try:
                return _pt_forward_impl(x, mask, self.flat, tb, True)
            except Exception:
                # Fallback if this jax build rejects pl.Buffered(1) on inputs.
                self._buffered_ok = False
        return _pt_forward_impl(x, mask, self.flat, tb, False)


# --------------------------------------------------------------------------
# Parameter init (Xavier-uniform Linear, zero bias, LN gamma=1 / beta=0)
# --------------------------------------------------------------------------
def init_params(key):
    params = []
    n_layers = len(LAYER_DIMS) - 1
    keys = jax.random.split(key, n_layers)
    for i in range(n_layers):
        fan_in, fan_out = LAYER_DIMS[i], LAYER_DIMS[i + 1]
        limit = (6.0 / (fan_in + fan_out)) ** 0.5
        w = jax.random.uniform(keys[i], (fan_in, fan_out), jnp.float32, -limit, limit)
        b = jnp.zeros((fan_out,), jnp.float32)
        if i < n_layers - 1:
            gamma = jnp.ones((fan_out,), jnp.float32)
            beta = jnp.zeros((fan_out,), jnp.float32)
            params.append((w, b, gamma, beta))
        else:
            params.append((w, b))
    return params


def reference_forward(x, mask, params):
    """Pure-JAX reference mirroring the kernel numerics (bf16 matmul, f32 acc)."""
    h = x.astype(jnp.bfloat16)
    for w, b, g, be in params[:-1]:
        z = jnp.dot(h, w.astype(jnp.bfloat16),
                    preferred_element_type=jnp.float32) + b
        mu = jnp.mean(z, axis=-1, keepdims=True)
        var = jnp.mean((z - mu) ** 2, axis=-1, keepdims=True)
        z = (z - mu) / jnp.sqrt(var + LN_EPS) * g + be
        h = jnp.maximum(z, 0.0).astype(jnp.bfloat16)
    w, b = params[-1]
    logits = (jnp.dot(h, w.astype(jnp.bfloat16),
                      preferred_element_type=jnp.float32) + b) / TEMPERATURE
    masked = jnp.where(mask == 0, -jnp.inf, logits)
    return jax.nn.softmax(masked, axis=1)


if __name__ == "__main__":
    key = jax.random.PRNGKey(0)
    k_params, k_x, k_mask = jax.random.split(key, 3)

    params = init_params(k_params)
    forward = PTForward(params)

    # Small test batch (single tile)
    batch = 8
    x = jax.random.normal(k_x, (batch, D_IN), jnp.float32)
    mask = (jax.random.uniform(k_mask, (batch, D_OUT)) > 0.4).astype(jnp.float32)
    mask = mask.at[:, 0].set(1.0)  # at least one legal move per row

    probs = jax.block_until_ready(forward(x, mask))
    ref = reference_forward(x, mask, params)
    assert probs.shape == (batch, D_OUT)
    assert bool(jnp.all(jnp.where(mask == 0, probs == 0.0, True)))
    assert bool(jnp.allclose(jnp.sum(probs, axis=1), 1.0, atol=1e-5))
    assert bool(jnp.allclose(probs, ref, atol=1e-3, rtol=1e-3))

    # Second batch exercising a 2-step grid (megacore path + batch padding)
    batch2 = 24
    k_x2, k_m2 = jax.random.split(k_x)
    x2 = jax.random.normal(k_x2, (batch2, D_IN), jnp.float32)
    mask2 = (jax.random.uniform(k_m2, (batch2, D_OUT)) > 0.4).astype(jnp.float32)
    mask2 = mask2.at[:, 0].set(1.0)
    probs2 = jax.block_until_ready(forward(x2, mask2))
    ref2 = reference_forward(x2, mask2, params)
    assert probs2.shape == (batch2, D_OUT)
    assert bool(jnp.allclose(probs2, ref2, atol=1e-3, rtol=1e-3))

    print("KERNEL_OK")
</pallas_src>

<mosaic_0001>
module attributes {stable_mosaic.version = 11 : i64} {
  func.func @pt_kernel(%arg0: i32, %arg1: memref<8x512xbf16, #tpu.memory_space<vmem>>, %arg2: memref<8x128xbf16, #tpu.memory_space<vmem>>, %arg3: memref<512x1024xbf16, #tpu.memory_space<vmem>>, %arg4: memref<1x1024xf32, #tpu.memory_space<vmem>>, %arg5: memref<1x1024xf32, #tpu.memory_space<vmem>>, %arg6: memref<1x1024xf32, #tpu.memory_space<vmem>>, %arg7: memref<1024x512xbf16, #tpu.memory_space<vmem>>, %arg8: memref<1x512xf32, #tpu.memory_space<vmem>>, %arg9: memref<1x512xf32, #tpu.memory_space<vmem>>, %arg10: memref<1x512xf32, #tpu.memory_space<vmem>>, %arg11: memref<512x256xbf16, #tpu.memory_space<vmem>>, %arg12: memref<1x256xf32, #tpu.memory_space<vmem>>, %arg13: memref<1x256xf32, #tpu.memory_space<vmem>>, %arg14: memref<1x256xf32, #tpu.memory_space<vmem>>, %arg15: memref<256x128xbf16, #tpu.memory_space<vmem>>, %arg16: memref<1x128xf32, #tpu.memory_space<vmem>>, %arg17: memref<1x128xf32, #tpu.memory_space<vmem>>, %arg18: memref<1x128xf32, #tpu.memory_space<vmem>>, %arg19: memref<128x128xbf16, #tpu.memory_space<vmem>>, %arg20: memref<1x128xf32, #tpu.memory_space<vmem>>, %arg21: memref<8x128xf32, #tpu.memory_space<vmem>>) attributes {dimension_semantics = [#tpu.dimension_semantics<parallel>], iteration_bounds = array<i64: 1>, scalar_prefetch = 0 : i64, scratch_operands = 0 : i64, tpu.core_type = #tpu.core_type<tc>, window_params = [{transform_indices = @transform_0, window_bounds = array<i64: 8, 512>}, {transform_indices = @transform_1, window_bounds = array<i64: 8, 128>}, {pipeline_mode = #tpu.pipeline_mode<synchronous>, transform_indices = @transform_2, window_bounds = array<i64: 512, 1024>}, {pipeline_mode = #tpu.pipeline_mode<synchronous>, transform_indices = @transform_3, window_bounds = array<i64: 1, 1024>}, {pipeline_mode = #tpu.pipeline_mode<synchronous>, transform_indices = @transform_4, window_bounds = array<i64: 1, 1024>}, {pipeline_mode = #tpu.pipeline_mode<synchronous>, transform_indices = @transform_5, window_bounds = array<i64: 1, 1024>}, {pipeline_mode = #tpu.pipeline_mode<synchronous>, transform_indices = @transform_6, window_bounds = array<i64: 1024, 512>}, {pipeline_mode = #tpu.pipeline_mode<synchronous>, transform_indices = @transform_7, window_bounds = array<i64: 1, 512>}, {pipeline_mode = #tpu.pipeline_mode<synchronous>, transform_indices = @transform_8, window_bounds = array<i64: 1, 512>}, {pipeline_mode = #tpu.pipeline_mode<synchronous>, transform_indices = @transform_9, window_bounds = array<i64: 1, 512>}, {pipeline_mode = #tpu.pipeline_mode<synchronous>, transform_indices = @transform_10, window_bounds = array<i64: 512, 256>}, {pipeline_mode = #tpu.pipeline_mode<synchronous>, transform_indices = @transform_11, window_bounds = array<i64: 1, 256>}, {pipeline_mode = #tpu.pipeline_mode<synchronous>, transform_indices = @transform_12, window_bounds = array<i64: 1, 256>}, {pipeline_mode = #tpu.pipeline_mode<synchronous>, transform_indices = @transform_13, window_bounds = array<i64: 1, 256>}, {pipeline_mode = #tpu.pipeline_mode<synchronous>, transform_indices = @transform_14, window_bounds = array<i64: 256, 128>}, {pipeline_mode = #tpu.pipeline_mode<synchronous>, transform_indices = @transform_15, window_bounds = array<i64: 1, 128>}, {pipeline_mode = #tpu.pipeline_mode<synchronous>, transform_indices = @transform_16, window_bounds = array<i64: 1, 128>}, {pipeline_mode = #tpu.pipeline_mode<synchronous>, transform_indices = @transform_17, window_bounds = array<i64: 1, 128>}, {pipeline_mode = #tpu.pipeline_mode<synchronous>, transform_indices = @transform_18, window_bounds = array<i64: 128, 128>}, {pipeline_mode = #tpu.pipeline_mode<synchronous>, transform_indices = @transform_19, window_bounds = array<i64: 1, 128>}, {transform_indices = @transform_20, window_bounds = array<i64: 8, 128>}]} {
    %c0 = arith.constant 0 : index
    %c0_0 = arith.constant 0 : index
    %0 = vector.load %arg1[%c0, %c0_0] : memref<8x512xbf16, #tpu.memory_space<vmem>>, vector<8x512xbf16>
    %c0_1 = arith.constant 0 : index
    %c0_2 = arith.constant 0 : index
    %1 = vector.load %arg3[%c0_1, %c0_2] : memref<512x1024xbf16, #tpu.memory_space<vmem>>, vector<512x1024xbf16>
    %cst = arith.constant dense<0.000000e+00> : vector<8x1024xf32>
    %2 = tpu.matmul %0, %1, %cst {dimension_numbers = #tpu.dot_dimension_numbers<[1], [0], [0], [1], [0, 0, 1, 1], [], []>} : vector<8x512xbf16>, vector<512x1024xbf16>, vector<8x1024xf32> -> vector<8x1024xf32>
    %c0_3 = arith.constant 0 : index
    %c0_4 = arith.constant 0 : index
    %3 = vector.load %arg4[%c0_3, %c0_4] : memref<1x1024xf32, #tpu.memory_space<vmem>>, vector<1x1024xf32>
    %4 = vector.broadcast %3 : vector<1x1024xf32> to vector<8x1024xf32>
    %5 = arith.addf %2, %4 : vector<8x1024xf32>
    %cst_5 = arith.constant dense<0.000000e+00> : vector<8xf32>
    %6 = vector.multi_reduction <add>, %5, %cst_5 [1] : vector<8x1024xf32> to vector<8xf32>
    %7 = vector.shape_cast %6 : vector<8xf32> to vector<8x1xf32>
    %cst_6 = arith.constant 9.765625E-4 : f32
    %8 = vector.broadcast %cst_6 : f32 to vector<8x1xf32>
    %9 = arith.mulf %7, %8 : vector<8x1xf32>
    %10 = vector.broadcast %9 : vector<8x1xf32> to vector<8x1024xf32>
    %11 = arith.subf %5, %10 : vector<8x1024xf32>
    %12 = arith.mulf %11, %11 : vector<8x1024xf32>
    %cst_7 = arith.constant dense<0.000000e+00> : vector<8xf32>
    %13 = vector.multi_reduction <add>, %12, %cst_7 [1] : vector<8x1024xf32> to vector<8xf32>
    %14 = vector.shape_cast %13 : vector<8xf32> to vector<8x1xf32>
    %cst_8 = arith.constant 9.765625E-4 : f32
    %15 = vector.broadcast %cst_8 : f32 to vector<8x1xf32>
    %16 = arith.mulf %14, %15 : vector<8x1xf32>
    %cst_9 = arith.constant 9.99999974E-6 : f32
    %17 = vector.broadcast %cst_9 : f32 to vector<8x1xf32>
    %18 = arith.addf %16, %17 : vector<8x1xf32>
    %19 = math.rsqrt %18 : vector<8x1xf32>
    %20 = vector.broadcast %19 : vector<8x1xf32> to vector<8x1024xf32>
    %21 = arith.mulf %11, %20 : vector<8x1024xf32>
    %c0_10 = arith.constant 0 : index
    %c0_11 = arith.constant 0 : index
    %22 = vector.load %arg5[%c0_10, %c0_11] : memref<1x1024xf32, #tpu.memory_space<vmem>>, vector<1x1024xf32>
    %23 = vector.broadcast %22 : vector<1x1024xf32> to vector<8x1024xf32>
    %24 = arith.mulf %21, %23 : vector<8x1024xf32>
    %c0_12 = arith.constant 0 : index
    %c0_13 = arith.constant 0 : index
    %25 = vector.load %arg6[%c0_12, %c0_13] : memref<1x1024xf32, #tpu.memory_space<vmem>>, vector<1x1024xf32>
    %26 = vector.broadcast %25 : vector<1x1024xf32> to vector<8x1024xf32>
    %27 = arith.addf %24, %26 : vector<8x1024xf32>
    %cst_14 = arith.constant 0.000000e+00 : f32
    %28 = vector.broadcast %cst_14 : f32 to vector<8x1024xf32>
    %29 = arith.maximumf %27, %28 : vector<8x1024xf32>
    %30 = arith.truncf %29 : vector<8x1024xf32> to vector<8x1024xbf16>
    %c0_15 = arith.constant 0 : index
    %c0_16 = arith.constant 0 : index
    %31 = vector.load %arg7[%c0_15, %c0_16] : memref<1024x512xbf16, #tpu.memory_space<vmem>>, vector<1024x512xbf16>
    %cst_17 = arith.constant dense<0.000000e+00> : vector<8x512xf32>
    %32 = tpu.matmul %30, %31, %cst_17 {dimension_numbers = #tpu.dot_dimension_numbers<[1], [0], [0], [1], [0, 0, 1, 1], [], []>} : vector<8x1024xbf16>, vector<1024x512xbf16>, vector<8x512xf32> -> vector<8x512xf32>
    %c0_18 = arith.constant 0 : index
    %c0_19 = arith.constant 0 : index
    %33 = vector.load %arg8[%c0_18, %c0_19] : memref<1x512xf32, #tpu.memory_space<vmem>>, vector<1x512xf32>
    %34 = vector.broadcast %33 : vector<1x512xf32> to vector<8x512xf32>
    %35 = arith.addf %32, %34 : vector<8x512xf32>
    %cst_20 = arith.constant dense<0.000000e+00> : vector<8xf32>
    %36 = vector.multi_reduction <add>, %35, %cst_20 [1] : vector<8x512xf32> to vector<8xf32>
    %37 = vector.shape_cast %36 : vector<8xf32> to vector<8x1xf32>
    %cst_21 = arith.constant 0.001953125 : f32
    %38 = vector.broadcast %cst_21 : f32 to vector<8x1xf32>
    %39 = arith.mulf %37, %38 : vector<8x1xf32>
    %40 = vector.broadcast %39 : vector<8x1xf32> to vector<8x512xf32>
    %41 = arith.subf %35, %40 : vector<8x512xf32>
    %42 = arith.mulf %41, %41 : vector<8x512xf32>
    %cst_22 = arith.constant dense<0.000000e+00> : vector<8xf32>
    %43 = vector.multi_reduction <add>, %42, %cst_22 [1] : vector<8x512xf32> to vector<8xf32>
    %44 = vector.shape_cast %43 : vector<8xf32> to vector<8x1xf32>
    %cst_23 = arith.constant 0.001953125 : f32
    %45 = vector.broadcast %cst_23 : f32 to vector<8x1xf32>
    %46 = arith.mulf %44, %45 : vector<8x1xf32>
    %cst_24 = arith.constant 9.99999974E-6 : f32
    %47 = vector.broadcast %cst_24 : f32 to vector<8x1xf32>
    %48 = arith.addf %46, %47 : vector<8x1xf32>
    %49 = math.rsqrt %48 : vector<8x1xf32>
    %50 = vector.broadcast %49 : vector<8x1xf32> to vector<8x512xf32>
    %51 = arith.mulf %41, %50 : vector<8x512xf32>
    %c0_25 = arith.constant 0 : index
    %c0_26 = arith.constant 0 : index
    %52 = vector.load %arg9[%c0_25, %c0_26] : memref<1x512xf32, #tpu.memory_space<vmem>>, vector<1x512xf32>
    %53 = vector.broadcast %52 : vector<1x512xf32> to vector<8x512xf32>
    %54 = arith.mulf %51, %53 : vector<8x512xf32>
    %c0_27 = arith.constant 0 : index
    %c0_28 = arith.constant 0 : index
    %55 = vector.load %arg10[%c0_27, %c0_28] : memref<1x512xf32, #tpu.memory_space<vmem>>, vector<1x512xf32>
    %56 = vector.broadcast %55 : vector<1x512xf32> to vector<8x512xf32>
    %57 = arith.addf %54, %56 : vector<8x512xf32>
    %cst_29 = arith.constant 0.000000e+00 : f32
    %58 = vector.broadcast %cst_29 : f32 to vector<8x512xf32>
    %59 = arith.maximumf %57, %58 : vector<8x512xf32>
    %60 = arith.truncf %59 : vector<8x512xf32> to vector<8x512xbf16>
    %c0_30 = arith.constant 0 : index
    %c0_31 = arith.constant 0 : index
    %61 = vector.load %arg11[%c0_30, %c0_31] : memref<512x256xbf16, #tpu.memory_space<vmem>>, vector<512x256xbf16>
    %cst_32 = arith.constant dense<0.000000e+00> : vector<8x256xf32>
    %62 = tpu.matmul %60, %61, %cst_32 {dimension_numbers = #tpu.dot_dimension_numbers<[1], [0], [0], [1], [0, 0, 1, 1], [], []>} : vector<8x512xbf16>, vector<512x256xbf16>, vector<8x256xf32> -> vector<8x256xf32>
    %c0_33 = arith.constant 0 : index
    %c0_34 = arith.constant 0 : index
    %63 = vector.load %arg12[%c0_33, %c0_34] : memref<1x256xf32, #tpu.memory_space<vmem>>, vector<1x256xf32>
    %64 = vector.broadcast %63 : vector<1x256xf32> to vector<8x256xf32>
    %65 = arith.addf %62, %64 : vector<8x256xf32>
    %cst_35 = arith.constant dense<0.000000e+00> : vector<8xf32>
    %66 = vector.multi_reduction <add>, %65, %cst_35 [1] : vector<8x256xf32> to vector<8xf32>
    %67 = vector.shape_cast %66 : vector<8xf32> to vector<8x1xf32>
    %cst_36 = arith.constant 3.906250e-03 : f32
    %68 = vector.broadcast %cst_36 : f32 to vector<8x1xf32>
    %69 = arith.mulf %67, %68 : vector<8x1xf32>
    %70 = vector.broadcast %69 : vector<8x1xf32> to vector<8x256xf32>
    %71 = arith.subf %65, %70 : vector<8x256xf32>
    %72 = arith.mulf %71, %71 : vector<8x256xf32>
    %cst_37 = arith.constant dense<0.000000e+00> : vector<8xf32>
    %73 = vector.multi_reduction <add>, %72, %cst_37 [1] : vector<8x256xf32> to vector<8xf32>
    %74 = vector.shape_cast %73 : vector<8xf32> to vector<8x1xf32>
    %cst_38 = arith.constant 3.906250e-03 : f32
    %75 = vector.broadcast %cst_38 : f32 to vector<8x1xf32>
    %76 = arith.mulf %74, %75 : vector<8x1xf32>
    %cst_39 = arith.constant 9.99999974E-6 : f32
    %77 = vector.broadcast %cst_39 : f32 to vector<8x1xf32>
    %78 = arith.addf %76, %77 : vector<8x1xf32>
    %79 = math.rsqrt %78 : vector<8x1xf32>
    %80 = vector.broadcast %79 : vector<8x1xf32> to vector<8x256xf32>
    %81 = arith.mulf %71, %80 : vector<8x256xf32>
    %c0_40 = arith.constant 0 : index
    %c0_41 = arith.constant 0 : index
    %82 = vector.load %arg13[%c0_40, %c0_41] : memref<1x256xf32, #tpu.memory_space<vmem>>, vector<1x256xf32>
    %83 = vector.broadcast %82 : vector<1x256xf32> to vector<8x256xf32>
    %84 = arith.mulf %81, %83 : vector<8x256xf32>
    %c0_42 = arith.constant 0 : index
    %c0_43 = arith.constant 0 : index
    %85 = vector.load %arg14[%c0_42, %c0_43] : memref<1x256xf32, #tpu.memory_space<vmem>>, vector<1x256xf32>
    %86 = vector.broadcast %85 : vector<1x256xf32> to vector<8x256xf32>
    %87 = arith.addf %84, %86 : vector<8x256xf32>
    %cst_44 = arith.constant 0.000000e+00 : f32
    %88 = vector.broadcast %cst_44 : f32 to vector<8x256xf32>
    %89 = arith.maximumf %87, %88 : vector<8x256xf32>
    %90 = arith.truncf %89 : vector<8x256xf32> to vector<8x256xbf16>
    %c0_45 = arith.constant 0 : index
    %c0_46 = arith.constant 0 : index
    %91 = vector.load %arg15[%c0_45, %c0_46] : memref<256x128xbf16, #tpu.memory_space<vmem>>, vector<256x128xbf16>
    %cst_47 = arith.constant dense<0.000000e+00> : vector<8x128xf32>
    %92 = tpu.matmul %90, %91, %cst_47 {dimension_numbers = #tpu.dot_dimension_numbers<[1], [0], [0], [1], [0, 0, 1, 1], [], []>} : vector<8x256xbf16>, vector<256x128xbf16>, vector<8x128xf32> -> vector<8x128xf32>
    %c0_48 = arith.constant 0 : index
    %c0_49 = arith.constant 0 : index
    %93 = vector.load %arg16[%c0_48, %c0_49] : memref<1x128xf32, #tpu.memory_space<vmem>>, vector<1x128xf32>
    %94 = vector.broadcast %93 : vector<1x128xf32> to vector<8x128xf32>
    %95 = arith.addf %92, %94 : vector<8x128xf32>
    %cst_50 = arith.constant dense<0.000000e+00> : vector<8xf32>
    %96 = vector.multi_reduction <add>, %95, %cst_50 [1] : vector<8x128xf32> to vector<8xf32>
    %97 = vector.shape_cast %96 : vector<8xf32> to vector<8x1xf32>
    %cst_51 = arith.constant 7.812500e-03 : f32
    %98 = vector.broadcast %cst_51 : f32 to vector<8x1xf32>
    %99 = arith.mulf %97, %98 : vector<8x1xf32>
    %100 = vector.broadcast %99 : vector<8x1xf32> to vector<8x128xf32>
    %101 = arith.subf %95, %100 : vector<8x128xf32>
    %102 = arith.mulf %101, %101 : vector<8x128xf32>
    %cst_52 = arith.constant dense<0.000000e+00> : vector<8xf32>
    %103 = vector.multi_reduction <add>, %102, %cst_52 [1] : vector<8x128xf32> to vector<8xf32>
    %104 = vector.shape_cast %103 : vector<8xf32> to vector<8x1xf32>
    %cst_53 = arith.constant 7.812500e-03 : f32
    %105 = vector.broadcast %cst_53 : f32 to vector<8x1xf32>
    %106 = arith.mulf %104, %105 : vector<8x1xf32>
    %cst_54 = arith.constant 9.99999974E-6 : f32
    %107 = vector.broadcast %cst_54 : f32 to vector<8x1xf32>
    %108 = arith.addf %106, %107 : vector<8x1xf32>
    %109 = math.rsqrt %108 : vector<8x1xf32>
    %110 = vector.broadcast %109 : vector<8x1xf32> to vector<8x128xf32>
    %111 = arith.mulf %101, %110 : vector<8x128xf32>
    %c0_55 = arith.constant 0 : index
    %c0_56 = arith.constant 0 : index
    %112 = vector.load %arg17[%c0_55, %c0_56] : memref<1x128xf32, #tpu.memory_space<vmem>>, vector<1x128xf32>
    %113 = vector.broadcast %112 : vector<1x128xf32> to vector<8x128xf32>
    %114 = arith.mulf %111, %113 : vector<8x128xf32>
    %c0_57 = arith.constant 0 : index
    %c0_58 = arith.constant 0 : index
    %115 = vector.load %arg18[%c0_57, %c0_58] : memref<1x128xf32, #tpu.memory_space<vmem>>, vector<1x128xf32>
    %116 = vector.broadcast %115 : vector<1x128xf32> to vector<8x128xf32>
    %117 = arith.addf %114, %116 : vector<8x128xf32>
    %cst_59 = arith.constant 0.000000e+00 : f32
    %118 = vector.broadcast %cst_59 : f32 to vector<8x128xf32>
    %119 = arith.maximumf %117, %118 : vector<8x128xf32>
    %120 = arith.truncf %119 : vector<8x128xf32> to vector<8x128xbf16>
    %c0_60 = arith.constant 0 : index
    %c0_61 = arith.constant 0 : index
    %121 = vector.load %arg19[%c0_60, %c0_61] : memref<128x128xbf16, #tpu.memory_space<vmem>>, vector<128x128xbf16>
    %cst_62 = arith.constant dense<0.000000e+00> : vector<8x128xf32>
    %122 = tpu.matmul %120, %121, %cst_62 {dimension_numbers = #tpu.dot_dimension_numbers<[1], [0], [0], [1], [0, 0, 1, 1], [], []>} : vector<8x128xbf16>, vector<128x128xbf16>, vector<8x128xf32> -> vector<8x128xf32>
    %c0_63 = arith.constant 0 : index
    %c0_64 = arith.constant 0 : index
    %123 = vector.load %arg20[%c0_63, %c0_64] : memref<1x128xf32, #tpu.memory_space<vmem>>, vector<1x128xf32>
    %124 = vector.broadcast %123 : vector<1x128xf32> to vector<8x128xf32>
    %125 = arith.addf %122, %124 : vector<8x128xf32>
    %c0_65 = arith.constant 0 : index
    %c0_66 = arith.constant 0 : index
    %126 = vector.load %arg2[%c0_65, %c0_66] : memref<8x128xbf16, #tpu.memory_space<vmem>>, vector<8x128xbf16>
    %127 = arith.extf %126 : vector<8x128xbf16> to vector<8x128xf32>
    %128 = arith.addf %125, %127 : vector<8x128xf32>
    %cst_67 = arith.constant dense<0xFF800000> : vector<8xf32>
    %129 = vector.multi_reduction <maximumf>, %128, %cst_67 [1] : vector<8x128xf32> to vector<8xf32>
    %130 = vector.shape_cast %129 : vector<8xf32> to vector<8x1xf32>
    %131 = vector.broadcast %130 : vector<8x1xf32> to vector<8x128xf32>
    %132 = arith.subf %128, %131 : vector<8x128xf32>
    %133 = math.exp %132 : vector<8x128xf32>
    %cst_68 = arith.constant dense<0.000000e+00> : vector<8xf32>
    %134 = vector.multi_reduction <add>, %133, %cst_68 [1] : vector<8x128xf32> to vector<8xf32>
    %135 = vector.shape_cast %134 : vector<8xf32> to vector<8x1xf32>
    %136 = tpu.reciprocal %135 {approx = true} : vector<8x1xf32> -> vector<8x1xf32>
    %137 = arith.mulf %135, %136 : vector<8x1xf32>
    %cst_69 = arith.constant 2.000000e+00 : f32
    %138 = vector.broadcast %cst_69 : f32 to vector<8x1xf32>
    %139 = arith.subf %138, %137 : vector<8x1xf32>
    %140 = arith.mulf %136, %139 : vector<8x1xf32>
    %141 = vector.broadcast %140 : vector<8x1xf32> to vector<8x128xf32>
    %142 = arith.mulf %133, %141 : vector<8x128xf32>
    %c0_70 = arith.constant 0 : index
    %c0_71 = arith.constant 0 : index
    %143 = vector.load %arg21[%c0_70, %c0_71] : memref<8x128xf32, #tpu.memory_space<vmem>>, vector<8x128xf32>
    tpu.vector_store %arg21[%c0_70, %c0_71], %142 {strides = array<i32>} : memref<8x128xf32, #tpu.memory_space<vmem>>, vector<8x128xf32>,
    return
  }
  func.func @transform_0(%arg0: i32) -> (i32, i32) {
    %c0_i32 = arith.constant 0 : i32
    %c0_i32_0 = arith.constant 0 : i32
    return %arg0, %c0_i32 : i32, i32
  }
  func.func @transform_1(%arg0: i32) -> (i32, i32) {
    %c0_i32 = arith.constant 0 : i32
    %c0_i32_0 = arith.constant 0 : i32
    return %arg0, %c0_i32 : i32, i32
  }
  func.func @transform_2(%arg0: i32) -> (i32, i32) {
    %c0_i32 = arith.constant 0 : i32
    %c0_i32_0 = arith.constant 0 : i32
    %c0_i32_1 = arith.constant 0 : i32
    return %c0_i32, %c0_i32_0 : i32, i32
  }
  func.func @transform_3(%arg0: i32) -> (i32, i32) {
    %c0_i32 = arith.constant 0 : i32
    %c0_i32_0 = arith.constant 0 : i32
    %c0_i32_1 = arith.constant 0 : i32
    return %c0_i32, %c0_i32_0 : i32, i32
  }
  func.func @transform_4(%arg0: i32) -> (i32, i32) {
    %c0_i32 = arith.constant 0 : i32
    %c0_i32_0 = arith.constant 0 : i32
    %c0_i32_1 = arith.constant 0 : i32
    return %c0_i32, %c0_i32_0 : i32, i32
  }
  func.func @transform_5(%arg0: i32) -> (i32, i32) {
    %c0_i32 = arith.constant 0 : i32
    %c0_i32_0 = arith.constant 0 : i32
    %c0_i32_1 = arith.constant 0 : i32
    return %c0_i32, %c0_i32_0 : i32, i32
  }
  func.func @transform_6(%arg0: i32) -> (i32, i32) {
    %c0_i32 = arith.constant 0 : i32
    %c0_i32_0 = arith.constant 0 : i32
    %c0_i32_1 = arith.constant 0 : i32
    return %c0_i32, %c0_i32_0 : i32, i32
  }
  func.func @transform_7(%arg0: i32) -> (i32, i32) {
    %c0_i32 = arith.constant 0 : i32
    %c0_i32_0 = arith.constant 0 : i32
    %c0_i32_1 = arith.constant 0 : i32
    return %c0_i32, %c0_i32_0 : i32, i32
  }
  func.func @transform_8(%arg0: i32) -> (i32, i32) {
    %c0_i32 = arith.constant 0 : i32
    %c0_i32_0 = arith.constant 0 : i32
    %c0_i32_1 = arith.constant 0 : i32
    return %c0_i32, %c0_i32_0 : i32, i32
  }
  func.func @transform_9(%arg0: i32) -> (i32, i32) {
    %c0_i32 = arith.constant 0 : i32
    %c0_i32_0 = arith.constant 0 : i32
    %c0_i32_1 = arith.constant 0 : i32
    return %c0_i32, %c0_i32_0 : i32, i32
  }
  func.func @transform_10(%arg0: i32) -> (i32, i32) {
    %c0_i32 = arith.constant 0 : i32
    %c0_i32_0 = arith.constant 0 : i32
    %c0_i32_1 = arith.constant 0 : i32
    return %c0_i32, %c0_i32_0 : i32, i32
  }
  func.func @transform_11(%arg0: i32) -> (i32, i32) {
    %c0_i32 = arith.constant 0 : i32
    %c0_i32_0 = arith.constant 0 : i32
    %c0_i32_1 = arith.constant 0 : i32
    return %c0_i32, %c0_i32_0 : i32, i32
  }
  func.func @transform_12(%arg0: i32) -> (i32, i32) {
    %c0_i32 = arith.constant 0 : i32
    %c0_i32_0 = arith.constant 0 : i32
    %c0_i32_1 = arith.constant 0 : i32
    return %c0_i32, %c0_i32_0 : i32, i32
  }
  func.func @transform_13(%arg0: i32) -> (i32, i32) {
    %c0_i32 = arith.constant 0 : i32
    %c0_i32_0 = arith.constant 0 : i32
    %c0_i32_1 = arith.constant 0 : i32
    return %c0_i32, %c0_i32_0 : i32, i32
  }
  func.func @transform_14(%arg0: i32) -> (i32, i32) {
    %c0_i32 = arith.constant 0 : i32
    %c0_i32_0 = arith.constant 0 : i32
    %c0_i32_1 = arith.constant 0 : i32
    return %c0_i32, %c0_i32_0 : i32, i32
  }
  func.func @transform_15(%arg0: i32) -> (i32, i32) {
    %c0_i32 = arith.constant 0 : i32
    %c0_i32_0 = arith.constant 0 : i32
    %c0_i32_1 = arith.constant 0 : i32
    return %c0_i32, %c0_i32_0 : i32, i32
  }
  func.func @transform_16(%arg0: i32) -> (i32, i32) {
    %c0_i32 = arith.constant 0 : i32
    %c0_i32_0 = arith.constant 0 : i32
    %c0_i32_1 = arith.constant 0 : i32
    return %c0_i32, %c0_i32_0 : i32, i32
  }
  func.func @transform_17(%arg0: i32) -> (i32, i32) {
    %c0_i32 = arith.constant 0 : i32
    %c0_i32_0 = arith.constant 0 : i32
    %c0_i32_1 = arith.constant 0 : i32
    return %c0_i32, %c0_i32_0 : i32, i32
  }
  func.func @transform_18(%arg0: i32) -> (i32, i32) {
    %c0_i32 = arith.constant 0 : i32
    %c0_i32_0 = arith.constant 0 : i32
    %c0_i32_1 = arith.constant 0 : i32
    return %c0_i32, %c0_i32_0 : i32, i32
  }
  func.func @transform_19(%arg0: i32) -> (i32, i32) {
    %c0_i32 = arith.constant 0 : i32
    %c0_i32_0 = arith.constant 0 : i32
    %c0_i32_1 = arith.constant 0 : i32
    return %c0_i32, %c0_i32_0 : i32, i32
  }
  func.func @transform_20(%arg0: i32) -> (i32, i32) {
    %c0_i32 = arith.constant 0 : i32
    %c0_i32_0 = arith.constant 0 : i32
    return %arg0, %c0_i32 : i32, i32
  }
}

module attributes {stable_mosaic.version = 11 : i64} {
  func.func @pt_kernel(%arg0: i32, %arg1: memref<8x512xbf16, #tpu.memory_space<vmem>>, %arg2: memref<8x128xbf16, #tpu.memory_space<vmem>>, %arg3: memref<512x1024xbf16, #tpu.memory_space<vmem>>, %arg4: memref<1x1024xf32, #tpu.memory_space<vmem>>, %arg5: memref<1x1024xf32, #tpu.memory_space<vmem>>, %arg6: memref<1x1024xf32, #tpu.memory_space<vmem>>, %arg7: memref<1024x512xbf16, #tpu.memory_space<vmem>>, %arg8: memref<1x512xf32, #tpu.memory_space<vmem>>, %arg9: memref<1x512xf32, #tpu.memory_space<vmem>>, %arg10: memref<1x512xf32, #tpu.memory_space<vmem>>, %arg11: memref<512x256xbf16, #tpu.memory_space<vmem>>, %arg12: memref<1x256xf32, #tpu.memory_space<vmem>>, %arg13: memref<1x256xf32, #tpu.memory_space<vmem>>, %arg14: memref<1x256xf32, #tpu.memory_space<vmem>>, %arg15: memref<256x128xbf16, #tpu.memory_space<vmem>>, %arg16: memref<1x128xf32, #tpu.memory_space<vmem>>, %arg17: memref<1x128xf32, #tpu.memory_space<vmem>>, %arg18: memref<1x128xf32, #tpu.memory_space<vmem>>, %arg19: memref<128x128xbf16, #tpu.memory_space<vmem>>, %arg20: memref<1x128xf32, #tpu.memory_space<vmem>>, %arg21: memref<8x128xf32, #tpu.memory_space<vmem>>) attributes {dimension_semantics = [#tpu.dimension_semantics<parallel>], iteration_bounds = array<i64: 1>, scalar_prefetch = 0 : i64, scratch_operands = 0 : i64, tpu.core_type = #tpu.core_type<tc>, window_params = [{transform_indices = @transform_0, window_bounds = array<i64: 8, 512>}, {transform_indices = @transform_1, window_bounds = array<i64: 8, 128>}, {pipeline_mode = #tpu.pipeline_mode<synchronous>, transform_indices = @transform_2, window_bounds = array<i64: 512, 1024>}, {pipeline_mode = #tpu.pipeline_mode<synchronous>, transform_indices = @transform_3, window_bounds = array<i64: 1, 1024>}, {pipeline_mode = #tpu.pipeline_mode<synchronous>, transform_indices = @transform_4, window_bounds = array<i64: 1, 1024>}, {pipeline_mode = #tpu.pipeline_mode<synchronous>, transform_indices = @transform_5, window_bounds = array<i64: 1, 1024>}, {pipeline_mode = #tpu.pipeline_mode<synchronous>, transform_indices = @transform_6, window_bounds = array<i64: 1024, 512>}, {pipeline_mode = #tpu.pipeline_mode<synchronous>, transform_indices = @transform_7, window_bounds = array<i64: 1, 512>}, {pipeline_mode = #tpu.pipeline_mode<synchronous>, transform_indices = @transform_8, window_bounds = array<i64: 1, 512>}, {pipeline_mode = #tpu.pipeline_mode<synchronous>, transform_indices = @transform_9, window_bounds = array<i64: 1, 512>}, {pipeline_mode = #tpu.pipeline_mode<synchronous>, transform_indices = @transform_10, window_bounds = array<i64: 512, 256>}, {pipeline_mode = #tpu.pipeline_mode<synchronous>, transform_indices = @transform_11, window_bounds = array<i64: 1, 256>}, {pipeline_mode = #tpu.pipeline_mode<synchronous>, transform_indices = @transform_12, window_bounds = array<i64: 1, 256>}, {pipeline_mode = #tpu.pipeline_mode<synchronous>, transform_indices = @transform_13, window_bounds = array<i64: 1, 256>}, {pipeline_mode = #tpu.pipeline_mode<synchronous>, transform_indices = @transform_14, window_bounds = array<i64: 256, 128>}, {pipeline_mode = #tpu.pipeline_mode<synchronous>, transform_indices = @transform_15, window_bounds = array<i64: 1, 128>}, {pipeline_mode = #tpu.pipeline_mode<synchronous>, transform_indices = @transform_16, window_bounds = array<i64: 1, 128>}, {pipeline_mode = #tpu.pipeline_mode<synchronous>, transform_indices = @transform_17, window_bounds = array<i64: 1, 128>}, {pipeline_mode = #tpu.pipeline_mode<synchronous>, transform_indices = @transform_18, window_bounds = array<i64: 128, 128>}, {pipeline_mode = #tpu.pipeline_mode<synchronous>, transform_indices = @transform_19, window_bounds = array<i64: 1, 128>}, {transform_indices = @transform_20, window_bounds = array<i64: 8, 128>}]} {
    %c0 = arith.constant 0 : index
    %c0_0 = arith.constant 0 : index
    %0 = vector.load %arg1[%c0, %c0_0] : memref<8x512xbf16, #tpu.memory_space<vmem>>, vector<8x512xbf16>
    %c0_1 = arith.constant 0 : index
    %c0_2 = arith.constant 0 : index
    %1 = vector.load %arg3[%c0_1, %c0_2] : memref<512x1024xbf16, #tpu.memory_space<vmem>>, vector<512x1024xbf16>
    %cst = arith.constant dense<0.000000e+00> : vector<8x1024xf32>
    %2 = tpu.matmul %0, %1, %cst {dimension_numbers = #tpu.dot_dimension_numbers<[1], [0], [0], [1], [0, 0, 1, 1], [], []>} : vector<8x512xbf16>, vector<512x1024xbf16>, vector<8x1024xf32> -> vector<8x1024xf32>
    %c0_3 = arith.constant 0 : index
    %c0_4 = arith.constant 0 : index
    %3 = vector.load %arg4[%c0_3, %c0_4] : memref<1x1024xf32, #tpu.memory_space<vmem>>, vector<1x1024xf32>
    %4 = vector.broadcast %3 : vector<1x1024xf32> to vector<8x1024xf32>
    %5 = arith.addf %2, %4 : vector<8x1024xf32>
    %cst_5 = arith.constant dense<0.000000e+00> : vector<8xf32>
    %6 = vector.multi_reduction <add>, %5, %cst_5 [1] : vector<8x1024xf32> to vector<8xf32>
    %7 = vector.shape_cast %6 : vector<8xf32> to vector<8x1xf32>
    %cst_6 = arith.constant 9.765625E-4 : f32
    %8 = vector.broadcast %cst_6 : f32 to vector<8x1xf32>
    %9 = arith.mulf %7, %8 : vector<8x1xf32>
    %10 = vector.broadcast %9 : vector<8x1xf32> to vector<8x1024xf32>
    %11 = arith.subf %5, %10 : vector<8x1024xf32>
    %12 = arith.mulf %11, %11 : vector<8x1024xf32>
    %cst_7 = arith.constant dense<0.000000e+00> : vector<8xf32>
    %13 = vector.multi_reduction <add>, %12, %cst_7 [1] : vector<8x1024xf32> to vector<8xf32>
    %14 = vector.shape_cast %13 : vector<8xf32> to vector<8x1xf32>
    %cst_8 = arith.constant 9.765625E-4 : f32
    %15 = vector.broadcast %cst_8 : f32 to vector<8x1xf32>
    %16 = arith.mulf %14, %15 : vector<8x1xf32>
    %cst_9 = arith.constant 9.99999974E-6 : f32
    %17 = vector.broadcast %cst_9 : f32 to vector<8x1xf32>
    %18 = arith.addf %16, %17 : vector<8x1xf32>
    %19 = math.rsqrt %18 : vector<8x1xf32>
    %20 = vector.broadcast %19 : vector<8x1xf32> to vector<8x1024xf32>
    %21 = arith.mulf %11, %20 : vector<8x1024xf32>
    %c0_10 = arith.constant 0 : index
    %c0_11 = arith.constant 0 : index
    %22 = vector.load %arg5[%c0_10, %c0_11] : memref<1x1024xf32, #tpu.memory_space<vmem>>, vector<1x1024xf32>
    %23 = vector.broadcast %22 : vector<1x1024xf32> to vector<8x1024xf32>
    %24 = arith.mulf %21, %23 : vector<8x1024xf32>
    %c0_12 = arith.constant 0 : index
    %c0_13 = arith.constant 0 : index
    %25 = vector.load %arg6[%c0_12, %c0_13] : memref<1x1024xf32, #tpu.memory_space<vmem>>, vector<1x1024xf32>
    %26 = vector.broadcast %25 : vector<1x1024xf32> to vector<8x1024xf32>
    %27 = arith.addf %24, %26 : vector<8x1024xf32>
    %cst_14 = arith.constant 0.000000e+00 : f32
    %28 = vector.broadcast %cst_14 : f32 to vector<8x1024xf32>
    %29 = arith.maximumf %27, %28 : vector<8x1024xf32>
    %30 = arith.truncf %29 : vector<8x1024xf32> to vector<8x1024xbf16>
    %c0_15 = arith.constant 0 : index
    %c0_16 = arith.constant 0 : index
    %31 = vector.load %arg7[%c0_15, %c0_16] : memref<1024x512xbf16, #tpu.memory_space<vmem>>, vector<1024x512xbf16>
    %cst_17 = arith.constant dense<0.000000e+00> : vector<8x512xf32>
    %32 = tpu.matmul %30, %31, %cst_17 {dimension_numbers = #tpu.dot_dimension_numbers<[1], [0], [0], [1], [0, 0, 1, 1], [], []>} : vector<8x1024xbf16>, vector<1024x512xbf16>, vector<8x512xf32> -> vector<8x512xf32>
    %c0_18 = arith.constant 0 : index
    %c0_19 = arith.constant 0 : index
    %33 = vector.load %arg8[%c0_18, %c0_19] : memref<1x512xf32, #tpu.memory_space<vmem>>, vector<1x512xf32>
    %34 = vector.broadcast %33 : vector<1x512xf32> to vector<8x512xf32>
    %35 = arith.addf %32, %34 : vector<8x512xf32>
    %cst_20 = arith.constant dense<0.000000e+00> : vector<8xf32>
    %36 = vector.multi_reduction <add>, %35, %cst_20 [1] : vector<8x512xf32> to vector<8xf32>
    %37 = vector.shape_cast %36 : vector<8xf32> to vector<8x1xf32>
    %cst_21 = arith.constant 0.001953125 : f32
    %38 = vector.broadcast %cst_21 : f32 to vector<8x1xf32>
    %39 = arith.mulf %37, %38 : vector<8x1xf32>
    %40 = vector.broadcast %39 : vector<8x1xf32> to vector<8x512xf32>
    %41 = arith.subf %35, %40 : vector<8x512xf32>
    %42 = arith.mulf %41, %41 : vector<8x512xf32>
    %cst_22 = arith.constant dense<0.000000e+00> : vector<8xf32>
    %43 = vector.multi_reduction <add>, %42, %cst_22 [1] : vector<8x512xf32> to vector<8xf32>
    %44 = vector.shape_cast %43 : vector<8xf32> to vector<8x1xf32>
    %cst_23 = arith.constant 0.001953125 : f32
    %45 = vector.broadcast %cst_23 : f32 to vector<8x1xf32>
    %46 = arith.mulf %44, %45 : vector<8x1xf32>
    %cst_24 = arith.constant 9.99999974E-6 : f32
    %47 = vector.broadcast %cst_24 : f32 to vector<8x1xf32>
    %48 = arith.addf %46, %47 : vector<8x1xf32>
    %49 = math.rsqrt %48 : vector<8x1xf32>
    %50 = vector.broadcast %49 : vector<8x1xf32> to vector<8x512xf32>
    %51 = arith.mulf %41, %50 : vector<8x512xf32>
    %c0_25 = arith.constant 0 : index
    %c0_26 = arith.constant 0 : index
    %52 = vector.load %arg9[%c0_25, %c0_26] : memref<1x512xf32, #tpu.memory_space<vmem>>, vector<1x512xf32>
    %53 = vector.broadcast %52 : vector<1x512xf32> to vector<8x512xf32>
    %54 = arith.mulf %51, %53 : vector<8x512xf32>
    %c0_27 = arith.constant 0 : index
    %c0_28 = arith.constant 0 : index
    %55 = vector.load %arg10[%c0_27, %c0_28] : memref<1x512xf32, #tpu.memory_space<vmem>>, vector<1x512xf32>
    %56 = vector.broadcast %55 : vector<1x512xf32> to vector<8x512xf32>
    %57 = arith.addf %54, %56 : vector<8x512xf32>
    %cst_29 = arith.constant 0.000000e+00 : f32
    %58 = vector.broadcast %cst_29 : f32 to vector<8x512xf32>
    %59 = arith.maximumf %57, %58 : vector<8x512xf32>
    %60 = arith.truncf %59 : vector<8x512xf32> to vector<8x512xbf16>
    %c0_30 = arith.constant 0 : index
    %c0_31 = arith.constant 0 : index
    %61 = vector.load %arg11[%c0_30, %c0_31] : memref<512x256xbf16, #tpu.memory_space<vmem>>, vector<512x256xbf16>
    %cst_32 = arith.constant dense<0.000000e+00> : vector<8x256xf32>
    %62 = tpu.matmul %60, %61, %cst_32 {dimension_numbers = #tpu.dot_dimension_numbers<[1], [0], [0], [1], [0, 0, 1, 1], [], []>} : vector<8x512xbf16>, vector<512x256xbf16>, vector<8x256xf32> -> vector<8x256xf32>
    %c0_33 = arith.constant 0 : index
    %c0_34 = arith.constant 0 : index
    %63 = vector.load %arg12[%c0_33, %c0_34] : memref<1x256xf32, #tpu.memory_space<vmem>>, vector<1x256xf32>
    %64 = vector.broadcast %63 : vector<1x256xf32> to vector<8x256xf32>
    %65 = arith.addf %62, %64 : vector<8x256xf32>
    %cst_35 = arith.constant dense<0.000000e+00> : vector<8xf32>
    %66 = vector.multi_reduction <add>, %65, %cst_35 [1] : vector<8x256xf32> to vector<8xf32>
    %67 = vector.shape_cast %66 : vector<8xf32> to vector<8x1xf32>
    %cst_36 = arith.constant 3.906250e-03 : f32
    %68 = vector.broadcast %cst_36 : f32 to vector<8x1xf32>
    %69 = arith.mulf %67, %68 : vector<8x1xf32>
    %70 = vector.broadcast %69 : vector<8x1xf32> to vector<8x256xf32>
    %71 = arith.subf %65, %70 : vector<8x256xf32>
    %72 = arith.mulf %71, %71 : vector<8x256xf32>
    %cst_37 = arith.constant dense<0.000000e+00> : vector<8xf32>
    %73 = vector.multi_reduction <add>, %72, %cst_37 [1] : vector<8x256xf32> to vector<8xf32>
    %74 = vector.shape_cast %73 : vector<8xf32> to vector<8x1xf32>
    %cst_38 = arith.constant 3.906250e-03 : f32
    %75 = vector.broadcast %cst_38 : f32 to vector<8x1xf32>
    %76 = arith.mulf %74, %75 : vector<8x1xf32>
    %cst_39 = arith.constant 9.99999974E-6 : f32
    %77 = vector.broadcast %cst_39 : f32 to vector<8x1xf32>
    %78 = arith.addf %76, %77 : vector<8x1xf32>
    %79 = math.rsqrt %78 : vector<8x1xf32>
    %80 = vector.broadcast %79 : vector<8x1xf32> to vector<8x256xf32>
    %81 = arith.mulf %71, %80 : vector<8x256xf32>
    %c0_40 = arith.constant 0 : index
    %c0_41 = arith.constant 0 : index
    %82 = vector.load %arg13[%c0_40, %c0_41] : memref<1x256xf32, #tpu.memory_space<vmem>>, vector<1x256xf32>
    %83 = vector.broadcast %82 : vector<1x256xf32> to vector<8x256xf32>
    %84 = arith.mulf %81, %83 : vector<8x256xf32>
    %c0_42 = arith.constant 0 : index
    %c0_43 = arith.constant 0 : index
    %85 = vector.load %arg14[%c0_42, %c0_43] : memref<1x256xf32, #tpu.memory_space<vmem>>, vector<1x256xf32>
    %86 = vector.broadcast %85 : vector<1x256xf32> to vector<8x256xf32>
    %87 = arith.addf %84, %86 : vector<8x256xf32>
    %cst_44 = arith.constant 0.000000e+00 : f32
    %88 = vector.broadcast %cst_44 : f32 to vector<8x256xf32>
    %89 = arith.maximumf %87, %88 : vector<8x256xf32>
    %90 = arith.truncf %89 : vector<8x256xf32> to vector<8x256xbf16>
    %c0_45 = arith.constant 0 : index
    %c0_46 = arith.constant 0 : index
    %91 = vector.load %arg15[%c0_45, %c0_46] : memref<256x128xbf16, #tpu.memory_space<vmem>>, vector<256x128xbf16>
    %cst_47 = arith.constant dense<0.000000e+00> : vector<8x128xf32>
    %92 = tpu.matmul %90, %91, %cst_47 {dimension_numbers = #tpu.dot_dimension_numbers<[1], [0], [0], [1], [0, 0, 1, 1], [], []>} : vector<8x256xbf16>, vector<256x128xbf16>, vector<8x128xf32> -> vector<8x128xf32>
    %c0_48 = arith.constant 0 : index
    %c0_49 = arith.constant 0 : index
    %93 = vector.load %arg16[%c0_48, %c0_49] : memref<1x128xf32, #tpu.memory_space<vmem>>, vector<1x128xf32>
    %94 = vector.broadcast %93 : vector<1x128xf32> to vector<8x128xf32>
    %95 = arith.addf %92, %94 : vector<8x128xf32>
    %cst_50 = arith.constant dense<0.000000e+00> : vector<8xf32>
    %96 = vector.multi_reduction <add>, %95, %cst_50 [1] : vector<8x128xf32> to vector<8xf32>
    %97 = vector.shape_cast %96 : vector<8xf32> to vector<8x1xf32>
    %cst_51 = arith.constant 7.812500e-03 : f32
    %98 = vector.broadcast %cst_51 : f32 to vector<8x1xf32>
    %99 = arith.mulf %97, %98 : vector<8x1xf32>
    %100 = vector.broadcast %99 : vector<8x1xf32> to vector<8x128xf32>
    %101 = arith.subf %95, %100 : vector<8x128xf32>
    %102 = arith.mulf %101, %101 : vector<8x128xf32>
    %cst_52 = arith.constant dense<0.000000e+00> : vector<8xf32>
    %103 = vector.multi_reduction <add>, %102, %cst_52 [1] : vector<8x128xf32> to vector<8xf32>
    %104 = vector.shape_cast %103 : vector<8xf32> to vector<8x1xf32>
    %cst_53 = arith.constant 7.812500e-03 : f32
    %105 = vector.broadcast %cst_53 : f32 to vector<8x1xf32>
    %106 = arith.mulf %104, %105 : vector<8x1xf32>
    %cst_54 = arith.constant 9.99999974E-6 : f32
    %107 = vector.broadcast %cst_54 : f32 to vector<8x1xf32>
    %108 = arith.addf %106, %107 : vector<8x1xf32>
    %109 = math.rsqrt %108 : vector<8x1xf32>
    %110 = vector.broadcast %109 : vector<8x1xf32> to vector<8x128xf32>
    %111 = arith.mulf %101, %110 : vector<8x128xf32>
    %c0_55 = arith.constant 0 : index
    %c0_56 = arith.constant 0 : index
    %112 = vector.load %arg17[%c0_55, %c0_56] : memref<1x128xf32, #tpu.memory_space<vmem>>, vector<1x128xf32>
    %113 = vector.broadcast %112 : vector<1x128xf32> to vector<8x128xf32>
    %114 = arith.mulf %111, %113 : vector<8x128xf32>
    %c0_57 = arith.constant 0 : index
    %c0_58 = arith.constant 0 : index
    %115 = vector.load %arg18[%c0_57, %c0_58] : memref<1x128xf32, #tpu.memory_space<vmem>>, vector<1x128xf32>
    %116 = vector.broadcast %115 : vector<1x128xf32> to vector<8x128xf32>
    %117 = arith.addf %114, %116 : vector<8x128xf32>
    %cst_59 = arith.constant 0.000000e+00 : f32
    %118 = vector.broadcast %cst_59 : f32 to vector<8x128xf32>
    %119 = arith.maximumf %117, %118 : vector<8x128xf32>
    %120 = arith.truncf %119 : vector<8x128xf32> to vector<8x128xbf16>
    %c0_60 = arith.constant 0 : index
    %c0_61 = arith.constant 0 : index
    %121 = vector.load %arg19[%c0_60, %c0_61] : memref<128x128xbf16, #tpu.memory_space<vmem>>, vector<128x128xbf16>
    %cst_62 = arith.constant dense<0.000000e+00> : vector<8x128xf32>
    %122 = tpu.matmul %120, %121, %cst_62 {dimension_numbers = #tpu.dot_dimension_numbers<[1], [0], [0], [1], [0, 0, 1, 1], [], []>} : vector<8x128xbf16>, vector<128x128xbf16>, vector<8x128xf32> -> vector<8x128xf32>
    %c0_63 = arith.constant 0 : index
    %c0_64 = arith.constant 0 : index
    %123 = vector.load %arg20[%c0_63, %c0_64] : memref<1x128xf32, #tpu.memory_space<vmem>>, vector<1x128xf32>
    %124 = vector.broadcast %123 : vector<1x128xf32> to vector<8x128xf32>
    %125 = arith.addf %122, %124 : vector<8x128xf32>
    %c0_65 = arith.constant 0 : index
    %c0_66 = arith.constant 0 : index
    %126 = vector.load %arg2[%c0_65, %c0_66] : memref<8x128xbf16, #tpu.memory_space<vmem>>, vector<8x128xbf16>
    %127 = arith.extf %126 : vector<8x128xbf16> to vector<8x128xf32>
    %128 = arith.addf %125, %127 : vector<8x128xf32>
    %cst_67 = arith.constant dense<0xFF800000> : vector<8xf32>
    %129 = vector.multi_reduction <maximumf>, %128, %cst_67 [1] : vector<8x128xf32> to vector<8xf32>
    %130 = vector.shape_cast %129 : vector<8xf32> to vector<8x1xf32>
    %131 = vector.broadcast %130 : vector<8x1xf32> to vector<8x128xf32>
    %132 = arith.subf %128, %131 : vector<8x128xf32>
    %133 = math.exp %132 : vector<8x128xf32>
    %cst_68 = arith.constant dense<0.000000e+00> : vector<8xf32>
    %134 = vector.multi_reduction <add>, %133, %cst_68 [1] : vector<8x128xf32> to vector<8xf32>
    %135 = vector.shape_cast %134 : vector<8xf32> to vector<8x1xf32>
    %136 = tpu.reciprocal %135 {approx = true} : vector<8x1xf32> -> vector<8x1xf32>
    %137 = arith.mulf %135, %136 : vector<8x1xf32>
    %cst_69 = arith.constant 2.000000e+00 : f32
    %138 = vector.broadcast %cst_69 : f32 to vector<8x1xf32>
    %139 = arith.subf %138, %137 : vector<8x1xf32>
    %140 = arith.mulf %136, %139 : vector<8x1xf32>
    %141 = vector.broadcast %140 : vector<8x1xf32> to vector<8x128xf32>
    %142 = arith.mulf %133, %141 : vector<8x128xf32>
    %c0_70 = arith.constant 0 : index
    %c0_71 = arith.constant 0 : index
    %143 = vector.load %arg21[%c0_70, %c0_71] : memref<8x128xf32, #tpu.memory_space<vmem>>, vector<8x128xf32>
    tpu.vector_store %arg21[%c0_70, %c0_71], %142 {strides = array<i32>} : memref<8x128xf32, #tpu.memory_space<vmem>>, vector<8x128xf32>,
    return
  }
  func.func @transform_0(%arg0: i32) -> (i32, i32) {
    %c0_i32 = arith.constant 0 : i32
    %c0_i32_0 = arith.constant 0 : i32
    return %arg0, %c0_i32 : i32, i32
  }
  func.func @transform_1(%arg0: i32) -> (i32, i32) {
    %c0_i32 = arith.constant 0 : i32
    %c0_i32_0 = arith.constant 0 : i32
    return %arg0, %c0_i32 : i32, i32
  }
  func.func @transform_2(%arg0: i32) -> (i32, i32) {
    %c0_i32 = arith.constant 0 : i32
    %c0_i32_0 = arith.constant 0 : i32
    %c0_i32_1 = arith.constant 0 : i32
    return %c0_i32, %c0_i32_0 : i32, i32
  }
  func.func @transform_3(%arg0: i32) -> (i32, i32) {
    %c0_i32 = arith.constant 0 : i32
    %c0_i32_0 = arith.constant 0 : i32
    %c0_i32_1 = arith.constant 0 : i32
    return %c0_i32, %c0_i32_0 : i32, i32
  }
  func.func @transform_4(%arg0: i32) -> (i32, i32) {
    %c0_i32 = arith.constant 0 : i32
    %c0_i32_0 = arith.constant 0 : i32
    %c0_i32_1 = arith.constant 0 : i32
    return %c0_i32, %c0_i32_0 : i32, i32
  }
  func.func @transform_5(%arg0: i32) -> (i32, i32) {
    %c0_i32 = arith.constant 0 : i32
    %c0_i32_0 = arith.constant 0 : i32
    %c0_i32_1 = arith.constant 0 : i32
    return %c0_i32, %c0_i32_0 : i32, i32
  }
  func.func @transform_6(%arg0: i32) -> (i32, i32) {
    %c0_i32 = arith.constant 0 : i32
    %c0_i32_0 = arith.constant 0 : i32
    %c0_i32_1 = arith.constant 0 : i32
    return %c0_i32, %c0_i32_0 : i32, i32
  }
  func.func @transform_7(%arg0: i32) -> (i32, i32) {
    %c0_i32 = arith.constant 0 : i32
    %c0_i32_0 = arith.constant 0 : i32
    %c0_i32_1 = arith.constant 0 : i32
    return %c0_i32, %c0_i32_0 : i32, i32
  }
  func.func @transform_8(%arg0: i32) -> (i32, i32) {
    %c0_i32 = arith.constant 0 : i32
    %c0_i32_0 = arith.constant 0 : i32
    %c0_i32_1 = arith.constant 0 : i32
    return %c0_i32, %c0_i32_0 : i32, i32
  }
  func.func @transform_9(%arg0: i32) -> (i32, i32) {
    %c0_i32 = arith.constant 0 : i32
    %c0_i32_0 = arith.constant 0 : i32
    %c0_i32_1 = arith.constant 0 : i32
    return %c0_i32, %c0_i32_0 : i32, i32
  }
  func.func @transform_10(%arg0: i32) -> (i32, i32) {
    %c0_i32 = arith.constant 0 : i32
    %c0_i32_0 = arith.constant 0 : i32
    %c0_i32_1 = arith.constant 0 : i32
    return %c0_i32, %c0_i32_0 : i32, i32
  }
  func.func @transform_11(%arg0: i32) -> (i32, i32) {
    %c0_i32 = arith.constant 0 : i32
    %c0_i32_0 = arith.constant 0 : i32
    %c0_i32_1 = arith.constant 0 : i32
    return %c0_i32, %c0_i32_0 : i32, i32
  }
  func.func @transform_12(%arg0: i32) -> (i32, i32) {
    %c0_i32 = arith.constant 0 : i32
    %c0_i32_0 = arith.constant 0 : i32
    %c0_i32_1 = arith.constant 0 : i32
    return %c0_i32, %c0_i32_0 : i32, i32
  }
  func.func @transform_13(%arg0: i32) -> (i32, i32) {
    %c0_i32 = arith.constant 0 : i32
    %c0_i32_0 = arith.constant 0 : i32
    %c0_i32_1 = arith.constant 0 : i32
    return %c0_i32, %c0_i32_0 : i32, i32
  }
  func.func @transform_14(%arg0: i32) -> (i32, i32) {
    %c0_i32 = arith.constant 0 : i32
    %c0_i32_0 = arith.constant 0 : i32
    %c0_i32_1 = arith.constant 0 : i32
    return %c0_i32, %c0_i32_0 : i32, i32
  }
  func.func @transform_15(%arg0: i32) -> (i32, i32) {
    %c0_i32 = arith.constant 0 : i32
    %c0_i32_0 = arith.constant 0 : i32
    %c0_i32_1 = arith.constant 0 : i32
    return %c0_i32, %c0_i32_0 : i32, i32
  }
  func.func @transform_16(%arg0: i32) -> (i32, i32) {
    %c0_i32 = arith.constant 0 : i32
    %c0_i32_0 = arith.constant 0 : i32
    %c0_i32_1 = arith.constant 0 : i32
    return %c0_i32, %c0_i32_0 : i32, i32
  }
  func.func @transform_17(%arg0: i32) -> (i32, i32) {
    %c0_i32 = arith.constant 0 : i32
    %c0_i32_0 = arith.constant 0 : i32
    %c0_i32_1 = arith.constant 0 : i32
    return %c0_i32, %c0_i32_0 : i32, i32
  }
  func.func @transform_18(%arg0: i32) -> (i32, i32) {
    %c0_i32 = arith.constant 0 : i32
    %c0_i32_0 = arith.constant 0 : i32
    %c0_i32_1 = arith.constant 0 : i32
    return %c0_i32, %c0_i32_0 : i32, i32
  }
  func.func @transform_19(%arg0: i32) -> (i32, i32) {
    %c0_i32 = arith.constant 0 : i32
    %c0_i32_0 = arith.constant 0 : i32
    %c0_i32_1 = arith.constant 0 : i32
    return %c0_i32, %c0_i32_0 : i32, i32
  }
  func.func @transform_20(%arg0: i32) -> (i32, i32) {
    %c0_i32 = arith.constant 0 : i32
    %c0_i32_0 = arith.constant 0 : i32
    return %arg0, %c0_i32 : i32, i32
  }
}

</mosaic_0001>

<bundles_post_ra>
// kernel: _pt_forward_impl.1
= control target key start
LH: loop header
LB: loop body
LE: loop exit
PB: predicated region body
PF: predicated region fallthrough
CT: control target
= control target key end

     0   :  { %s7298_s0 = inlined_call_operand.vmem [shape: bf16[8,512], index: 0, kind: input, shape index: {}]   ;;  %s7299_s1 = inlined_call_operand.vmem [shape: bf16[8,128], index: 1, kind: input, shape index: {}]   ;;  %s7300_s2 = inlined_call_operand.hbm [shape: bf16[512,1024], index: 2, kind: input, shape index: {}]   ;;  %s7301_s3 = inlined_call_operand.hbm [shape: f32[1,1024], index: 3, kind: input, shape index: {}]   ;;  %s7302_s4 = inlined_call_operand.hbm [shape: f32[1,1024], index: 4, kind: input, shape index: {}]   ;;  %s7303_s5 = inlined_call_operand.hbm [shape: f32[1,1024], index: 5, kind: input, shape index: {}]   ;;  %s7304_s6 = inlined_call_operand.hbm [shape: bf16[1024,512], index: 6, kind: input, shape index: {}]   ;;  %s7305_s7 = inlined_call_operand.hbm [shape: f32[1,512], index: 7, kind: input, shape index: {}]   ;;  %s7306_s8 = inlined_call_operand.hbm [shape: f32[1,512], index: 8, kind: input, shape index: {}]   ;;  %s7307_s9 = inlined_call_operand.hbm [shape: f32[1,512], index: 9, kind: input, shape index: {}]   ;;  %s7308_s10 = inlined_call_operand.hbm [shape: bf16[512,256], index: 10, kind: input, shape index: {}]   ;;  %s7309_s11 = inlined_call_operand.hbm [shape: f32[1,256], index: 11, kind: input, shape index: {}]   ;;  %s7310_s12 = inlined_call_operand.hbm [shape: f32[1,256], index: 12, kind: input, shape index: {}]   ;;  %s7311_s13 = inlined_call_operand.hbm [shape: f32[1,256], index: 13, kind: input, shape index: {}]   ;;  %s7312_s14 = inlined_call_operand.vmem [shape: bf16[256,128], index: 14, kind: input, shape index: {}]   ;;  %s7313_s15 = inlined_call_operand.hbm [shape: f32[1,128], index: 15, kind: input, shape index: {}]   ;;  %s7314_s16 = inlined_call_operand.hbm [shape: f32[1,128], index: 16, kind: input, shape index: {}]   ;;  %s7315_s17 = inlined_call_operand.hbm [shape: f32[1,128], index: 17, kind: input, shape index: {}]   ;;  %s7316_s18 = inlined_call_operand.hbm [shape: bf16[128,128], index: 18, kind: input, shape index: {}]   ;;  %s7317_s19 = inlined_call_operand.hbm [shape: f32[1,128], index: 19, kind: input, shape index: {}]   ;;  %s7318_s20 = inlined_call_operand.hbm [shape: f32[8,128], index: 20, kind: output, shape index: {}]  }
   0x1   :  { %7320 = sst [smem:[#allocation40_spill]] %s7298_s0 }
   0x2   :  { %7321 = sst [smem:[#allocation41_spill]] %s7299_s1 }
   0x3   :  { %7322 = sst [smem:[#allocation42_spill]] %s7300_s2 }
   0x4   :  { %7323 = sst [smem:[#allocation43_spill]] %s7301_s3 }
   0x5   :  { %7324 = sst [smem:[#allocation44_spill]] %s7302_s4 }
   0x6   :  { %25 = vsyncpa [#allocation3], 0 }
   0x7   :  { %26 = vsyncpa [#allocation6], 0 }
   0x8   :  { %27 = vsyncpa [#allocation9], 0 }
   0x9   :  { %28 = vsyncpa [#allocation12], 0 }
   0xa   :  { %29 = vsyncpa [#allocation15], 0 }
   0xb   :  { %30 = vsyncpa [#allocation18], 0 }
   0xc   :  { %31 = vsyncpa [#allocation21], 0 }
   0xd   :  { %32 = vsyncpa [#allocation24], 0 }
   0xe   :  { %33 = vsyncpa [#allocation27], 0 }
   0xf   :  { %34 = vsyncpa [#allocation4], 0  ;;  %s6794_s1 = smov [#allocation5]   ;;  %s6795_s23 = smov [#allocation8]  }
  0x10   :  { %s57_s22 = sshll.u32 %s6794_s1, 4  ;;  %s77_s24 = sshll.u32 %s6795_s23, 4  ;;  %s58_s22 = int_to_ptr.vmem [resolvable:$true] %s57_s22  ;;  %s78_s24 = int_to_ptr.vmem [resolvable:$true] %s77_s24 }
  0x11   :  { %s6422_s2 = scalar_lea.vmem %s58_s22, 128  ;;  %p6427_p1 = scmp.lt.s32.totalorder %s58_s22, %s58_s22 }
  0x12   :  { %p6423_p0 = scmp.ne.s32.totalorder %s58_s22, %s6422_s2  ;;  %p6428_p2 = scmp.lt.s32.totalorder %s6422_s2, %s6422_s2 }
  0x14   :  { %p6429_p3 = por %p6428_p2, %p6427_p1 }
  0x16   :  { %p6430_p4 = pnand %p6429_p3, %p6423_p0 }
  0x18   :  { %6433 = shalt.err (!%p6430_p4)
}
  0x19   :  { %s7325_s26 = sld [smem:[#allocation43_spill]]  ;;  %s6442_s27 = scalar_lea.vmem %s78_s24, 128 }
  0x1a   :  { %p6443_p5 = scmp.ne.s32.totalorder %s78_s24, %s6442_s27  ;;  %p6447_p6 = scmp.lt.s32.totalorder %s78_s24, %s78_s24 }
  0x1b   :  { %p6448_p7 = scmp.lt.s32.totalorder %s6442_s27, %s6442_s27 }
  0x1d   :  { %p6449_p8 = por %p6448_p7, %p6447_p6 }
  0x1f   :  { %60 = dma.hbm_to_vmem [thread:$0]  %s7325_s26, 128, %s58_s22, [#allocation6]  }
  0x20   :  { %p6450_p9 = pnand %p6449_p8, %p6443_p5 }
  0x22   :  { %6453 = shalt.err (!%p6450_p9)
}
  0x23   :  { %80 = dma.hbm_to_vmem [thread:$0]  %s7303_s5, 128, %s78_s24, [#allocation9]  }
  0x24   :  { %s6796_s29 = smov [#allocation11]   ;;  %s6797_s0 = smov [#allocation14]  }
  0x25   :  { %s99_s30 = sshll.u32 %s6796_s29, 4  ;;  %s119_s21 = sshll.u32 %s6797_s0, 4  ;;  %s100_s30 = int_to_ptr.vmem [resolvable:$true] %s99_s30  ;;  %s120_s21 = int_to_ptr.vmem [resolvable:$true] %s119_s21 }
  0x26   :  { %s6462_s1 = scalar_lea.vmem %s100_s30, 64  ;;  %p6467_p11 = scmp.lt.s32.totalorder %s100_s30, %s100_s30 }
  0x27   :  { %p6463_p10 = scmp.ne.s32.totalorder %s100_s30, %s6462_s1  ;;  %p6468_p12 = scmp.lt.s32.totalorder %s6462_s1, %s6462_s1 }
  0x29   :  { %p6469_p13 = por %p6468_p12, %p6467_p11 }
  0x2b   :  { %p6470_p0 = pnand %p6469_p13, %p6463_p10 }
  0x2d   :  { %6473 = shalt.err (!%p6470_p0)
}
  0x2e   :  { %102 = dma.hbm_to_vmem [thread:$0]  %s7305_s7, 64, %s100_s30, [#allocation12]  }
  0x2f   :  { %s6482_s2 = scalar_lea.vmem %s120_s21, 64  ;;  %p6487_p2 = scmp.lt.s32.totalorder %s120_s21, %s120_s21 }
  0x30   :  { %p6483_p1 = scmp.ne.s32.totalorder %s120_s21, %s6482_s2  ;;  %p6488_p3 = scmp.lt.s32.totalorder %s6482_s2, %s6482_s2 }
  0x32   :  { %p6489_p4 = por %p6488_p3, %p6487_p2 }
  0x34   :  { %p6490_p5 = pnand %p6489_p4, %p6483_p1 }
  0x36   :  { %6493 = shalt.err (!%p6490_p5)
}
  0x37   :  { %122 = dma.hbm_to_vmem [thread:$0]  %s7307_s9, 64, %s120_s21, [#allocation15]  }
  0x38   :  { %s6798_s25 = smov [#allocation17]   ;;  %s6799_s26 = smov [#allocation20]  }
  0x39   :  { %s141_s3 = sshll.u32 %s6798_s25, 4  ;;  %s161_s27 = sshll.u32 %s6799_s26, 4  ;;  %s142_s3 = int_to_ptr.vmem [resolvable:$true] %s141_s3  ;;  %s162_s27 = int_to_ptr.vmem [resolvable:$true] %s161_s27 }
  0x3a   :  { %s6502_s28 = scalar_lea.vmem %s142_s3, 32  ;;  %p6507_p7 = scmp.lt.s32.totalorder %s142_s3, %s142_s3 }
  0x3b   :  { %p6503_p6 = scmp.ne.s32.totalorder %s142_s3, %s6502_s28  ;;  %p6508_p8 = scmp.lt.s32.totalorder %s6502_s28, %s6502_s28 }
  0x3d   :  { %p6509_p9 = por %p6508_p8, %p6507_p7 }
  0x3f   :  { %p6510_p10 = pnand %p6509_p9, %p6503_p6 }
  0x41   :  { %6513 = shalt.err (!%p6510_p10)
}
  0x42   :  { %144 = dma.hbm_to_vmem [thread:$0]  %s7309_s11, 32, %s142_s3, [#allocation18]  }
  0x43   :  { %s6522_s29 = scalar_lea.vmem %s162_s27, 32  ;;  %p6527_p12 = scmp.lt.s32.totalorder %s162_s27, %s162_s27 }
  0x44   :  { %p6523_p11 = scmp.ne.s32.totalorder %s162_s27, %s6522_s29  ;;  %p6528_p13 = scmp.lt.s32.totalorder %s6522_s29, %s6522_s29 }
  0x46   :  { %p6529_p0 = por %p6528_p13, %p6527_p12 }
  0x48   :  { %p6530_p1 = pnand %p6529_p0, %p6523_p11 }
  0x4a   :  { %6533 = shalt.err (!%p6530_p1)
}
  0x4b   :  { %164 = dma.hbm_to_vmem [thread:$0]  %s7311_s13, 32, %s162_s27, [#allocation21]  }
  0x4c   :  { %s6800_s0 = smov [#allocation23]   ;;  %s6801_s1 = smov [#allocation26]  }
  0x4d   :  { %s183_s21 = sshll.u32 %s6800_s0, 4  ;;  %s202_s22 = sshll.u32 %s6801_s1, 4  ;;  %s184_s21 = int_to_ptr.vmem [resolvable:$true] %s183_s21  ;;  %s203_s22 = int_to_ptr.vmem [resolvable:$true] %s202_s22 }
  0x4e   :  { %s6542_s23 = scalar_lea.vmem %s184_s21, 16  ;;  %s6546_s11 = scalar_lea.vmem %s184_s21, 32 }
  0x4f   :  { %p6543_p2 = scmp.ne.s32.totalorder %s184_s21, %s6542_s23  ;;  %p6547_p3 = scmp.lt.s32.totalorder %s184_s21, %s184_s21 }
  0x50   :  { %p6548_p4 = scmp.lt.s32.totalorder %s6546_s11, %s6542_s23 }
  0x52   :  { %p6549_p5 = por %p6548_p4, %p6547_p3 }
  0x54   :  { %p6550_p6 = pnand %p6549_p5, %p6543_p2 }
  0x56   :  { %6553 = shalt.err (!%p6550_p6)
}
  0x57   :  { %186 = dma.hbm_to_vmem [thread:$0]  %s7314_s16, 16, %s184_s21, [#allocation24]  }
  0x58   :  { %s6562_s24 = scalar_lea.vmem %s203_s22, 1024  ;;  %p6567_p8 = scmp.lt.s32.totalorder %s203_s22, %s203_s22 }
  0x59   :  { %p6563_p7 = scmp.ne.s32.totalorder %s203_s22, %s6562_s24  ;;  %p6568_p9 = scmp.lt.s32.totalorder %s6562_s24, %s6562_s24 }
  0x5b   :  { %p6569_p10 = por %p6568_p9, %p6567_p8 }
  0x5d   :  { %p6570_p11 = pnand %p6569_p10, %p6563_p7 }
  0x5f   :  { %6573 = shalt.err (!%p6570_p11)
}
  0x60   :  { %s6802_s13 = smov 64   ;;  %s6803_s25 = smov 4  }
  0x61   :  { %208 = dma.hbm_to_vmem [thread:$0]  %s7316_s18, 1024, %s203_s22, [#allocation27], %s6802_s13, %s6802_s13, %s6803_s25  }
  0x62   :  { %s6804_s27 = smov [#allocation2]  }
  0x63   :  { %s44_s28 = sshll.u32 %s6804_s27, 4  ;;  %s45_s28 = int_to_ptr.vmem [resolvable:$true] %s44_s28 }
  0x64   :  { %s6582_s7 = scalar_lea.vmem %s45_s28, 32768  ;;  %p6587_p13 = scmp.lt.s32.totalorder %s45_s28, %s45_s28 }
  0x65   :  { %p6583_p12 = scmp.ne.s32.totalorder %s45_s28, %s6582_s7  ;;  %p6588_p0 = scmp.lt.s32.totalorder %s6582_s7, %s6582_s7 }
  0x67   :  { %p6589_p1 = por %p6588_p0, %p6587_p13 }
  0x69   :  { %p6590_p2 = pnand %p6589_p1, %p6583_p12 }
  0x6b   :  { %6593 = shalt.err (!%p6590_p2)
}
  0x6c   :  { %s6805_s16 = smov 512   ;;  %s6806_s4 = smov 32  }
  0x6d   :  { %s7326_s30 = sld [smem:[#allocation42_spill]]  ;;  %s6807_s0 = smov [#allocation7]  }
  0x6e   :  { %s67_s21 = sshll.u32 %s6807_s0, 4  ;;  %s6808_s18 = smov [#allocation10]   ;;  %s68_s21 = int_to_ptr.vmem [resolvable:$true] %s67_s21 }
  0x6f   :  { %s86_s1 = sshll.u32 %s6808_s18, 4  ;;  %s6602_s22 = scalar_lea.vmem %s68_s21, 128  ;;  %s87_s1 = int_to_ptr.vmem [resolvable:$true] %s86_s1 }
  0x70   :  { %p6603_p3 = scmp.ne.s32.totalorder %s68_s21, %s6602_s22  ;;  %p6607_p4 = scmp.lt.s32.totalorder %s68_s21, %s68_s21 }
  0x71   :  { %p6608_p5 = scmp.lt.s32.totalorder %s6602_s22, %s6602_s22 }
  0x73   :  { %50 = dma.hbm_to_vmem [thread:$0]  %s7326_s30, 32768, %s45_s28, [#allocation3], %s6805_s16, %s6805_s16, %s6806_s4  }
  0x74   :  { %p6609_p6 = por %p6608_p5, %p6607_p4 }
  0x76   :  { %p6610_p7 = pnand %p6609_p6, %p6603_p3 }
  0x78   :  { %6613 = shalt.err (!%p6610_p7)
}
  0x79   :  { %s7327_s2 = sld [smem:[#allocation44_spill]]  ;;  %s6622_s5 = scalar_lea.vmem %s87_s1, 32768 }
  0x7a   :  { %p6623_p8 = scmp.ne.s32.totalorder %s87_s1, %s6622_s5  ;;  %p6627_p9 = scmp.lt.s32.totalorder %s87_s1, %s87_s1 }
  0x7b   :  { %p6628_p10 = scmp.lt.s32.totalorder %s6622_s5, %s6622_s5 }
  0x7d   :  { %p6629_p11 = por %p6628_p10, %p6627_p9 }
  0x7f   :  { %70 = dma.hbm_to_vmem [thread:$0]  %s7327_s2, 128, %s68_s21, [#allocation6]  }
  0x80   :  { %p6630_p12 = pnand %p6629_p11, %p6623_p8 }
  0x82   :  { %6633 = shalt.err (!%p6630_p12)
}
  0x83   :  { %s6809_s24 = smov 256   ;;  %s6810_s13 = smov 16  }
  0x84   :  { %92 = dma.hbm_to_vmem [thread:$0]  %s7304_s6, 32768, %s87_s1, [#allocation9], %s6809_s24, %s6809_s24, %s6810_s13  }
  0x85   :  { %s6811_s26 = smov [#allocation13]   ;;  %s6812_s28 = smov [#allocation16]  }
  0x86   :  { %s109_s27 = sshll.u32 %s6811_s26, 4  ;;  %s128_s7 = sshll.u32 %s6812_s28, 4  ;;  %s110_s27 = int_to_ptr.vmem [resolvable:$true] %s109_s27  ;;  %s129_s7 = int_to_ptr.vmem [resolvable:$true] %s128_s7 }
  0x87   :  { %s6642_s16 = scalar_lea.vmem %s110_s27, 64  ;;  %p6647_p0 = scmp.lt.s32.totalorder %s110_s27, %s110_s27 }
  0x88   :  { %p6643_p13 = scmp.ne.s32.totalorder %s110_s27, %s6642_s16  ;;  %p6648_p1 = scmp.lt.s32.totalorder %s6642_s16, %s6642_s16 }
  0x8a   :  { %p6649_p2 = por %p6648_p1, %p6647_p0 }
  0x8c   :  { %p6650_p3 = pnand %p6649_p2, %p6643_p13 }
  0x8e   :  { %6653 = shalt.err (!%p6650_p3)
}
  0x8f   :  { %112 = dma.hbm_to_vmem [thread:$0]  %s7306_s8, 64, %s110_s27, [#allocation12]  }
  0x90   :  { %s6662_s9 = scalar_lea.vmem %s129_s7, 8192  ;;  %p6667_p5 = scmp.lt.s32.totalorder %s129_s7, %s129_s7 }
  0x91   :  { %p6663_p4 = scmp.ne.s32.totalorder %s129_s7, %s6662_s9  ;;  %p6668_p6 = scmp.lt.s32.totalorder %s6662_s9, %s6662_s9 }
  0x93   :  { %p6669_p7 = por %p6668_p6, %p6667_p5 }
  0x95   :  { %p6670_p8 = pnand %p6669_p7, %p6663_p4 }
  0x97   :  { %6673 = shalt.err (!%p6670_p8)
}
  0x98   :  { %s6813_s6 = smov 128   ;;  %s6814_s30 = smov 8  }
  0x99   :  { %134 = dma.hbm_to_vmem [thread:$0]  %s7308_s10, 8192, %s129_s7, [#allocation15], %s6813_s6, %s6813_s6, %s6814_s30  }
  0x9a   :  { %s6815_s18 = smov [#allocation19]   ;;  %s6816_s22 = smov [#allocation22]  }
  0x9b   :  { %s151_s1 = sshll.u32 %s6815_s18, 4  ;;  %s173_s23 = sshll.u32 %s6816_s22, 4  ;;  %s152_s1 = int_to_ptr.vmem [resolvable:$true] %s151_s1  ;;  %s174_s23 = int_to_ptr.vmem [resolvable:$true] %s173_s23 }
  0x9c   :  { %s6682_s8 = scalar_lea.vmem %s152_s1, 32  ;;  %p6687_p10 = scmp.lt.s32.totalorder %s152_s1, %s152_s1 }
  0x9d   :  { %p6683_p9 = scmp.ne.s32.totalorder %s152_s1, %s6682_s8  ;;  %p6688_p11 = scmp.lt.s32.totalorder %s6682_s8, %s6682_s8 }
  0x9f   :  { %p6689_p12 = por %p6688_p11, %p6687_p10 }
  0xa1   :  { %p6690_p13 = pnand %p6689_p12, %p6683_p9 }
  0xa3   :  { %6693 = shalt.err (!%p6690_p13)
}
  0xa4   :  { %154 = dma.hbm_to_vmem [thread:$0]  %s7310_s12, 32, %s152_s1, [#allocation18]  }
  0xa5   :  { %s6702_s5 = scalar_lea.vmem %s174_s23, 16  ;;  %s6706_s10 = scalar_lea.vmem %s174_s23, 32 }
  0xa6   :  { %p6703_p0 = scmp.ne.s32.totalorder %s174_s23, %s6702_s5  ;;  %p6707_p1 = scmp.lt.s32.totalorder %s174_s23, %s174_s23 }
  0xa7   :  { %p6708_p2 = scmp.lt.s32.totalorder %s6706_s10, %s6702_s5 }
  0xa9   :  { %p6709_p3 = por %p6708_p2, %p6707_p1 }
  0xab   :  { %p6710_p4 = pnand %p6709_p3, %p6703_p0 }
  0xad   :  { %6713 = shalt.err (!%p6710_p4)
}
  0xae   :  { %176 = dma.hbm_to_vmem [thread:$0]  %s7313_s15, 16, %s174_s23, [#allocation21]  }
  0xaf   :  { %s6817_s25 = smov [#allocation25]   ;;  %s6818_s26 = smov [#allocation28]  }
  0xb0   :  { %s193_s3 = sshll.u32 %s6817_s25, 4  ;;  %s215_s27 = sshll.u32 %s6818_s26, 4  ;;  %s194_s3 = int_to_ptr.vmem [resolvable:$true] %s193_s3  ;;  %s216_s27 = int_to_ptr.vmem [resolvable:$true] %s215_s27 }
  0xb1   :  { %s6722_s28 = scalar_lea.vmem %s194_s3, 16  ;;  %s6726_s12 = scalar_lea.vmem %s194_s3, 32 }
  0xb2   :  { %p6723_p5 = scmp.ne.s32.totalorder %s194_s3, %s6722_s28  ;;  %p6727_p6 = scmp.lt.s32.totalorder %s194_s3, %s194_s3 }
  0xb3   :  { %p6728_p7 = scmp.lt.s32.totalorder %s6726_s12, %s6722_s28 }
  0xb5   :  { %p6729_p8 = por %p6728_p7, %p6727_p6 }
  0xb7   :  { %p6730_p9 = pnand %p6729_p8, %p6723_p5 }
  0xb9   :  { %6733 = shalt.err (!%p6730_p9)
}
  0xba   :  { %196 = dma.hbm_to_vmem [thread:$0]  %s7315_s17, 16, %s194_s3, [#allocation24]  }
  0xbb   :  { %s6742_s4 = scalar_lea.vmem %s216_s27, 16  ;;  %s6746_s15 = scalar_lea.vmem %s216_s27, 32 }
  0xbc   :  { %p6743_p10 = scmp.ne.s32.totalorder %s216_s27, %s6742_s4  ;;  %p6747_p11 = scmp.lt.s32.totalorder %s216_s27, %s216_s27 }
  0xbd   :  { %p6748_p12 = scmp.lt.s32.totalorder %s6746_s15, %s6742_s4 }
  0xbf   :  { %p6749_p13 = por %p6748_p12, %p6747_p11 }
  0xc1   :  { %p6750_p0 = pnand %p6749_p13, %p6743_p10 }
  0xc3   :  { %6753 = shalt.err (!%p6750_p0)
}
  0xc4   :  { %218 = dma.hbm_to_vmem [thread:$0]  %s7317_s19, 16, %s216_s27, [#allocation27]  }
  0xc5   :  { %6774 = dma.done.wait [#allocation3], 32768  }
  0xc6   :  { %6775 = vsyncadd [#allocation3], 4294934528 }
  0xc7   :  { %6776 = dma.done.wait [#allocation6], 256  }
  0xc8   :  { %6777 = vsyncadd [#allocation6], 4294967040 }
  0xc9   :  { %6778 = dma.done.wait [#allocation9], 32896  }
  0xca   :  { %6779 = vsyncadd [#allocation9], 4294934400 }
  0xcb   :  { %6780 = dma.done.wait [#allocation12], 128  }
  0xcc   :  { %6781 = vsyncadd [#allocation12], 4294967168 }
  0xcd   :  { %6782 = dma.done.wait [#allocation15], 8256  }
  0xce   :  { %6783 = vsyncadd [#allocation15], 4294959040 }
  0xcf   :  { %6784 = dma.done.wait [#allocation18], 64  }
  0xd0   :  { %6785 = vsyncadd [#allocation18], 4294967232 }
  0xd1   :  { %6786 = dma.done.wait [#allocation21], 48  }
  0xd2   :  { %6787 = vsyncadd [#allocation21], 4294967248 }
  0xd3   :  { %6788 = dma.done.wait [#allocation24], 32  }
  0xd4   :  { %6789 = vsyncadd [#allocation24], 4294967264 }
  0xd5   :  { %6790 = dma.done.wait [#allocation27], 1040  }
  0xd6   :  { %6791 = vsyncadd [#allocation27], 4294966256  ;;  %v329_v0 = vld [vmem:[#allocation2 + $0x1c0] sm:$0xff]  ;;  %s7328_s6 = sld [smem:[#allocation40_spill]]  ;;  %vm6820_vm0 = vmmov 0   ;;  %s6821_s8 = smov [#allocation29]  }
  0xd7   :  { %v333_v1 = vld [vmem:[#allocation2 + $0x1e0] sm:$0xff]  ;;  %s7329_s23 = sld [smem:[#allocation41_spill]]  ;;  %s5190_s11 = sshll.u32 %s6821_s8, 4  ;;  %s5191_s11 = int_to_ptr.vmem [resolvable:$true] %s5190_s11 }
  0xd8   :  { %v457_v2 = vld [vmem:[#allocation2 + $0x5c0] sm:$0xff]  ;;  %v5268_v3 = vcombine.high %v329_v0, %v333_v1  ;;  %v5267_v5 = vcombine.low %v329_v0, %v333_v1  ;;  %s6754_s2 = scalar_lea.vmem %s5191_s11, 128  ;;  %p6759_p2 = scmp.lt.s32.totalorder %s5191_s11, %s5191_s11 }
  0xd9   :  { %v461_v4 = vld [vmem:[#allocation2 + $0x5e0] sm:$0xff]  ;;  %p6755_p1 = scmp.ne.s32.totalorder %s5191_s11, %s6754_s2  ;;  %p6760_p3 = scmp.lt.s32.totalorder %s6754_s2, %s6754_s2 }
  0xda   :  { %v321_v6 = vld [vmem:[#allocation2 + $0x180] sm:$0xff]  ;;  %v5396_v8 = vcombine.high %v457_v2, %v461_v4  ;;  %v5395_v9 = vcombine.low %v457_v2, %v461_v4  ;;  %1865 = vmatprep.subr.bf16.mxu0 %v5268_v3 }
  0xdb   :  { %v325_v7 = vld [vmem:[#allocation2 + $0x1a0] sm:$0xff]  ;;  %1866 = vmatpush1.bf16.msra.mxu0 %v5267_v5  ;;  %p6761_p4 = por %p6760_p3, %p6759_p2 }
  0xdc   :  { %v5260_v10 = vcombine.high %v321_v6, %v325_v7  ;;  %v449_v11 = vld [vmem:[#allocation2 + $0x580] sm:$0xff]  ;;  %1906 = vmatprep.subr.bf16.mxu1 %v5396_v8  ;;  %v5259_v18 = vcombine.low %v321_v6, %v325_v7  ;;  %v6986_v54 = vld [vmem:[%s7328_s6 + $0x8] sm:$0xff] }
  0xdd   :  { %v453_v12 = vld [vmem:[#allocation2 + $0x5a0] sm:$0xff]  ;;  %1907 = vmatpush1.bf16.msra.mxu1 %v5395_v9  ;;  %v6994_v59 = vcombine.high %v6986_v54, %v6986_v54  ;;  %p6762_p5 = pnand %p6761_p4, %p6755_p1 }
  0xde   :  { %v313_v13 = vld [vmem:[#allocation2 + $0x140] sm:$0xff]  ;;  %v5388_v14 = vcombine.high %v449_v11, %v453_v12  ;;  %1867 = vmatprep.subr.bf16.mxu0 %v5260_v10  ;;  %v5387_v19 = vcombine.low %v449_v11, %v453_v12 }
  0xdf   :  { %v317_v15 = vld [vmem:[#allocation2 + $0x160] sm:$0xff]  ;;  %1868 = vmatpush1.bf16.msra.mxu0 %v5259_v18  ;;  %1938 = vmatprep.mubr.bf16.mxu1 %v6994_v59 }
  0xe0   :  { %v441_v16 = vld [vmem:[#allocation2 + $0x540] sm:$0xff]  ;;  %v5252_v20 = vcombine.high %v313_v13, %v317_v15  ;;  %1908 = vmatprep.subr.bf16.mxu1 %v5388_v14  ;;  %v5251_v26 = vcombine.low %v313_v13, %v317_v15 }
  0xe1   :  { %v445_v17 = vld [vmem:[#allocation2 + $0x560] sm:$0xff]  ;;  %1909 = vmatpush1.bf16.msra.mxu1 %v5387_v19 }
  0xe2   :  { %v5380_v21 = vcombine.high %v441_v16, %v445_v17  ;;  %v305_v22 = vld [vmem:[#allocation2 + $0x100] sm:$0xff]  ;;  %1869 = vmatprep.subr.bf16.mxu0 %v5252_v20  ;;  %v5379_v27 = vcombine.low %v441_v16, %v445_v17 }
  0xe3   :  { %v309_v23 = vld [vmem:[#allocation2 + $0x120] sm:$0xff]  ;;  %1870 = vmatpush1.bf16.msra.mxu0 %v5251_v26 }
  0xe4   :  { %v433_v24 = vld [vmem:[#allocation2 + $0x500] sm:$0xff]  ;;  %v5244_v28 = vcombine.high %v305_v22, %v309_v23  ;;  %1910 = vmatprep.subr.bf16.mxu1 %v5380_v21  ;;  %v5243_v34 = vcombine.low %v305_v22, %v309_v23 }
  0xe5   :  { %v437_v25 = vld [vmem:[#allocation2 + $0x520] sm:$0xff]  ;;  %1911 = vmatpush1.bf16.msra.mxu1 %v5379_v27 }
  0xe6   :  { %v5372_v29 = vcombine.high %v433_v24, %v437_v25  ;;  %v297_v30 = vld [vmem:[#allocation2 + $0xc0] sm:$0xff]  ;;  %1871 = vmatprep.subr.bf16.mxu0 %v5244_v28  ;;  %v5371_v35 = vcombine.low %v433_v24, %v437_v25 }
  0xe7   :  { %v301_v31 = vld [vmem:[#allocation2 + $0xe0] sm:$0xff]  ;;  %1872 = vmatpush1.bf16.msra.mxu0 %v5243_v34 }
  0xe8   :  { %v425_v32 = vld [vmem:[#allocation2 + $0x4c0] sm:$0xff]  ;;  %v5236_v36 = vcombine.high %v297_v30, %v301_v31  ;;  %1912 = vmatprep.subr.bf16.mxu1 %v5372_v29  ;;  %v5235_v42 = vcombine.low %v297_v30, %v301_v31 }
  0xe9   :  { %v429_v33 = vld [vmem:[#allocation2 + $0x4e0] sm:$0xff]  ;;  %1913 = vmatpush1.bf16.msra.mxu1 %v5371_v35 }
  0xea   :  { %v5364_v37 = vcombine.high %v425_v32, %v429_v33  ;;  %v289_v38 = vld [vmem:[#allocation2 + $0x80] sm:$0xff]  ;;  %1873 = vmatprep.subr.bf16.mxu0 %v5236_v36  ;;  %v5363_v43 = vcombine.low %v425_v32, %v429_v33 }
  0xeb   :  { %v293_v39 = vld [vmem:[#allocation2 + $0xa0] sm:$0xff]  ;;  %1874 = vmatpush1.bf16.msra.mxu0 %v5235_v42 }
  0xec   :  { %v417_v40 = vld [vmem:[#allocation2 + $0x480] sm:$0xff]  ;;  %v5228_v44 = vcombine.high %v289_v38, %v293_v39  ;;  %1914 = vmatprep.subr.bf16.mxu1 %v5364_v37  ;;  %v5227_v50 = vcombine.low %v289_v38, %v293_v39 }
  0xed   :  { %v421_v41 = vld [vmem:[#allocation2 + $0x4a0] sm:$0xff]  ;;  %1915 = vmatpush1.bf16.msra.mxu1 %v5363_v43 }
  0xee   :  { %v5356_v45 = vcombine.high %v417_v40, %v421_v41  ;;  %v281_v46 = vld [vmem:[#allocation2 + $0x40] sm:$0xff]  ;;  %1875 = vmatprep.subr.bf16.mxu0 %v5228_v44  ;;  %v5355_v51 = vcombine.low %v417_v40, %v421_v41 }
  0xef   :  { %v285_v47 = vld [vmem:[#allocation2 + $0x60] sm:$0xff]  ;;  %1876 = vmatpush1.bf16.msra.mxu0 %v5227_v50 }
  0xf0   :  { %v409_v48 = vld [vmem:[#allocation2 + $0x440] sm:$0xff]  ;;  %v5220_v52 = vcombine.high %v281_v46, %v285_v47  ;;  %1916 = vmatprep.subr.bf16.mxu1 %v5356_v45  ;;  %v5219_v62 = vcombine.low %v281_v46, %v285_v47 }
  0xf1   :  { %v413_v49 = vld [vmem:[#allocation2 + $0x460] sm:$0xff]  ;;  %1917 = vmatpush1.bf16.msra.mxu1 %v5355_v51 }
  0xf2   :  { %v6981_v53 = vld [vmem:[%s7328_s6] sm:$0xff]  ;;  %v5348_v55 = vcombine.high %v409_v48, %v413_v49  ;;  %1877 = vmatprep.subr.bf16.mxu0 %v5220_v52  ;;  %v5347_v63 = vcombine.low %v409_v48, %v413_v49 }
  0xf3   :  { %v273_v56 = vld [vmem:[#allocation2] sm:$0xff]  ;;  %v6990_v58 = vcombine.high %v6981_v53, %v6981_v53  ;;  %1878 = vmatpush1.bf16.msra.mxu0 %v5219_v62 }
  0xf4   :  { %v277_v57 = vld [vmem:[#allocation2 + $0x20] sm:$0xff]  ;;  %1918 = vmatprep.subr.bf16.mxu1 %v5348_v55 }
  0xf5   :  { %v401_v60 = vld [vmem:[#allocation2 + $0x400] sm:$0xff]  ;;  %1897 = vmatprep.mubr.bf16.mxu0 %v6990_v58  ;;  %v5212_v0 = vcombine.high %v273_v56, %v277_v57  ;;  %v5211_v6 = vcombine.low %v273_v56, %v277_v57  ;;  %1919 = vmatpush1.bf16.msra.mxu1 %v5347_v63 }
  0xf6   :  { %v405_v61 = vld [vmem:[#allocation2 + $0x420] sm:$0xff] }
  0xf7   :  { %v5340_v1 = vcombine.high %v401_v60, %v405_v61  ;;  %v393_v2 = vld [vmem:[#allocation2 + $0x3c0] sm:$0xff]  ;;  %1879 = vmatprep.subr.bf16.mxu0 %v5212_v0  ;;  %v5339_v7 = vcombine.low %v401_v60, %v405_v61 }
  0xf8   :  { %v397_v3 = vld [vmem:[#allocation2 + $0x3e0] sm:$0xff]  ;;  %1880 = vmatpush1.bf16.msra.mxu0 %v5211_v6  ;;  %v330_v6 = vld [vmem:[#allocation2 + $0x1c8] sm:$0xff] }
  0xf9   :  { %v521_v4 = vld [vmem:[#allocation2 + $0x7c0] sm:$0xff]  ;;  %v5332_v8 = vcombine.high %v393_v2, %v397_v3  ;;  %1920 = vmatprep.subr.bf16.mxu1 %v5340_v1  ;;  %v5331_v14 = vcombine.low %v393_v2, %v397_v3 }
  0xfa   :  { %v525_v5 = vld [vmem:[#allocation2 + $0x7e0] sm:$0xff]  ;;  %1921 = vmatpush1.bf16.msra.mxu1 %v5339_v7  ;;  %v334_v7 = vld [vmem:[#allocation2 + $0x1e8] sm:$0xff] }
  0xfb   :  { %v5460_v9 = vcombine.high %v521_v4, %v525_v5  ;;  %v385_v10 = vld [vmem:[#allocation2 + $0x380] sm:$0xff]  ;;  %1881 = vmatprep.subr.bf16.mxu0 %v5332_v8  ;;  %v5459_v15 = vcombine.low %v521_v4, %v525_v5  ;;  %v458_v8 = vld [vmem:[#allocation2 + $0x5c8] sm:$0xff] }
  0xfc   :  { %v389_v11 = vld [vmem:[#allocation2 + $0x3a0] sm:$0xff]  ;;  %1882 = vmatpush2.bf16.msra.mxu0 %v5331_v14  ;;  %v322_v14 = vld [vmem:[#allocation2 + $0x188] sm:$0xff] }
  0xfd   :  { %v513_v12 = vld [vmem:[#allocation2 + $0x780] sm:$0xff]  ;;  %v5324_v16 = vcombine.high %v385_v10, %v389_v11  ;;  %1922 = vmatprep.subr.bf16.mxu1 %v5460_v9  ;;  %v5323_v22 = vcombine.low %v385_v10, %v389_v11  ;;  %v462_v9 = vld [vmem:[#allocation2 + $0x5e8] sm:$0xff] }
  0xfe   :  { %v517_v13 = vld [vmem:[#allocation2 + $0x7a0] sm:$0xff]  ;;  %1923 = vmatpush2.bf16.msra.mxu1 %v5459_v15  ;;  %v326_v15 = vld [vmem:[#allocation2 + $0x1a8] sm:$0xff] }
  0xff   :  { %v5452_v17 = vcombine.high %v513_v12, %v517_v13  ;;  %v377_v18 = vld [vmem:[#allocation2 + $0x340] sm:$0xff]  ;;  %1883 = vmatprep.subr.bf16.mxu0 %v5324_v16  ;;  %v5451_v23 = vcombine.low %v513_v12, %v517_v13  ;;  %v5270_v12 = vcombine.high %v330_v6, %v334_v7  ;;  %v5398_v13 = vcombine.high %v458_v8, %v462_v9 }
 0x100   :  { %v381_v19 = vld [vmem:[#allocation2 + $0x360] sm:$0xff]  ;;  %1884 = vmatpush2.bf16.msra.mxu0 %v5323_v22  ;;  %v7000_v16 = vcombine.low %v6981_v53, %v6981_v53  ;;  %v5262_v22 = vcombine.high %v322_v14, %v326_v15  ;;  %v5261_v53 = vcombine.low %v322_v14, %v326_v15 }
 0x101   :  { %v505_v20 = vld [vmem:[#allocation2 + $0x740] sm:$0xff]  ;;  %v5316_v24 = vcombine.high %v377_v18, %v381_v19  ;;  %1924 = vmatprep.subr.bf16.mxu1 %v5452_v17  ;;  %v5315_v30 = vcombine.low %v377_v18, %v381_v19  ;;  %v450_v17 = vld [vmem:[#allocation2 + $0x588] sm:$0xff]  ;;  %v7004_v19 = vcombine.low %v6986_v54, %v6986_v54 }
 0x102   :  { %v509_v21 = vld [vmem:[#allocation2 + $0x760] sm:$0xff]  ;;  %1925 = vmatpush2.bf16.msra.mxu1 %v5451_v23  ;;  %v454_v18 = vld [vmem:[#allocation2 + $0x5a8] sm:$0xff] }
 0x103   :  { %v5444_v25 = vcombine.high %v505_v20, %v509_v21  ;;  %v369_v26 = vld [vmem:[#allocation2 + $0x300] sm:$0xff]  ;;  %1885 = vmatprep.subr.bf16.mxu0 %v5316_v24  ;;  %v5443_v31 = vcombine.low %v505_v20, %v509_v21  ;;  %v5269_v20 = vcombine.low %v330_v6, %v334_v7  ;;  %v5397_v21 = vcombine.low %v458_v8, %v462_v9  ;;  %v314_v23 = vld [vmem:[#allocation2 + $0x148] sm:$0xff] }
 0x104   :  { %v373_v27 = vld [vmem:[#allocation2 + $0x320] sm:$0xff]  ;;  %1886 = vmatpush2.bf16.msra.mxu0 %v5315_v30  ;;  %v318_v24 = vld [vmem:[#allocation2 + $0x168] sm:$0xff]  ;;  %v5389_v54 = vcombine.low %v450_v17, %v454_v18 }
 0x105   :  { %v497_v28 = vld [vmem:[#allocation2 + $0x700] sm:$0xff]  ;;  %v5308_v32 = vcombine.high %v369_v26, %v373_v27  ;;  %1926 = vmatprep.subr.bf16.mxu1 %v5444_v25  ;;  %v5307_v38 = vcombine.low %v369_v26, %v373_v27  ;;  %v442_v25 = vld [vmem:[#allocation2 + $0x548] sm:$0xff]  ;;  %v5390_v26 = vcombine.high %v450_v17, %v454_v18 }
 0x106   :  { %v501_v29 = vld [vmem:[#allocation2 + $0x720] sm:$0xff]  ;;  %1927 = vmatpush2.bf16.msra.mxu1 %v5443_v31  ;;  %v446_v27 = vld [vmem:[#allocation2 + $0x568] sm:$0xff] }
 0x107   :  { %v5436_v33 = vcombine.high %v497_v28, %v501_v29  ;;  %v361_v34 = vld [vmem:[#allocation2 + $0x2c0] sm:$0xff]  ;;  %1887 = vmatprep.subr.bf16.mxu0 %v5308_v32  ;;  %v5435_v39 = vcombine.low %v497_v28, %v501_v29  ;;  %v5254_v28 = vcombine.high %v314_v23, %v318_v24  ;;  %v306_v29 = vld [vmem:[#allocation2 + $0x108] sm:$0xff]  ;;  %v5382_v32 = vcombine.high %v442_v25, %v446_v27 }
 0x108   :  { %v365_v35 = vld [vmem:[#allocation2 + $0x2e0] sm:$0xff]  ;;  %1888 = vmatpush2.bf16.msra.mxu0 %v5307_v38  ;;  %v310_v30 = vld [vmem:[#allocation2 + $0x128] sm:$0xff] }
 0x109   :  { %v489_v36 = vld [vmem:[#allocation2 + $0x6c0] sm:$0xff]  ;;  %v5300_v40 = vcombine.high %v361_v34, %v365_v35  ;;  %1928 = vmatprep.subr.bf16.mxu1 %v5436_v33  ;;  %v5299_v46 = vcombine.low %v361_v34, %v365_v35  ;;  %v434_v31 = vld [vmem:[#allocation2 + $0x508] sm:$0xff]  ;;  %v5253_v34 = vcombine.low %v314_v23, %v318_v24  ;;  %v5381_v35 = vcombine.low %v442_v25, %v446_v27 }
 0x10a   :  { %v493_v37 = vld [vmem:[#allocation2 + $0x6e0] sm:$0xff]  ;;  %1929 = vmatpush2.bf16.msra.mxu1 %v5435_v39  ;;  %v438_v33 = vld [vmem:[#allocation2 + $0x528] sm:$0xff] }
 0x10b   :  { %v5428_v41 = vcombine.high %v489_v36, %v493_v37  ;;  %v353_v42 = vld [vmem:[#allocation2 + $0x280] sm:$0xff]  ;;  %1889 = vmatprep.subr.bf16.mxu0 %v5300_v40  ;;  %v5427_v47 = vcombine.low %v489_v36, %v493_v37  ;;  %v5246_v36 = vcombine.high %v306_v29, %v310_v30  ;;  %v298_v37 = vld [vmem:[#allocation2 + $0xc8] sm:$0xff]  ;;  %v5374_v40 = vcombine.high %v434_v31, %v438_v33 }
 0x10c   :  { %v357_v43 = vld [vmem:[#allocation2 + $0x2a0] sm:$0xff]  ;;  %1890 = vmatpush2.bf16.msra.mxu0 %v5299_v46  ;;  %v302_v38 = vld [vmem:[#allocation2 + $0xe8] sm:$0xff] }
 0x10d   :  { %v481_v44 = vld [vmem:[#allocation2 + $0x680] sm:$0xff]  ;;  %v5292_v48 = vcombine.high %v353_v42, %v357_v43  ;;  %1930 = vmatprep.subr.bf16.mxu1 %v5428_v41  ;;  %v5291_v56 = vcombine.low %v353_v42, %v357_v43  ;;  %v426_v39 = vld [vmem:[#allocation2 + $0x4c8] sm:$0xff]  ;;  %v5245_v42 = vcombine.low %v306_v29, %v310_v30  ;;  %v5373_v43 = vcombine.low %v434_v31, %v438_v33 }
 0x10e   :  { %v485_v45 = vld [vmem:[#allocation2 + $0x6a0] sm:$0xff]  ;;  %1931 = vmatpush2.bf16.msra.mxu1 %v5427_v47  ;;  %v430_v41 = vld [vmem:[#allocation2 + $0x4e8] sm:$0xff] }
 0x10f   :  { %v5420_v49 = vcombine.high %v481_v44, %v485_v45  ;;  %v345_v50 = vld [vmem:[#allocation2 + $0x240] sm:$0xff]  ;;  %1891 = vmatprep.subr.bf16.mxu0 %v5292_v48  ;;  %v5419_v57 = vcombine.low %v481_v44, %v485_v45  ;;  %v5238_v44 = vcombine.high %v298_v37, %v302_v38  ;;  %v290_v45 = vld [vmem:[#allocation2 + $0x88] sm:$0xff]  ;;  %v5366_v48 = vcombine.high %v426_v39, %v430_v41 }
 0x110   :  { %v349_v51 = vld [vmem:[#allocation2 + $0x260] sm:$0xff]  ;;  %1892 = vmatpush2.bf16.msra.mxu0 %v5291_v56  ;;  %v294_v46 = vld [vmem:[#allocation2 + $0xa8] sm:$0xff] }
 0x111   :  { %v473_v52 = vld [vmem:[#allocation2 + $0x640] sm:$0xff]  ;;  %v5284_v60 = vcombine.high %v345_v50, %v349_v51  ;;  %1932 = vmatprep.subr.bf16.mxu1 %v5420_v49  ;;  %v5283_v2 = vcombine.low %v345_v50, %v349_v51  ;;  %v418_v47 = vld [vmem:[#allocation2 + $0x488] sm:$0xff]  ;;  %v5237_v50 = vcombine.low %v298_v37, %v302_v38  ;;  %v5365_v51 = vcombine.low %v426_v39, %v430_v41 }
 0x112   :  { %v477_v55 = vld [vmem:[#allocation2 + $0x660] sm:$0xff]  ;;  %1933 = vmatpush2.bf16.msra.mxu1 %v5419_v57  ;;  %v422_v49 = vld [vmem:[#allocation2 + $0x4a8] sm:$0xff] }
 0x113   :  { %v5412_v61 = vcombine.high %v473_v52, %v477_v55  ;;  %v337_v62 = vld [vmem:[#allocation2 + $0x200] sm:$0xff]  ;;  %1893 = vmatprep.subr.bf16.mxu0 %v5284_v60  ;;  %v5411_v3 = vcombine.low %v473_v52, %v477_v55  ;;  %v5230_v52 = vcombine.high %v290_v45, %v294_v46  ;;  %v282_v55 = vld [vmem:[#allocation2 + $0x48] sm:$0xff]  ;;  %v5358_v60 = vcombine.high %v418_v47, %v422_v49 }
 0x114   :  { %v341_v63 = vld [vmem:[#allocation2 + $0x220] sm:$0xff]  ;;  %1894 = vmatpush2.bf16.msra.mxu0 %v5283_v2  ;;  %v286_v56 = vld [vmem:[#allocation2 + $0x68] sm:$0xff] }
 0x115   :  { %v465_v0 = vld [vmem:[#allocation2 + $0x600] sm:$0xff]  ;;  %v5276_v4 = vcombine.high %v337_v62, %v341_v63  ;;  %1934 = vmatprep.subr.bf16.mxu1 %v5412_v61  ;;  %v5275_v10 = vcombine.low %v337_v62, %v341_v63  ;;  %v410_v57 = vld [vmem:[#allocation2 + $0x448] sm:$0xff]  ;;  %v5229_v62 = vcombine.low %v290_v45, %v294_v46  ;;  %v5357_v63 = vcombine.low %v418_v47, %v422_v49 }
 0x116   :  { %v469_v1 = vld [vmem:[#allocation2 + $0x620] sm:$0xff]  ;;  %1935 = vmatpush2.bf16.msra.mxu1 %v5411_v3  ;;  %v414_v61 = vld [vmem:[#allocation2 + $0x468] sm:$0xff]  ;;  %v5221_v6 = vcombine.low %v282_v55, %v286_v56 }
 0x117   :  { %v5404_v5 = vcombine.high %v465_v0, %v469_v1  ;;  %1895 = vmatprep.subr.bf16.mxu0 %v5276_v4  ;;  %v5403_v11 = vcombine.low %v465_v0, %v469_v1  ;;  %v5222_v0 = vcombine.high %v282_v55, %v286_v56  ;;  %v274_v1 = vld [vmem:[#allocation2 + $0x8] sm:$0xff]  ;;  %v5350_v4 = vcombine.high %v410_v57, %v414_v61 }
 0x118   :  { %1896 = vmatpush2.bf16.msra.mxu0 %v5275_v10  ;;  %v278_v2 = vld [vmem:[#allocation2 + $0x28] sm:$0xff]  ;;  %v5349_v7 = vcombine.low %v410_v57, %v414_v61 }
 0x119   :  { %1936 = vmatprep.subr.bf16.mxu1 %v5404_v5  ;;  %1947 = vmatprep.subr.bf16.mxu0 %v5270_v12  ;;  %v402_v3 = vld [vmem:[#allocation2 + $0x408] sm:$0xff]  ;;  %v5214_v8 = vcombine.high %v274_v1, %v278_v2  ;;  %v5213_v14 = vcombine.low %v274_v1, %v278_v2 }
 0x11a   :  { %1937 = vmatpush2.bf16.msra.mxu1 %v5403_v11  ;;  %v406_v5 = vld [vmem:[#allocation2 + $0x428] sm:$0xff] }
 0x11b   :  { %1988 = vmatprep.subr.bf16.mxu1 %v5398_v13  ;;  %1898 = vmatmul.mubr.bf16.vlgmr.msra.gmra.mxu0 %v7000_v16  ;;  %v394_v9 = vld [vmem:[#allocation2 + $0x3c8] sm:$0xff]  ;;  %v5342_v12 = vcombine.high %v402_v3, %v406_v5  ;;  %v5341_v15 = vcombine.low %v402_v3, %v406_v5 }
 0x11c   :  { %1948 = vmatpush1.bf16.msra.mxu0 %v5269_v20  ;;  %1979 = vmatprep.mubr.bf16.mxu0 %v6990_v58  ;;  %v398_v10 = vld [vmem:[#allocation2 + $0x3e8] sm:$0xff] }
 0x11d   :  { %1939 = vmatmul.mubr.bf16.vlgmr.msra.gmra.mxu1 %v7004_v19  ;;  %1949 = vmatprep.subr.bf16.mxu0 %v5262_v22  ;;  %v522_v11 = vld [vmem:[#allocation2 + $0x7c8] sm:$0xff]  ;;  %v5334_v17 = vcombine.high %v394_v9, %v398_v10  ;;  %v5333_v24 = vcombine.low %v394_v9, %v398_v10 }
 0x11e   :  { %1989 = vmatpush1.bf16.msra.mxu1 %v5397_v21  ;;  %2020 = vmatprep.mubr.bf16.mxu1 %v6994_v59  ;;  %v526_v13 = vld [vmem:[#allocation2 + $0x7e8] sm:$0xff] }
 0x11f   :  { %1990 = vmatprep.subr.bf16.mxu1 %v5390_v26  ;;  %v386_v18 = vld [vmem:[#allocation2 + $0x388] sm:$0xff]  ;;  %v5462_v22 = vcombine.high %v522_v11, %v526_v13  ;;  %v5461_v25 = vcombine.low %v522_v11, %v526_v13  ;;  %v331_v13 = vld [vmem:[#allocation2 + $0x1d0] sm:$0xff] }
 0x120   :  { %1950 = vmatpush1.bf16.msra.mxu0 %v5261_v53  ;;  %v390_v20 = vld [vmem:[#allocation2 + $0x3a8] sm:$0xff] }
 0x121   :  { %1951 = vmatprep.subr.bf16.mxu0 %v5254_v28  ;;  %v514_v21 = vld [vmem:[#allocation2 + $0x788] sm:$0xff]  ;;  %v5326_v26 = vcombine.high %v386_v18, %v390_v20  ;;  %v5325_v30 = vcombine.low %v386_v18, %v390_v20  ;;  %v463_v18 = vld [vmem:[#allocation2 + $0x5f0] sm:$0xff] }
 0x122   :  { %1991 = vmatpush1.bf16.msra.mxu1 %v5389_v54  ;;  %v518_v23 = vld [vmem:[#allocation2 + $0x7a8] sm:$0xff] }
 0x123   :  { %1992 = vmatprep.subr.bf16.mxu1 %v5382_v32  ;;  %v378_v27 = vld [vmem:[#allocation2 + $0x348] sm:$0xff]  ;;  %v5454_v28 = vcombine.high %v514_v21, %v518_v23  ;;  %v5453_v31 = vcombine.low %v514_v21, %v518_v23  ;;  %v323_v23 = vld [vmem:[#allocation2 + $0x190] sm:$0xff] }
 0x124   :  { %1952 = vmatpush1.bf16.msra.mxu0 %v5253_v34  ;;  %v382_v53 = vld [vmem:[#allocation2 + $0x368] sm:$0xff] }
 0x125   :  { %1953 = vmatprep.subr.bf16.mxu0 %v5246_v36  ;;  %v506_v54 = vld [vmem:[#allocation2 + $0x748] sm:$0xff]  ;;  %v5318_v32 = vcombine.high %v378_v27, %v382_v53  ;;  %v5317_v38 = vcombine.low %v378_v27, %v382_v53  ;;  %v455_v27 = vld [vmem:[#allocation2 + $0x5b0] sm:$0xff] }
 0x126   :  { %1993 = vmatpush1.bf16.msra.mxu1 %v5381_v35  ;;  %v510_v29 = vld [vmem:[#allocation2 + $0x768] sm:$0xff] }
 0x127   :  { %1994 = vmatprep.subr.bf16.mxu1 %v5374_v40  ;;  %v370_v33 = vld [vmem:[#allocation2 + $0x308] sm:$0xff]  ;;  %v5446_v36 = vcombine.high %v506_v54, %v510_v29  ;;  %v5445_v39 = vcombine.low %v506_v54, %v510_v29  ;;  %v315_v54 = vld [vmem:[#allocation2 + $0x150] sm:$0xff] }
 0x128   :  { %1954 = vmatpush1.bf16.msra.mxu0 %v5245_v42  ;;  %v374_v34 = vld [vmem:[#allocation2 + $0x328] sm:$0xff] }
 0x129   :  { %1955 = vmatprep.subr.bf16.mxu0 %v5238_v44  ;;  %v498_v35 = vld [vmem:[#allocation2 + $0x708] sm:$0xff]  ;;  %v5310_v40 = vcombine.high %v370_v33, %v374_v34  ;;  %v5309_v46 = vcombine.low %v370_v33, %v374_v34 }
 0x12a   :  { %1995 = vmatpush1.bf16.msra.mxu1 %v5373_v43  ;;  %v502_v37 = vld [vmem:[#allocation2 + $0x728] sm:$0xff] }
 0x12b   :  { %1996 = vmatprep.subr.bf16.mxu1 %v5366_v48  ;;  %v362_v41 = vld [vmem:[#allocation2 + $0x2c8] sm:$0xff]  ;;  %v5438_v44 = vcombine.high %v498_v35, %v502_v37  ;;  %v5437_v47 = vcombine.low %v498_v35, %v502_v37  ;;  %v307_v35 = vld [vmem:[#allocation2 + $0x110] sm:$0xff] }
 0x12c   :  { %1956 = vmatpush1.bf16.msra.mxu0 %v5237_v50  ;;  %v366_v42 = vld [vmem:[#allocation2 + $0x2e8] sm:$0xff] }
 0x12d   :  { %1957 = vmatprep.subr.bf16.mxu0 %v5230_v52  ;;  %v490_v43 = vld [vmem:[#allocation2 + $0x6c8] sm:$0xff]  ;;  %v5302_v48 = vcombine.high %v362_v41, %v366_v42  ;;  %v5301_v56 = vcombine.low %v362_v41, %v366_v42 }
 0x12e   :  { %1997 = vmatpush1.bf16.msra.mxu1 %v5365_v51  ;;  %v494_v45 = vld [vmem:[#allocation2 + $0x6e8] sm:$0xff] }
 0x12f   :  { %1998 = vmatprep.subr.bf16.mxu1 %v5358_v60  ;;  %v354_v49 = vld [vmem:[#allocation2 + $0x288] sm:$0xff]  ;;  %v5430_v52 = vcombine.high %v490_v43, %v494_v45  ;;  %v5429_v57 = vcombine.low %v490_v43, %v494_v45  ;;  %v299_v43 = vld [vmem:[#allocation2 + $0xd0] sm:$0xff] }
 0x130   :  { %1958 = vmatpush1.bf16.msra.mxu0 %v5229_v62  ;;  %v358_v50 = vld [vmem:[#allocation2 + $0x2a8] sm:$0xff] }
 0x131   :  { %1959 = vmatprep.subr.bf16.mxu0 %v5222_v0  ;;  %v482_v51 = vld [vmem:[#allocation2 + $0x688] sm:$0xff]  ;;  %v5294_v60 = vcombine.high %v354_v49, %v358_v50  ;;  %v5293_v2 = vcombine.low %v354_v49, %v358_v50 }
 0x132   :  { %1999 = vmatpush1.bf16.msra.mxu1 %v5357_v63  ;;  %v486_v55 = vld [vmem:[#allocation2 + $0x6a8] sm:$0xff] }
 0x133   :  { %2000 = vmatprep.subr.bf16.mxu1 %v5350_v4  ;;  %v346_v61 = vld [vmem:[#allocation2 + $0x248] sm:$0xff]  ;;  %v5422_v0 = vcombine.high %v482_v51, %v486_v55  ;;  %v5421_v3 = vcombine.low %v482_v51, %v486_v55  ;;  %v291_v51 = vld [vmem:[#allocation2 + $0x90] sm:$0xff] }
 0x134   :  { %1960 = vmatpush1.bf16.msra.mxu0 %v5221_v6  ;;  %v350_v62 = vld [vmem:[#allocation2 + $0x268] sm:$0xff] }
 0x135   :  { %1961 = vmatprep.subr.bf16.mxu0 %v5214_v8  ;;  %v474_v63 = vld [vmem:[#allocation2 + $0x648] sm:$0xff]  ;;  %v5286_v4 = vcombine.high %v346_v61, %v350_v62  ;;  %v5285_v10 = vcombine.low %v346_v61, %v350_v62 }
 0x136   :  { %2001 = vmatpush1.bf16.msra.mxu1 %v5349_v7  ;;  %v478_v1 = vld [vmem:[#allocation2 + $0x668] sm:$0xff] }
 0x137   :  { %2002 = vmatprep.subr.bf16.mxu1 %v5342_v12  ;;  %v338_v5 = vld [vmem:[#allocation2 + $0x208] sm:$0xff]  ;;  %v5414_v8 = vcombine.high %v474_v63, %v478_v1  ;;  %v5413_v11 = vcombine.low %v474_v63, %v478_v1  ;;  %v283_v63 = vld [vmem:[#allocation2 + $0x50] sm:$0xff] }
 0x138   :  { %1962 = vmatpush1.bf16.msra.mxu0 %v5213_v14  ;;  %v342_v6 = vld [vmem:[#allocation2 + $0x228] sm:$0xff]  ;;  %v335_v14 = vld [vmem:[#allocation2 + $0x1f0] sm:$0xff] }
 0x139   :  { %1963 = vmatprep.subr.bf16.mxu0 %v5334_v17  ;;  %v466_v7 = vld [vmem:[#allocation2 + $0x608] sm:$0xff]  ;;  %v5278_v12 = vcombine.high %v338_v5, %v342_v6  ;;  %v5277_v20 = vcombine.low %v338_v5, %v342_v6  ;;  %v5271_v53 = vcombine.low %v331_v13, %v335_v14 }
 0x13a   :  { %2003 = vmatpush1.bf16.msra.mxu1 %v5341_v15  ;;  %v470_v9 = vld [vmem:[#allocation2 + $0x628] sm:$0xff]  ;;  %v459_v15 = vld [vmem:[#allocation2 + $0x5d0] sm:$0xff] }
 0x13b   :  { %2004 = vmatprep.subr.bf16.mxu1 %v5462_v22  ;;  %v5406_v17 = vcombine.high %v466_v7, %v470_v9  ;;  %v5405_v21 = vcombine.low %v466_v7, %v470_v9  ;;  %v5272_v22 = vcombine.high %v331_v13, %v335_v14  ;;  %v5399_v29 = vcombine.low %v459_v15, %v463_v18  ;;  %v275_v7 = vld [vmem:[#allocation2 + $0x10] sm:$0xff] }
 0x13c   :  { %1964 = vmatpush2.bf16.msra.mxu0 %v5333_v24  ;;  %v327_v24 = vld [vmem:[#allocation2 + $0x1b0] sm:$0xff] }
 0x13d   :  { %1965 = vmatprep.subr.bf16.mxu0 %v5326_v26  ;;  %v5400_v26 = vcombine.high %v459_v15, %v463_v18  ;;  %v5263_v34 = vcombine.low %v323_v23, %v327_v24  ;;  %v395_v15 = vld [vmem:[#allocation2 + $0x3d0] sm:$0xff] }
 0x13e   :  { %2005 = vmatpush2.bf16.msra.mxu1 %v5461_v25  ;;  %v451_v25 = vld [vmem:[#allocation2 + $0x590] sm:$0xff] }
 0x13f   :  { %2006 = vmatprep.subr.bf16.mxu1 %v5454_v28  ;;  %v319_v28 = vld [vmem:[#allocation2 + $0x170] sm:$0xff]  ;;  %v5392_v33 = vcombine.high %v451_v25, %v455_v27  ;;  %v5391_v37 = vcombine.low %v451_v25, %v455_v27 }
 0x140   :  { %1966 = vmatpush2.bf16.msra.mxu0 %v5325_v30  ;;  %v5264_v30 = vcombine.high %v323_v23, %v327_v24  ;;  %v5255_v42 = vcombine.low %v315_v54, %v319_v28  ;;  %v387_v25 = vld [vmem:[#allocation2 + $0x390] sm:$0xff] }
 0x141   :  { %1967 = vmatprep.subr.bf16.mxu0 %v5318_v32  ;;  %v447_v32 = vld [vmem:[#allocation2 + $0x570] sm:$0xff] }
 0x142   :  { %2007 = vmatpush2.bf16.msra.mxu1 %v5453_v31  ;;  %v443_v31 = vld [vmem:[#allocation2 + $0x550] sm:$0xff] }
 0x143   :  { %2008 = vmatprep.subr.bf16.mxu1 %v5446_v36  ;;  %v311_v36 = vld [vmem:[#allocation2 + $0x130] sm:$0xff]  ;;  %v5384_v41 = vcombine.high %v443_v31, %v447_v32  ;;  %v5383_v45 = vcombine.low %v443_v31, %v447_v32 }
 0x144   :  { %1968 = vmatpush2.bf16.msra.mxu0 %v5317_v38  ;;  %v5256_v38 = vcombine.high %v315_v54, %v319_v28  ;;  %v5247_v50 = vcombine.low %v307_v35, %v311_v36  ;;  %v515_v54 = vld [vmem:[#allocation2 + $0x790] sm:$0xff] }
 0x145   :  { %1969 = vmatprep.subr.bf16.mxu0 %v5310_v40  ;;  %v439_v40 = vld [vmem:[#allocation2 + $0x530] sm:$0xff] }
 0x146   :  { %2009 = vmatpush2.bf16.msra.mxu1 %v5445_v39  ;;  %v435_v39 = vld [vmem:[#allocation2 + $0x510] sm:$0xff] }
 0x147   :  { %2010 = vmatprep.subr.bf16.mxu1 %v5438_v44  ;;  %v303_v44 = vld [vmem:[#allocation2 + $0xf0] sm:$0xff]  ;;  %v5376_v49 = vcombine.high %v435_v39, %v439_v40  ;;  %v5375_v55 = vcombine.low %v435_v39, %v439_v40 }
 0x148   :  { %1970 = vmatpush2.bf16.msra.mxu0 %v5309_v46  ;;  %v5248_v46 = vcombine.high %v307_v35, %v311_v36  ;;  %v5239_v62 = vcombine.low %v299_v43, %v303_v44  ;;  %v519_v28 = vld [vmem:[#allocation2 + $0x7b0] sm:$0xff] }
 0x149   :  { %1971 = vmatprep.subr.bf16.mxu0 %v5302_v48  ;;  %v431_v48 = vld [vmem:[#allocation2 + $0x4f0] sm:$0xff] }
 0x14a   :  { %2011 = vmatpush2.bf16.msra.mxu1 %v5437_v47  ;;  %v427_v47 = vld [vmem:[#allocation2 + $0x4d0] sm:$0xff] }
 0x14b   :  { %2012 = vmatprep.subr.bf16.mxu1 %v5430_v52  ;;  %v295_v52 = vld [vmem:[#allocation2 + $0xb0] sm:$0xff]  ;;  %v5368_v61 = vcombine.high %v427_v47, %v431_v48  ;;  %v5367_v1 = vcombine.low %v427_v47, %v431_v48 }
 0x14c   :  { %1972 = vmatpush2.bf16.msra.mxu0 %v5301_v56  ;;  %v5240_v56 = vcombine.high %v299_v43, %v303_v44  ;;  %v5231_v6 = vcombine.low %v291_v51, %v295_v52  ;;  %v379_v31 = vld [vmem:[#allocation2 + $0x350] sm:$0xff] }
 0x14d   :  { %1973 = vmatprep.subr.bf16.mxu0 %v5294_v60  ;;  %v423_v60 = vld [vmem:[#allocation2 + $0x4b0] sm:$0xff] }
 0x14e   :  { %2013 = vmatpush2.bf16.msra.mxu1 %v5429_v57  ;;  %v419_v57 = vld [vmem:[#allocation2 + $0x490] sm:$0xff] }
 0x14f   :  { %2014 = vmatprep.subr.bf16.mxu1 %v5422_v0  ;;  %v287_v0 = vld [vmem:[#allocation2 + $0x70] sm:$0xff]  ;;  %v5360_v5 = vcombine.high %v419_v57, %v423_v60  ;;  %v5359_v9 = vcombine.low %v419_v57, %v423_v60 }
 0x150   :  { %1974 = vmatpush2.bf16.msra.mxu0 %v5293_v2  ;;  %v5232_v2 = vcombine.high %v291_v51, %v295_v52  ;;  %v5223_v14 = vcombine.low %v283_v63, %v287_v0  ;;  %v383_v32 = vld [vmem:[#allocation2 + $0x370] sm:$0xff] }
 0x151   :  { %1975 = vmatprep.subr.bf16.mxu0 %v5286_v4  ;;  %v415_v4 = vld [vmem:[#allocation2 + $0x470] sm:$0xff] }
 0x152   :  { %2015 = vmatpush2.bf16.msra.mxu1 %v5421_v3  ;;  %v411_v3 = vld [vmem:[#allocation2 + $0x450] sm:$0xff] }
 0x153   :  { %2016 = vmatprep.subr.bf16.mxu1 %v5414_v8  ;;  %v279_v8 = vld [vmem:[#allocation2 + $0x30] sm:$0xff]  ;;  %v5352_v13 = vcombine.high %v411_v3, %v415_v4  ;;  %v5351_v18 = vcombine.low %v411_v3, %v415_v4 }
 0x154   :  { %1976 = vmatpush2.bf16.msra.mxu0 %v5285_v10  ;;  %v5224_v10 = vcombine.high %v283_v63, %v287_v0  ;;  %v5215_v24 = vcombine.low %v275_v7, %v279_v8  ;;  %v507_v35 = vld [vmem:[#allocation2 + $0x750] sm:$0xff] }
 0x155   :  { %1977 = vmatprep.subr.bf16.mxu0 %v5278_v12  ;;  %v407_v12 = vld [vmem:[#allocation2 + $0x430] sm:$0xff] }
 0x156   :  { %2017 = vmatpush2.bf16.msra.mxu1 %v5413_v11  ;;  %v403_v11 = vld [vmem:[#allocation2 + $0x410] sm:$0xff] }
 0x157   :  { %2018 = vmatprep.subr.bf16.mxu1 %v5406_v17  ;;  %v399_v17 = vld [vmem:[#allocation2 + $0x3f0] sm:$0xff]  ;;  %v5344_v23 = vcombine.high %v403_v11, %v407_v12  ;;  %v5343_v27 = vcombine.low %v403_v11, %v407_v12 }
 0x158   :  { %1978 = vmatpush2.bf16.msra.mxu0 %v5277_v20  ;;  %v5216_v20 = vcombine.high %v275_v7, %v279_v8  ;;  %v511_v36 = vld [vmem:[#allocation2 + $0x770] sm:$0xff] }
 0x159   :  { %2029 = vmatprep.subr.bf16.mxu0 %v5272_v22  ;;  %v527_v22 = vld [vmem:[#allocation2 + $0x7f0] sm:$0xff] }
 0x15a   :  { %2019 = vmatpush2.bf16.msra.mxu1 %v5405_v21  ;;  %v523_v21 = vld [vmem:[#allocation2 + $0x7d0] sm:$0xff] }
 0x15b   :  { %2070 = vmatprep.subr.bf16.mxu1 %v5400_v26  ;;  %1980 = vmatmul.mubr.bf16.vlgmr.msra.gmra.mxu0 %v7000_v16  ;;  %v391_v26 = vld [vmem:[#allocation2 + $0x3b0] sm:$0xff] }
 0x15c   :  { %2030 = vmatpush1.bf16.msra.mxu0 %v5271_v53  ;;  %2061 = vmatprep.mubr.bf16.mxu0 %v6990_v58  ;;  %v5336_v53 = vcombine.high %v395_v15, %v399_v17  ;;  %v371_v39 = vld [vmem:[#allocation2 + $0x310] sm:$0xff] }
 0x15d   :  { %2021 = vmatmul.mubr.bf16.vlgmr.msra.gmra.mxu1 %v7004_v19  ;;  %2031 = vmatprep.subr.bf16.mxu0 %v5264_v30  ;;  %v5335_v30 = vcombine.low %v395_v15, %v399_v17  ;;  %v375_v40 = vld [vmem:[#allocation2 + $0x330] sm:$0xff] }
 0x15e   :  { %2071 = vmatpush1.bf16.msra.mxu1 %v5399_v29  ;;  %2102 = vmatprep.mubr.bf16.mxu1 %v6994_v59  ;;  %v5464_v29 = vcombine.high %v523_v21, %v527_v22  ;;  %v499_v43 = vld [vmem:[#allocation2 + $0x710] sm:$0xff] }
 0x15f   :  { %2072 = vmatprep.subr.bf16.mxu1 %v5392_v33  ;;  %v5463_v33 = vcombine.low %v523_v21, %v527_v22  ;;  %v503_v44 = vld [vmem:[#allocation2 + $0x730] sm:$0xff]  ;;  %v332_v21 = vld [vmem:[#allocation2 + $0x1d8] sm:$0xff] }
 0x160   :  { %2032 = vmatpush1.bf16.msra.mxu0 %v5263_v34  ;;  %v5328_v34 = vcombine.high %v387_v25, %v391_v26  ;;  %v363_v47 = vld [vmem:[#allocation2 + $0x2d0] sm:$0xff]  ;;  %v336_v22 = vld [vmem:[#allocation2 + $0x1f8] sm:$0xff] }
 0x161   :  { %2033 = vmatprep.subr.bf16.mxu0 %v5256_v38  ;;  %v5327_v38 = vcombine.low %v387_v25, %v391_v26  ;;  %v367_v48 = vld [vmem:[#allocation2 + $0x2f0] sm:$0xff]  ;;  %v460_v25 = vld [vmem:[#allocation2 + $0x5d8] sm:$0xff] }
 0x162   :  { %2073 = vmatpush1.bf16.msra.mxu1 %v5391_v37  ;;  %v5456_v37 = vcombine.high %v515_v54, %v519_v28  ;;  %v491_v51 = vld [vmem:[#allocation2 + $0x6d0] sm:$0xff]  ;;  %v464_v26 = vld [vmem:[#allocation2 + $0x5f8] sm:$0xff] }
 0x163   :  { %2074 = vmatprep.subr.bf16.mxu1 %v5384_v41  ;;  %v5455_v41 = vcombine.low %v515_v54, %v519_v28  ;;  %v495_v52 = vld [vmem:[#allocation2 + $0x6f0] sm:$0xff]  ;;  %v324_v54 = vld [vmem:[#allocation2 + $0x198] sm:$0xff] }
 0x164   :  { %2034 = vmatpush1.bf16.msra.mxu0 %v5255_v42  ;;  %v5320_v42 = vcombine.high %v379_v31, %v383_v32  ;;  %v355_v57 = vld [vmem:[#allocation2 + $0x290] sm:$0xff]  ;;  %v328_v28 = vld [vmem:[#allocation2 + $0x1b8] sm:$0xff] }
 0x165   :  { %2035 = vmatprep.subr.bf16.mxu0 %v5248_v46  ;;  %v5319_v46 = vcombine.low %v379_v31, %v383_v32  ;;  %v359_v60 = vld [vmem:[#allocation2 + $0x2b0] sm:$0xff]  ;;  %v452_v31 = vld [vmem:[#allocation2 + $0x598] sm:$0xff] }
 0x166   :  { %2075 = vmatpush1.bf16.msra.mxu1 %v5383_v45  ;;  %v5448_v45 = vcombine.high %v507_v35, %v511_v36  ;;  %v483_v63 = vld [vmem:[#allocation2 + $0x690] sm:$0xff]  ;;  %v456_v32 = vld [vmem:[#allocation2 + $0x5b8] sm:$0xff] }
 0x167   :  { %2076 = vmatprep.subr.bf16.mxu1 %v5376_v49  ;;  %v5447_v49 = vcombine.low %v507_v35, %v511_v36  ;;  %v487_v0 = vld [vmem:[#allocation2 + $0x6b0] sm:$0xff]  ;;  %v316_v35 = vld [vmem:[#allocation2 + $0x158] sm:$0xff] }
 0x168   :  { %2036 = vmatpush1.bf16.msra.mxu0 %v5247_v50  ;;  %v5312_v50 = vcombine.high %v371_v39, %v375_v40  ;;  %v347_v3 = vld [vmem:[#allocation2 + $0x250] sm:$0xff]  ;;  %v320_v36 = vld [vmem:[#allocation2 + $0x178] sm:$0xff] }
 0x169   :  { %2037 = vmatprep.subr.bf16.mxu0 %v5240_v56  ;;  %v5311_v56 = vcombine.low %v371_v39, %v375_v40  ;;  %v351_v4 = vld [vmem:[#allocation2 + $0x270] sm:$0xff]  ;;  %v444_v39 = vld [vmem:[#allocation2 + $0x558] sm:$0xff]  ;;  %v5394_v40 = vcombine.high %v452_v31, %v456_v32 }
 0x16a   :  { %2077 = vmatpush1.bf16.msra.mxu1 %v5375_v55  ;;  %v5440_v55 = vcombine.high %v499_v43, %v503_v44  ;;  %v475_v7 = vld [vmem:[#allocation2 + $0x650] sm:$0xff] }
 0x16b   :  { %2078 = vmatprep.subr.bf16.mxu1 %v5368_v61  ;;  %v5439_v61 = vcombine.low %v499_v43, %v503_v44  ;;  %v479_v8 = vld [vmem:[#allocation2 + $0x670] sm:$0xff]  ;;  %v308_v43 = vld [vmem:[#allocation2 + $0x118] sm:$0xff] }
 0x16c   :  { %2038 = vmatpush1.bf16.msra.mxu0 %v5239_v62  ;;  %v5304_v62 = vcombine.high %v363_v47, %v367_v48  ;;  %v339_v11 = vld [vmem:[#allocation2 + $0x210] sm:$0xff]  ;;  %v312_v44 = vld [vmem:[#allocation2 + $0x138] sm:$0xff] }
 0x16d   :  { %2039 = vmatprep.subr.bf16.mxu0 %v5232_v2  ;;  %v5303_v2 = vcombine.low %v363_v47, %v367_v48  ;;  %v343_v12 = vld [vmem:[#allocation2 + $0x230] sm:$0xff]  ;;  %v436_v47 = vld [vmem:[#allocation2 + $0x518] sm:$0xff] }
 0x16e   :  { %2079 = vmatpush1.bf16.msra.mxu1 %v5367_v1  ;;  %v5432_v1 = vcombine.high %v491_v51, %v495_v52  ;;  %v467_v15 = vld [vmem:[#allocation2 + $0x610] sm:$0xff]  ;;  %v440_v48 = vld [vmem:[#allocation2 + $0x538] sm:$0xff] }
 0x16f   :  { %2080 = vmatprep.subr.bf16.mxu1 %v5360_v5  ;;  %v5431_v5 = vcombine.low %v491_v51, %v495_v52  ;;  %v471_v17 = vld [vmem:[#allocation2 + $0x630] sm:$0xff]  ;;  %v300_v51 = vld [vmem:[#allocation2 + $0xd8] sm:$0xff] }
 0x170   :  { %2040 = vmatpush1.bf16.msra.mxu0 %v5231_v6  ;;  %v5296_v6 = vcombine.high %v355_v57, %v359_v60  ;;  %v304_v52 = vld [vmem:[#allocation2 + $0xf8] sm:$0xff] }
 0x171   :  { %2041 = vmatprep.subr.bf16.mxu0 %v5224_v10  ;;  %v5295_v10 = vcombine.low %v355_v57, %v359_v60  ;;  %v428_v57 = vld [vmem:[#allocation2 + $0x4d8] sm:$0xff]  ;;  %v5378_v60 = vcombine.high %v436_v47, %v440_v48 }
 0x172   :  { %2081 = vmatpush1.bf16.msra.mxu1 %v5359_v9  ;;  %v5424_v9 = vcombine.high %v483_v63, %v487_v0 }
 0x173   :  { %2082 = vmatprep.subr.bf16.mxu1 %v5352_v13  ;;  %v5423_v13 = vcombine.low %v483_v63, %v487_v0  ;;  %v292_v63 = vld [vmem:[#allocation2 + $0x98] sm:$0xff] }
 0x174   :  { %2042 = vmatpush1.bf16.msra.mxu0 %v5223_v14  ;;  %v5288_v14 = vcombine.high %v347_v3, %v351_v4  ;;  %v296_v0 = vld [vmem:[#allocation2 + $0xb8] sm:$0xff] }
 0x175   :  { %2043 = vmatprep.subr.bf16.mxu0 %v5216_v20  ;;  %v5287_v20 = vcombine.low %v347_v3, %v351_v4  ;;  %v5241_v4 = vcombine.low %v300_v51, %v304_v52 }
 0x176   :  { %2083 = vmatpush1.bf16.msra.mxu1 %v5351_v18  ;;  %v5416_v18 = vcombine.high %v475_v7, %v479_v8 }
 0x177   :  { %2084 = vmatprep.subr.bf16.mxu1 %v5344_v23  ;;  %v5415_v23 = vcombine.low %v475_v7, %v479_v8  ;;  %v284_v8 = vld [vmem:[#allocation2 + $0x58] sm:$0xff] }
 0x178   :  { %2044 = vmatpush1.bf16.msra.mxu0 %v5215_v24  ;;  %v5280_v24 = vcombine.high %v339_v11, %v343_v12 }
 0x179   :  { %2045 = vmatprep.subr.bf16.mxu0 %v5336_v53  ;;  %v5279_v53 = vcombine.low %v339_v11, %v343_v12  ;;  %v416_v11 = vld [vmem:[#allocation2 + $0x478] sm:$0xff]  ;;  %v5233_v12 = vcombine.low %v292_v63, %v296_v0 }
 0x17a   :  { %2085 = vmatpush1.bf16.msra.mxu1 %v5343_v27  ;;  %v5408_v27 = vcombine.high %v467_v15, %v471_v17 }
 0x17b   :  { %2086 = vmatprep.subr.bf16.mxu1 %v5464_v29  ;;  %v5407_v29 = vcombine.low %v467_v15, %v471_v17  ;;  %v276_v17 = vld [vmem:[#allocation2 + $0x18] sm:$0xff] }
 0x17c   :  { %2046 = vmatpush2.bf16.msra.mxu0 %v5335_v30  ;;  %v5274_v30 = vcombine.high %v332_v21, %v336_v22 }
 0x17d   :  { %2047 = vmatprep.subr.bf16.mxu0 %v5328_v34  ;;  %v5273_v34 = vcombine.low %v332_v21, %v336_v22  ;;  %v408_v21 = vld [vmem:[#allocation2 + $0x438] sm:$0xff] }
 0x17e   :  { %2087 = vmatpush2.bf16.msra.mxu1 %v5463_v33  ;;  %v5402_v33 = vcombine.high %v460_v25, %v464_v26 }
 0x17f   :  { %2088 = vmatprep.subr.bf16.mxu1 %v5456_v37  ;;  %v5401_v37 = vcombine.low %v460_v25, %v464_v26  ;;  %v396_v26 = vld [vmem:[#allocation2 + $0x3d8] sm:$0xff] }
 0x180   :  { %2048 = vmatpush2.bf16.msra.mxu0 %v5327_v38  ;;  %v5266_v38 = vcombine.high %v324_v54, %v328_v28 }
 0x181   :  { %2049 = vmatprep.subr.bf16.mxu0 %v5320_v42  ;;  %v5265_v42 = vcombine.low %v324_v54, %v328_v28  ;;  %v528_v54 = vld [vmem:[#allocation2 + $0x7f8] sm:$0xff] }
 0x182   :  { %2089 = vmatpush2.bf16.msra.mxu1 %v5455_v41  ;;  %v448_v41 = vld [vmem:[#allocation2 + $0x578] sm:$0xff] }
 0x183   :  { %2090 = vmatprep.subr.bf16.mxu1 %v5448_v45  ;;  %v5393_v45 = vcombine.low %v452_v31, %v456_v32  ;;  %v388_v32 = vld [vmem:[#allocation2 + $0x398] sm:$0xff] }
 0x184   :  { %2050 = vmatpush2.bf16.msra.mxu0 %v5319_v46  ;;  %v5258_v46 = vcombine.high %v316_v35, %v320_v36 }
 0x185   :  { %2051 = vmatprep.subr.bf16.mxu0 %v5312_v50  ;;  %v5257_v50 = vcombine.low %v316_v35, %v320_v36  ;;  %v520_v35 = vld [vmem:[#allocation2 + $0x7b8] sm:$0xff] }
 0x186   :  { %2091 = vmatpush2.bf16.msra.mxu1 %v5447_v49  ;;  %v5386_v49 = vcombine.high %v444_v39, %v448_v41 }
 0x187   :  { %2092 = vmatprep.subr.bf16.mxu1 %v5440_v55  ;;  %v5385_v55 = vcombine.low %v444_v39, %v448_v41  ;;  %v384_v41 = vld [vmem:[#allocation2 + $0x378] sm:$0xff] }
 0x188   :  { %2052 = vmatpush2.bf16.msra.mxu0 %v5311_v56  ;;  %v5250_v56 = vcombine.high %v308_v43, %v312_v44 }
 0x189   :  { %2053 = vmatprep.subr.bf16.mxu0 %v5304_v62  ;;  %v5249_v62 = vcombine.low %v308_v43, %v312_v44  ;;  %v512_v43 = vld [vmem:[#allocation2 + $0x778] sm:$0xff] }
 0x18a   :  { %2093 = vmatpush2.bf16.msra.mxu1 %v5439_v61  ;;  %v432_v61 = vld [vmem:[#allocation2 + $0x4f8] sm:$0xff] }
 0x18b   :  { %2094 = vmatprep.subr.bf16.mxu1 %v5432_v1  ;;  %v420_v1 = vld [vmem:[#allocation2 + $0x498] sm:$0xff]  ;;  %v5370_v3 = vcombine.high %v428_v57, %v432_v61 }
 0x18c   :  { %2054 = vmatpush2.bf16.msra.mxu0 %v5303_v2  ;;  %v424_v2 = vld [vmem:[#allocation2 + $0x4b8] sm:$0xff] }
 0x18d   :  { %2055 = vmatprep.subr.bf16.mxu0 %v5296_v6  ;;  %v5234_v6 = vcombine.high %v292_v63, %v296_v0  ;;  %v5362_v7 = vcombine.high %v420_v1, %v424_v2  ;;  %v496_v63 = vld [vmem:[#allocation2 + $0x6f8] sm:$0xff] }
 0x18e   :  { %2095 = vmatpush2.bf16.msra.mxu1 %v5431_v5  ;;  %v5369_v5 = vcombine.low %v428_v57, %v432_v61  ;;  %v368_v61 = vld [vmem:[#allocation2 + $0x2f8] sm:$0xff] }
 0x18f   :  { %2096 = vmatprep.subr.bf16.mxu1 %v5424_v9  ;;  %v288_v9 = vld [vmem:[#allocation2 + $0x78] sm:$0xff] }
 0x190   :  { %2056 = vmatpush2.bf16.msra.mxu0 %v5295_v10  ;;  %v412_v10 = vld [vmem:[#allocation2 + $0x458] sm:$0xff]  ;;  %v5225_v22 = vcombine.low %v284_v8, %v288_v9 }
 0x191   :  { %2057 = vmatprep.subr.bf16.mxu0 %v5288_v14  ;;  %v5226_v14 = vcombine.high %v284_v8, %v288_v9  ;;  %v5354_v15 = vcombine.high %v412_v10, %v416_v11 }
 0x192   :  { %2097 = vmatpush2.bf16.msra.mxu1 %v5423_v13  ;;  %v5361_v13 = vcombine.low %v420_v1, %v424_v2  ;;  %v356_v2 = vld [vmem:[#allocation2 + $0x298] sm:$0xff] }
 0x193   :  { %2098 = vmatprep.subr.bf16.mxu1 %v5416_v18  ;;  %v280_v18 = vld [vmem:[#allocation2 + $0x38] sm:$0xff] }
 0x194   :  { %2058 = vmatpush2.bf16.msra.mxu0 %v5287_v20  ;;  %v404_v20 = vld [vmem:[#allocation2 + $0x418] sm:$0xff]  ;;  %v5217_v28 = vcombine.low %v276_v17, %v280_v18 }
 0x195   :  { %2059 = vmatprep.subr.bf16.mxu0 %v5280_v24  ;;  %v5218_v24 = vcombine.high %v276_v17, %v280_v18  ;;  %v5346_v25 = vcombine.high %v404_v20, %v408_v21 }
 0x196   :  { %2099 = vmatpush2.bf16.msra.mxu1 %v5415_v23  ;;  %v5353_v23 = vcombine.low %v412_v10, %v416_v11  ;;  %v348_v10 = vld [vmem:[#allocation2 + $0x258] sm:$0xff] }
 0x197   :  { %2100 = vmatprep.subr.bf16.mxu1 %v5408_v27  ;;  %v400_v27 = vld [vmem:[#allocation2 + $0x3f8] sm:$0xff] }
 0x198   :  { %2060 = vmatpush2.bf16.msra.mxu0 %v5279_v53  ;;  %v524_v53 = vld [vmem:[#allocation2 + $0x7d8] sm:$0xff]  ;;  %v5337_v36 = vcombine.low %v396_v26, %v400_v27 }
 0x199   :  { %2111 = vmatprep.subr.bf16.mxu0 %v5274_v30  ;;  %v5338_v30 = vcombine.high %v396_v26, %v400_v27  ;;  %v5466_v31 = vcombine.high %v524_v53, %v528_v54  ;;  %v352_v11 = vld [vmem:[#allocation2 + $0x278] sm:$0xff] }
 0x19a   :  { %2101 = vmatpush2.bf16.msra.mxu1 %v5407_v29  ;;  %v5345_v29 = vcombine.low %v404_v20, %v408_v21  ;;  %v5290_v18 = vcombine.high %v348_v10, %v352_v11  ;;  %v340_v21 = vld [vmem:[#allocation2 + $0x218] sm:$0xff] }
 0x19b   :  { %2152 = vmatprep.subr.bf16.mxu1 %v5402_v33  ;;  %2062 = vmatmul.mubr.bf16.vlgmr.msra.gmra.mxu0 %v7000_v16  ;;  %v392_v33 = vld [vmem:[#allocation2 + $0x3b8] sm:$0xff] }
 0x19c   :  { %2112 = vmatpush1.bf16.msra.mxu0 %v5273_v34  ;;  %2143 = vmatprep.mubr.bf16.mxu0 %v6990_v58  ;;  %v5377_v58 = vcombine.low %v436_v47, %v440_v48  ;;  %v516_v34 = vld [vmem:[#allocation2 + $0x798] sm:$0xff]  ;;  %v5329_v44 = vcombine.low %v388_v32, %v392_v33 }
 0x19d   :  { %2103 = vmatmul.mubr.bf16.vlgmr.msra.gmra.mxu1 %v7004_v19  ;;  %2113 = vmatprep.subr.bf16.mxu0 %v5266_v38  ;;  %v5330_v38 = vcombine.high %v388_v32, %v392_v33  ;;  %v5458_v39 = vcombine.high %v516_v34, %v520_v35  ;;  %v372_v48 = vld [vmem:[#allocation2 + $0x318] sm:$0xff] }
 0x19e   :  { %2153 = vmatpush1.bf16.msra.mxu1 %v5401_v37  ;;  %2184 = vmatprep.mubr.bf16.mxu1 %v6994_v59  ;;  %v5242_v59 = vcombine.high %v300_v51, %v304_v52  ;;  %v5465_v37 = vcombine.low %v524_v53, %v528_v54  ;;  %v504_v51 = vld [vmem:[#allocation2 + $0x738] sm:$0xff] }
 0x19f   :  { %2154 = vmatprep.subr.bf16.mxu1 %v5394_v40  ;;  %v380_v40 = vld [vmem:[#allocation2 + $0x358] sm:$0xff] }
 0x1a0   :  { %2114 = vmatpush1.bf16.msra.mxu0 %v5265_v42  ;;  %v508_v42 = vld [vmem:[#allocation2 + $0x758] sm:$0xff]  ;;  %v5321_v52 = vcombine.low %v380_v40, %v384_v41 }
 0x1a1   :  { %2115 = vmatprep.subr.bf16.mxu0 %v5258_v46  ;;  %v5322_v46 = vcombine.high %v380_v40, %v384_v41  ;;  %v5450_v47 = vcombine.high %v508_v42, %v512_v43 }
 0x1a2   :  { %2155 = vmatpush1.bf16.msra.mxu1 %v5393_v45  ;;  %v5457_v45 = vcombine.low %v516_v34, %v520_v35 }
 0x1a3   :  { %2156 = vmatprep.subr.bf16.mxu1 %v5386_v49  ;;  %v376_v49 = vld [vmem:[#allocation2 + $0x338] sm:$0xff] }
 0x1a4   :  { %2116 = vmatpush1.bf16.msra.mxu0 %v5257_v50  ;;  %v500_v50 = vld [vmem:[#allocation2 + $0x718] sm:$0xff]  ;;  %v5313_v0 = vcombine.low %v372_v48, %v376_v49 }
 0x1a5   :  { %2117 = vmatprep.subr.bf16.mxu0 %v5250_v56  ;;  %v5314_v56 = vcombine.high %v372_v48, %v376_v49  ;;  %v5442_v57 = vcombine.high %v500_v50, %v504_v51 }
 0x1a6   :  { %2157 = vmatpush1.bf16.msra.mxu1 %v5385_v55  ;;  %v5449_v55 = vcombine.low %v508_v42, %v512_v43 }
 0x1a7   :  { %2158 = vmatprep.subr.bf16.mxu1 %v5378_v60  ;;  %v364_v60 = vld [vmem:[#allocation2 + $0x2d8] sm:$0xff] }
 0x1a8   :  { %2118 = vmatpush1.bf16.msra.mxu0 %v5249_v62  ;;  %v492_v62 = vld [vmem:[#allocation2 + $0x6d8] sm:$0xff] }
 0x1a9   :  { %2119 = vmatprep.subr.bf16.mxu0 %v5242_v59  ;;  %v5306_v59 = vcombine.high %v364_v60, %v368_v61  ;;  %v5434_v1 = vcombine.high %v492_v62, %v496_v63 }
 0x1aa   :  { %2159 = vmatpush1.bf16.msra.mxu1 %v5377_v58  ;;  %v5441_v58 = vcombine.low %v500_v50, %v504_v51 }
 0x1ab   :  { %2160 = vmatprep.subr.bf16.mxu1 %v5370_v3  ;;  %v360_v3 = vld [vmem:[#allocation2 + $0x2b8] sm:$0xff] }
 0x1ac   :  { %2120 = vmatpush1.bf16.msra.mxu0 %v5241_v4  ;;  %v484_v4 = vld [vmem:[#allocation2 + $0x698] sm:$0xff]  ;;  %v5298_v8 = vcombine.high %v356_v2, %v360_v3 }
 0x1ad   :  { %2121 = vmatprep.subr.bf16.mxu0 %v5234_v6  ;;  %v5305_v6 = vcombine.low %v364_v60, %v368_v61 }
 0x1ae   :  { %2161 = vmatpush1.bf16.msra.mxu1 %v5369_v5  ;;  %v488_v5 = vld [vmem:[#allocation2 + $0x6b8] sm:$0xff] }
 0x1af   :  { %2162 = vmatprep.subr.bf16.mxu1 %v5362_v7  ;;  %v5433_v7 = vcombine.low %v492_v62, %v496_v63  ;;  %v5426_v9 = vcombine.high %v484_v4, %v488_v5  ;;  %v5425_v17 = vcombine.low %v484_v4, %v488_v5 }
 0x1b0   :  { %2122 = vmatpush1.bf16.msra.mxu0 %v5233_v12  ;;  %v476_v12 = vld [vmem:[#allocation2 + $0x658] sm:$0xff] }
 0x1b1   :  { %2123 = vmatprep.subr.bf16.mxu0 %v5226_v14  ;;  %v5297_v14 = vcombine.low %v356_v2, %v360_v3 }
 0x1b2   :  { %2163 = vmatpush1.bf16.msra.mxu1 %v5361_v13  ;;  %v480_v13 = vld [vmem:[#allocation2 + $0x678] sm:$0xff] }
 0x1b3   :  { %2164 = vmatprep.subr.bf16.mxu1 %v5354_v15  ;;  %v531_v15 = vlaneseq  ;;  %v5418_v20 = vcombine.high %v476_v12, %v480_v13  ;;  %v5417_v27 = vcombine.low %v476_v12, %v480_v13 }
 0x1b4   :  { %2124 = vmatpush1.bf16.msra.mxu0 %v5225_v22  ;;  %v344_v22 = vld [vmem:[#allocation2 + $0x238] sm:$0xff] }
 0x1b5   :  { %2125 = vmatprep.subr.bf16.mxu0 %v5218_v24  ;;  %v472_v24 = vld [vmem:[#allocation2 + $0x638] sm:$0xff]  ;;  %v7018_v26 = vshrl.u32 %v531_v15, 7  ;;  %v5282_v53 = vcombine.high %v340_v21, %v344_v22 }
 0x1b6   :  { %2165 = vmatpush1.bf16.msra.mxu1 %v5353_v23  ;;  %v468_v23 = vld [vmem:[#allocation2 + $0x618] sm:$0xff] }
 0x1b7   :  { %2166 = vmatprep.subr.bf16.mxu1 %v5346_v25  ;;  %v5289_v25 = vcombine.low %v348_v10, %v352_v11  ;;  %v5410_v54 = vcombine.high %v468_v23, %v472_v24  ;;  %v7026_v32 = vsub.s32 1, %v7018_v26 }
 0x1b8   :  { %2126 = vmatpush1.bf16.msra.mxu0 %v5217_v28  ;;  %v5281_v28 = vcombine.low %v340_v21, %v344_v22 }
 0x1b9   :  { %2127 = vmatprep.subr.bf16.mxu0 %v5338_v30  ;;  %v5409_v30 = vcombine.low %v468_v23, %v472_v24 }
 0x1ba   :  { %2167 = vmatpush1.bf16.msra.mxu1 %v5345_v29  ;;  %v7021_v29 = vsub.s32 0, %v7018_v26 }
 0x1bb   :  { %2168 = vmatprep.subr.bf16.mxu1 %v5466_v31  ;;  %v7023_v31 = vld [vmem:[#allocation5] sm:$0xff] }
 0x1bc   :  { %2128 = vmatpush2.bf16.msra.mxu0 %v5337_v36  ;;  %v534_v33 = vrot.slane %v7023_v31, %v7021_v29  ;;  %v538_v34 = vrot.slane %v7023_v31, %v7026_v32 }
 0x1bd   :  { %2129 = vmatprep.subr.bf16.mxu0 %v5330_v38 }
 0x1be   :  { %2169 = vmatpush2.bf16.msra.mxu1 %v5465_v37 }
 0x1bf   :  { %2170 = vmatprep.subr.bf16.mxu1 %v5458_v39 }
 0x1c0   :  { %2130 = vmatpush2.bf16.msra.mxu0 %v5329_v44 }
 0x1c1   :  { %2131 = vmatprep.subr.bf16.mxu0 %v5322_v46 }
 0x1c2   :  { %2171 = vmatpush2.bf16.msra.mxu1 %v5457_v45 }
 0x1c3   :  { %2172 = vmatprep.subr.bf16.mxu1 %v5450_v47  ;;  %v7039_v47 = vsub.s32 2, %v7018_v26 }
 0x1c4   :  { %2132 = vmatpush2.bf16.msra.mxu0 %v5321_v52 }
 0x1c5   :  { %2133 = vmatprep.subr.bf16.mxu0 %v5314_v56 }
 0x1c6   :  { %2173 = vmatpush2.bf16.msra.mxu1 %v5449_v55 }
 0x1c7   :  { %2174 = vmatprep.subr.bf16.mxu1 %v5442_v57 }
 0x1c8   :  { %2134 = vmatpush2.bf16.msra.mxu0 %v5313_v0 }
 0x1c9   :  { %2135 = vmatprep.subr.bf16.mxu0 %v5306_v59 }
 0x1ca   :  { %2175 = vmatpush2.bf16.msra.mxu1 %v5441_v58 }
 0x1cb   :  { %2176 = vmatprep.subr.bf16.mxu1 %v5434_v1 }
 0x1cc   :  { %2136 = vmatpush2.bf16.msra.mxu0 %v5305_v6 }
 0x1cd   :  { %2137 = vmatprep.subr.bf16.mxu0 %v5298_v8 }
 0x1ce   :  { %2177 = vmatpush2.bf16.msra.mxu1 %v5433_v7  ;;  %v7053_v7 = vsub.s32 4, %v7018_v26 }
 0x1cf   :  { %2178 = vmatprep.subr.bf16.mxu1 %v5426_v9  ;;  %v7058_v9 = vsub.s32 5, %v7018_v26 }
 0x1d0   :  { %2138 = vmatpush2.bf16.msra.mxu0 %v5297_v14  ;;  %v550_v8 = vrot.slane %v7023_v31, %v7053_v7  ;;  %v7066_v14 = vsub.s32 6, %v7018_v26 }
 0x1d1   :  { %2139 = vmatprep.subr.bf16.mxu0 %v5290_v18  ;;  %v554_v12 = vrot.slane %v7023_v31, %v7058_v9  ;;  %v7071_v18 = vsub.s32 7, %v7018_v26 }
 0x1d2   :  { %2179 = vmatpush2.bf16.msra.mxu1 %v5425_v17  ;;  %v558_v21 = vrot.slane %v7023_v31, %v7066_v14 }
 0x1d3   :  { %2180 = vmatprep.subr.bf16.mxu1 %v5418_v20  ;;  %v562_v24 = vrot.slane %v7023_v31, %v7071_v18 }
 0x1d4   :  { %2140 = vmatpush2.bf16.msra.mxu0 %v5289_v25 }
 0x1d5   :  { %2141 = vmatprep.subr.bf16.mxu0 %v5282_v53 }
 0x1d6   :  { %2181 = vmatpush2.bf16.msra.mxu1 %v5417_v27 }
 0x1d7   :  { %2182 = vmatprep.subr.bf16.mxu1 %v5410_v54 }
 0x1d8   :  { %2142 = vmatpush2.bf16.msra.mxu0 %v5281_v28 }
 0x1da   :  { %2183 = vmatpush2.bf16.msra.mxu1 %v5409_v30 }
 0x1db   :  { %v1899_v35 = vpop.f32.mrf.mxu0  ;;  %2144 = vmatmul.mubr.bf16.vlgmr.msra.gmra.mxu0 %v7000_v16  ;;  %v7042_v16 = vsub.s32 3, %v7018_v26 }
 0x1dc   :  { %v1900_v36 = vadd.f32 %v1899_v35, %v534_v33 }
 0x1dd   :  { %v1940_v37 = vpop.f32.mrf.mxu1  ;;  %2185 = vmatmul.mubr.bf16.vlgmr.msra.gmra.mxu1 %v7004_v19  ;;  %v1901_v38 = vpop.f32.mrf.mxu0  ;;  %v542_v19 = vrot.slane %v7023_v31, %v7039_v47  ;;  %v546_v48 = vrot.slane %v7023_v31, %v7042_v16 }
 0x1de   :  { %v7034_v39 = vadd.f32 %v1940_v37, %v1900_v36  ;;  %v1902_v40 = vadd.f32 %v1901_v38, %v538_v34 }
 0x1df   :  { %v1942_v41 = vpop.f32.mrf.mxu1  ;;  %v1903_v42 = vpop.f32.mrf.mxu0 }
 0x1e0   :  { %v7036_v43 = vadd.f32 %v1942_v41, %v1902_v40  ;;  %v5898_v41 = vld [vmem:[#allocation10 + $0xe0] ss:$16 sps:$4 sm:$0xff]   ;;  %v5900_v42 = vld [vmem:[#allocation10 + $0xe4] ss:$16 sps:$4 sm:$0xff]  }
 0x1e1   :  { %v1944_v44 = vpop.f32.mrf.mxu1  ;;  %v1904_v45 = vpop.f32.mrf.mxu0  ;;  %3913 = vmatprep.subr.bf16.mxu0 %v5900_v42 }
 0x1e2   :  { %v2193_v10 = vadd.f32 %v7036_v43, %v7034_v39  ;;  %v5901_v44 = vld [vmem:[#allocation10 + $0x2e0] ss:$16 sps:$4 sm:$0xff]   ;;  %v5903_v45 = vld [vmem:[#allocation10 + $0x2e4] ss:$16 sps:$4 sm:$0xff]   ;;  %3914 = vmatpush1.bf16.msra.mxu0 %v5898_v41 }
 0x1e3   :  { %v1945_v46 = vpop.f32.mrf.mxu1  ;;  %3954 = vmatprep.subr.bf16.mxu1 %v5903_v45 }
 0x1e4   :  { %v5906_v46 = vld [vmem:[#allocation10 + $0xc4] ss:$16 sps:$4 sm:$0xff]   ;;  %3955 = vmatpush1.bf16.msra.mxu1 %v5901_v44 }
 0x1e5   :  { %3915 = vmatprep.subr.bf16.mxu0 %v5906_v46 }
 0x21b   :  { %v1981_v49 = vpop.f32.mrf.mxu0 }
 0x21c   :  { %v1982_v50 = vadd.f32 %v1981_v49, %v542_v19  ;;  %v5909_v19 = vld [vmem:[#allocation10 + $0x2c4] ss:$16 sps:$4 sm:$0xff]   ;;  %v5907_v49 = vld [vmem:[#allocation10 + $0x2c0] ss:$16 sps:$4 sm:$0xff]  }
 0x21d   :  { %v2022_v51 = vpop.f32.mrf.mxu1  ;;  %v1983_v52 = vpop.f32.mrf.mxu0  ;;  %3956 = vmatprep.subr.bf16.mxu1 %v5909_v19 }
 0x21e   :  { %v7048_v55 = vadd.f32 %v2022_v51, %v1982_v50  ;;  %v1984_v56 = vadd.f32 %v1983_v52, %v546_v48  ;;  %v5904_v48 = vld [vmem:[#allocation10 + $0xc0] ss:$16 sps:$4 sm:$0xff]   ;;  %v5912_v50 = vld [vmem:[#allocation10 + $0xa4] ss:$16 sps:$4 sm:$0xff]   ;;  %3957 = vmatpush1.bf16.msra.mxu1 %v5907_v49 }
 0x21f   :  { %v2024_v57 = vpop.f32.mrf.mxu1  ;;  %v1985_v60 = vpop.f32.mrf.mxu0  ;;  %v5915_v51 = vld [vmem:[#allocation10 + $0x2a4] ss:$16 sps:$4 sm:$0xff]   ;;  %3916 = vmatpush1.bf16.msra.mxu0 %v5904_v48  ;;  %v5910_v52 = vld [vmem:[#allocation10 + $0xa0] ss:$16 sps:$4 sm:$0xff]  }
 0x220   :  { %v7050_v61 = vadd.f32 %v2024_v57, %v1984_v56  ;;  %v2194_v13 = vadd.f32 %v2193_v10, %v7048_v55  ;;  %3917 = vmatprep.subr.bf16.mxu0 %v5912_v50  ;;  %v5913_v56 = vld [vmem:[#allocation10 + $0x2a0] ss:$16 sps:$4 sm:$0xff]   ;;  %v5918_v57 = vld [vmem:[#allocation10 + $0x84] ss:$16 sps:$4 sm:$0xff]   ;;  %3958 = vmatprep.subr.bf16.mxu1 %v5915_v51 }
 0x221   :  { %v2026_v62 = vpop.f32.mrf.mxu1  ;;  %v1986_v63 = vpop.f32.mrf.mxu0  ;;  %v5921_v60 = vld [vmem:[#allocation10 + $0x284] ss:$16 sps:$4 sm:$0xff]   ;;  %v5934_v10 = vld [vmem:[#allocation10 + $0x20] ss:$16 sps:$4 sm:$0xff]  }
 0x222   :  { %v2195_v20 = vadd.f32 %v2194_v13, %v7050_v61  ;;  %v5916_v62 = vld [vmem:[#allocation10 + $0x80] ss:$16 sps:$4 sm:$0xff]   ;;  %3959 = vmatpush1.bf16.msra.mxu1 %v5913_v56  ;;  %v5945_v13 = vld [vmem:[#allocation10 + $0x204] ss:$16 sps:$4 sm:$0xff]  }
 0x223   :  { %v2027_v0 = vpop.f32.mrf.mxu1  ;;  %3918 = vmatpush1.bf16.msra.mxu0 %v5910_v52  ;;  %v5919_v63 = vld [vmem:[#allocation10 + $0x280] ss:$16 sps:$4 sm:$0xff]   ;;  %3960 = vmatprep.subr.bf16.mxu1 %v5921_v60  ;;  %v5954_v48 = vld [vmem:[#allocation10 + $0x1c4] ss:$16 sps:$4 sm:$0xff]  }
 0x224   :  { %3919 = vmatprep.subr.bf16.mxu0 %v5918_v57  ;;  %v5924_v0 = vld [vmem:[#allocation10 + $0x64] ss:$16 sps:$4 sm:$0xff]   ;;  %v5952_v50 = vld [vmem:[#allocation10 + $0x1c0] ss:$16 sps:$4 sm:$0xff]  }
 0x225   :  { %v5957_v49 = vld [vmem:[#allocation10 + $0x3c4] ss:$16 sps:$4 sm:$0xff]   ;;  %v5955_v51 = vld [vmem:[#allocation10 + $0x3c0] ss:$16 sps:$4 sm:$0xff]  }
 0x226   :  { %3961 = vmatpush1.bf16.msra.mxu1 %v5919_v63  ;;  %v5963_v52 = vld [vmem:[#allocation10 + $0x3a4] ss:$16 sps:$4 sm:$0xff]   ;;  %v5958_v56 = vld [vmem:[#allocation10 + $0x1a0] ss:$16 sps:$4 sm:$0xff]  }
 0x227   :  { %3920 = vmatpush1.bf16.msra.mxu0 %v5916_v62  ;;  %v5961_v57 = vld [vmem:[#allocation10 + $0x3a0] ss:$16 sps:$4 sm:$0xff]   ;;  %v5966_v60 = vld [vmem:[#allocation10 + $0x184] ss:$16 sps:$4 sm:$0xff]  }
 0x228   :  { %3921 = vmatprep.subr.bf16.mxu0 %v5924_v0  ;;  %v5969_v62 = vld [vmem:[#allocation10 + $0x384] ss:$16 sps:$4 sm:$0xff]   ;;  %v5964_v63 = vld [vmem:[#allocation10 + $0x180] ss:$16 sps:$4 sm:$0xff]  }
 0x229   :  { %v5967_v0 = vld [vmem:[#allocation10 + $0x380] ss:$16 sps:$4 sm:$0xff]  }
 0x25b   :  { %v2063_v58 = vpop.f32.mrf.mxu0 }
 0x25c   :  { %v2064_v11 = vadd.f32 %v2063_v58, %v550_v8  ;;  %v5927_v58 = vld [vmem:[#allocation10 + $0x264] ss:$16 sps:$4 sm:$0xff]  }
 0x25d   :  { %v2104_v59 = vpop.f32.mrf.mxu1  ;;  %v2065_v1 = vpop.f32.mrf.mxu0  ;;  %3962 = vmatprep.subr.bf16.mxu1 %v5927_v58  ;;  %v5939_v8 = vld [vmem:[#allocation10 + $0x224] ss:$16 sps:$4 sm:$0xff]  }
 0x25e   :  { %v7068_v15 = vadd.f32 %v2104_v59, %v2064_v11  ;;  %v2066_v17 = vadd.f32 %v2065_v1, %v554_v12  ;;  %v5922_v59 = vld [vmem:[#allocation10 + $0x60] ss:$16 sps:$4 sm:$0xff]   ;;  %v5942_v12 = vld [vmem:[#allocation10 + $0x4] ss:$16 sps:$4 sm:$0xff]  }
 0x25f   :  { %v2106_v2 = vpop.f32.mrf.mxu1  ;;  %v2067_v3 = vpop.f32.mrf.mxu0  ;;  %v5925_v1 = vld [vmem:[#allocation10 + $0x260] ss:$16 sps:$4 sm:$0xff]   ;;  %3922 = vmatpush1.bf16.msra.mxu0 %v5922_v59  ;;  %v5972_v58 = vld [vmem:[#allocation10 + $0x164] ss:$16 sps:$4 sm:$0xff]  }
 0x260   :  { %v2196_v22 = vadd.f32 %v2195_v20, %v7068_v15  ;;  %v7077_v23 = vadd.f32 %v2106_v2, %v2066_v17  ;;  %v5930_v2 = vld [vmem:[#allocation10 + $0x44] ss:$16 sps:$4 sm:$0xff]   ;;  %3963 = vmatpush1.bf16.msra.mxu1 %v5925_v1  ;;  %v5937_v11 = vld [vmem:[#allocation10 + $0x220] ss:$16 sps:$4 sm:$0xff]  }
 0x261   :  { %v2108_v4 = vpop.f32.mrf.mxu1  ;;  %v2068_v5 = vpop.f32.mrf.mxu0  ;;  %v5933_v3 = vld [vmem:[#allocation10 + $0x244] ss:$16 sps:$4 sm:$0xff]   ;;  %3923 = vmatprep.subr.bf16.mxu0 %v5930_v2  ;;  %v5940_v17 = vld [vmem:[#allocation10] ss:$16 sps:$4 sm:$0xff]  }
 0x262   :  { %v2197_v28 = vadd.f32 %v2196_v22, %v7077_v23  ;;  %v5928_v4 = vld [vmem:[#allocation10 + $0x40] ss:$16 sps:$4 sm:$0xff]   ;;  %3964 = vmatprep.subr.bf16.mxu1 %v5933_v3  ;;  %v5951_v22 = vld [vmem:[#allocation10 + $0x3e4] ss:$16 sps:$4 sm:$0xff]  }
 0x263   :  { %v2109_v6 = vpop.f32.mrf.mxu1  ;;  %v5931_v5 = vld [vmem:[#allocation10 + $0x240] ss:$16 sps:$4 sm:$0xff]   ;;  %3924 = vmatpush1.bf16.msra.mxu0 %v5928_v4  ;;  %v5975_v59 = vld [vmem:[#allocation10 + $0x364] ss:$16 sps:$4 sm:$0xff]  }
 0x264   :  { %v5936_v6 = vld [vmem:[#allocation10 + $0x24] ss:$16 sps:$4 sm:$0xff]   ;;  %3965 = vmatpush1.bf16.msra.mxu1 %v5931_v5  ;;  %v5943_v20 = vld [vmem:[#allocation10 + $0x200] ss:$16 sps:$4 sm:$0xff]  }
 0x265   :  { %3925 = vmatprep.subr.bf16.mxu0 %v5936_v6  ;;  %3966 = vmatprep.subr.bf16.mxu1 %v5939_v8  ;;  %v5970_v1 = vld [vmem:[#allocation10 + $0x160] ss:$16 sps:$4 sm:$0xff]   ;;  %v5978_v3 = vld [vmem:[#allocation10 + $0x144] ss:$16 sps:$4 sm:$0xff]  }
 0x266   :  { %v5973_v2 = vld [vmem:[#allocation10 + $0x360] ss:$16 sps:$4 sm:$0xff]   ;;  %v5981_v4 = vld [vmem:[#allocation10 + $0x344] ss:$16 sps:$4 sm:$0xff]  }
 0x267   :  { %3926 = vmatpush1.bf16.msra.mxu0 %v5934_v10  ;;  %v5976_v5 = vld [vmem:[#allocation10 + $0x140] ss:$16 sps:$4 sm:$0xff]   ;;  %v5984_v8 = vld [vmem:[#allocation10 + $0x124] ss:$16 sps:$4 sm:$0xff]  }
 0x268   :  { %3967 = vmatpush1.bf16.msra.mxu1 %v5937_v11  ;;  %3927 = vmatprep.subr.bf16.mxu0 %v5942_v12  ;;  %v5979_v6 = vld [vmem:[#allocation10 + $0x340] ss:$16 sps:$4 sm:$0xff]   ;;  %v5987_v10 = vld [vmem:[#allocation10 + $0x324] ss:$16 sps:$4 sm:$0xff]  }
 0x269   :  { %3968 = vmatprep.subr.bf16.mxu1 %v5945_v13  ;;  %v5982_v11 = vld [vmem:[#allocation10 + $0x120] ss:$16 sps:$4 sm:$0xff]   ;;  %v5990_v13 = vld [vmem:[#allocation10 + $0x104] ss:$16 sps:$4 sm:$0xff]  }
 0x26a   :  { %v5985_v12 = vld [vmem:[#allocation10 + $0x320] ss:$16 sps:$4 sm:$0xff]  }
 0x26b   :  { %3928 = vmatpush1.bf16.msra.mxu0 %v5940_v17  ;;  %v5993_v17 = vld [vmem:[#allocation10 + $0x304] ss:$16 sps:$4 sm:$0xff]  }
 0x26c   :  { %3969 = vmatpush1.bf16.msra.mxu1 %v5943_v20  ;;  %v5988_v20 = vld [vmem:[#allocation10 + $0x100] ss:$16 sps:$4 sm:$0xff]  }
 0x26d   :  { %3970 = vmatprep.subr.bf16.mxu1 %v5951_v22  ;;  %v5996_v22 = vld [vmem:[#allocation10 + $0x4e4] ss:$16 sps:$4 sm:$0xff]  }
 0x29b   :  { %v2145_v25 = vpop.f32.mrf.mxu0 }
 0x29c   :  { %v2146_v27 = vadd.f32 %v2145_v25, %v558_v21  ;;  %v5948_v21 = vld [vmem:[#allocation10 + $0x1e4] ss:$16 sps:$4 sm:$0xff]   ;;  %v5949_v25 = vld [vmem:[#allocation10 + $0x3e0] ss:$16 sps:$4 sm:$0xff]  }
 0x29d   :  { %v2186_v53 = vpop.f32.mrf.mxu1  ;;  %v2147_v54 = vpop.f32.mrf.mxu0  ;;  %3929 = vmatprep.subr.bf16.mxu0 %v5948_v21  ;;  %3971 = vmatpush2.bf16.msra.mxu1 %v5949_v25  ;;  %v5991_v21 = vld [vmem:[#allocation10 + $0x300] ss:$16 sps:$4 sm:$0xff]  }
 0x29e   :  { %v7082_v26 = vadd.f32 %v2186_v53, %v2146_v27  ;;  %v2148_v30 = vadd.f32 %v2147_v54, %v562_v24  ;;  %v5946_v24 = vld [vmem:[#allocation10 + $0x1e0] ss:$16 sps:$4 sm:$0xff]   ;;  %3972 = vmatprep.subr.bf16.mxu1 %v5957_v49 }
 0x29f   :  { %v2188_v33 = vpop.f32.mrf.mxu1  ;;  %v2149_v34 = vpop.f32.mrf.mxu0  ;;  %3930 = vmatpush2.bf16.msra.mxu0 %v5946_v24  ;;  %v5999_v24 = vld [vmem:[#allocation10 + $0x6e4] ss:$16 sps:$4 sm:$0xff]  }
 0x2a0   :  { %v7084_v35 = vadd.f32 %v2188_v33, %v2148_v30  ;;  %v2198_v37 = vadd.f32 %v2197_v28, %v7082_v26  ;;  %3931 = vmatprep.subr.bf16.mxu0 %v5954_v48 }
 0x2a1   :  { %v2190_v36 = vpop.f32.mrf.mxu1  ;;  %v2150_v38 = vpop.f32.mrf.mxu0  ;;  %3973 = vmatpush2.bf16.msra.mxu1 %v5955_v51 }
 0x2a2   :  { %v2199_v31 = vadd.f32 %v2198_v37, %v7084_v35  ;;  %3974 = vmatprep.subr.bf16.mxu1 %v5963_v52 }
 0x2a3   :  { %v2191_v40 = vpop.f32.mrf.mxu1  ;;  %3932 = vmatpush2.bf16.msra.mxu0 %v5952_v50 }
 0x2a4   :  { %2200 = vadd.xlane.f32.xlu0 %v2199_v31 }
 0x2a5   :  { %3975 = vmatpush2.bf16.msra.mxu1 %v5961_v57 }
 0x2a6   :  { %3976 = vmatprep.subr.bf16.mxu1 %v5969_v62 }
 0x2a9   :  { %3977 = vmatpush2.bf16.msra.mxu1 %v5967_v0 }
 0x2aa   :  { %3978 = vmatprep.subr.bf16.mxu1 %v5975_v59 }
 0x2ad   :  { %3979 = vmatpush2.bf16.msra.mxu1 %v5973_v2 }
 0x2ae   :  { %3980 = vmatprep.subr.bf16.mxu1 %v5981_v4 }
 0x2b1   :  { %3981 = vmatpush2.bf16.msra.mxu1 %v5979_v6 }
 0x2b2   :  { %3982 = vmatprep.subr.bf16.mxu1 %v5987_v10 }
 0x2b5   :  { %3983 = vmatpush2.bf16.msra.mxu1 %v5985_v12 }
 0x2b6   :  { %3984 = vmatprep.subr.bf16.mxu1 %v5993_v17  ;;  %v5997_v17 = vld [vmem:[#allocation10 + $0x6e0] ss:$16 sps:$4 sm:$0xff]  }
 0x2b9   :  { %3985 = vmatpush2.bf16.msra.mxu1 %v5991_v21 }
 0x2ba   :  { %4036 = vmatprep.subr.bf16.mxu1 %v5999_v24  ;;  %v6005_v24 = vld [vmem:[#allocation10 + $0x6c4] ss:$16 sps:$4 sm:$0xff]  }
 0x32d   :  { %v2201_v27 = vpop.xlane.xlu0 %2200 }
 0x32e   :  { %v2202_v53 = vmul.f32 0.0009765625, %v2201_v27 }
 0x330   :  { %v7089_v54 = vsub.f32 %v7034_v39, %v2202_v53  ;;  %v7092_v28 = vsub.f32 %v7036_v43, %v2202_v53  ;;  %v7095_v30 = vsub.f32 %v7048_v55, %v2202_v53  ;;  %v7098_v33 = vsub.f32 %v7050_v61, %v2202_v53 }
 0x331   :  { %v7105_v37 = vsub.f32 %v7068_v15, %v2202_v53  ;;  %v7110_v38 = vsub.f32 %v7077_v23, %v2202_v53  ;;  %v7115_v40 = vsub.f32 %v7082_v26, %v2202_v53  ;;  %v7120_v15 = vsub.f32 %v7084_v35, %v2202_v53  ;;  %v5960_v35 = vld [vmem:[#allocation10 + $0x1a4] ss:$16 sps:$4 sm:$0xff]  }
 0x332   :  { %v2211_v34 = vmul.f32 %v7089_v54, %v7089_v54  ;;  %v2212_v36 = vmul.f32 %v7092_v28, %v7092_v28  ;;  %v2213_v39 = vmul.f32 %v7095_v30, %v7095_v30  ;;  %v2214_v55 = vmul.f32 %v7098_v33, %v7098_v33  ;;  %3933 = vmatprep.subr.bf16.mxu0 %v5960_v35 }
 0x333   :  { %v2215_v31 = vmul.f32 %v7105_v37, %v7105_v37  ;;  %v2216_v42 = vmul.f32 %v7110_v38, %v7110_v38  ;;  %v2217_v23 = vmul.f32 %v7115_v40, %v7115_v40  ;;  %v2218_v46 = vmul.f32 %v7120_v15, %v7120_v15  ;;  %3934 = vmatpush2.bf16.msra.mxu0 %v5958_v56 }
 0x334   :  { %v2219_v43 = vadd.f32 %v2212_v36, %v2211_v34  ;;  %3935 = vmatprep.subr.bf16.mxu0 %v5966_v60  ;;  %v2239_v34 = vld [vmem:[#allocation7] sm:$0xff]  ;;  %v2289_v36 = vld [vmem:[#allocation8] sm:$0xff] }
 0x335   :  { %v2314_v48 = vrot.slane %v2289_v36, %v7058_v9  ;;  %v2322_v49 = vrot.slane %v2289_v36, %v7071_v18  ;;  %v2310_v50 = vrot.slane %v2289_v36, %v7053_v7  ;;  %v2318_v51 = vrot.slane %v2289_v36, %v7066_v14 }
 0x336   :  { %v2220_v61 = vadd.f32 %v2219_v43, %v2213_v39  ;;  %v2260_v39 = vrot.slane %v2239_v34, %v7053_v7  ;;  %v2268_v43 = vrot.slane %v2239_v34, %v7066_v14 }
 0x337   :  { %3936 = vmatpush2.bf16.msra.mxu0 %v5964_v63 }
 0x338   :  { %v2221_v41 = vadd.f32 %v2220_v61, %v2214_v55  ;;  %3937 = vmatprep.subr.bf16.mxu0 %v5972_v58  ;;  %v2248_v55 = vrot.slane %v2239_v34, %v7026_v32  ;;  %v2256_v61 = vrot.slane %v2239_v34, %v7042_v16 }
 0x33a   :  { %v2222_v44 = vadd.f32 %v2221_v41, %v2215_v31  ;;  %v2244_v31 = vrot.slane %v2239_v34, %v7021_v29  ;;  %v2252_v41 = vrot.slane %v2239_v34, %v7039_v47 }
 0x33b   :  { %3938 = vmatpush2.bf16.msra.mxu0 %v5970_v1 }
 0x33c   :  { %v2223_v45 = vadd.f32 %v2222_v44, %v2216_v42  ;;  %3939 = vmatprep.subr.bf16.mxu0 %v5978_v3  ;;  %v2264_v42 = vrot.slane %v2239_v34, %v7058_v9  ;;  %v2272_v44 = vrot.slane %v2239_v34, %v7071_v18  ;;  %v6003_v34 = vld [vmem:[#allocation10 + $0x6c0] ss:$16 sps:$4 sm:$0xff]  }
 0x33e   :  { %v2224_v26 = vadd.f32 %v2223_v45, %v2217_v23  ;;  %v2298_v23 = vrot.slane %v2289_v36, %v7026_v32  ;;  %v2306_v45 = vrot.slane %v2289_v36, %v7042_v16 }
 0x33f   :  { %3940 = vmatpush2.bf16.msra.mxu0 %v5976_v5 }
 0x340   :  { %v2225_v19 = vadd.f32 %v2224_v26, %v2218_v46  ;;  %3941 = vmatprep.subr.bf16.mxu0 %v5984_v8  ;;  %v2294_v46 = vrot.slane %v2289_v36, %v7021_v29  ;;  %v2302_v26 = vrot.slane %v2289_v36, %v7039_v47  ;;  %v6008_v36 = vld [vmem:[#allocation10 + $0x4a4] ss:$16 sps:$4 sm:$0xff]  }
 0x342   :  { %2226 = vadd.xlane.f32.xlu0 %v2225_v19 }
 0x343   :  { %3942 = vmatpush2.bf16.msra.mxu0 %v5982_v11 }
 0x344   :  { %3943 = vmatprep.subr.bf16.mxu0 %v5990_v13  ;;  %v5994_v13 = vld [vmem:[#allocation10 + $0x4e0] ss:$16 sps:$4 sm:$0xff]  }
 0x347   :  { %3944 = vmatpush2.bf16.msra.mxu0 %v5988_v20 }
 0x348   :  { %3995 = vmatprep.subr.bf16.mxu0 %v5996_v22  ;;  %v6002_v22 = vld [vmem:[#allocation10 + $0x4c4] ss:$16 sps:$4 sm:$0xff]  }
 0x3cb   :  { %v2227_v25 = vpop.xlane.xlu0 %2226 }
 0x3cc   :  { %v2228_v27 = vmul.f32 0.0009765625, %v2227_v25 }
 0x3ce   :  { %v2229_v53 = vadd.f32 1e-05, %v2228_v27 }
 0x3d0   :  { %6402 = vrsqrt.f32 %v2229_v53  ;;  %v6000_v53 = vld [vmem:[#allocation10 + $0x4c0] ss:$16 sps:$4 sm:$0xff]  }
 0x3dd   :  { %v6403_v19 = vpop.eup %6402 }
 0x3de   :  { %v2232_v35 = vmul.f32 %v6403_v19, %v7092_v28  ;;  %v2234_v52 = vmul.f32 %v6403_v19, %v7098_v33  ;;  %v2231_v56 = vmul.f32 %v6403_v19, %v7089_v54  ;;  %v2233_v57 = vmul.f32 %v6403_v19, %v7095_v30 }
 0x3df   :  { %v2236_v60 = vmul.f32 %v6403_v19, %v7110_v38  ;;  %v2238_v62 = vmul.f32 %v6403_v19, %v7120_v15  ;;  %v2235_v9 = vmul.f32 %v6403_v19, %v7105_v37  ;;  %v2237_v18 = vmul.f32 %v6403_v19, %v7115_v40  ;;  %v6029_v19 = vld [vmem:[#allocation10 + $0x644] ss:$16 sps:$4 sm:$0xff]  }
 0x3e0   :  { %v2282_v63 = vmul.f32 %v2248_v55, %v2232_v35  ;;  %v2284_v7 = vmul.f32 %v2256_v61, %v2234_v52  ;;  %v2281_v0 = vmul.f32 %v2244_v31, %v2231_v56  ;;  %v2283_v14 = vmul.f32 %v2252_v41, %v2233_v57  ;;  %v6009_v55 = vld [vmem:[#allocation10 + $0x6a0] ss:$16 sps:$4 sm:$0xff]   ;;  %v6014_v61 = vld [vmem:[#allocation10 + $0x484] ss:$16 sps:$4 sm:$0xff]  }
 0x3e1   :  { %v2286_v58 = vmul.f32 %v2264_v42, %v2236_v60  ;;  %v2288_v28 = vmul.f32 %v2272_v44, %v2238_v62  ;;  %v2285_v59 = vmul.f32 %v2260_v39, %v2235_v9  ;;  %v2287_v33 = vmul.f32 %v2268_v43, %v2237_v18  ;;  %v6011_v39 = vld [vmem:[#allocation10 + $0x6a4] ss:$16 sps:$4 sm:$0xff]   ;;  %v6006_v43 = vld [vmem:[#allocation10 + $0x4a0] ss:$16 sps:$4 sm:$0xff]  }
 0x3e2   :  { %v2332_v1 = vadd.f32 %v2298_v23, %v2282_v63  ;;  %v2334_v54 = vadd.f32 %v2306_v45, %v2284_v7  ;;  %v2331_v2 = vadd.f32 %v2294_v46, %v2281_v0  ;;  %v2333_v30 = vadd.f32 %v2302_v26, %v2283_v14  ;;  %v6017_v31 = vld [vmem:[#allocation10 + $0x684] ss:$16 sps:$4 sm:$0xff]   ;;  %v6012_v41 = vld [vmem:[#allocation10 + $0x480] ss:$16 sps:$4 sm:$0xff]  }
 0x3e3   :  { %v2336_v3 = vadd.f32 %v2314_v48, %v2286_v58  ;;  %v2338_v38 = vadd.f32 %v2322_v49, %v2288_v28  ;;  %v7152_v4 = vadd.f32 %v2310_v50, %v2285_v59  ;;  %v7154_v15 = vadd.f32 %v2318_v51, %v2287_v33  ;;  %v6015_v42 = vld [vmem:[#allocation10 + $0x680] ss:$16 sps:$4 sm:$0xff]   ;;  %v6020_v44 = vld [vmem:[#allocation10 + $0x464] ss:$16 sps:$4 sm:$0xff]  }
 0x3e4   :  { %v2340_v37 = vmax.f32 %v2332_v1, 0.0  ;;  %v2342_v40 = vmax.f32 %v2334_v54, 0.0  ;;  %v2339_v5 = vmax.f32 %v2331_v2, 0.0  ;;  %v2341_v6 = vmax.f32 %v2333_v30, 0.0  ;;  %v6023_v23 = vld [vmem:[#allocation10 + $0x664] ss:$16 sps:$4 sm:$0xff]  }
 0x3e5   :  { %v2344_v8 = vmax.f32 %v2336_v3, 0.0  ;;  %v2346_v10 = vmax.f32 %v2338_v38, 0.0  ;;  %v6018_v45 = vld [vmem:[#allocation10 + $0x460] ss:$16 sps:$4 sm:$0xff]   ;;  %v6026_v26 = vld [vmem:[#allocation10 + $0x444] ss:$16 sps:$4 sm:$0xff]  }
 0x3e6   :  { %v7156_v11 = vpack.c.bf16 %v2340_v37, %v2340_v37  ;;  %v7158_v12 = vpack.c.bf16 %v2342_v40, %v2342_v40  ;;  %v7160_v20 = vpack.c.bf16 %v2339_v5, %v2339_v5  ;;  %v7162_v21 = vpack.c.bf16 %v2341_v6, %v2341_v6  ;;  %v6021_v46 = vld [vmem:[#allocation10 + $0x660] ss:$16 sps:$4 sm:$0xff]   ;;  %v6032_v50 = vld [vmem:[#allocation10 + $0x424] ss:$16 sps:$4 sm:$0xff]  }
 0x3e7   :  { %v7168_v25 = vpack.c.bf16 %v2344_v8, %v2344_v8  ;;  %v7170_v27 = vpack.c.bf16 %v2346_v10, %v2346_v10  ;;  %v6024_v48 = vld [vmem:[#allocation10 + $0x440] ss:$16 sps:$4 sm:$0xff]   ;;  %v6035_v51 = vld [vmem:[#allocation10 + $0x624] ss:$16 sps:$4 sm:$0xff]  }
 0x3e8   :  { %3945 = vmatprep.mubr.bf16.mxu0 %v7156_v11  ;;  %3986 = vmatprep.mubr.bf16.mxu1 %v7158_v12  ;;  %v6027_v49 = vld [vmem:[#allocation10 + $0x640] ss:$16 sps:$4 sm:$0xff]   ;;  %v6038_v56 = vld [vmem:[#allocation10 + $0x404] ss:$16 sps:$4 sm:$0xff]  }
 0x3e9   :  { %3946 = vmatmul.mubr.bf16.vlgmr.msra.gmra.mxu0 %v7160_v20  ;;  %3987 = vmatmul.mubr.bf16.vlgmr.msra.gmra.mxu1 %v7162_v21  ;;  %v6030_v35 = vld [vmem:[#allocation10 + $0x420] ss:$16 sps:$4 sm:$0xff]   ;;  %v6041_v57 = vld [vmem:[#allocation10 + $0x604] ss:$16 sps:$4 sm:$0xff]  }
 0x3ea   :  { %3996 = vmatpush1.bf16.msra.mxu0 %v5994_v13  ;;  %4037 = vmatpush1.bf16.msra.mxu1 %v5997_v17  ;;  %v6033_v52 = vld [vmem:[#allocation10 + $0x620] ss:$16 sps:$4 sm:$0xff]   ;;  %v6044_v9 = vld [vmem:[#allocation10 + $0x5e4] ss:$16 sps:$4 sm:$0xff]  }
 0x3eb   :  { %4027 = vmatprep.mubr.bf16.mxu0 %v7168_v25  ;;  %4068 = vmatprep.mubr.bf16.mxu1 %v7170_v27  ;;  %v6036_v60 = vld [vmem:[#allocation10 + $0x400] ss:$16 sps:$4 sm:$0xff]   ;;  %v6047_v18 = vld [vmem:[#allocation10 + $0x7e4] ss:$16 sps:$4 sm:$0xff]  }
 0x3ec   :  { %3997 = vmatprep.subr.bf16.mxu0 %v6002_v22  ;;  %4038 = vmatprep.subr.bf16.mxu1 %v6005_v24  ;;  %v6039_v62 = vld [vmem:[#allocation10 + $0x600] ss:$16 sps:$4 sm:$0xff]   ;;  %v6050_v0 = vld [vmem:[#allocation10 + $0x5c4] ss:$16 sps:$4 sm:$0xff]  }
 0x3ed   :  { %v6042_v63 = vld [vmem:[#allocation10 + $0x5e0] ss:$16 sps:$4 sm:$0xff]   ;;  %v6053_v14 = vld [vmem:[#allocation10 + $0x7c4] ss:$16 sps:$4 sm:$0xff]  }
 0x3ee   :  { %3998 = vmatpush1.bf16.msra.mxu0 %v6000_v53  ;;  %4039 = vmatpush1.bf16.msra.mxu1 %v6003_v34  ;;  %v6045_v7 = vld [vmem:[#allocation10 + $0x7e0] ss:$16 sps:$4 sm:$0xff]   ;;  %v6056_v59 = vld [vmem:[#allocation10 + $0x5a4] ss:$16 sps:$4 sm:$0xff]  }
 0x3ef   :  { %3999 = vmatprep.subr.bf16.mxu0 %v6008_v36  ;;  %4040 = vmatprep.subr.bf16.mxu1 %v6011_v39  ;;  %v6048_v58 = vld [vmem:[#allocation10 + $0x5c0] ss:$16 sps:$4 sm:$0xff]   ;;  %v6059_v33 = vld [vmem:[#allocation10 + $0x7a4] ss:$16 sps:$4 sm:$0xff]  }
 0x3f0   :  { %v6051_v28 = vld [vmem:[#allocation10 + $0x7c0] ss:$16 sps:$4 sm:$0xff]   ;;  %v6062_v2 = vld [vmem:[#allocation10 + $0x584] ss:$16 sps:$4 sm:$0xff]  }
 0x3f1   :  { %v6054_v1 = vld [vmem:[#allocation10 + $0x5a0] ss:$16 sps:$4 sm:$0xff]   ;;  %v6065_v30 = vld [vmem:[#allocation10 + $0x784] ss:$16 sps:$4 sm:$0xff]  }
 0x3f2   :  { %4000 = vmatpush1.bf16.msra.mxu0 %v6006_v43  ;;  %4041 = vmatpush1.bf16.msra.mxu1 %v6009_v55  ;;  %v6057_v54 = vld [vmem:[#allocation10 + $0x7a0] ss:$16 sps:$4 sm:$0xff]   ;;  %v6068_v37 = vld [vmem:[#allocation10 + $0x564] ss:$16 sps:$4 sm:$0xff]  }
 0x3f3   :  { %4001 = vmatprep.subr.bf16.mxu0 %v6014_v61  ;;  %4042 = vmatprep.subr.bf16.mxu1 %v6017_v31  ;;  %v6060_v3 = vld [vmem:[#allocation10 + $0x580] ss:$16 sps:$4 sm:$0xff]   ;;  %v6071_v40 = vld [vmem:[#allocation10 + $0x764] ss:$16 sps:$4 sm:$0xff]   ;;  %v2343_v61 = vmax.f32 %v7152_v4, 0.0  ;;  %v2345_v31 = vmax.f32 %v7154_v15, 0.0 }
 0x3f4   :  { %v6063_v38 = vld [vmem:[#allocation10 + $0x780] ss:$16 sps:$4 sm:$0xff]   ;;  %v6074_v8 = vld [vmem:[#allocation10 + $0x544] ss:$16 sps:$4 sm:$0xff]   ;;  %v6096_v4 = vld [vmem:[#allocation10 + $0xc8] ss:$16 sps:$4 sm:$0xff]  }
 0x3f5   :  { %v6066_v5 = vld [vmem:[#allocation10 + $0x560] ss:$16 sps:$4 sm:$0xff]   ;;  %v6077_v10 = vld [vmem:[#allocation10 + $0x744] ss:$16 sps:$4 sm:$0xff]   ;;  %v6099_v15 = vld [vmem:[#allocation10 + $0x2c8] ss:$16 sps:$4 sm:$0xff]  }
 0x3f6   :  { %4002 = vmatpush1.bf16.msra.mxu0 %v6012_v41  ;;  %4043 = vmatpush1.bf16.msra.mxu1 %v6015_v42  ;;  %v6069_v6 = vld [vmem:[#allocation10 + $0x760] ss:$16 sps:$4 sm:$0xff]   ;;  %v6080_v22 = vld [vmem:[#allocation10 + $0x524] ss:$16 sps:$4 sm:$0xff]   ;;  %v6092_v41 = vld [vmem:[#allocation10 + $0xec] ss:$16 sps:$4 sm:$0xff]  }
 0x3f7   :  { %4003 = vmatprep.subr.bf16.mxu0 %v6020_v44  ;;  %4044 = vmatprep.subr.bf16.mxu1 %v6023_v23  ;;  %v6072_v13 = vld [vmem:[#allocation10 + $0x540] ss:$16 sps:$4 sm:$0xff]   ;;  %v6083_v24 = vld [vmem:[#allocation10 + $0x724] ss:$16 sps:$4 sm:$0xff]   ;;  %v6095_v42 = vld [vmem:[#allocation10 + $0x2ec] ss:$16 sps:$4 sm:$0xff]   ;;  %v7176_v23 = vpack.c.bf16 %v2343_v61, %v2343_v61 }
 0x3f8   :  { %v6075_v17 = vld [vmem:[#allocation10 + $0x740] ss:$16 sps:$4 sm:$0xff]   ;;  %v6086_v36 = vld [vmem:[#allocation10 + $0x504] ss:$16 sps:$4 sm:$0xff]   ;;  %v6090_v44 = vld [vmem:[#allocation10 + $0xe8] ss:$16 sps:$4 sm:$0xff]  }
 0x3f9   :  { %v6078_v53 = vld [vmem:[#allocation10 + $0x520] ss:$16 sps:$4 sm:$0xff]   ;;  %v6089_v39 = vld [vmem:[#allocation10 + $0x704] ss:$16 sps:$4 sm:$0xff]   ;;  %v6170_v61 = vld [vmem:[#allocation10 + $0x14c] ss:$16 sps:$4 sm:$0xff]  }
 0x3fa   :  { %4004 = vmatpush1.bf16.msra.mxu0 %v6018_v45  ;;  %4045 = vmatpush1.bf16.msra.mxu1 %v6021_v46  ;;  %v6081_v34 = vld [vmem:[#allocation10 + $0x720] ss:$16 sps:$4 sm:$0xff]   ;;  %v7178_v45 = vpack.c.bf16 %v2345_v31, %v2345_v31  ;;  %v6093_v46 = vld [vmem:[#allocation10 + $0x2e8] ss:$16 sps:$4 sm:$0xff]   ;;  %v6173_v31 = vld [vmem:[#allocation10 + $0x34c] ss:$16 sps:$4 sm:$0xff]  }
 0x3fb   :  { %4005 = vmatprep.subr.bf16.mxu0 %v6026_v26  ;;  %4046 = vmatprep.subr.bf16.mxu1 %v6029_v19  ;;  %v6084_v43 = vld [vmem:[#allocation10 + $0x500] ss:$16 sps:$4 sm:$0xff]   ;;  %v6098_v26 = vld [vmem:[#allocation10 + $0xcc] ss:$16 sps:$4 sm:$0xff]  }
 0x3fc   :  { %v6087_v55 = vld [vmem:[#allocation10 + $0x700] ss:$16 sps:$4 sm:$0xff]   ;;  %v6101_v19 = vld [vmem:[#allocation10 + $0x2cc] ss:$16 sps:$4 sm:$0xff]  }
 0x3fe   :  { %4006 = vmatpush1.bf16.msra.mxu0 %v6024_v48  ;;  %4047 = vmatpush1.bf16.msra.mxu1 %v6027_v49  ;;  %v6104_v48 = vld [vmem:[#allocation10 + $0xac] ss:$16 sps:$4 sm:$0xff]  }
 0x3ff   :  { %4007 = vmatprep.subr.bf16.mxu0 %v6032_v50  ;;  %4048 = vmatprep.subr.bf16.mxu1 %v6035_v51  ;;  %v6107_v49 = vld [vmem:[#allocation10 + $0x2ac] ss:$16 sps:$4 sm:$0xff]   ;;  %v6102_v50 = vld [vmem:[#allocation10 + $0xa8] ss:$16 sps:$4 sm:$0xff]  }
 0x400   :  { %v6105_v51 = vld [vmem:[#allocation10 + $0x2a8] ss:$16 sps:$4 sm:$0xff]  }
 0x402   :  { %4008 = vmatpush1.bf16.msra.mxu0 %v6030_v35  ;;  %4049 = vmatpush1.bf16.msra.mxu1 %v6033_v52  ;;  %v6110_v35 = vld [vmem:[#allocation10 + $0x8c] ss:$16 sps:$4 sm:$0xff]  }
 0x403   :  { %4009 = vmatprep.subr.bf16.mxu0 %v6038_v56  ;;  %4050 = vmatprep.subr.bf16.mxu1 %v6041_v57  ;;  %v6113_v52 = vld [vmem:[#allocation10 + $0x28c] ss:$16 sps:$4 sm:$0xff]   ;;  %v6108_v56 = vld [vmem:[#allocation10 + $0x88] ss:$16 sps:$4 sm:$0xff]  }
 0x404   :  { %v6116_v57 = vld [vmem:[#allocation10 + $0x6c] ss:$16 sps:$4 sm:$0xff]  }
 0x406   :  { %4010 = vmatpush1.bf16.msra.mxu0 %v6036_v60  ;;  %4051 = vmatpush1.bf16.msra.mxu1 %v6039_v62  ;;  %v6114_v60 = vld [vmem:[#allocation10 + $0x68] ss:$16 sps:$4 sm:$0xff]  }
 0x407   :  { %4011 = vmatprep.subr.bf16.mxu0 %v6044_v9  ;;  %4052 = vmatprep.subr.bf16.mxu1 %v6047_v18  ;;  %v6117_v62 = vld [vmem:[#allocation10 + $0x268] ss:$16 sps:$4 sm:$0xff]   ;;  %v6122_v9 = vld [vmem:[#allocation10 + $0x4c] ss:$16 sps:$4 sm:$0xff]  }
 0x408   :  { %v6125_v18 = vld [vmem:[#allocation10 + $0x24c] ss:$16 sps:$4 sm:$0xff]  }
 0x40a   :  { %4012 = vmatpush2.bf16.msra.mxu0 %v6042_v63  ;;  %4053 = vmatpush2.bf16.msra.mxu1 %v6045_v7  ;;  %v6120_v63 = vld [vmem:[#allocation10 + $0x48] ss:$16 sps:$4 sm:$0xff]  }
 0x40b   :  { %4013 = vmatprep.subr.bf16.mxu0 %v6050_v0  ;;  %4054 = vmatprep.subr.bf16.mxu1 %v6053_v14  ;;  %v6123_v7 = vld [vmem:[#allocation10 + $0x248] ss:$16 sps:$4 sm:$0xff]   ;;  %v6128_v0 = vld [vmem:[#allocation10 + $0x2c] ss:$16 sps:$4 sm:$0xff]  }
 0x40c   :  { %v6131_v14 = vld [vmem:[#allocation10 + $0x22c] ss:$16 sps:$4 sm:$0xff]  }
 0x40e   :  { %4014 = vmatpush2.bf16.msra.mxu0 %v6048_v58  ;;  %4055 = vmatpush2.bf16.msra.mxu1 %v6051_v28  ;;  %v6126_v58 = vld [vmem:[#allocation10 + $0x28] ss:$16 sps:$4 sm:$0xff]  }
 0x40f   :  { %4015 = vmatprep.subr.bf16.mxu0 %v6056_v59  ;;  %4056 = vmatprep.subr.bf16.mxu1 %v6059_v33  ;;  %v6129_v28 = vld [vmem:[#allocation10 + $0x228] ss:$16 sps:$4 sm:$0xff]   ;;  %v6134_v59 = vld [vmem:[#allocation10 + $0xc] ss:$16 sps:$4 sm:$0xff]  }
 0x410   :  { %v6137_v33 = vld [vmem:[#allocation10 + $0x20c] ss:$16 sps:$4 sm:$0xff]  }
 0x412   :  { %4016 = vmatpush2.bf16.msra.mxu0 %v6054_v1  ;;  %4057 = vmatpush2.bf16.msra.mxu1 %v6057_v54  ;;  %v6132_v1 = vld [vmem:[#allocation10 + $0x8] ss:$16 sps:$4 sm:$0xff]  }
 0x413   :  { %4017 = vmatprep.subr.bf16.mxu0 %v6062_v2  ;;  %4058 = vmatprep.subr.bf16.mxu1 %v6065_v30  ;;  %v6135_v54 = vld [vmem:[#allocation10 + $0x208] ss:$16 sps:$4 sm:$0xff]   ;;  %v6140_v2 = vld [vmem:[#allocation10 + $0x1ec] ss:$16 sps:$4 sm:$0xff]  }
 0x414   :  { %v6143_v30 = vld [vmem:[#allocation10 + $0x3ec] ss:$16 sps:$4 sm:$0xff]  }
 0x416   :  { %4018 = vmatpush2.bf16.msra.mxu0 %v6060_v3  ;;  %4059 = vmatpush2.bf16.msra.mxu1 %v6063_v38  ;;  %v6138_v3 = vld [vmem:[#allocation10 + $0x1e8] ss:$16 sps:$4 sm:$0xff]  }
 0x417   :  { %4019 = vmatprep.subr.bf16.mxu0 %v6068_v37  ;;  %4060 = vmatprep.subr.bf16.mxu1 %v6071_v40  ;;  %v6141_v38 = vld [vmem:[#allocation10 + $0x3e8] ss:$16 sps:$4 sm:$0xff]   ;;  %v6146_v37 = vld [vmem:[#allocation10 + $0x1cc] ss:$16 sps:$4 sm:$0xff]  }
 0x418   :  { %v6149_v40 = vld [vmem:[#allocation10 + $0x3cc] ss:$16 sps:$4 sm:$0xff]  }
 0x41a   :  { %4020 = vmatpush2.bf16.msra.mxu0 %v6066_v5  ;;  %4061 = vmatpush2.bf16.msra.mxu1 %v6069_v6  ;;  %v6144_v5 = vld [vmem:[#allocation10 + $0x1c8] ss:$16 sps:$4 sm:$0xff]  }
 0x41b   :  { %4021 = vmatprep.subr.bf16.mxu0 %v6074_v8  ;;  %4062 = vmatprep.subr.bf16.mxu1 %v6077_v10  ;;  %v6147_v6 = vld [vmem:[#allocation10 + $0x3c8] ss:$16 sps:$4 sm:$0xff]   ;;  %v6152_v8 = vld [vmem:[#allocation10 + $0x1ac] ss:$16 sps:$4 sm:$0xff]  }
 0x41c   :  { %v6155_v10 = vld [vmem:[#allocation10 + $0x3ac] ss:$16 sps:$4 sm:$0xff]  }
 0x41e   :  { %4022 = vmatpush2.bf16.msra.mxu0 %v6072_v13  ;;  %4063 = vmatpush2.bf16.msra.mxu1 %v6075_v17  ;;  %v6150_v13 = vld [vmem:[#allocation10 + $0x1a8] ss:$16 sps:$4 sm:$0xff]  }
 0x41f   :  { %4023 = vmatprep.subr.bf16.mxu0 %v6080_v22  ;;  %4064 = vmatprep.subr.bf16.mxu1 %v6083_v24  ;;  %v6153_v17 = vld [vmem:[#allocation10 + $0x3a8] ss:$16 sps:$4 sm:$0xff]   ;;  %v6158_v22 = vld [vmem:[#allocation10 + $0x18c] ss:$16 sps:$4 sm:$0xff]  }
 0x420   :  { %v6161_v24 = vld [vmem:[#allocation10 + $0x38c] ss:$16 sps:$4 sm:$0xff]  }
 0x422   :  { %4024 = vmatpush2.bf16.msra.mxu0 %v6078_v53  ;;  %4065 = vmatpush2.bf16.msra.mxu1 %v6081_v34  ;;  %v6156_v53 = vld [vmem:[#allocation10 + $0x188] ss:$16 sps:$4 sm:$0xff]  }
 0x423   :  { %4025 = vmatprep.subr.bf16.mxu0 %v6086_v36  ;;  %4066 = vmatprep.subr.bf16.mxu1 %v6089_v39  ;;  %v6159_v34 = vld [vmem:[#allocation10 + $0x388] ss:$16 sps:$4 sm:$0xff]   ;;  %v6164_v36 = vld [vmem:[#allocation10 + $0x16c] ss:$16 sps:$4 sm:$0xff]  }
 0x424   :  { %v6167_v39 = vld [vmem:[#allocation10 + $0x36c] ss:$16 sps:$4 sm:$0xff]  }
 0x426   :  { %4026 = vmatpush2.bf16.msra.mxu0 %v6084_v43  ;;  %4067 = vmatpush2.bf16.msra.mxu1 %v6087_v55  ;;  %v6162_v43 = vld [vmem:[#allocation10 + $0x168] ss:$16 sps:$4 sm:$0xff]  }
 0x427   :  { %4077 = vmatprep.subr.bf16.mxu0 %v6092_v41  ;;  %4118 = vmatprep.subr.bf16.mxu1 %v6095_v42  ;;  %v6165_v55 = vld [vmem:[#allocation10 + $0x368] ss:$16 sps:$4 sm:$0xff]  }
 0x428   :  { %v6168_v41 = vld [vmem:[#allocation10 + $0x148] ss:$16 sps:$4 sm:$0xff]  }
 0x429   :  { %4028 = vmatmul.mubr.bf16.vlgmr.msra.gmra.mxu0 %v7176_v23  ;;  %4069 = vmatmul.mubr.bf16.vlgmr.msra.gmra.mxu1 %v7178_v45  ;;  %v6171_v42 = vld [vmem:[#allocation10 + $0x348] ss:$16 sps:$4 sm:$0xff]  }
 0x42a   :  { %4078 = vmatpush1.bf16.msra.mxu0 %v6090_v44  ;;  %4109 = vmatprep.mubr.bf16.mxu0 %v7156_v11  ;;  %v6111_v11 = vld [vmem:[#allocation10 + $0x288] ss:$16 sps:$4 sm:$0xff]   ;;  %v6176_v44 = vld [vmem:[#allocation10 + $0x12c] ss:$16 sps:$4 sm:$0xff]  }
 0x42b   :  { %4119 = vmatpush1.bf16.msra.mxu1 %v6093_v46  ;;  %4150 = vmatprep.mubr.bf16.mxu1 %v7158_v12  ;;  %v6119_v12 = vld [vmem:[#allocation10 + $0x26c] ss:$16 sps:$4 sm:$0xff]  }
 0x42c   :  { %4079 = vmatprep.subr.bf16.mxu0 %v6098_v26  ;;  %4120 = vmatprep.subr.bf16.mxu1 %v6101_v19  ;;  %v6179_v46 = vld [vmem:[#allocation10 + $0x32c] ss:$16 sps:$4 sm:$0xff]   ;;  %v6174_v26 = vld [vmem:[#allocation10 + $0x128] ss:$16 sps:$4 sm:$0xff]  }
 0x42d   :  { %v6177_v19 = vld [vmem:[#allocation10 + $0x328] ss:$16 sps:$4 sm:$0xff]  }
 0x42e   :  { %4080 = vmatpush1.bf16.msra.mxu0 %v6096_v4  ;;  %v6182_v4 = vld [vmem:[#allocation10 + $0x10c] ss:$16 sps:$4 sm:$0xff]  }
 0x42f   :  { %4121 = vmatpush1.bf16.msra.mxu1 %v6099_v15  ;;  %4081 = vmatprep.subr.bf16.mxu0 %v6104_v48  ;;  %v6185_v15 = vld [vmem:[#allocation10 + $0x30c] ss:$16 sps:$4 sm:$0xff]   ;;  %v6180_v48 = vld [vmem:[#allocation10 + $0x108] ss:$16 sps:$4 sm:$0xff]  }
 0x430   :  { %4122 = vmatprep.subr.bf16.mxu1 %v6107_v49  ;;  %v6183_v49 = vld [vmem:[#allocation10 + $0x308] ss:$16 sps:$4 sm:$0xff]  }
 0x432   :  { %4082 = vmatpush1.bf16.msra.mxu0 %v6102_v50  ;;  %v6188_v50 = vld [vmem:[#allocation10 + $0x4ec] ss:$16 sps:$4 sm:$0xff]  }
 0x433   :  { %4123 = vmatpush1.bf16.msra.mxu1 %v6105_v51  ;;  %4083 = vmatprep.subr.bf16.mxu0 %v6110_v35  ;;  %v6191_v51 = vld [vmem:[#allocation10 + $0x6ec] ss:$16 sps:$4 sm:$0xff]   ;;  %v6186_v35 = vld [vmem:[#allocation10 + $0x4e8] ss:$16 sps:$4 sm:$0xff]  }
 0x434   :  { %4124 = vmatprep.subr.bf16.mxu1 %v6113_v52  ;;  %v6189_v52 = vld [vmem:[#allocation10 + $0x6e8] ss:$16 sps:$4 sm:$0xff]  }
 0x436   :  { %4084 = vmatpush1.bf16.msra.mxu0 %v6108_v56  ;;  %v6194_v56 = vld [vmem:[#allocation10 + $0x4cc] ss:$16 sps:$4 sm:$0xff]  }
 0x437   :  { %4125 = vmatpush1.bf16.msra.mxu1 %v6111_v11  ;;  %4085 = vmatprep.subr.bf16.mxu0 %v6116_v57  ;;  %v6197_v11 = vld [vmem:[#allocation10 + $0x6cc] ss:$16 sps:$4 sm:$0xff]   ;;  %v6192_v57 = vld [vmem:[#allocation10 + $0x4c8] ss:$16 sps:$4 sm:$0xff]  }
 0x438   :  { %4126 = vmatprep.subr.bf16.mxu1 %v6119_v12  ;;  %v6195_v12 = vld [vmem:[#allocation10 + $0x6c8] ss:$16 sps:$4 sm:$0xff]  }
 0x43a   :  { %4086 = vmatpush1.bf16.msra.mxu0 %v6114_v60  ;;  %v6200_v60 = vld [vmem:[#allocation10 + $0x4ac] ss:$16 sps:$4 sm:$0xff]  }
 0x43b   :  { %4127 = vmatpush1.bf16.msra.mxu1 %v6117_v62  ;;  %4087 = vmatprep.subr.bf16.mxu0 %v6122_v9  ;;  %v6203_v62 = vld [vmem:[#allocation10 + $0x6ac] ss:$16 sps:$4 sm:$0xff]   ;;  %v6198_v9 = vld [vmem:[#allocation10 + $0x4a8] ss:$16 sps:$4 sm:$0xff]  }
 0x43c   :  { %4128 = vmatprep.subr.bf16.mxu1 %v6125_v18  ;;  %v6206_v18 = vld [vmem:[#allocation10 + $0x48c] ss:$16 sps:$4 sm:$0xff]  }
 0x43e   :  { %4088 = vmatpush1.bf16.msra.mxu0 %v6120_v63  ;;  %v6204_v63 = vld [vmem:[#allocation10 + $0x488] ss:$16 sps:$4 sm:$0xff]  }
 0x43f   :  { %4129 = vmatpush1.bf16.msra.mxu1 %v6123_v7  ;;  %4089 = vmatprep.subr.bf16.mxu0 %v6128_v0  ;;  %v6212_v7 = vld [vmem:[#allocation10 + $0x46c] ss:$16 sps:$4 sm:$0xff]  }
 0x440   :  { %4130 = vmatprep.subr.bf16.mxu1 %v6131_v14  ;;  %v6215_v0 = vld [vmem:[#allocation10 + $0x66c] ss:$16 sps:$4 sm:$0xff]   ;;  %v6213_v14 = vld [vmem:[#allocation10 + $0x668] ss:$16 sps:$4 sm:$0xff]  }
 0x442   :  { %4090 = vmatpush1.bf16.msra.mxu0 %v6126_v58  ;;  %v6218_v58 = vld [vmem:[#allocation10 + $0x44c] ss:$16 sps:$4 sm:$0xff]  }
 0x443   :  { %4131 = vmatpush1.bf16.msra.mxu1 %v6129_v28  ;;  %4091 = vmatprep.subr.bf16.mxu0 %v6134_v59  ;;  %v6221_v28 = vld [vmem:[#allocation10 + $0x64c] ss:$16 sps:$4 sm:$0xff]   ;;  %v6216_v59 = vld [vmem:[#allocation10 + $0x448] ss:$16 sps:$4 sm:$0xff]  }
 0x444   :  { %4132 = vmatprep.subr.bf16.mxu1 %v6137_v33  ;;  %v6219_v33 = vld [vmem:[#allocation10 + $0x648] ss:$16 sps:$4 sm:$0xff]  }
 0x446   :  { %4092 = vmatpush1.bf16.msra.mxu0 %v6132_v1  ;;  %v6224_v1 = vld [vmem:[#allocation10 + $0x42c] ss:$16 sps:$4 sm:$0xff]  }
 0x447   :  { %4133 = vmatpush1.bf16.msra.mxu1 %v6135_v54  ;;  %4093 = vmatprep.subr.bf16.mxu0 %v6140_v2  ;;  %v6227_v54 = vld [vmem:[#allocation10 + $0x62c] ss:$16 sps:$4 sm:$0xff]   ;;  %v6222_v2 = vld [vmem:[#allocation10 + $0x428] ss:$16 sps:$4 sm:$0xff]  }
 0x448   :  { %4134 = vmatprep.subr.bf16.mxu1 %v6143_v30  ;;  %v6225_v30 = vld [vmem:[#allocation10 + $0x628] ss:$16 sps:$4 sm:$0xff]  }
 0x44a   :  { %4094 = vmatpush2.bf16.msra.mxu0 %v6138_v3  ;;  %v6230_v3 = vld [vmem:[#allocation10 + $0x40c] ss:$16 sps:$4 sm:$0xff]  }
 0x44b   :  { %4135 = vmatpush2.bf16.msra.mxu1 %v6141_v38  ;;  %4095 = vmatprep.subr.bf16.mxu0 %v6146_v37  ;;  %v6233_v38 = vld [vmem:[#allocation10 + $0x60c] ss:$16 sps:$4 sm:$0xff]   ;;  %v6228_v37 = vld [vmem:[#allocation10 + $0x408] ss:$16 sps:$4 sm:$0xff]  }
 0x44c   :  { %4136 = vmatprep.subr.bf16.mxu1 %v6149_v40  ;;  %v6231_v40 = vld [vmem:[#allocation10 + $0x608] ss:$16 sps:$4 sm:$0xff]  }
 0x44e   :  { %4096 = vmatpush2.bf16.msra.mxu0 %v6144_v5  ;;  %v6236_v5 = vld [vmem:[#allocation10 + $0x5ec] ss:$16 sps:$4 sm:$0xff]  }
 0x44f   :  { %4137 = vmatpush2.bf16.msra.mxu1 %v6147_v6  ;;  %4097 = vmatprep.subr.bf16.mxu0 %v6152_v8  ;;  %v6239_v6 = vld [vmem:[#allocation10 + $0x7ec] ss:$16 sps:$4 sm:$0xff]   ;;  %v6234_v8 = vld [vmem:[#allocation10 + $0x5e8] ss:$16 sps:$4 sm:$0xff]  }
 0x450   :  { %4138 = vmatprep.subr.bf16.mxu1 %v6155_v10  ;;  %v6237_v10 = vld [vmem:[#allocation10 + $0x7e8] ss:$16 sps:$4 sm:$0xff]  }
 0x452   :  { %4098 = vmatpush2.bf16.msra.mxu0 %v6150_v13  ;;  %v6242_v13 = vld [vmem:[#allocation10 + $0x5cc] ss:$16 sps:$4 sm:$0xff]  }
 0x453   :  { %4139 = vmatpush2.bf16.msra.mxu1 %v6153_v17  ;;  %4099 = vmatprep.subr.bf16.mxu0 %v6158_v22  ;;  %v6245_v17 = vld [vmem:[#allocation10 + $0x7cc] ss:$16 sps:$4 sm:$0xff]   ;;  %v6240_v22 = vld [vmem:[#allocation10 + $0x5c8] ss:$16 sps:$4 sm:$0xff]  }
 0x454   :  { %4140 = vmatprep.subr.bf16.mxu1 %v6161_v24  ;;  %v6243_v24 = vld [vmem:[#allocation10 + $0x7c8] ss:$16 sps:$4 sm:$0xff]  }
 0x456   :  { %4100 = vmatpush2.bf16.msra.mxu0 %v6156_v53  ;;  %v6248_v53 = vld [vmem:[#allocation10 + $0x5ac] ss:$16 sps:$4 sm:$0xff]  }
 0x457   :  { %4141 = vmatpush2.bf16.msra.mxu1 %v6159_v34  ;;  %4101 = vmatprep.subr.bf16.mxu0 %v6164_v36  ;;  %v6251_v34 = vld [vmem:[#allocation10 + $0x7ac] ss:$16 sps:$4 sm:$0xff]   ;;  %v6246_v36 = vld [vmem:[#allocation10 + $0x5a8] ss:$16 sps:$4 sm:$0xff]  }
 0x458   :  { %4142 = vmatprep.subr.bf16.mxu1 %v6167_v39  ;;  %v6249_v39 = vld [vmem:[#allocation10 + $0x7a8] ss:$16 sps:$4 sm:$0xff]  }
 0x45a   :  { %4102 = vmatpush2.bf16.msra.mxu0 %v6162_v43  ;;  %v6254_v43 = vld [vmem:[#allocation10 + $0x58c] ss:$16 sps:$4 sm:$0xff]  }
 0x45b   :  { %4143 = vmatpush2.bf16.msra.mxu1 %v6165_v55  ;;  %4103 = vmatprep.subr.bf16.mxu0 %v6170_v61  ;;  %v6257_v55 = vld [vmem:[#allocation10 + $0x78c] ss:$16 sps:$4 sm:$0xff]   ;;  %v6252_v61 = vld [vmem:[#allocation10 + $0x588] ss:$16 sps:$4 sm:$0xff]  }
 0x45c   :  { %4144 = vmatprep.subr.bf16.mxu1 %v6173_v31  ;;  %v6255_v31 = vld [vmem:[#allocation10 + $0x788] ss:$16 sps:$4 sm:$0xff]  }
 0x45e   :  { %4104 = vmatpush2.bf16.msra.mxu0 %v6168_v41  ;;  %v6260_v41 = vld [vmem:[#allocation10 + $0x56c] ss:$16 sps:$4 sm:$0xff]  }
 0x45f   :  { %4145 = vmatpush2.bf16.msra.mxu1 %v6171_v42  ;;  %4105 = vmatprep.subr.bf16.mxu0 %v6176_v44  ;;  %v6263_v42 = vld [vmem:[#allocation10 + $0x76c] ss:$16 sps:$4 sm:$0xff]   ;;  %v6258_v44 = vld [vmem:[#allocation10 + $0x568] ss:$16 sps:$4 sm:$0xff]  }
 0x460   :  { %4146 = vmatprep.subr.bf16.mxu1 %v6179_v46  ;;  %v6261_v46 = vld [vmem:[#allocation10 + $0x768] ss:$16 sps:$4 sm:$0xff]  }
 0x462   :  { %4106 = vmatpush2.bf16.msra.mxu0 %v6174_v26  ;;  %v6266_v26 = vld [vmem:[#allocation10 + $0x54c] ss:$16 sps:$4 sm:$0xff]  }
 0x463   :  { %4147 = vmatpush2.bf16.msra.mxu1 %v6177_v19  ;;  %4107 = vmatprep.subr.bf16.mxu0 %v6182_v4  ;;  %v6269_v19 = vld [vmem:[#allocation10 + $0x74c] ss:$16 sps:$4 sm:$0xff]   ;;  %v6264_v4 = vld [vmem:[#allocation10 + $0x548] ss:$16 sps:$4 sm:$0xff]  }
 0x464   :  { %4148 = vmatprep.subr.bf16.mxu1 %v6185_v15  ;;  %v6267_v15 = vld [vmem:[#allocation10 + $0x748] ss:$16 sps:$4 sm:$0xff]  }
 0x466   :  { %4108 = vmatpush2.bf16.msra.mxu0 %v6180_v48  ;;  %v6272_v48 = vld [vmem:[#allocation10 + $0x52c] ss:$16 sps:$4 sm:$0xff]  }
 0x467   :  { %4149 = vmatpush2.bf16.msra.mxu1 %v6183_v49  ;;  %4159 = vmatprep.subr.bf16.mxu0 %v6188_v50  ;;  %v6275_v49 = vld [vmem:[#allocation10 + $0x72c] ss:$16 sps:$4 sm:$0xff]   ;;  %v6270_v50 = vld [vmem:[#allocation10 + $0x528] ss:$16 sps:$4 sm:$0xff]  }
 0x468   :  { %4200 = vmatprep.subr.bf16.mxu1 %v6191_v51  ;;  %v6273_v51 = vld [vmem:[#allocation10 + $0x728] ss:$16 sps:$4 sm:$0xff]  }
 0x469   :  { %4110 = vmatmul.mubr.bf16.vlgmr.msra.gmra.mxu0 %v7160_v20  ;;  %v6201_v20 = vld [vmem:[#allocation10 + $0x6a8] ss:$16 sps:$4 sm:$0xff]  }
 0x46a   :  { %4151 = vmatmul.mubr.bf16.vlgmr.msra.gmra.mxu1 %v7162_v21  ;;  %4160 = vmatpush1.bf16.msra.mxu0 %v6186_v35  ;;  %v6209_v21 = vld [vmem:[#allocation10 + $0x68c] ss:$16 sps:$4 sm:$0xff]  }
 0x46b   :  { %4191 = vmatprep.mubr.bf16.mxu0 %v7168_v25  ;;  %4201 = vmatpush1.bf16.msra.mxu1 %v6189_v52  ;;  %v6207_v25 = vld [vmem:[#allocation10 + $0x688] ss:$16 sps:$4 sm:$0xff]   ;;  %v6278_v35 = vld [vmem:[#allocation10 + $0x50c] ss:$16 sps:$4 sm:$0xff]  }
 0x46c   :  { %4232 = vmatprep.mubr.bf16.mxu1 %v7170_v27  ;;  %4161 = vmatprep.subr.bf16.mxu0 %v6194_v56  ;;  %v6210_v27 = vld [vmem:[#allocation10 + $0x468] ss:$16 sps:$4 sm:$0xff]   ;;  %v6281_v52 = vld [vmem:[#allocation10 + $0x70c] ss:$16 sps:$4 sm:$0xff]  }
 0x46d   :  { %4202 = vmatprep.subr.bf16.mxu1 %v6197_v11  ;;  %v6276_v56 = vld [vmem:[#allocation10 + $0x508] ss:$16 sps:$4 sm:$0xff]  }
 0x46e   :  { %4162 = vmatpush1.bf16.msra.mxu0 %v6192_v57  ;;  %v6279_v11 = vld [vmem:[#allocation10 + $0x708] ss:$16 sps:$4 sm:$0xff]   ;;  %v2611_v57 = vld [vmem:[#allocation11] sm:$0xf] }
 0x46f   :  { %4203 = vmatpush1.bf16.msra.mxu1 %v6195_v12  ;;  %4163 = vmatprep.subr.bf16.mxu0 %v6200_v60  ;;  %v2616_v12 = vrot.slane %v2611_v57, %v7021_v29  ;;  %v2620_v60 = vrot.slane %v2611_v57, %v7026_v32 }
 0x470   :  { %4204 = vmatprep.subr.bf16.mxu1 %v6203_v62 }
 0x472   :  { %4164 = vmatpush1.bf16.msra.mxu0 %v6198_v9 }
 0x473   :  { %4205 = vmatpush1.bf16.msra.mxu1 %v6201_v20  ;;  %4165 = vmatprep.subr.bf16.mxu0 %v6206_v18 }
 0x474   :  { %4206 = vmatprep.subr.bf16.mxu1 %v6209_v21 }
 0x476   :  { %4166 = vmatpush1.bf16.msra.mxu0 %v6204_v63 }
 0x477   :  { %4207 = vmatpush1.bf16.msra.mxu1 %v6207_v25  ;;  %4167 = vmatprep.subr.bf16.mxu0 %v6212_v7 }
 0x478   :  { %4208 = vmatprep.subr.bf16.mxu1 %v6215_v0 }
 0x47a   :  { %4168 = vmatpush1.bf16.msra.mxu0 %v6210_v27 }
 0x47b   :  { %4209 = vmatpush1.bf16.msra.mxu1 %v6213_v14  ;;  %4169 = vmatprep.subr.bf16.mxu0 %v6218_v58 }
 0x47c   :  { %4210 = vmatprep.subr.bf16.mxu1 %v6221_v28 }
 0x47e   :  { %4170 = vmatpush1.bf16.msra.mxu0 %v6216_v59 }
 0x47f   :  { %4211 = vmatpush1.bf16.msra.mxu1 %v6219_v33  ;;  %4171 = vmatprep.subr.bf16.mxu0 %v6224_v1 }
 0x480   :  { %4212 = vmatprep.subr.bf16.mxu1 %v6227_v54 }
 0x482   :  { %4172 = vmatpush1.bf16.msra.mxu0 %v6222_v2 }
 0x483   :  { %4213 = vmatpush1.bf16.msra.mxu1 %v6225_v30  ;;  %4173 = vmatprep.subr.bf16.mxu0 %v6230_v3 }
 0x484   :  { %4214 = vmatprep.subr.bf16.mxu1 %v6233_v38 }
 0x486   :  { %4174 = vmatpush1.bf16.msra.mxu0 %v6228_v37 }
 0x487   :  { %4215 = vmatpush1.bf16.msra.mxu1 %v6231_v40  ;;  %4175 = vmatprep.subr.bf16.mxu0 %v6236_v5 }
 0x488   :  { %4216 = vmatprep.subr.bf16.mxu1 %v6239_v6 }
 0x48a   :  { %4176 = vmatpush2.bf16.msra.mxu0 %v6234_v8 }
 0x48b   :  { %4217 = vmatpush2.bf16.msra.mxu1 %v6237_v10  ;;  %4177 = vmatprep.subr.bf16.mxu0 %v6242_v13 }
 0x48c   :  { %4218 = vmatprep.subr.bf16.mxu1 %v6245_v17 }
 0x48e   :  { %4178 = vmatpush2.bf16.msra.mxu0 %v6240_v22 }
 0x48f   :  { %4219 = vmatpush2.bf16.msra.mxu1 %v6243_v24  ;;  %4179 = vmatprep.subr.bf16.mxu0 %v6248_v53  ;;  %v2624_v24 = vrot.slane %v2611_v57, %v7039_v47  ;;  %v2628_v53 = vrot.slane %v2611_v57, %v7042_v16  ;;  %v6290_v57 = vld [vmem:[#allocation16 + $0x64] ss:$8 sps:$4 sm:$0xff]  }
 0x490   :  { %4220 = vmatprep.subr.bf16.mxu1 %v6251_v34 }
 0x492   :  { %4180 = vmatpush2.bf16.msra.mxu0 %v6246_v36 }
 0x493   :  { %4221 = vmatpush2.bf16.msra.mxu1 %v6249_v39  ;;  %4181 = vmatprep.subr.bf16.mxu0 %v6254_v43 }
 0x494   :  { %4222 = vmatprep.subr.bf16.mxu1 %v6257_v55 }
 0x496   :  { %4182 = vmatpush2.bf16.msra.mxu0 %v6252_v61 }
 0x497   :  { %4223 = vmatpush2.bf16.msra.mxu1 %v6255_v31  ;;  %4183 = vmatprep.subr.bf16.mxu0 %v6260_v41 }
 0x498   :  { %4224 = vmatprep.subr.bf16.mxu1 %v6263_v42 }
 0x49a   :  { %4184 = vmatpush2.bf16.msra.mxu0 %v6258_v44 }
 0x49b   :  { %4225 = vmatpush2.bf16.msra.mxu1 %v6261_v46  ;;  %4185 = vmatprep.subr.bf16.mxu0 %v6266_v26 }
 0x49c   :  { %4226 = vmatprep.subr.bf16.mxu1 %v6269_v19 }
 0x49e   :  { %4186 = vmatpush2.bf16.msra.mxu0 %v6264_v4 }
 0x49f   :  { %4227 = vmatpush2.bf16.msra.mxu1 %v6267_v15  ;;  %4187 = vmatprep.subr.bf16.mxu0 %v6272_v48 }
 0x4a0   :  { %4228 = vmatprep.subr.bf16.mxu1 %v6275_v49 }
 0x4a2   :  { %4188 = vmatpush2.bf16.msra.mxu0 %v6270_v50 }
 0x4a3   :  { %4229 = vmatpush2.bf16.msra.mxu1 %v6273_v51  ;;  %4189 = vmatprep.subr.bf16.mxu0 %v6278_v35  ;;  %v6282_v35 = vld [vmem:[#allocation16 + $0x70] ss:$8 sps:$4 sm:$0xff]  }
 0x4a4   :  { %4230 = vmatprep.subr.bf16.mxu1 %v6281_v52  ;;  %v6284_v52 = vld [vmem:[#allocation16 + $0x74] ss:$8 sps:$4 sm:$0xff]  }
 0x4a6   :  { %4190 = vmatpush2.bf16.msra.mxu0 %v6276_v56  ;;  %v6285_v56 = vld [vmem:[#allocation16 + $0x170] ss:$8 sps:$4 sm:$0xff]  }
 0x4a7   :  { %4231 = vmatpush2.bf16.msra.mxu1 %v6279_v11  ;;  %v6287_v11 = vld [vmem:[#allocation16 + $0x174] ss:$8 sps:$4 sm:$0xff]   ;;  %4723 = vmatprep.subr.bf16.mxu0 %v6284_v52 }
 0x4a8   :  { %4764 = vmatprep.subr.bf16.mxu1 %v6287_v11  ;;  %v6356_v52 = vld [vmem:[#allocation16 + $0xb4] ss:$8 sps:$4 sm:$0xff]   ;;  %v6354_v11 = vld [vmem:[#allocation16 + $0xb0] ss:$8 sps:$4 sm:$0xff]  }
 0x4a9   :  { %4192 = vmatmul.mubr.bf16.vlgmr.msra.gmra.mxu0 %v7176_v23  ;;  %v3947_v62 = vpop.f32.mrf.mxu0  ;;  %v3988_v9 = vpop.f32.mrf.mxu1 }
 0x4aa   :  { %4233 = vmatmul.mubr.bf16.vlgmr.msra.gmra.mxu1 %v7178_v45  ;;  %v3948_v20 = vadd.f32 %v3947_v62, %v2616_v12  ;;  %v6293_v12 = vld [vmem:[#allocation16 + $0x164] ss:$8 sps:$4 sm:$0xff]   ;;  %4724 = vmatpush1.bf16.msra.mxu0 %v6282_v35  ;;  %v6291_v62 = vld [vmem:[#allocation16 + $0x160] ss:$8 sps:$4 sm:$0xff]  }
 0x4ab   :  { %v3949_v18 = vpop.f32.mrf.mxu0  ;;  %v3990_v21 = vpop.f32.mrf.mxu1  ;;  %4765 = vmatpush1.bf16.msra.mxu1 %v6285_v56  ;;  %4725 = vmatprep.subr.bf16.mxu0 %v6290_v57  ;;  %v6351_v35 = vld [vmem:[#allocation16 + $0x1c0] ss:$8 sps:$4 sm:$0xff]   ;;  %v6359_v56 = vld [vmem:[#allocation16 + $0x1b4] ss:$8 sps:$4 sm:$0xff]   ;;  %v6357_v57 = vld [vmem:[#allocation16 + $0x1b0] ss:$8 sps:$4 sm:$0xff]  }
 0x4ac   :  { %v3989_v63 = vadd.f32 %v3988_v9, %v3948_v20  ;;  %v3950_v25 = vadd.f32 %v3949_v18, %v2620_v60  ;;  %v6288_v60 = vld [vmem:[#allocation16 + $0x60] ss:$8 sps:$4 sm:$0xff]   ;;  %v6296_v9 = vld [vmem:[#allocation16 + $0x54] ss:$8 sps:$4 sm:$0xff]   ;;  %4766 = vmatprep.subr.bf16.mxu1 %v6293_v12  ;;  %v6294_v18 = vld [vmem:[#allocation16 + $0x50] ss:$8 sps:$4 sm:$0xff]  }
 0x4ad   :  { %v3951_v7 = vpop.f32.mrf.mxu0  ;;  %v3992_v0 = vpop.f32.mrf.mxu1  ;;  %v6299_v20 = vld [vmem:[#allocation16 + $0x154] ss:$8 sps:$4 sm:$0xff]   ;;  %v6362_v12 = vld [vmem:[#allocation16 + $0xa4] ss:$8 sps:$4 sm:$0xff]  }
 0x4ae   :  { %v3991_v27 = vadd.f32 %v3990_v21, %v3950_v25  ;;  %4726 = vmatpush1.bf16.msra.mxu0 %v6288_v60  ;;  %v6297_v21 = vld [vmem:[#allocation16 + $0x150] ss:$8 sps:$4 sm:$0xff]   ;;  %v6305_v25 = vld [vmem:[#allocation16 + $0x144] ss:$8 sps:$4 sm:$0xff]   ;;  %v6300_v7 = vld [vmem:[#allocation16 + $0x40] ss:$8 sps:$4 sm:$0xff]  }
 0x4af   :  { %v3952_v14 = vpop.f32.mrf.mxu0  ;;  %v3993_v58 = vpop.f32.mrf.mxu1  ;;  %4767 = vmatpush1.bf16.msra.mxu1 %v6291_v62  ;;  %4727 = vmatprep.subr.bf16.mxu0 %v6296_v9  ;;  %v6303_v0 = vld [vmem:[#allocation16 + $0x140] ss:$8 sps:$4 sm:$0xff]   ;;  %v6365_v60 = vld [vmem:[#allocation16 + $0x1a4] ss:$8 sps:$4 sm:$0xff]  }
 0x4b0   :  { %4768 = vmatprep.subr.bf16.mxu1 %v6299_v20  ;;  %v6311_v14 = vld [vmem:[#allocation16 + $0x134] ss:$8 sps:$4 sm:$0xff]   ;;  %v6306_v58 = vld [vmem:[#allocation16 + $0x30] ss:$8 sps:$4 sm:$0xff]   ;;  %v6360_v62 = vld [vmem:[#allocation16 + $0xa0] ss:$8 sps:$4 sm:$0xff]  }
 0x4b1   :  { %v6363_v9 = vld [vmem:[#allocation16 + $0x1a0] ss:$8 sps:$4 sm:$0xff]   ;;  %v6368_v20 = vld [vmem:[#allocation16 + $0x94] ss:$8 sps:$4 sm:$0xff]  }
 0x4b2   :  { %4728 = vmatpush1.bf16.msra.mxu0 %v6294_v18  ;;  %v6371_v18 = vld [vmem:[#allocation16 + $0x194] ss:$8 sps:$4 sm:$0xff]  }
 0x4b3   :  { %4769 = vmatpush1.bf16.msra.mxu1 %v6297_v21  ;;  %v6366_v21 = vld [vmem:[#allocation16 + $0x90] ss:$8 sps:$4 sm:$0xff]  }
 0x4b4   :  { %4770 = vmatprep.subr.bf16.mxu1 %v6305_v25  ;;  %v6374_v25 = vld [vmem:[#allocation16 + $0x84] ss:$8 sps:$4 sm:$0xff]  }
 0x4b7   :  { %4771 = vmatpush1.bf16.msra.mxu1 %v6303_v0  ;;  %v6372_v0 = vld [vmem:[#allocation16 + $0x80] ss:$8 sps:$4 sm:$0xff]  }
 0x4b8   :  { %4772 = vmatprep.subr.bf16.mxu1 %v6311_v14 }
 0x4e9   :  { %v4029_v28 = vpop.f32.mrf.mxu0  ;;  %v4070_v59 = vpop.f32.mrf.mxu1 }
 0x4ea   :  { %v4030_v33 = vadd.f32 %v4029_v28, %v3989_v63  ;;  %v6302_v63 = vld [vmem:[#allocation16 + $0x44] ss:$8 sps:$4 sm:$0xff]   ;;  %v6309_v28 = vld [vmem:[#allocation16 + $0x130] ss:$8 sps:$4 sm:$0xff]  }
 0x4eb   :  { %v4031_v1 = vpop.f32.mrf.mxu0  ;;  %v4072_v54 = vpop.f32.mrf.mxu1  ;;  %4729 = vmatprep.subr.bf16.mxu0 %v6302_v63  ;;  %4773 = vmatpush1.bf16.msra.mxu1 %v6309_v28  ;;  %v6369_v63 = vld [vmem:[#allocation16 + $0x190] ss:$8 sps:$4 sm:$0xff]  }
 0x4ec   :  { %v7192_v23 = vadd.f32 %v4070_v59, %v4030_v33  ;;  %v4032_v2 = vadd.f32 %v4031_v1, %v3991_v27  ;;  %v6308_v27 = vld [vmem:[#allocation16 + $0x34] ss:$8 sps:$4 sm:$0xff]   ;;  %4730 = vmatpush1.bf16.msra.mxu0 %v6300_v7  ;;  %v6314_v59 = vld [vmem:[#allocation16 + $0x24] ss:$8 sps:$4 sm:$0xff]   ;;  %v6312_v1 = vld [vmem:[#allocation16 + $0x20] ss:$8 sps:$4 sm:$0xff]  }
 0x4ed   :  { %v4033_v30 = vpop.f32.mrf.mxu0  ;;  %v4074_v45 = vpop.f32.mrf.mxu1  ;;  %4731 = vmatprep.subr.bf16.mxu0 %v6308_v27  ;;  %v6317_v33 = vld [vmem:[#allocation16 + $0x124] ss:$8 sps:$4 sm:$0xff]   ;;  %v6375_v27 = vld [vmem:[#allocation16 + $0x180] ss:$8 sps:$4 sm:$0xff]  }
 0x4ee   :  { %v7194_v3 = vadd.f32 %v4072_v54, %v4032_v2  ;;  %v6315_v54 = vld [vmem:[#allocation16 + $0x120] ss:$8 sps:$4 sm:$0xff]   ;;  %v6320_v2 = vld [vmem:[#allocation16 + $0x14] ss:$8 sps:$4 sm:$0xff]   ;;  %4774 = vmatprep.subr.bf16.mxu1 %v6317_v33  ;;  %v6318_v45 = vld [vmem:[#allocation16 + $0x10] ss:$8 sps:$4 sm:$0xff]  }
 0x4ef   :  { %v4034_v38 = vpop.f32.mrf.mxu0  ;;  %v4075_v37 = vpop.f32.mrf.mxu1  ;;  %v6323_v30 = vld [vmem:[#allocation16 + $0x114] ss:$8 sps:$4 sm:$0xff]   ;;  %4775 = vmatpush1.bf16.msra.mxu1 %v6315_v54  ;;  %v6377_v7 = vld [vmem:[#allocation16 + $0x184] ss:$8 sps:$4 sm:$0xff]  }
 0x4f0   :  { %v4241_v42 = vadd.f32 %v7194_v3, %v7192_v23  ;;  %4732 = vmatpush1.bf16.msra.mxu0 %v6306_v58  ;;  %v6321_v38 = vld [vmem:[#allocation16 + $0x110] ss:$8 sps:$4 sm:$0xff]   ;;  %v6326_v37 = vld [vmem:[#allocation16 + $0x4] ss:$8 sps:$4 sm:$0xff]   ;;  %4776 = vmatprep.subr.bf16.mxu1 %v6323_v30  ;;  %v4293_v33 = vld [vmem:[#allocation14] sm:$0xf] }
 0x4f1   :  { %4733 = vmatprep.subr.bf16.mxu0 %v6314_v59  ;;  %v4267_v59 = vld [vmem:[#allocation13] sm:$0xf] }
 0x4f2   :  { %v4284_v54 = vrot.slane %v4267_v59, %v7042_v16  ;;  %v4280_v30 = vrot.slane %v4267_v59, %v7039_v47 }
 0x4f3   :  { %4777 = vmatpush1.bf16.msra.mxu1 %v6321_v38  ;;  %v4302_v38 = vrot.slane %v4293_v33, %v7026_v32 }
 0x4f4   :  { %4734 = vmatpush1.bf16.msra.mxu0 %v6312_v1  ;;  %v4276_v1 = vrot.slane %v4267_v59, %v7026_v32 }
 0x4f5   :  { %4735 = vmatprep.subr.bf16.mxu0 %v6320_v2  ;;  %v4272_v2 = vrot.slane %v4267_v59, %v7021_v29  ;;  %v6386_v59 = vld [vmem:[%s7312_s14 + $0x58] sm:$0xff]  }
 0x4f8   :  { %4736 = vmatpush1.bf16.msra.mxu0 %v6318_v45 }
 0x4f9   :  { %4737 = vmatprep.subr.bf16.mxu0 %v6326_v37  ;;  %v4310_v37 = vrot.slane %v4293_v33, %v7042_v16 }
 0x529   :  { %v4111_v40 = vpop.f32.mrf.mxu0 }
 0x52a   :  { %v4152_v5 = vpop.f32.mrf.mxu1  ;;  %v4112_v34 = vadd.f32 %v4111_v40, %v2624_v24  ;;  %v6329_v40 = vld [vmem:[#allocation16 + $0x104] ss:$8 sps:$4 sm:$0xff]  }
 0x52b   :  { %v4113_v6 = vpop.f32.mrf.mxu0  ;;  %4778 = vmatprep.subr.bf16.mxu1 %v6329_v40  ;;  %v4298_v40 = vrot.slane %v4293_v33, %v7021_v29 }
 0x52c   :  { %v4154_v8 = vpop.f32.mrf.mxu1  ;;  %v4114_v36 = vadd.f32 %v4113_v6, %v2628_v53  ;;  %v4153_v39 = vadd.f32 %v4152_v5, %v4112_v34  ;;  %v6324_v5 = vld [vmem:[#allocation16] ss:$8 sps:$4 sm:$0xff]  }
 0x52d   :  { %v4115_v10 = vpop.f32.mrf.mxu0  ;;  %v6327_v6 = vld [vmem:[#allocation16 + $0x100] ss:$8 sps:$4 sm:$0xff]   ;;  %4738 = vmatpush1.bf16.msra.mxu0 %v6324_v5  ;;  %v4306_v5 = vrot.slane %v4293_v33, %v7039_v47  ;;  %v6387_v33 = vld [vmem:[%s7312_s14 + $0x18] sm:$0xff]  }
 0x52e   :  { %v4156_v13 = vpop.f32.mrf.mxu1  ;;  %v4155_v55 = vadd.f32 %v4154_v8, %v4114_v36  ;;  %v6332_v8 = vld [vmem:[#allocation16 + $0xf4] ss:$8 sps:$4 sm:$0xff]   ;;  %4779 = vmatpush1.bf16.msra.mxu1 %v6327_v6 }
 0x52f   :  { %v4116_v17 = vpop.f32.mrf.mxu0  ;;  %v6335_v10 = vld [vmem:[#allocation16 + $0x1f4] ss:$8 sps:$4 sm:$0xff]   ;;  %v6330_v13 = vld [vmem:[#allocation16 + $0xf0] ss:$8 sps:$4 sm:$0xff]   ;;  %4739 = vmatprep.subr.bf16.mxu0 %v6332_v8 }
 0x530   :  { %v4157_v22 = vpop.f32.mrf.mxu1  ;;  %v6333_v17 = vld [vmem:[#allocation16 + $0x1f0] ss:$8 sps:$4 sm:$0xff]   ;;  %4780 = vmatprep.subr.bf16.mxu1 %v6335_v10 }
 0x531   :  { %4740 = vmatpush2.bf16.msra.mxu0 %v6330_v13 }
 0x532   :  { %4781 = vmatpush2.bf16.msra.mxu1 %v6333_v17 }
 0x569   :  { %v4193_v43 = vpop.f32.mrf.mxu0 }
 0x56a   :  { %v4194_v61 = vadd.f32 %v4193_v43, %v4153_v39  ;;  %v4234_v31 = vpop.f32.mrf.mxu1 }
 0x56b   :  { %v4195_v41 = vpop.f32.mrf.mxu0 }
 0x56c   :  { %v7200_v44 = vadd.f32 %v4234_v31, %v4194_v61  ;;  %v4196_v46 = vadd.f32 %v4195_v41, %v4155_v55  ;;  %v4236_v26 = vpop.f32.mrf.mxu1 }
 0x56d   :  { %v4197_v19 = vpop.f32.mrf.mxu0 }
 0x56e   :  { %v7202_v4 = vadd.f32 %v4236_v26, %v4196_v46  ;;  %v4238_v15 = vpop.f32.mrf.mxu1  ;;  %v4242_v48 = vadd.f32 %v4241_v42, %v7200_v44  ;;  %v6338_v42 = vld [vmem:[#allocation16 + $0xe4] ss:$8 sps:$4 sm:$0xff]   ;;  %v6336_v46 = vld [vmem:[#allocation16 + $0xe0] ss:$8 sps:$4 sm:$0xff]   ;;  %v6342_v19 = vld [vmem:[#allocation16 + $0xd0] ss:$8 sps:$4 sm:$0xff]  }
 0x56f   :  { %v4198_v49 = vpop.f32.mrf.mxu0  ;;  %v6339_v26 = vld [vmem:[#allocation16 + $0x1e0] ss:$8 sps:$4 sm:$0xff]   ;;  %4741 = vmatprep.subr.bf16.mxu0 %v6338_v42  ;;  %v6345_v15 = vld [vmem:[#allocation16 + $0x1d0] ss:$8 sps:$4 sm:$0xff]  }
 0x570   :  { %v4239_v50 = vpop.f32.mrf.mxu1  ;;  %v4243_v51 = vadd.f32 %v4242_v48, %v7202_v4  ;;  %4742 = vmatpush2.bf16.msra.mxu0 %v6336_v46  ;;  %v6347_v48 = vld [vmem:[#allocation16 + $0x1d4] ss:$8 sps:$4 sm:$0xff]   ;;  %v6350_v49 = vld [vmem:[#allocation16 + $0xc4] ss:$8 sps:$4 sm:$0xff]  }
 0x571   :  { %v6353_v50 = vld [vmem:[#allocation16 + $0x1c4] ss:$8 sps:$4 sm:$0xff]  }
 0x572   :  { %4244 = vadd.xlane.f32.xlu1 %v4243_v51  ;;  %v6348_v51 = vld [vmem:[#allocation16 + $0xc0] ss:$8 sps:$4 sm:$0xff]  }
 0x5fb   :  { %v4245_v22 = vpop.xlane.xlu1 %4244 }
 0x5fc   :  { %v4246_v24 = vmul.f32 0.001953125, %v4245_v22 }
 0x5fe   :  { %v7207_v53 = vsub.f32 %v7192_v23, %v4246_v24  ;;  %v7210_v34 = vsub.f32 %v7194_v3, %v4246_v24  ;;  %v7213_v36 = vsub.f32 %v7200_v44, %v4246_v24  ;;  %v7216_v39 = vsub.f32 %v7202_v4, %v4246_v24  ;;  %v6341_v44 = vld [vmem:[#allocation16 + $0x1e4] ss:$8 sps:$4 sm:$0xff]   ;;  %v6344_v4 = vld [vmem:[#allocation16 + $0xd4] ss:$8 sps:$4 sm:$0xff]  }
 0x5ff   :  { %4782 = vmatprep.subr.bf16.mxu1 %v6341_v44  ;;  %4743 = vmatprep.subr.bf16.mxu0 %v6344_v4 }
 0x600   :  { %v4251_v43 = vmul.f32 %v7207_v53, %v7207_v53  ;;  %v4252_v55 = vmul.f32 %v7210_v34, %v7210_v34  ;;  %v4253_v61 = vmul.f32 %v7213_v36, %v7213_v36  ;;  %v4254_v3 = vmul.f32 %v7216_v39, %v7216_v39  ;;  %4783 = vmatpush2.bf16.msra.mxu1 %v6339_v26 }
 0x601   :  { %4784 = vmatprep.subr.bf16.mxu1 %v6347_v48  ;;  %4744 = vmatpush2.bf16.msra.mxu0 %v6342_v19 }
 0x602   :  { %v4255_v23 = vadd.f32 %v4252_v55, %v4251_v43  ;;  %4745 = vmatprep.subr.bf16.mxu0 %v6350_v49 }
 0x604   :  { %v4256_v31 = vadd.f32 %v4255_v23, %v4253_v61  ;;  %4785 = vmatpush2.bf16.msra.mxu1 %v6345_v15 }
 0x605   :  { %4786 = vmatprep.subr.bf16.mxu1 %v6353_v50  ;;  %4746 = vmatpush2.bf16.msra.mxu0 %v6348_v51 }
 0x606   :  { %v4257_v41 = vadd.f32 %v4256_v31, %v4254_v3  ;;  %4747 = vmatprep.subr.bf16.mxu0 %v6356_v52 }
 0x608   :  { %4258 = vadd.xlane.f32.xlu1 %v4257_v41  ;;  %4787 = vmatpush2.bf16.msra.mxu1 %v6351_v35 }
 0x609   :  { %4788 = vmatprep.subr.bf16.mxu1 %v6359_v56  ;;  %4748 = vmatpush2.bf16.msra.mxu0 %v6354_v11 }
 0x60a   :  { %4749 = vmatprep.subr.bf16.mxu0 %v6362_v12  ;;  %v6378_v12 = vld [vmem:[%s7312_s14 + $0x78] sm:$0xff]  }
 0x60c   :  { %4789 = vmatpush2.bf16.msra.mxu1 %v6357_v57 }
 0x60d   :  { %4790 = vmatprep.subr.bf16.mxu1 %v6365_v60  ;;  %4750 = vmatpush2.bf16.msra.mxu0 %v6360_v62  ;;  %v6379_v60 = vld [vmem:[%s7312_s14 + $0x38] sm:$0xff]  }
 0x60e   :  { %4751 = vmatprep.subr.bf16.mxu0 %v6368_v20 }
 0x610   :  { %4791 = vmatpush2.bf16.msra.mxu1 %v6363_v9 }
 0x611   :  { %4792 = vmatprep.subr.bf16.mxu1 %v6371_v18  ;;  %4752 = vmatpush2.bf16.msra.mxu0 %v6366_v21 }
 0x612   :  { %4753 = vmatprep.subr.bf16.mxu0 %v6374_v25 }
 0x614   :  { %4793 = vmatpush2.bf16.msra.mxu1 %v6369_v63 }
 0x615   :  { %4794 = vmatprep.subr.bf16.mxu1 %v6377_v7  ;;  %4754 = vmatpush2.bf16.msra.mxu0 %v6372_v0  ;;  %v6380_v7 = vld [vmem:[%s7312_s14 + $0x70] sm:$0xff]  }
 0x616   :  { %5815 = vmatprep.subr.bf16.mxu0 %v6378_v12  ;;  %v6381_v0 = vld [vmem:[%s7312_s14 + $0x30] sm:$0xff]  }
 0x618   :  { %4795 = vmatpush2.bf16.msra.mxu1 %v6375_v27  ;;  %v6382_v27 = vld [vmem:[%s7312_s14 + $0x68] sm:$0xff]  }
 0x691   :  { %v4259_v14 = vpop.xlane.xlu1 %4258 }
 0x692   :  { %v4260_v58 = vmul.f32 0.001953125, %v4259_v14  ;;  %v6383_v14 = vld [vmem:[%s7312_s14 + $0x28] sm:$0xff]  }
 0x694   :  { %v4261_v28 = vadd.f32 1e-05, %v4260_v58  ;;  %v6384_v58 = vld [vmem:[%s7312_s14 + $0x60] sm:$0xff]  }
 0x696   :  { %6404 = vrsqrt.f32 %v4261_v28  ;;  %v6385_v28 = vld [vmem:[%s7312_s14 + $0x20] sm:$0xff]  }
 0x6a3   :  { %v6405_v45 = vpop.eup %6404 }
 0x6a4   :  { %v4264_v6 = vmul.f32 %v6405_v45, %v7210_v34  ;;  %v4266_v8 = vmul.f32 %v6405_v45, %v7216_v39  ;;  %v4263_v10 = vmul.f32 %v6405_v45, %v7207_v53  ;;  %v4265_v13 = vmul.f32 %v6405_v45, %v7213_v36  ;;  %v4391_v53 = vld [vmem:[#allocation17] sm:$0x3] }
 0x6a5   :  { %v4396_v36 = vrot.slane %v4391_v53, %v7021_v29  ;;  %v4400_v46 = vrot.slane %v4391_v53, %v7026_v32  ;;  %v6392_v45 = vld [vmem:[%s7312_s14 + $0x40] sm:$0xff]  }
 0x6a6   :  { %v4290_v17 = vmul.f32 %v4276_v1, %v4264_v6  ;;  %v4292_v22 = vmul.f32 %v4284_v54, %v4266_v8  ;;  %v4289_v24 = vmul.f32 %v4272_v2, %v4263_v10  ;;  %v4291_v43 = vmul.f32 %v4280_v30, %v4265_v13  ;;  %v6388_v1 = vld [vmem:[%s7312_s14 + $0x50] sm:$0xff]   ;;  %v6390_v2 = vld [vmem:[%s7312_s14 + $0x48] sm:$0xff]   ;;  %v4821_v6 = vld [vmem:[#allocation19] sm:$0x3] }
 0x6a7   :  { %v6389_v54 = vld [vmem:[%s7312_s14 + $0x10] sm:$0xff]   ;;  %v6391_v30 = vld [vmem:[%s7312_s14 + $0x8] sm:$0xff]   ;;  %v4826_v10 = vrot.slane %v4821_v6, %v7021_v29  ;;  %v4830_v13 = vrot.slane %v4821_v6, %v7026_v32 }
 0x6a8   :  { %v4316_v55 = vadd.f32 %v4302_v38, %v4290_v17  ;;  %v4318_v61 = vadd.f32 %v4310_v37, %v4292_v22  ;;  %v4315_v23 = vadd.f32 %v4298_v40, %v4289_v24  ;;  %v4317_v16 = vadd.f32 %v4306_v5, %v4291_v43  ;;  %v6393_v38 = vld [vmem:[%s7312_s14] sm:$0xff]   ;;  %v4835_v8 = vld [vmem:[#allocation20] sm:$0x3] }
 0x6a9   :  { %v4840_v24 = vrot.slane %v4835_v8, %v7021_v29  ;;  %v4844_v43 = vrot.slane %v4835_v8, %v7026_v32  ;;  %v6394_v32 = vld [vmem:[#allocation26 + $0x38] sm:$0xff]  }
 0x6aa   :  { %v4320_v3 = vmax.f32 %v4316_v55, 0.0  ;;  %v4322_v31 = vmax.f32 %v4318_v61, 0.0  ;;  %v4319_v41 = vmax.f32 %v4315_v23, 0.0  ;;  %v4321_v47 = vmax.f32 %v4317_v16, 0.0 }
 0x6ac   :  { %v4324_v42 = vpack.c.bf16 %v4320_v3, %v4320_v3  ;;  %v4326_v34 = vpack.c.bf16 %v4322_v31, %v4322_v31  ;;  %v4323_v44 = vpack.c.bf16 %v4319_v41, %v4319_v41  ;;  %v4325_v39 = vpack.c.bf16 %v4321_v47, %v4321_v47 }
 0x6ae   :  { %4755 = vmatprep.mubr.bf16.mxu0 %v4324_v42  ;;  %4796 = vmatprep.mubr.bf16.mxu1 %v4326_v34 }
 0x6af   :  { %4756 = vmatmul.mubr.bf16.vlgmr.msra.gmra.mxu0 %v4323_v44  ;;  %4797 = vmatmul.mubr.bf16.vlgmr.msra.gmra.mxu1 %v4325_v39  ;;  %v5787_v39 = vld [vmem:[#allocation22] ss:$0 sm:$0xff] }
 0x6b0   :  { %5816 = vmatpush3.bf16.msra.mxu0 %v6379_v60 }
 0x6b1   :  { %5817 = vmatprep.subr.bf16.mxu0 %v6380_v7 }
 0x6b4   :  { %5818 = vmatpush3.bf16.msra.mxu0 %v6381_v0  ;;  %v5168_v0 = vld [vmem:[%s7329_s23] sm:$0xf] }
 0x6b5   :  { %5819 = vmatprep.subr.bf16.mxu0 %v6382_v27  ;;  %v5806_v27 = vld [vmem:[#allocation28] ss:$0 sm:$0xff] }
 0x6b8   :  { %5820 = vmatpush3.bf16.msra.mxu0 %v6383_v14  ;;  %v5169_v14 = vunpack.c.l.bf16 %v5168_v0 }
 0x6b9   :  { %5821 = vmatprep.subr.bf16.mxu0 %v6384_v58 }
 0x6bc   :  { %5822 = vmatpush3.bf16.msra.mxu0 %v6385_v28 }
 0x6bd   :  { %5823 = vmatprep.subr.bf16.mxu0 %v6386_v59 }
 0x6c0   :  { %5824 = vmatpush3.bf16.msra.mxu0 %v6387_v33 }
 0x6c1   :  { %5825 = vmatprep.subr.bf16.mxu0 %v6388_v1 }
 0x6c4   :  { %5826 = vmatpush3.bf16.msra.mxu0 %v6389_v54 }
 0x6c5   :  { %5827 = vmatprep.subr.bf16.mxu0 %v6390_v2 }
 0x6c8   :  { %5828 = vmatpush3.bf16.msra.mxu0 %v6391_v30 }
 0x6c9   :  { %5829 = vmatprep.subr.bf16.mxu0 %v6392_v45 }
 0x6cc   :  { %5830 = vmatpush3.bf16.msra.mxu0 %v6393_v38 }
 0x76f   :  { %v4757_v26 = vpop.f32.mrf.mxu0  ;;  %v4798_v19 = vpop.f32.mrf.mxu1 }
 0x770   :  { %v4758_v4 = vadd.f32 %v4757_v26, %v4396_v36  ;;  %v6819_v26 = vmov 0.0  }
 0x771   :  { %v4759_v15 = vpop.f32.mrf.mxu0  ;;  %v4800_v48 = vpop.f32.mrf.mxu1  ;;  %5846 = vmatprep.subr.bf16.mxu1 %v6819_v26  ;;  %5862 = vmatprep.mubr.msk.bf16.mxu1 %vm6820_vm0, %v6819_v26 }
 0x772   :  { %v4760_v49 = vadd.f32 %v4759_v15, %v4400_v46  ;;  %v4799_v35 = vadd.f32 %v4798_v19, %v4758_v4  ;;  %5847 = vmatpush3.bf16.msra.mxu1 %v6394_v32 }
 0x773   :  { %v4761_v50 = vpop.f32.mrf.mxu0  ;;  %v4802_v51 = vpop.f32.mrf.mxu1  ;;  %5848 = vmatprep.subr.bf16.mxu1 %v6819_v26 }
 0x774   :  { %v4801_v52 = vadd.f32 %v4800_v48, %v4760_v49  ;;  %v6395_v49 = vld [vmem:[#allocation26 + $0x30] sm:$0xff]   ;;  %v6396_v50 = vld [vmem:[#allocation26 + $0x28] sm:$0xff]   ;;  %v6397_v51 = vld [vmem:[#allocation26 + $0x20] sm:$0xff]  }
 0x775   :  { %v4762_v56 = vpop.f32.mrf.mxu0  ;;  %v4803_v11 = vpop.f32.mrf.mxu1 }
 0x776   :  { %v4805_v57 = vadd.f32 %v4801_v52, %v4799_v35  ;;  %5849 = vmatpush3.bf16.msra.mxu1 %v6395_v49  ;;  %v6400_v56 = vld [vmem:[#allocation26 + $0x8] sm:$0xff]   ;;  %v6401_v11 = vld [vmem:[#allocation26] sm:$0xff]  }
 0x777   :  { %5850 = vmatprep.subr.bf16.mxu1 %v6819_v26 }
 0x778   :  { %4806 = vadd.xlane.f32.xlu0 %v4805_v57 }
 0x77a   :  { %5851 = vmatpush3.bf16.msra.mxu1 %v6396_v50 }
 0x77b   :  { %5852 = vmatprep.subr.bf16.mxu1 %v6819_v26 }
 0x77e   :  { %5853 = vmatpush3.bf16.msra.mxu1 %v6397_v51 }
 0x77f   :  { %5854 = vmatprep.subr.bf16.mxu1 %v6819_v26 }
 0x801   :  { %v4807_v62 = vpop.xlane.xlu0 %4806 }
 0x802   :  { %v4808_v9 = vmul.f32 0.00390625, %v4807_v62 }
 0x804   :  { %v4809_v20 = vsub.f32 %v4799_v35, %v4808_v9  ;;  %v4810_v18 = vsub.f32 %v4801_v52, %v4808_v9  ;;  %v6398_v35 = vld [vmem:[#allocation26 + $0x18] sm:$0xff]   ;;  %v6399_v52 = vld [vmem:[#allocation26 + $0x10] sm:$0xff]  }
 0x805   :  { %5855 = vmatpush3.bf16.msra.mxu1 %v6398_v35  ;;  %v5804_v9 = vld [vmem:[#allocation23] ss:$0 sm:$0xff] }
 0x806   :  { %v4811_v21 = vmul.f32 %v4809_v20, %v4809_v20  ;;  %v4812_v63 = vmul.f32 %v4810_v18, %v4810_v18  ;;  %5856 = vmatprep.subr.bf16.mxu1 %v6819_v26 }
 0x808   :  { %v4813_v25 = vadd.f32 %v4812_v63, %v4811_v21 }
 0x809   :  { %5857 = vmatpush3.bf16.msra.mxu1 %v6399_v52 }
 0x80a   :  { %4814 = vadd.xlane.f32.xlu1 %v4813_v25  ;;  %5858 = vmatprep.subr.bf16.mxu1 %v6819_v26 }
 0x80d   :  { %5859 = vmatpush3.bf16.msra.mxu1 %v6400_v56 }
 0x80e   :  { %5860 = vmatprep.subr.bf16.mxu1 %v6819_v26 }
 0x811   :  { %5861 = vmatpush3.bf16.msra.mxu1 %v6401_v11 }
 0x893   :  { %v4815_v37 = vpop.xlane.xlu1 %4814 }
 0x894   :  { %v4816_v40 = vmul.f32 0.00390625, %v4815_v37 }
 0x896   :  { %v4817_v5 = vadd.f32 1e-05, %v4816_v40 }
 0x898   :  { %6406 = vrsqrt.f32 %v4817_v5 }
 0x8a5   :  { %v6407_v17 = vpop.eup %6406 }
 0x8a6   :  { %v4820_v22 = vmul.f32 %v6407_v17, %v4810_v18  ;;  %v4819_v55 = vmul.f32 %v6407_v17, %v4809_v20  ;;  %v5805_v18 = vld [vmem:[#allocation25] ss:$0 sm:$0xff] }
 0x8a8   :  { %v4834_v61 = vmul.f32 %v4830_v13, %v4820_v22  ;;  %v4833_v23 = vmul.f32 %v4826_v10, %v4819_v55 }
 0x8aa   :  { %v4848_v16 = vadd.f32 %v4844_v43, %v4834_v61  ;;  %v4847_v3 = vadd.f32 %v4840_v24, %v4833_v23 }
 0x8ac   :  { %v4850_v31 = vmax.f32 %v4848_v16, 0.0  ;;  %v4849_v41 = vmax.f32 %v4847_v3, 0.0 }
 0x8ae   :  { %v4852_v47 = vpack.c.bf16 %v4850_v31, %v4850_v31  ;;  %v4851_v42 = vpack.c.bf16 %v4849_v41, %v4849_v41 }
 0x8b0   :  { %5020 = vmatprep.mubr.bf16.mxu0 %v4852_v47 }
 0x8b1   :  { %5021 = vmatmul.mubr.bf16.vlgmr.msra.gmra.mxu0 %v4851_v42 }
 0x971   :  { %v5831_v34 = vpop.f32.mrf.mxu0 }
 0x973   :  { %v5832_v44 = vpop.f32.mrf.mxu0 }
 0x974   :  { %v5833_v53 = vadd.f32 %v5832_v44, %v5831_v34 }
 0x975   :  { %v5834_v36 = vpop.f32.mrf.mxu0 }
 0x976   :  { %v5023_v46 = vadd.f32 %v5833_v53, %v5787_v39 }
 0x977   :  { %v5835_v29 = vpop.f32.mrf.mxu0 }
 0x978   :  { %5028 = vadd.xlane.f32.xlu0 %v5023_v46 }
 0xa01   :  { %v5029_v19 = vpop.xlane.xlu0 %5028 }
 0xa02   :  { %v5030_v4 = vmul.f32 0.0078125, %v5029_v19 }
 0xa04   :  { %v5031_v15 = vsub.f32 %v5023_v46, %v5030_v4 }
 0xa06   :  { %v5032_v48 = vmul.f32 %v5031_v15, %v5031_v15 }
 0xa08   :  { %5033 = vadd.xlane.f32.xlu1 %v5032_v48 }
 0xa91   :  { %v5034_v57 = vpop.xlane.xlu1 %5033 }
 0xa92   :  { %v5035_v12 = vmul.f32 0.0078125, %v5034_v57 }
 0xa94   :  { %v5036_v60 = vadd.f32 1e-05, %v5035_v12 }
 0xa96   :  { %6408 = vrsqrt.f32 %v5036_v60 }
 0xaa3   :  { %v6409_v62 = vpop.eup %6408 }
 0xaa4   :  { %v5038_v20 = vmul.f32 %v6409_v62, %v5031_v15 }
 0xaa6   :  { %v5046_v21 = vmul.f32 %v5804_v9, %v5038_v20 }
 0xaa8   :  { %v5054_v63 = vadd.f32 %v5805_v18, %v5046_v21 }
 0xaaa   :  { %v5055_v25 = vmax.f32 %v5054_v63, 0.0 }
 0xaac   :  { %v5056_v7 = vpack.c.bf16 %v5055_v25, %v5055_v25 }
 0xaae   :  { %5863 = vmatmul.mubr.bf16.vlgmr.msra.gmra.mxu1 %v5056_v7 }
 0xb6e   :  { %v5162_v58 = vpop.f32.mrf.mxu1 }
 0xb6f   :  { %v5163_v28 = vadd.f32 %v5806_v27, %v5162_v58 }
 0xb70   :  { %v5864_v59 = vpop.f32.mrf.mxu1 }
 0xb71   :  { %v5170_v33 = vadd.f32 %v5169_v14, %v5163_v28 }
 0xb72   :  { %v5165_v1 = vpop.f32.mrf.mxu1 }
 0xb73   :  { %5171 = vmax.xlane.f32.xlu0 %v5170_v33 }
 0xb74   :  { %v5865_v54 = vpop.f32.mrf.mxu1 }
 0xbfc   :  { %v5172_v2 = vpop.xlane.xlu0 %5171 }
 0xbfd   :  { %v5173_v30 = vsub.f32 %v5170_v33, %v5172_v2 }
 0xbff   :  { %v5174_v45 = vmul.f32 1.442695, %v5173_v30 }
 0xc01   :  { %6410 = vpow2.f32 %v5174_v45 }
 0xc0e   :  { %v6411_v38 = vpop.eup %6410 }
 0xc0f   :  { %5176 = vadd.xlane.f32.xlu1 %v6411_v38 }
 0xc98   :  { %v5177_v37 = vpop.xlane.xlu1 %5176 }
 0xc99   :  { %6412 = vrcp.f32 %v5177_v37 }
 0xca6   :  { %v6413_v40 = vpop.eup %6412 }
 0xca7   :  { %v5179_v5 = vmul.f32 %v6413_v40, %v5177_v37 }
 0xca9   :  { %v5180_v6 = vsub.f32 2.0, %v5179_v5 }
 0xcab   :  { %v5181_v8 = vmul.f32 %v6413_v40, %v5180_v6 }
 0xcad   :  { %v5182_v10 = vmul.f32 %v6411_v38, %v5181_v8 }
 0xcaf   :  { %5183 = vst [vmem:[#allocation29] sm:$0xff] %v5182_v10 }
 0xcb0   :  { %6765 = shalt.err (!%p6762_p5)
}
 0xcb1   :  { %5193 = dma.vmem_to_hbm [thread:$0]  %s5191_s11, 128, %s7318_s20, [#allocation4]  }
 0xcb2   :  { %6792 = dma.done.wait [#allocation4], 128  }
 0xcb3   :  { %6793 = vsyncadd [#allocation4], 4294967168 }
 0xcb4   :  { %5197 = vsyncpa [#allocation3], 1 }
 0xcb5   :  { %5198 = vsyncpa [#allocation6], 1 }
 0xcb6   :  { %5199 = vsyncpa [#allocation9], 1 }
 0xcb7   :  { %5200 = vsyncpa [#allocation12], 1 }
 0xcb8   :  { %5201 = vsyncpa [#allocation15], 1 }
 0xcb9   :  { %5202 = vsyncpa [#allocation18], 1 }
 0xcba   :  { %5203 = vsyncpa [#allocation21], 1 }
 0xcbb   :  { %5204 = vsyncpa [#allocation24], 1 }
 0xcbc   :  { %5205 = vsyncpa [#allocation27], 1 }
 0xcbd   :  { %5206 = vsyncpa [#allocation4], 1 }

// kernel: _pt_forward_impl.1
= control target key start
LH: loop header
LB: loop body
LE: loop exit
PB: predicated region body
PF: predicated region fallthrough
CT: control target
= control target key end

     0   :  { %s7298_s0 = inlined_call_operand.vmem [shape: bf16[8,512], index: 0, kind: input, shape index: {}]   ;;  %s7299_s1 = inlined_call_operand.vmem [shape: bf16[8,128], index: 1, kind: input, shape index: {}]   ;;  %s7300_s2 = inlined_call_operand.hbm [shape: bf16[512,1024], index: 2, kind: input, shape index: {}]   ;;  %s7301_s3 = inlined_call_operand.hbm [shape: f32[1,1024], index: 3, kind: input, shape index: {}]   ;;  %s7302_s4 = inlined_call_operand.hbm [shape: f32[1,1024], index: 4, kind: input, shape index: {}]   ;;  %s7303_s5 = inlined_call_operand.hbm [shape: f32[1,1024], index: 5, kind: input, shape index: {}]   ;;  %s7304_s6 = inlined_call_operand.hbm [shape: bf16[1024,512], index: 6, kind: input, shape index: {}]   ;;  %s7305_s7 = inlined_call_operand.hbm [shape: f32[1,512], index: 7, kind: input, shape index: {}]   ;;  %s7306_s8 = inlined_call_operand.hbm [shape: f32[1,512], index: 8, kind: input, shape index: {}]   ;;  %s7307_s9 = inlined_call_operand.hbm [shape: f32[1,512], index: 9, kind: input, shape index: {}]   ;;  %s7308_s10 = inlined_call_operand.hbm [shape: bf16[512,256], index: 10, kind: input, shape index: {}]   ;;  %s7309_s11 = inlined_call_operand.hbm [shape: f32[1,256], index: 11, kind: input, shape index: {}]   ;;  %s7310_s12 = inlined_call_operand.hbm [shape: f32[1,256], index: 12, kind: input, shape index: {}]   ;;  %s7311_s13 = inlined_call_operand.hbm [shape: f32[1,256], index: 13, kind: input, shape index: {}]   ;;  %s7312_s14 = inlined_call_operand.vmem [shape: bf16[256,128], index: 14, kind: input, shape index: {}]   ;;  %s7313_s15 = inlined_call_operand.hbm [shape: f32[1,128], index: 15, kind: input, shape index: {}]   ;;  %s7314_s16 = inlined_call_operand.hbm [shape: f32[1,128], index: 16, kind: input, shape index: {}]   ;;  %s7315_s17 = inlined_call_operand.hbm [shape: f32[1,128], index: 17, kind: input, shape index: {}]   ;;  %s7316_s18 = inlined_call_operand.hbm [shape: bf16[128,128], index: 18, kind: input, shape index: {}]   ;;  %s7317_s19 = inlined_call_operand.hbm [shape: f32[1,128], index: 19, kind: input, shape index: {}]   ;;  %s7318_s20 = inlined_call_operand.hbm [shape: f32[8,128], index: 20, kind: output, shape index: {}]  }
   0x1   :  { %7320 = sst [smem:[#allocation40_spill]] %s7298_s0 }
   0x2   :  { %7321 = sst [smem:[#allocation41_spill]] %s7299_s1 }
   0x3   :  { %7322 = sst [smem:[#allocation42_spill]] %s7300_s2 }
   0x4   :  { %7323 = sst [smem:[#allocation43_spill]] %s7301_s3 }
   0x5   :  { %7324 = sst [smem:[#allocation44_spill]] %s7302_s4 }
   0x6   :  { %25 = vsyncpa [#allocation3], 0 }
   0x7   :  { %26 = vsyncpa [#allocation6], 0 }
   0x8   :  { %27 = vsyncpa [#allocation9], 0 }
   0x9   :  { %28 = vsyncpa [#allocation12], 0 }
   0xa   :  { %29 = vsyncpa [#allocation15], 0 }
   0xb   :  { %30 = vsyncpa [#allocation18], 0 }
   0xc   :  { %31 = vsyncpa [#allocation21], 0 }
   0xd   :  { %32 = vsyncpa [#allocation24], 0 }
   0xe   :  { %33 = vsyncpa [#allocation27], 0 }
   0xf   :  { %34 = vsyncpa [#allocation4], 0  ;;  %s6794_s1 = smov [#allocation5]   ;;  %s6795_s23 = smov [#allocation8]  }
  0x10   :  { %s57_s22 = sshll.u32 %s6794_s1, 4  ;;  %s77_s24 = sshll.u32 %s6795_s23, 4  ;;  %s58_s22 = int_to_ptr.vmem [resolvable:$true] %s57_s22  ;;  %s78_s24 = int_to_ptr.vmem [resolvable:$true] %s77_s24 }
  0x11   :  { %s6422_s2 = scalar_lea.vmem %s58_s22, 128  ;;  %p6427_p1 = scmp.lt.s32.totalorder %s58_s22, %s58_s22 }
  0x12   :  { %p6423_p0 = scmp.ne.s32.totalorder %s58_s22, %s6422_s2  ;;  %p6428_p2 = scmp.lt.s32.totalorder %s6422_s2, %s6422_s2 }
  0x14   :  { %p6429_p3 = por %p6428_p2, %p6427_p1 }
  0x16   :  { %p6430_p4 = pnand %p6429_p3, %p6423_p0 }
  0x18   :  { %6433 = shalt.err (!%p6430_p4)
}
  0x19   :  { %s7325_s26 = sld [smem:[#allocation43_spill]]  ;;  %s6442_s27 = scalar_lea.vmem %s78_s24, 128 }
  0x1a   :  { %p6443_p5 = scmp.ne.s32.totalorder %s78_s24, %s6442_s27  ;;  %p6447_p6 = scmp.lt.s32.totalorder %s78_s24, %s78_s24 }
  0x1b   :  { %p6448_p7 = scmp.lt.s32.totalorder %s6442_s27, %s6442_s27 }
  0x1d   :  { %p6449_p8 = por %p6448_p7, %p6447_p6 }
  0x1f   :  { %60 = dma.hbm_to_vmem [thread:$0]  %s7325_s26, 128, %s58_s22, [#allocation6]  }
  0x20   :  { %p6450_p9 = pnand %p6449_p8, %p6443_p5 }
  0x22   :  { %6453 = shalt.err (!%p6450_p9)
}
  0x23   :  { %80 = dma.hbm_to_vmem [thread:$0]  %s7303_s5, 128, %s78_s24, [#allocation9]  }
  0x24   :  { %s6796_s29 = smov [#allocation11]   ;;  %s6797_s0 = smov [#allocation14]  }
  0x25   :  { %s99_s30 = sshll.u32 %s6796_s29, 4  ;;  %s119_s21 = sshll.u32 %s6797_s0, 4  ;;  %s100_s30 = int_to_ptr.vmem [resolvable:$true] %s99_s30  ;;  %s120_s21 = int_to_ptr.vmem [resolvable:$true] %s119_s21 }
  0x26   :  { %s6462_s1 = scalar_lea.vmem %s100_s30, 64  ;;  %p6467_p11 = scmp.lt.s32.totalorder %s100_s30, %s100_s30 }
  0x27   :  { %p6463_p10 = scmp.ne.s32.totalorder %s100_s30, %s6462_s1  ;;  %p6468_p12 = scmp.lt.s32.totalorder %s6462_s1, %s6462_s1 }
  0x29   :  { %p6469_p13 = por %p6468_p12, %p6467_p11 }
  0x2b   :  { %p6470_p0 = pnand %p6469_p13, %p6463_p10 }
  0x2d   :  { %6473 = shalt.err (!%p6470_p0)
}
  0x2e   :  { %102 = dma.hbm_to_vmem [thread:$0]  %s7305_s7, 64, %s100_s30, [#allocation12]  }
  0x2f   :  { %s6482_s2 = scalar_lea.vmem %s120_s21, 64  ;;  %p6487_p2 = scmp.lt.s32.totalorder %s120_s21, %s120_s21 }
  0x30   :  { %p6483_p1 = scmp.ne.s32.totalorder %s120_s21, %s6482_s2  ;;  %p6488_p3 = scmp.lt.s32.totalorder %s6482_s2, %s6482_s2 }
  0x32   :  { %p6489_p4 = por %p6488_p3, %p6487_p2 }
  0x34   :  { %p6490_p5 = pnand %p6489_p4, %p6483_p1 }
  0x36   :  { %6493 = shalt.err (!%p6490_p5)
}
  0x37   :  { %122 = dma.hbm_to_vmem [thread:$0]  %s7307_s9, 64, %s120_s21, [#allocation15]  }
  0x38   :  { %s6798_s25 = smov [#allocation17]   ;;  %s6799_s26 = smov [#allocation20]  }
  0x39   :  { %s141_s3 = sshll.u32 %s6798_s25, 4  ;;  %s161_s27 = sshll.u32 %s6799_s26, 4  ;;  %s142_s3 = int_to_ptr.vmem [resolvable:$true] %s141_s3  ;;  %s162_s27 = int_to_ptr.vmem [resolvable:$true] %s161_s27 }
  0x3a   :  { %s6502_s28 = scalar_lea.vmem %s142_s3, 32  ;;  %p6507_p7 = scmp.lt.s32.totalorder %s142_s3, %s142_s3 }
  0x3b   :  { %p6503_p6 = scmp.ne.s32.totalorder %s142_s3, %s6502_s28  ;;  %p6508_p8 = scmp.lt.s32.totalorder %s6502_s28, %s6502_s28 }
  0x3d   :  { %p6509_p9 = por %p6508_p8, %p6507_p7 }
  0x3f   :  { %p6510_p10 = pnand %p6509_p9, %p6503_p6 }
  0x41   :  { %6513 = shalt.err (!%p6510_p10)
}
  0x42   :  { %144 = dma.hbm_to_vmem [thread:$0]  %s7309_s11, 32, %s142_s3, [#allocation18]  }
  0x43   :  { %s6522_s29 = scalar_lea.vmem %s162_s27, 32  ;;  %p6527_p12 = scmp.lt.s32.totalorder %s162_s27, %s162_s27 }
  0x44   :  { %p6523_p11 = scmp.ne.s32.totalorder %s162_s27, %s6522_s29  ;;  %p6528_p13 = scmp.lt.s32.totalorder %s6522_s29, %s6522_s29 }
  0x46   :  { %p6529_p0 = por %p6528_p13, %p6527_p12 }
  0x48   :  { %p6530_p1 = pnand %p6529_p0, %p6523_p11 }
  0x4a   :  { %6533 = shalt.err (!%p6530_p1)
}
  0x4b   :  { %164 = dma.hbm_to_vmem [thread:$0]  %s7311_s13, 32, %s162_s27, [#allocation21]  }
  0x4c   :  { %s6800_s0 = smov [#allocation23]   ;;  %s6801_s1 = smov [#allocation26]  }
  0x4d   :  { %s183_s21 = sshll.u32 %s6800_s0, 4  ;;  %s202_s22 = sshll.u32 %s6801_s1, 4  ;;  %s184_s21 = int_to_ptr.vmem [resolvable:$true] %s183_s21  ;;  %s203_s22 = int_to_ptr.vmem [resolvable:$true] %s202_s22 }
  0x4e   :  { %s6542_s23 = scalar_lea.vmem %s184_s21, 16  ;;  %s6546_s11 = scalar_lea.vmem %s184_s21, 32 }
  0x4f   :  { %p6543_p2 = scmp.ne.s32.totalorder %s184_s21, %s6542_s23  ;;  %p6547_p3 = scmp.lt.s32.totalorder %s184_s21, %s184_s21 }
  0x50   :  { %p6548_p4 = scmp.lt.s32.totalorder %s6546_s11, %s6542_s23 }
  0x52   :  { %p6549_p5 = por %p6548_p4, %p6547_p3 }
  0x54   :  { %p6550_p6 = pnand %p6549_p5, %p6543_p2 }
  0x56   :  { %6553 = shalt.err (!%p6550_p6)
}
  0x57   :  { %186 = dma.hbm_to_vmem [thread:$0]  %s7314_s16, 16, %s184_s21, [#allocation24]  }
  0x58   :  { %s6562_s24 = scalar_lea.vmem %s203_s22, 1024  ;;  %p6567_p8 = scmp.lt.s32.totalorder %s203_s22, %s203_s22 }
  0x59   :  { %p6563_p7 = scmp.ne.s32.totalorder %s203_s22, %s6562_s24  ;;  %p6568_p9 = scmp.lt.s32.totalorder %s6562_s24, %s6562_s24 }
  0x5b   :  { %p6569_p10 = por %p6568_p9, %p6567_p8 }
  0x5d   :  { %p6570_p11 = pnand %p6569_p10, %p6563_p7 }
  0x5f   :  { %6573 = shalt.err (!%p6570_p11)
}
  0x60   :  { %s6802_s13 = smov 64   ;;  %s6803_s25 = smov 4  }
  0x61   :  { %208 = dma.hbm_to_vmem [thread:$0]  %s7316_s18, 1024, %s203_s22, [#allocation27], %s6802_s13, %s6802_s13, %s6803_s25  }
  0x62   :  { %s6804_s27 = smov [#allocation2]  }
  0x63   :  { %s44_s28 = sshll.u32 %s6804_s27, 4  ;;  %s45_s28 = int_to_ptr.vmem [resolvable:$true] %s44_s28 }
  0x64   :  { %s6582_s7 = scalar_lea.vmem %s45_s28, 32768  ;;  %p6587_p13 = scmp.lt.s32.totalorder %s45_s28, %s45_s28 }
  0x65   :  { %p6583_p12 = scmp.ne.s32.totalorder %s45_s28, %s6582_s7  ;;  %p6588_p0 = scmp.lt.s32.totalorder %s6582_s7, %s6582_s7 }
  0x67   :  { %p6589_p1 = por %p6588_p0, %p6587_p13 }
  0x69   :  { %p6590_p2 = pnand %p6589_p1, %p6583_p12 }
  0x6b   :  { %6593 = shalt.err (!%p6590_p2)
}
  0x6c   :  { %s6805_s16 = smov 512   ;;  %s6806_s4 = smov 32  }
  0x6d   :  { %s7326_s30 = sld [smem:[#allocation42_spill]]  ;;  %s6807_s0 = smov [#allocation7]  }
  0x6e   :  { %s67_s21 = sshll.u32 %s6807_s0, 4  ;;  %s6808_s18 = smov [#allocation10]   ;;  %s68_s21 = int_to_ptr.vmem [resolvable:$true] %s67_s21 }
  0x6f   :  { %s86_s1 = sshll.u32 %s6808_s18, 4  ;;  %s6602_s22 = scalar_lea.vmem %s68_s21, 128  ;;  %s87_s1 = int_to_ptr.vmem [resolvable:$true] %s86_s1 }
  0x70   :  { %p6603_p3 = scmp.ne.s32.totalorder %s68_s21, %s6602_s22  ;;  %p6607_p4 = scmp.lt.s32.totalorder %s68_s21, %s68_s21 }
  0x71   :  { %p6608_p5 = scmp.lt.s32.totalorder %s6602_s22, %s6602_s22 }
  0x73   :  { %50 = dma.hbm_to_vmem [thread:$0]  %s7326_s30, 32768, %s45_s28, [#allocation3], %s6805_s16, %s6805_s16, %s6806_s4  }
  0x74   :  { %p6609_p6 = por %p6608_p5, %p6607_p4 }
  0x76   :  { %p6610_p7 = pnand %p6609_p6, %p6603_p3 }
  0x78   :  { %6613 = shalt.err (!%p6610_p7)
}
  0x79   :  { %s7327_s2 = sld [smem:[#allocation44_spill]]  ;;  %s6622_s5 = scalar_lea.vmem %s87_s1, 32768 }
  0x7a   :  { %p6623_p8 = scmp.ne.s32.totalorder %s87_s1, %s6622_s5  ;;  %p6627_p9 = scmp.lt.s32.totalorder %s87_s1, %s87_s1 }
  0x7b   :  { %p6628_p10 = scmp.lt.s32.totalorder %s6622_s5, %s6622_s5 }
  0x7d   :  { %p6629_p11 = por %p6628_p10, %p6627_p9 }
  0x7f   :  { %70 = dma.hbm_to_vmem [thread:$0]  %s7327_s2, 128, %s68_s21, [#allocation6]  }
  0x80   :  { %p6630_p12 = pnand %p6629_p11, %p6623_p8 }
  0x82   :  { %6633 = shalt.err (!%p6630_p12)
}
  0x83   :  { %s6809_s24 = smov 256   ;;  %s6810_s13 = smov 16  }
  0x84   :  { %92 = dma.hbm_to_vmem [thread:$0]  %s7304_s6, 32768, %s87_s1, [#allocation9], %s6809_s24, %s6809_s24, %s6810_s13  }
  0x85   :  { %s6811_s26 = smov [#allocation13]   ;;  %s6812_s28 = smov [#allocation16]  }
  0x86   :  { %s109_s27 = sshll.u32 %s6811_s26, 4  ;;  %s128_s7 = sshll.u32 %s6812_s28, 4  ;;  %s110_s27 = int_to_ptr.vmem [resolvable:$true] %s109_s27  ;;  %s129_s7 = int_to_ptr.vmem [resolvable:$true] %s128_s7 }
  0x87   :  { %s6642_s16 = scalar_lea.vmem %s110_s27, 64  ;;  %p6647_p0 = scmp.lt.s32.totalorder %s110_s27, %s110_s27 }
  0x88   :  { %p6643_p13 = scmp.ne.s32.totalorder %s110_s27, %s6642_s16  ;;  %p6648_p1 = scmp.lt.s32.totalorder %s6642_s16, %s6642_s16 }
  0x8a   :  { %p6649_p2 = por %p6648_p1, %p6647_p0 }
  0x8c   :  { %p6650_p3 = pnand %p6649_p2, %p6643_p13 }
  0x8e   :  { %6653 = shalt.err (!%p6650_p3)
}
  0x8f   :  { %112 = dma.hbm_to_vmem [thread:$0]  %s7306_s8, 64, %s110_s27, [#allocation12]  }
  0x90   :  { %s6662_s9 = scalar_lea.vmem %s129_s7, 8192  ;;  %p6667_p5 = scmp.lt.s32.totalorder %s129_s7, %s129_s7 }
  0x91   :  { %p6663_p4 = scmp.ne.s32.totalorder %s129_s7, %s6662_s9  ;;  %p6668_p6 = scmp.lt.s32.totalorder %s6662_s9, %s6662_s9 }
  0x93   :  { %p6669_p7 = por %p6668_p6, %p6667_p5 }
  0x95   :  { %p6670_p8 = pnand %p6669_p7, %p6663_p4 }
  0x97   :  { %6673 = shalt.err (!%p6670_p8)
}
  0x98   :  { %s6813_s6 = smov 128   ;;  %s6814_s30 = smov 8  }
  0x99   :  { %134 = dma.hbm_to_vmem [thread:$0]  %s7308_s10, 8192, %s129_s7, [#allocation15], %s6813_s6, %s6813_s6, %s6814_s30  }
  0x9a   :  { %s6815_s18 = smov [#allocation19]   ;;  %s6816_s22 = smov [#allocation22]  }
  0x9b   :  { %s151_s1 = sshll.u32 %s6815_s18, 4  ;;  %s173_s23 = sshll.u32 %s6816_s22, 4  ;;  %s152_s1 = int_to_ptr.vmem [resolvable:$true] %s151_s1  ;;  %s174_s23 = int_to_ptr.vmem [resolvable:$true] %s173_s23 }
  0x9c   :  { %s6682_s8 = scalar_lea.vmem %s152_s1, 32  ;;  %p6687_p10 = scmp.lt.s32.totalorder %s152_s1, %s152_s1 }
  0x9d   :  { %p6683_p9 = scmp.ne.s32.totalorder %s152_s1, %s6682_s8  ;;  %p6688_p11 = scmp.lt.s32.totalorder %s6682_s8, %s6682_s8 }
  0x9f   :  { %p6689_p12 = por %p6688_p11, %p6687_p10 }
  0xa1   :  { %p6690_p13 = pnand %p6689_p12, %p6683_p9 }
  0xa3   :  { %6693 = shalt.err (!%p6690_p13)
}
  0xa4   :  { %154 = dma.hbm_to_vmem [thread:$0]  %s7310_s12, 32, %s152_s1, [#allocation18]  }
  0xa5   :  { %s6702_s5 = scalar_lea.vmem %s174_s23, 16  ;;  %s6706_s10 = scalar_lea.vmem %s174_s23, 32 }
  0xa6   :  { %p6703_p0 = scmp.ne.s32.totalorder %s174_s23, %s6702_s5  ;;  %p6707_p1 = scmp.lt.s32.totalorder %s174_s23, %s174_s23 }
  0xa7   :  { %p6708_p2 = scmp.lt.s32.totalorder %s6706_s10, %s6702_s5 }
  0xa9   :  { %p6709_p3 = por %p6708_p2, %p6707_p1 }
  0xab   :  { %p6710_p4 = pnand %p6709_p3, %p6703_p0 }
  0xad   :  { %6713 = shalt.err (!%p6710_p4)
}
  0xae   :  { %176 = dma.hbm_to_vmem [thread:$0]  %s7313_s15, 16, %s174_s23, [#allocation21]  }
  0xaf   :  { %s6817_s25 = smov [#allocation25]   ;;  %s6818_s26 = smov [#allocation28]  }
  0xb0   :  { %s193_s3 = sshll.u32 %s6817_s25, 4  ;;  %s215_s27 = sshll.u32 %s6818_s26, 4  ;;  %s194_s3 = int_to_ptr.vmem [resolvable:$true] %s193_s3  ;;  %s216_s27 = int_to_ptr.vmem [resolvable:$true] %s215_s27 }
  0xb1   :  { %s6722_s28 = scalar_lea.vmem %s194_s3, 16  ;;  %s6726_s12 = scalar_lea.vmem %s194_s3, 32 }
  0xb2   :  { %p6723_p5 = scmp.ne.s32.totalorder %s194_s3, %s6722_s28  ;;  %p6727_p6 = scmp.lt.s32.totalorder %s194_s3, %s194_s3 }
  0xb3   :  { %p6728_p7 = scmp.lt.s32.totalorder %s6726_s12, %s6722_s28 }
  0xb5   :  { %p6729_p8 = por %p6728_p7, %p6727_p6 }
  0xb7   :  { %p6730_p9 = pnand %p6729_p8, %p6723_p5 }
  0xb9   :  { %6733 = shalt.err (!%p6730_p9)
}
  0xba   :  { %196 = dma.hbm_to_vmem [thread:$0]  %s7315_s17, 16, %s194_s3, [#allocation24]  }
  0xbb   :  { %s6742_s4 = scalar_lea.vmem %s216_s27, 16  ;;  %s6746_s15 = scalar_lea.vmem %s216_s27, 32 }
  0xbc   :  { %p6743_p10 = scmp.ne.s32.totalorder %s216_s27, %s6742_s4  ;;  %p6747_p11 = scmp.lt.s32.totalorder %s216_s27, %s216_s27 }
  0xbd   :  { %p6748_p12 = scmp.lt.s32.totalorder %s6746_s15, %s6742_s4 }
  0xbf   :  { %p6749_p13 = por %p6748_p12, %p6747_p11 }
  0xc1   :  { %p6750_p0 = pnand %p6749_p13, %p6743_p10 }
  0xc3   :  { %6753 = shalt.err (!%p6750_p0)
}
  0xc4   :  { %218 = dma.hbm_to_vmem [thread:$0]  %s7317_s19, 16, %s216_s27, [#allocation27]  }
  0xc5   :  { %6774 = dma.done.wait [#allocation3], 32768  }
  0xc6   :  { %6775 = vsyncadd [#allocation3], 4294934528 }
  0xc7   :  { %6776 = dma.done.wait [#allocation6], 256  }
  0xc8   :  { %6777 = vsyncadd [#allocation6], 4294967040 }
  0xc9   :  { %6778 = dma.done.wait [#allocation9], 32896  }
  0xca   :  { %6779 = vsyncadd [#allocation9], 4294934400 }
  0xcb   :  { %6780 = dma.done.wait [#allocation12], 128  }
  0xcc   :  { %6781 = vsyncadd [#allocation12], 4294967168 }
  0xcd   :  { %6782 = dma.done.wait [#allocation15], 8256  }
  0xce   :  { %6783 = vsyncadd [#allocation15], 4294959040 }
  0xcf   :  { %6784 = dma.done.wait [#allocation18], 64  }
  0xd0   :  { %6785 = vsyncadd [#allocation18], 4294967232 }
  0xd1   :  { %6786 = dma.done.wait [#allocation21], 48  }
  0xd2   :  { %6787 = vsyncadd [#allocation21], 4294967248 }
  0xd3   :  { %6788 = dma.done.wait [#allocation24], 32  }
  0xd4   :  { %6789 = vsyncadd [#allocation24], 4294967264 }
  0xd5   :  { %6790 = dma.done.wait [#allocation27], 1040  }
  0xd6   :  { %6791 = vsyncadd [#allocation27], 4294966256  ;;  %v329_v0 = vld [vmem:[#allocation2 + $0x1c0] sm:$0xff]  ;;  %s7328_s6 = sld [smem:[#allocation40_spill]]  ;;  %vm6820_vm0 = vmmov 0   ;;  %s6821_s8 = smov [#allocation29]  }
  0xd7   :  { %v333_v1 = vld [vmem:[#allocation2 + $0x1e0] sm:$0xff]  ;;  %s7329_s23 = sld [smem:[#allocation41_spill]]  ;;  %s5190_s11 = sshll.u32 %s6821_s8, 4  ;;  %s5191_s11 = int_to_ptr.vmem [resolvable:$true] %s5190_s11 }
  0xd8   :  { %v457_v2 = vld [vmem:[#allocation2 + $0x5c0] sm:$0xff]  ;;  %v5268_v3 = vcombine.high %v329_v0, %v333_v1  ;;  %v5267_v5 = vcombine.low %v329_v0, %v333_v1  ;;  %s6754_s2 = scalar_lea.vmem %s5191_s11, 128  ;;  %p6759_p2 = scmp.lt.s32.totalorder %s5191_s11, %s5191_s11 }
  0xd9   :  { %v461_v4 = vld [vmem:[#allocation2 + $0x5e0] sm:$0xff]  ;;  %p6755_p1 = scmp.ne.s32.totalorder %s5191_s11, %s6754_s2  ;;  %p6760_p3 = scmp.lt.s32.totalorder %s6754_s2, %s6754_s2 }
  0xda   :  { %v321_v6 = vld [vmem:[#allocation2 + $0x180] sm:$0xff]  ;;  %v5396_v8 = vcombine.high %v457_v2, %v461_v4  ;;  %v5395_v9 = vcombine.low %v457_v2, %v461_v4  ;;  %1865 = vmatprep.subr.bf16.mxu0 %v5268_v3 }
  0xdb   :  { %v325_v7 = vld [vmem:[#allocation2 + $0x1a0] sm:$0xff]  ;;  %1866 = vmatpush1.bf16.msra.mxu0 %v5267_v5  ;;  %p6761_p4 = por %p6760_p3, %p6759_p2 }
  0xdc   :  { %v5260_v10 = vcombine.high %v321_v6, %v325_v7  ;;  %v449_v11 = vld [vmem:[#allocation2 + $0x580] sm:$0xff]  ;;  %1906 = vmatprep.subr.bf16.mxu1 %v5396_v8  ;;  %v5259_v18 = vcombine.low %v321_v6, %v325_v7  ;;  %v6986_v54 = vld [vmem:[%s7328_s6 + $0x8] sm:$0xff] }
  0xdd   :  { %v453_v12 = vld [vmem:[#allocation2 + $0x5a0] sm:$0xff]  ;;  %1907 = vmatpush1.bf16.msra.mxu1 %v5395_v9  ;;  %v6994_v59 = vcombine.high %v6986_v54, %v6986_v54  ;;  %p6762_p5 = pnand %p6761_p4, %p6755_p1 }
  0xde   :  { %v313_v13 = vld [vmem:[#allocation2 + $0x140] sm:$0xff]  ;;  %v5388_v14 = vcombine.high %v449_v11, %v453_v12  ;;  %1867 = vmatprep.subr.bf16.mxu0 %v5260_v10  ;;  %v5387_v19 = vcombine.low %v449_v11, %v453_v12 }
  0xdf   :  { %v317_v15 = vld [vmem:[#allocation2 + $0x160] sm:$0xff]  ;;  %1868 = vmatpush1.bf16.msra.mxu0 %v5259_v18  ;;  %1938 = vmatprep.mubr.bf16.mxu1 %v6994_v59 }
  0xe0   :  { %v441_v16 = vld [vmem:[#allocation2 + $0x540] sm:$0xff]  ;;  %v5252_v20 = vcombine.high %v313_v13, %v317_v15  ;;  %1908 = vmatprep.subr.bf16.mxu1 %v5388_v14  ;;  %v5251_v26 = vcombine.low %v313_v13, %v317_v15 }
  0xe1   :  { %v445_v17 = vld [vmem:[#allocation2 + $0x560] sm:$0xff]  ;;  %1909 = vmatpush1.bf16.msra.mxu1 %v5387_v19 }
  0xe2   :  { %v5380_v21 = vcombine.high %v441_v16, %v445_v17  ;;  %v305_v22 = vld [vmem:[#allocation2 + $0x100] sm:$0xff]  ;;  %1869 = vmatprep.subr.bf16.mxu0 %v5252_v20  ;;  %v5379_v27 = vcombine.low %v441_v16, %v445_v17 }
  0xe3   :  { %v309_v23 = vld [vmem:[#allocation2 + $0x120] sm:$0xff]  ;;  %1870 = vmatpush1.bf16.msra.mxu0 %v5251_v26 }
  0xe4   :  { %v433_v24 = vld [vmem:[#allocation2 + $0x500] sm:$0xff]  ;;  %v5244_v28 = vcombine.high %v305_v22, %v309_v23  ;;  %1910 = vmatprep.subr.bf16.mxu1 %v5380_v21  ;;  %v5243_v34 = vcombine.low %v305_v22, %v309_v23 }
  0xe5   :  { %v437_v25 = vld [vmem:[#allocation2 + $0x520] sm:$0xff]  ;;  %1911 = vmatpush1.bf16.msra.mxu1 %v5379_v27 }
  0xe6   :  { %v5372_v29 = vcombine.high %v433_v24, %v437_v25  ;;  %v297_v30 = vld [vmem:[#allocation2 + $0xc0] sm:$0xff]  ;;  %1871 = vmatprep.subr.bf16.mxu0 %v5244_v28  ;;  %v5371_v35 = vcombine.low %v433_v24, %v437_v25 }
  0xe7   :  { %v301_v31 = vld [vmem:[#allocation2 + $0xe0] sm:$0xff]  ;;  %1872 = vmatpush1.bf16.msra.mxu0 %v5243_v34 }
  0xe8   :  { %v425_v32 = vld [vmem:[#allocation2 + $0x4c0] sm:$0xff]  ;;  %v5236_v36 = vcombine.high %v297_v30, %v301_v31  ;;  %1912 = vmatprep.subr.bf16.mxu1 %v5372_v29  ;;  %v5235_v42 = vcombine.low %v297_v30, %v301_v31 }
  0xe9   :  { %v429_v33 = vld [vmem:[#allocation2 + $0x4e0] sm:$0xff]  ;;  %1913 = vmatpush1.bf16.msra.mxu1 %v5371_v35 }
  0xea   :  { %v5364_v37 = vcombine.high %v425_v32, %v429_v33  ;;  %v289_v38 = vld [vmem:[#allocation2 + $0x80] sm:$0xff]  ;;  %1873 = vmatprep.subr.bf16.mxu0 %v5236_v36  ;;  %v5363_v43 = vcombine.low %v425_v32, %v429_v33 }
  0xeb   :  { %v293_v39 = vld [vmem:[#allocation2 + $0xa0] sm:$0xff]  ;;  %1874 = vmatpush1.bf16.msra.mxu0 %v5235_v42 }
  0xec   :  { %v417_v40 = vld [vmem:[#allocation2 + $0x480] sm:$0xff]  ;;  %v5228_v44 = vcombine.high %v289_v38, %v293_v39  ;;  %1914 = vmatprep.subr.bf16.mxu1 %v5364_v37  ;;  %v5227_v50 = vcombine.low %v289_v38, %v293_v39 }
  0xed   :  { %v421_v41 = vld [vmem:[#allocation2 + $0x4a0] sm:$0xff]  ;;  %1915 = vmatpush1.bf16.msra.mxu1 %v5363_v43 }
  0xee   :  { %v5356_v45 = vcombine.high %v417_v40, %v421_v41  ;;  %v281_v46 = vld [vmem:[#allocation2 + $0x40] sm:$0xff]  ;;  %1875 = vmatprep.subr.bf16.mxu0 %v5228_v44  ;;  %v5355_v51 = vcombine.low %v417_v40, %v421_v41 }
  0xef   :  { %v285_v47 = vld [vmem:[#allocation2 + $0x60] sm:$0xff]  ;;  %1876 = vmatpush1.bf16.msra.mxu0 %v5227_v50 }
  0xf0   :  { %v409_v48 = vld [vmem:[#allocation2 + $0x440] sm:$0xff]  ;;  %v5220_v52 = vcombine.high %v281_v46, %v285_v47  ;;  %1916 = vmatprep.subr.bf16.mxu1 %v5356_v45  ;;  %v5219_v62 = vcombine.low %v281_v46, %v285_v47 }
  0xf1   :  { %v413_v49 = vld [vmem:[#allocation2 + $0x460] sm:$0xff]  ;;  %1917 = vmatpush1.bf16.msra.mxu1 %v5355_v51 }
  0xf2   :  { %v6981_v53 = vld [vmem:[%s7328_s6] sm:$0xff]  ;;  %v5348_v55 = vcombine.high %v409_v48, %v413_v49  ;;  %1877 = vmatprep.subr.bf16.mxu0 %v5220_v52  ;;  %v5347_v63 = vcombine.low %v409_v48, %v413_v49 }
  0xf3   :  { %v273_v56 = vld [vmem:[#allocation2] sm:$0xff]  ;;  %v6990_v58 = vcombine.high %v6981_v53, %v6981_v53  ;;  %1878 = vmatpush1.bf16.msra.mxu0 %v5219_v62 }
  0xf4   :  { %v277_v57 = vld [vmem:[#allocation2 + $0x20] sm:$0xff]  ;;  %1918 = vmatprep.subr.bf16.mxu1 %v5348_v55 }
  0xf5   :  { %v401_v60 = vld [vmem:[#allocation2 + $0x400] sm:$0xff]  ;;  %1897 = vmatprep.mubr.bf16.mxu0 %v6990_v58  ;;  %v5212_v0 = vcombine.high %v273_v56, %v277_v57  ;;  %v5211_v6 = vcombine.low %v273_v56, %v277_v57  ;;  %1919 = vmatpush1.bf16.msra.mxu1 %v5347_v63 }
  0xf6   :  { %v405_v61 = vld [vmem:[#allocation2 + $0x420] sm:$0xff] }
  0xf7   :  { %v5340_v1 = vcombine.high %v401_v60, %v405_v61  ;;  %v393_v2 = vld [vmem:[#allocation2 + $0x3c0] sm:$0xff]  ;;  %1879 = vmatprep.subr.bf16.mxu0 %v5212_v0  ;;  %v5339_v7 = vcombine.low %v401_v60, %v405_v61 }
  0xf8   :  { %v397_v3 = vld [vmem:[#allocation2 + $0x3e0] sm:$0xff]  ;;  %1880 = vmatpush1.bf16.msra.mxu0 %v5211_v6  ;;  %v330_v6 = vld [vmem:[#allocation2 + $0x1c8] sm:$0xff] }
  0xf9   :  { %v521_v4 = vld [vmem:[#allocation2 + $0x7c0] sm:$0xff]  ;;  %v5332_v8 = vcombine.high %v393_v2, %v397_v3  ;;  %1920 = vmatprep.subr.bf16.mxu1 %v5340_v1  ;;  %v5331_v14 = vcombine.low %v393_v2, %v397_v3 }
  0xfa   :  { %v525_v5 = vld [vmem:[#allocation2 + $0x7e0] sm:$0xff]  ;;  %1921 = vmatpush1.bf16.msra.mxu1 %v5339_v7  ;;  %v334_v7 = vld [vmem:[#allocation2 + $0x1e8] sm:$0xff] }
  0xfb   :  { %v5460_v9 = vcombine.high %v521_v4, %v525_v5  ;;  %v385_v10 = vld [vmem:[#allocation2 + $0x380] sm:$0xff]  ;;  %1881 = vmatprep.subr.bf16.mxu0 %v5332_v8  ;;  %v5459_v15 = vcombine.low %v521_v4, %v525_v5  ;;  %v458_v8 = vld [vmem:[#allocation2 + $0x5c8] sm:$0xff] }
  0xfc   :  { %v389_v11 = vld [vmem:[#allocation2 + $0x3a0] sm:$0xff]  ;;  %1882 = vmatpush2.bf16.msra.mxu0 %v5331_v14  ;;  %v322_v14 = vld [vmem:[#allocation2 + $0x188] sm:$0xff] }
  0xfd   :  { %v513_v12 = vld [vmem:[#allocation2 + $0x780] sm:$0xff]  ;;  %v5324_v16 = vcombine.high %v385_v10, %v389_v11  ;;  %1922 = vmatprep.subr.bf16.mxu1 %v5460_v9  ;;  %v5323_v22 = vcombine.low %v385_v10, %v389_v11  ;;  %v462_v9 = vld [vmem:[#allocation2 + $0x5e8] sm:$0xff] }
  0xfe   :  { %v517_v13 = vld [vmem:[#allocation2 + $0x7a0] sm:$0xff]  ;;  %1923 = vmatpush2.bf16.msra.mxu1 %v5459_v15  ;;  %v326_v15 = vld [vmem:[#allocation2 + $0x1a8] sm:$0xff] }
  0xff   :  { %v5452_v17 = vcombine.high %v513_v12, %v517_v13  ;;  %v377_v18 = vld [vmem:[#allocation2 + $0x340] sm:$0xff]  ;;  %1883 = vmatprep.subr.bf16.mxu0 %v5324_v16  ;;  %v5451_v23 = vcombine.low %v513_v12, %v517_v13  ;;  %v5270_v12 = vcombine.high %v330_v6, %v334_v7  ;;  %v5398_v13 = vcombine.high %v458_v8, %v462_v9 }
 0x100   :  { %v381_v19 = vld [vmem:[#allocation2 + $0x360] sm:$0xff]  ;;  %1884 = vmatpush2.bf16.msra.mxu0 %v5323_v22  ;;  %v7000_v16 = vcombine.low %v6981_v53, %v6981_v53  ;;  %v5262_v22 = vcombine.high %v322_v14, %v326_v15  ;;  %v5261_v53 = vcombine.low %v322_v14, %v326_v15 }
 0x101   :  { %v505_v20 = vld [vmem:[#allocation2 + $0x740] sm:$0xff]  ;;  %v5316_v24 = vcombine.high %v377_v18, %v381_v19  ;;  %1924 = vmatprep.subr.bf16.mxu1 %v5452_v17  ;;  %v5315_v30 = vcombine.low %v377_v18, %v381_v19  ;;  %v450_v17 = vld [vmem:[#allocation2 + $0x588] sm:$0xff]  ;;  %v7004_v19 = vcombine.low %v6986_v54, %v6986_v54 }
 0x102   :  { %v509_v21 = vld [vmem:[#allocation2 + $0x760] sm:$0xff]  ;;  %1925 = vmatpush2.bf16.msra.mxu1 %v5451_v23  ;;  %v454_v18 = vld [vmem:[#allocation2 + $0x5a8] sm:$0xff] }
 0x103   :  { %v5444_v25 = vcombine.high %v505_v20, %v509_v21  ;;  %v369_v26 = vld [vmem:[#allocation2 + $0x300] sm:$0xff]  ;;  %1885 = vmatprep.subr.bf16.mxu0 %v5316_v24  ;;  %v5443_v31 = vcombine.low %v505_v20, %v509_v21  ;;  %v5269_v20 = vcombine.low %v330_v6, %v334_v7  ;;  %v5397_v21 = vcombine.low %v458_v8, %v462_v9  ;;  %v314_v23 = vld [vmem:[#allocation2 + $0x148] sm:$0xff] }
 0x104   :  { %v373_v27 = vld [vmem:[#allocation2 + $0x320] sm:$0xff]  ;;  %1886 = vmatpush2.bf16.msra.mxu0 %v5315_v30  ;;  %v318_v24 = vld [vmem:[#allocation2 + $0x168] sm:$0xff]  ;;  %v5389_v54 = vcombine.low %v450_v17, %v454_v18 }
 0x105   :  { %v497_v28 = vld [vmem:[#allocation2 + $0x700] sm:$0xff]  ;;  %v5308_v32 = vcombine.high %v369_v26, %v373_v27  ;;  %1926 = vmatprep.subr.bf16.mxu1 %v5444_v25  ;;  %v5307_v38 = vcombine.low %v369_v26, %v373_v27  ;;  %v442_v25 = vld [vmem:[#allocation2 + $0x548] sm:$0xff]  ;;  %v5390_v26 = vcombine.high %v450_v17, %v454_v18 }
 0x106   :  { %v501_v29 = vld [vmem:[#allocation2 + $0x720] sm:$0xff]  ;;  %1927 = vmatpush2.bf16.msra.mxu1 %v5443_v31  ;;  %v446_v27 = vld [vmem:[#allocation2 + $0x568] sm:$0xff] }
 0x107   :  { %v5436_v33 = vcombine.high %v497_v28, %v501_v29  ;;  %v361_v34 = vld [vmem:[#allocation2 + $0x2c0] sm:$0xff]  ;;  %1887 = vmatprep.subr.bf16.mxu0 %v5308_v32  ;;  %v5435_v39 = vcombine.low %v497_v28, %v501_v29  ;;  %v5254_v28 = vcombine.high %v314_v23, %v318_v24  ;;  %v306_v29 = vld [vmem:[#allocation2 + $0x108] sm:$0xff]  ;;  %v5382_v32 = vcombine.high %v442_v25, %v446_v27 }
 0x108   :  { %v365_v35 = vld [vmem:[#allocation2 + $0x2e0] sm:$0xff]  ;;  %1888 = vmatpush2.bf16.msra.mxu0 %v5307_v38  ;;  %v310_v30 = vld [vmem:[#allocation2 + $0x128] sm:$0xff] }
 0x109   :  { %v489_v36 = vld [vmem:[#allocation2 + $0x6c0] sm:$0xff]  ;;  %v5300_v40 = vcombine.high %v361_v34, %v365_v35  ;;  %1928 = vmatprep.subr.bf16.mxu1 %v5436_v33  ;;  %v5299_v46 = vcombine.low %v361_v34, %v365_v35  ;;  %v434_v31 = vld [vmem:[#allocation2 + $0x508] sm:$0xff]  ;;  %v5253_v34 = vcombine.low %v314_v23, %v318_v24  ;;  %v5381_v35 = vcombine.low %v442_v25, %v446_v27 }
 0x10a   :  { %v493_v37 = vld [vmem:[#allocation2 + $0x6e0] sm:$0xff]  ;;  %1929 = vmatpush2.bf16.msra.mxu1 %v5435_v39  ;;  %v438_v33 = vld [vmem:[#allocation2 + $0x528] sm:$0xff] }
 0x10b   :  { %v5428_v41 = vcombine.high %v489_v36, %v493_v37  ;;  %v353_v42 = vld [vmem:[#allocation2 + $0x280] sm:$0xff]  ;;  %1889 = vmatprep.subr.bf16.mxu0 %v5300_v40  ;;  %v5427_v47 = vcombine.low %v489_v36, %v493_v37  ;;  %v5246_v36 = vcombine.high %v306_v29, %v310_v30  ;;  %v298_v37 = vld [vmem:[#allocation2 + $0xc8] sm:$0xff]  ;;  %v5374_v40 = vcombine.high %v434_v31, %v438_v33 }
 0x10c   :  { %v357_v43 = vld [vmem:[#allocation2 + $0x2a0] sm:$0xff]  ;;  %1890 = vmatpush2.bf16.msra.mxu0 %v5299_v46  ;;  %v302_v38 = vld [vmem:[#allocation2 + $0xe8] sm:$0xff] }
 0x10d   :  { %v481_v44 = vld [vmem:[#allocation2 + $0x680] sm:$0xff]  ;;  %v5292_v48 = vcombine.high %v353_v42, %v357_v43  ;;  %1930 = vmatprep.subr.bf16.mxu1 %v5428_v41  ;;  %v5291_v56 = vcombine.low %v353_v42, %v357_v43  ;;  %v426_v39 = vld [vmem:[#allocation2 + $0x4c8] sm:$0xff]  ;;  %v5245_v42 = vcombine.low %v306_v29, %v310_v30  ;;  %v5373_v43 = vcombine.low %v434_v31, %v438_v33 }
 0x10e   :  { %v485_v45 = vld [vmem:[#allocation2 + $0x6a0] sm:$0xff]  ;;  %1931 = vmatpush2.bf16.msra.mxu1 %v5427_v47  ;;  %v430_v41 = vld [vmem:[#allocation2 + $0x4e8] sm:$0xff] }
 0x10f   :  { %v5420_v49 = vcombine.high %v481_v44, %v485_v45  ;;  %v345_v50 = vld [vmem:[#allocation2 + $0x240] sm:$0xff]  ;;  %1891 = vmatprep.subr.bf16.mxu0 %v5292_v48  ;;  %v5419_v57 = vcombine.low %v481_v44, %v485_v45  ;;  %v5238_v44 = vcombine.high %v298_v37, %v302_v38  ;;  %v290_v45 = vld [vmem:[#allocation2 + $0x88] sm:$0xff]  ;;  %v5366_v48 = vcombine.high %v426_v39, %v430_v41 }
 0x110   :  { %v349_v51 = vld [vmem:[#allocation2 + $0x260] sm:$0xff]  ;;  %1892 = vmatpush2.bf16.msra.mxu0 %v5291_v56  ;;  %v294_v46 = vld [vmem:[#allocation2 + $0xa8] sm:$0xff] }
 0x111   :  { %v473_v52 = vld [vmem:[#allocation2 + $0x640] sm:$0xff]  ;;  %v5284_v60 = vcombine.high %v345_v50, %v349_v51  ;;  %1932 = vmatprep.subr.bf16.mxu1 %v5420_v49  ;;  %v5283_v2 = vcombine.low %v345_v50, %v349_v51  ;;  %v418_v47 = vld [vmem:[#allocation2 + $0x488] sm:$0xff]  ;;  %v5237_v50 = vcombine.low %v298_v37, %v302_v38  ;;  %v5365_v51 = vcombine.low %v426_v39, %v430_v41 }
 0x112   :  { %v477_v55 = vld [vmem:[#allocation2 + $0x660] sm:$0xff]  ;;  %1933 = vmatpush2.bf16.msra.mxu1 %v5419_v57  ;;  %v422_v49 = vld [vmem:[#allocation2 + $0x4a8] sm:$0xff] }
 0x113   :  { %v5412_v61 = vcombine.high %v473_v52, %v477_v55  ;;  %v337_v62 = vld [vmem:[#allocation2 + $0x200] sm:$0xff]  ;;  %1893 = vmatprep.subr.bf16.mxu0 %v5284_v60  ;;  %v5411_v3 = vcombine.low %v473_v52, %v477_v55  ;;  %v5230_v52 = vcombine.high %v290_v45, %v294_v46  ;;  %v282_v55 = vld [vmem:[#allocation2 + $0x48] sm:$0xff]  ;;  %v5358_v60 = vcombine.high %v418_v47, %v422_v49 }
 0x114   :  { %v341_v63 = vld [vmem:[#allocation2 + $0x220] sm:$0xff]  ;;  %1894 = vmatpush2.bf16.msra.mxu0 %v5283_v2  ;;  %v286_v56 = vld [vmem:[#allocation2 + $0x68] sm:$0xff] }
 0x115   :  { %v465_v0 = vld [vmem:[#allocation2 + $0x600] sm:$0xff]  ;;  %v5276_v4 = vcombine.high %v337_v62, %v341_v63  ;;  %1934 = vmatprep.subr.bf16.mxu1 %v5412_v61  ;;  %v5275_v10 = vcombine.low %v337_v62, %v341_v63  ;;  %v410_v57 = vld [vmem:[#allocation2 + $0x448] sm:$0xff]  ;;  %v5229_v62 = vcombine.low %v290_v45, %v294_v46  ;;  %v5357_v63 = vcombine.low %v418_v47, %v422_v49 }
 0x116   :  { %v469_v1 = vld [vmem:[#allocation2 + $0x620] sm:$0xff]  ;;  %1935 = vmatpush2.bf16.msra.mxu1 %v5411_v3  ;;  %v414_v61 = vld [vmem:[#allocation2 + $0x468] sm:$0xff]  ;;  %v5221_v6 = vcombine.low %v282_v55, %v286_v56 }
 0x117   :  { %v5404_v5 = vcombine.high %v465_v0, %v469_v1  ;;  %1895 = vmatprep.subr.bf16.mxu0 %v5276_v4  ;;  %v5403_v11 = vcombine.low %v465_v0, %v469_v1  ;;  %v5222_v0 = vcombine.high %v282_v55, %v286_v56  ;;  %v274_v1 = vld [vmem:[#allocation2 + $0x8] sm:$0xff]  ;;  %v5350_v4 = vcombine.high %v410_v57, %v414_v61 }
 0x118   :  { %1896 = vmatpush2.bf16.msra.mxu0 %v5275_v10  ;;  %v278_v2 = vld [vmem:[#allocation2 + $0x28] sm:$0xff]  ;;  %v5349_v7 = vcombine.low %v410_v57, %v414_v61 }
 0x119   :  { %1936 = vmatprep.subr.bf16.mxu1 %v5404_v5  ;;  %1947 = vmatprep.subr.bf16.mxu0 %v5270_v12  ;;  %v402_v3 = vld [vmem:[#allocation2 + $0x408] sm:$0xff]  ;;  %v5214_v8 = vcombine.high %v274_v1, %v278_v2  ;;  %v5213_v14 = vcombine.low %v274_v1, %v278_v2 }
 0x11a   :  { %1937 = vmatpush2.bf16.msra.mxu1 %v5403_v11  ;;  %v406_v5 = vld [vmem:[#allocation2 + $0x428] sm:$0xff] }
 0x11b   :  { %1988 = vmatprep.subr.bf16.mxu1 %v5398_v13  ;;  %1898 = vmatmul.mubr.bf16.vlgmr.msra.gmra.mxu0 %v7000_v16  ;;  %v394_v9 = vld [vmem:[#allocation2 + $0x3c8] sm:$0xff]  ;;  %v5342_v12 = vcombine.high %v402_v3, %v406_v5  ;;  %v5341_v15 = vcombine.low %v402_v3, %v406_v5 }
 0x11c   :  { %1948 = vmatpush1.bf16.msra.mxu0 %v5269_v20  ;;  %1979 = vmatprep.mubr.bf16.mxu0 %v6990_v58  ;;  %v398_v10 = vld [vmem:[#allocation2 + $0x3e8] sm:$0xff] }
 0x11d   :  { %1939 = vmatmul.mubr.bf16.vlgmr.msra.gmra.mxu1 %v7004_v19  ;;  %1949 = vmatprep.subr.bf16.mxu0 %v5262_v22  ;;  %v522_v11 = vld [vmem:[#allocation2 + $0x7c8] sm:$0xff]  ;;  %v5334_v17 = vcombine.high %v394_v9, %v398_v10  ;;  %v5333_v24 = vcombine.low %v394_v9, %v398_v10 }
 0x11e   :  { %1989 = vmatpush1.bf16.msra.mxu1 %v5397_v21  ;;  %2020 = vmatprep.mubr.bf16.mxu1 %v6994_v59  ;;  %v526_v13 = vld [vmem:[#allocation2 + $0x7e8] sm:$0xff] }
 0x11f   :  { %1990 = vmatprep.subr.bf16.mxu1 %v5390_v26  ;;  %v386_v18 = vld [vmem:[#allocation2 + $0x388] sm:$0xff]  ;;  %v5462_v22 = vcombine.high %v522_v11, %v526_v13  ;;  %v5461_v25 = vcombine.low %v522_v11, %v526_v13  ;;  %v331_v13 = vld [vmem:[#allocation2 + $0x1d0] sm:$0xff] }
 0x120   :  { %1950 = vmatpush1.bf16.msra.mxu0 %v5261_v53  ;;  %v390_v20 = vld [vmem:[#allocation2 + $0x3a8] sm:$0xff] }
 0x121   :  { %1951 = vmatprep.subr.bf16.mxu0 %v5254_v28  ;;  %v514_v21 = vld [vmem:[#allocation2 + $0x788] sm:$0xff]  ;;  %v5326_v26 = vcombine.high %v386_v18, %v390_v20  ;;  %v5325_v30 = vcombine.low %v386_v18, %v390_v20  ;;  %v463_v18 = vld [vmem:[#allocation2 + $0x5f0] sm:$0xff] }
 0x122   :  { %1991 = vmatpush1.bf16.msra.mxu1 %v5389_v54  ;;  %v518_v23 = vld [vmem:[#allocation2 + $0x7a8] sm:$0xff] }
 0x123   :  { %1992 = vmatprep.subr.bf16.mxu1 %v5382_v32  ;;  %v378_v27 = vld [vmem:[#allocation2 + $0x348] sm:$0xff]  ;;  %v5454_v28 = vcombine.high %v514_v21, %v518_v23  ;;  %v5453_v31 = vcombine.low %v514_v21, %v518_v23  ;;  %v323_v23 = vld [vmem:[#allocation2 + $0x190] sm:$0xff] }
 0x124   :  { %1952 = vmatpush1.bf16.msra.mxu0 %v5253_v34  ;;  %v382_v53 = vld [vmem:[#allocation2 + $0x368] sm:$0xff] }
 0x125   :  { %1953 = vmatprep.subr.bf16.mxu0 %v5246_v36  ;;  %v506_v54 = vld [vmem:[#allocation2 + $0x748] sm:$0xff]  ;;  %v5318_v32 = vcombine.high %v378_v27, %v382_v53  ;;  %v5317_v38 = vcombine.low %v378_v27, %v382_v53  ;;  %v455_v27 = vld [vmem:[#allocation2 + $0x5b0] sm:$0xff] }
 0x126   :  { %1993 = vmatpush1.bf16.msra.mxu1 %v5381_v35  ;;  %v510_v29 = vld [vmem:[#allocation2 + $0x768] sm:$0xff] }
 0x127   :  { %1994 = vmatprep.subr.bf16.mxu1 %v5374_v40  ;;  %v370_v33 = vld [vmem:[#allocation2 + $0x308] sm:$0xff]  ;;  %v5446_v36 = vcombine.high %v506_v54, %v510_v29  ;;  %v5445_v39 = vcombine.low %v506_v54, %v510_v29  ;;  %v315_v54 = vld [vmem:[#allocation2 + $0x150] sm:$0xff] }
 0x128   :  { %1954 = vmatpush1.bf16.msra.mxu0 %v5245_v42  ;;  %v374_v34 = vld [vmem:[#allocation2 + $0x328] sm:$0xff] }
 0x129   :  { %1955 = vmatprep.subr.bf16.mxu0 %v5238_v44  ;;  %v498_v35 = vld [vmem:[#allocation2 + $0x708] sm:$0xff]  ;;  %v5310_v40 = vcombine.high %v370_v33, %v374_v34  ;;  %v5309_v46 = vcombine.low %v370_v33, %v374_v34 }
 0x12a   :  { %1995 = vmatpush1.bf16.msra.mxu1 %v5373_v43  ;;  %v502_v37 = vld [vmem:[#allocation2 + $0x728] sm:$0xff] }
 0x12b   :  { %1996 = vmatprep.subr.bf16.mxu1 %v5366_v48  ;;  %v362_v41 = vld [vmem:[#allocation2 + $0x2c8] sm:$0xff]  ;;  %v5438_v44 = vcombine.high %v498_v35, %v502_v37  ;;  %v5437_v47 = vcombine.low %v498_v35, %v502_v37  ;;  %v307_v35 = vld [vmem:[#allocation2 + $0x110] sm:$0xff] }
 0x12c   :  { %1956 = vmatpush1.bf16.msra.mxu0 %v5237_v50  ;;  %v366_v42 = vld [vmem:[#allocation2 + $0x2e8] sm:$0xff] }
 0x12d   :  { %1957 = vmatprep.subr.bf16.mxu0 %v5230_v52  ;;  %v490_v43 = vld [vmem:[#allocation2 + $0x6c8] sm:$0xff]  ;;  %v5302_v48 = vcombine.high %v362_v41, %v366_v42  ;;  %v5301_v56 = vcombine.low %v362_v41, %v366_v42 }
 0x12e   :  { %1997 = vmatpush1.bf16.msra.mxu1 %v5365_v51  ;;  %v494_v45 = vld [vmem:[#allocation2 + $0x6e8] sm:$0xff] }
 0x12f   :  { %1998 = vmatprep.subr.bf16.mxu1 %v5358_v60  ;;  %v354_v49 = vld [vmem:[#allocation2 + $0x288] sm:$0xff]  ;;  %v5430_v52 = vcombine.high %v490_v43, %v494_v45  ;;  %v5429_v57 = vcombine.low %v490_v43, %v494_v45  ;;  %v299_v43 = vld [vmem:[#allocation2 + $0xd0] sm:$0xff] }
 0x130   :  { %1958 = vmatpush1.bf16.msra.mxu0 %v5229_v62  ;;  %v358_v50 = vld [vmem:[#allocation2 + $0x2a8] sm:$0xff] }
 0x131   :  { %1959 = vmatprep.subr.bf16.mxu0 %v5222_v0  ;;  %v482_v51 = vld [vmem:[#allocation2 + $0x688] sm:$0xff]  ;;  %v5294_v60 = vcombine.high %v354_v49, %v358_v50  ;;  %v5293_v2 = vcombine.low %v354_v49, %v358_v50 }
 0x132   :  { %1999 = vmatpush1.bf16.msra.mxu1 %v5357_v63  ;;  %v486_v55 = vld [vmem:[#allocation2 + $0x6a8] sm:$0xff] }
 0x133   :  { %2000 = vmatprep.subr.bf16.mxu1 %v5350_v4  ;;  %v346_v61 = vld [vmem:[#allocation2 + $0x248] sm:$0xff]  ;;  %v5422_v0 = vcombine.high %v482_v51, %v486_v55  ;;  %v5421_v3 = vcombine.low %v482_v51, %v486_v55  ;;  %v291_v51 = vld [vmem:[#allocation2 + $0x90] sm:$0xff] }
 0x134   :  { %1960 = vmatpush1.bf16.msra.mxu0 %v5221_v6  ;;  %v350_v62 = vld [vmem:[#allocation2 + $0x268] sm:$0xff] }
 0x135   :  { %1961 = vmatprep.subr.bf16.mxu0 %v5214_v8  ;;  %v474_v63 = vld [vmem:[#allocation2 + $0x648] sm:$0xff]  ;;  %v5286_v4 = vcombine.high %v346_v61, %v350_v62  ;;  %v5285_v10 = vcombine.low %v346_v61, %v350_v62 }
 0x136   :  { %2001 = vmatpush1.bf16.msra.mxu1 %v5349_v7  ;;  %v478_v1 = vld [vmem:[#allocation2 + $0x668] sm:$0xff] }
 0x137   :  { %2002 = vmatprep.subr.bf16.mxu1 %v5342_v12  ;;  %v338_v5 = vld [vmem:[#allocation2 + $0x208] sm:$0xff]  ;;  %v5414_v8 = vcombine.high %v474_v63, %v478_v1  ;;  %v5413_v11 = vcombine.low %v474_v63, %v478_v1  ;;  %v283_v63 = vld [vmem:[#allocation2 + $0x50] sm:$0xff] }
 0x138   :  { %1962 = vmatpush1.bf16.msra.mxu0 %v5213_v14  ;;  %v342_v6 = vld [vmem:[#allocation2 + $0x228] sm:$0xff]  ;;  %v335_v14 = vld [vmem:[#allocation2 + $0x1f0] sm:$0xff] }
 0x139   :  { %1963 = vmatprep.subr.bf16.mxu0 %v5334_v17  ;;  %v466_v7 = vld [vmem:[#allocation2 + $0x608] sm:$0xff]  ;;  %v5278_v12 = vcombine.high %v338_v5, %v342_v6  ;;  %v5277_v20 = vcombine.low %v338_v5, %v342_v6  ;;  %v5271_v53 = vcombine.low %v331_v13, %v335_v14 }
 0x13a   :  { %2003 = vmatpush1.bf16.msra.mxu1 %v5341_v15  ;;  %v470_v9 = vld [vmem:[#allocation2 + $0x628] sm:$0xff]  ;;  %v459_v15 = vld [vmem:[#allocation2 + $0x5d0] sm:$0xff] }
 0x13b   :  { %2004 = vmatprep.subr.bf16.mxu1 %v5462_v22  ;;  %v5406_v17 = vcombine.high %v466_v7, %v470_v9  ;;  %v5405_v21 = vcombine.low %v466_v7, %v470_v9  ;;  %v5272_v22 = vcombine.high %v331_v13, %v335_v14  ;;  %v5399_v29 = vcombine.low %v459_v15, %v463_v18  ;;  %v275_v7 = vld [vmem:[#allocation2 + $0x10] sm:$0xff] }
 0x13c   :  { %1964 = vmatpush2.bf16.msra.mxu0 %v5333_v24  ;;  %v327_v24 = vld [vmem:[#allocation2 + $0x1b0] sm:$0xff] }
 0x13d   :  { %1965 = vmatprep.subr.bf16.mxu0 %v5326_v26  ;;  %v5400_v26 = vcombine.high %v459_v15, %v463_v18  ;;  %v5263_v34 = vcombine.low %v323_v23, %v327_v24  ;;  %v395_v15 = vld [vmem:[#allocation2 + $0x3d0] sm:$0xff] }
 0x13e   :  { %2005 = vmatpush2.bf16.msra.mxu1 %v5461_v25  ;;  %v451_v25 = vld [vmem:[#allocation2 + $0x590] sm:$0xff] }
 0x13f   :  { %2006 = vmatprep.subr.bf16.mxu1 %v5454_v28  ;;  %v319_v28 = vld [vmem:[#allocation2 + $0x170] sm:$0xff]  ;;  %v5392_v33 = vcombine.high %v451_v25, %v455_v27  ;;  %v5391_v37 = vcombine.low %v451_v25, %v455_v27 }
 0x140   :  { %1966 = vmatpush2.bf16.msra.mxu0 %v5325_v30  ;;  %v5264_v30 = vcombine.high %v323_v23, %v327_v24  ;;  %v5255_v42 = vcombine.low %v315_v54, %v319_v28  ;;  %v387_v25 = vld [vmem:[#allocation2 + $0x390] sm:$0xff] }
 0x141   :  { %1967 = vmatprep.subr.bf16.mxu0 %v5318_v32  ;;  %v447_v32 = vld [vmem:[#allocation2 + $0x570] sm:$0xff] }
 0x142   :  { %2007 = vmatpush2.bf16.msra.mxu1 %v5453_v31  ;;  %v443_v31 = vld [vmem:[#allocation2 + $0x550] sm:$0xff] }
 0x143   :  { %2008 = vmatprep.subr.bf16.mxu1 %v5446_v36  ;;  %v311_v36 = vld [vmem:[#allocation2 + $0x130] sm:$0xff]  ;;  %v5384_v41 = vcombine.high %v443_v31, %v447_v32  ;;  %v5383_v45 = vcombine.low %v443_v31, %v447_v32 }
 0x144   :  { %1968 = vmatpush2.bf16.msra.mxu0 %v5317_v38  ;;  %v5256_v38 = vcombine.high %v315_v54, %v319_v28  ;;  %v5247_v50 = vcombine.low %v307_v35, %v311_v36  ;;  %v515_v54 = vld [vmem:[#allocation2 + $0x790] sm:$0xff] }
 0x145   :  { %1969 = vmatprep.subr.bf16.mxu0 %v5310_v40  ;;  %v439_v40 = vld [vmem:[#allocation2 + $0x530] sm:$0xff] }
 0x146   :  { %2009 = vmatpush2.bf16.msra.mxu1 %v5445_v39  ;;  %v435_v39 = vld [vmem:[#allocation2 + $0x510] sm:$0xff] }
 0x147   :  { %2010 = vmatprep.subr.bf16.mxu1 %v5438_v44  ;;  %v303_v44 = vld [vmem:[#allocation2 + $0xf0] sm:$0xff]  ;;  %v5376_v49 = vcombine.high %v435_v39, %v439_v40  ;;  %v5375_v55 = vcombine.low %v435_v39, %v439_v40 }
 0x148   :  { %1970 = vmatpush2.bf16.msra.mxu0 %v5309_v46  ;;  %v5248_v46 = vcombine.high %v307_v35, %v311_v36  ;;  %v5239_v62 = vcombine.low %v299_v43, %v303_v44  ;;  %v519_v28 = vld [vmem:[#allocation2 + $0x7b0] sm:$0xff] }
 0x149   :  { %1971 = vmatprep.subr.bf16.mxu0 %v5302_v48  ;;  %v431_v48 = vld [vmem:[#allocation2 + $0x4f0] sm:$0xff] }
 0x14a   :  { %2011 = vmatpush2.bf16.msra.mxu1 %v5437_v47  ;;  %v427_v47 = vld [vmem:[#allocation2 + $0x4d0] sm:$0xff] }
 0x14b   :  { %2012 = vmatprep.subr.bf16.mxu1 %v5430_v52  ;;  %v295_v52 = vld [vmem:[#allocation2 + $0xb0] sm:$0xff]  ;;  %v5368_v61 = vcombine.high %v427_v47, %v431_v48  ;;  %v5367_v1 = vcombine.low %v427_v47, %v431_v48 }
 0x14c   :  { %1972 = vmatpush2.bf16.msra.mxu0 %v5301_v56  ;;  %v5240_v56 = vcombine.high %v299_v43, %v303_v44  ;;  %v5231_v6 = vcombine.low %v291_v51, %v295_v52  ;;  %v379_v31 = vld [vmem:[#allocation2 + $0x350] sm:$0xff] }
 0x14d   :  { %1973 = vmatprep.subr.bf16.mxu0 %v5294_v60  ;;  %v423_v60 = vld [vmem:[#allocation2 + $0x4b0] sm:$0xff] }
 0x14e   :  { %2013 = vmatpush2.bf16.msra.mxu1 %v5429_v57  ;;  %v419_v57 = vld [vmem:[#allocation2 + $0x490] sm:$0xff] }
 0x14f   :  { %2014 = vmatprep.subr.bf16.mxu1 %v5422_v0  ;;  %v287_v0 = vld [vmem:[#allocation2 + $0x70] sm:$0xff]  ;;  %v5360_v5 = vcombine.high %v419_v57, %v423_v60  ;;  %v5359_v9 = vcombine.low %v419_v57, %v423_v60 }
 0x150   :  { %1974 = vmatpush2.bf16.msra.mxu0 %v5293_v2  ;;  %v5232_v2 = vcombine.high %v291_v51, %v295_v52  ;;  %v5223_v14 = vcombine.low %v283_v63, %v287_v0  ;;  %v383_v32 = vld [vmem:[#allocation2 + $0x370] sm:$0xff] }
 0x151   :  { %1975 = vmatprep.subr.bf16.mxu0 %v5286_v4  ;;  %v415_v4 = vld [vmem:[#allocation2 + $0x470] sm:$0xff] }
 0x152   :  { %2015 = vmatpush2.bf16.msra.mxu1 %v5421_v3  ;;  %v411_v3 = vld [vmem:[#allocation2 + $0x450] sm:$0xff] }
 0x153   :  { %2016 = vmatprep.subr.bf16.mxu1 %v5414_v8  ;;  %v279_v8 = vld [vmem:[#allocation2 + $0x30] sm:$0xff]  ;;  %v5352_v13 = vcombine.high %v411_v3, %v415_v4  ;;  %v5351_v18 = vcombine.low %v411_v3, %v415_v4 }
 0x154   :  { %1976 = vmatpush2.bf16.msra.mxu0 %v5285_v10  ;;  %v5224_v10 = vcombine.high %v283_v63, %v287_v0  ;;  %v5215_v24 = vcombine.low %v275_v7, %v279_v8  ;;  %v507_v35 = vld [vmem:[#allocation2 + $0x750] sm:$0xff] }
 0x155   :  { %1977 = vmatprep.subr.bf16.mxu0 %v5278_v12  ;;  %v407_v12 = vld [vmem:[#allocation2 + $0x430] sm:$0xff] }
 0x156   :  { %2017 = vmatpush2.bf16.msra.mxu1 %v5413_v11  ;;  %v403_v11 = vld [vmem:[#allocation2 + $0x410] sm:$0xff] }
 0x157   :  { %2018 = vmatprep.subr.bf16.mxu1 %v5406_v17  ;;  %v399_v17 = vld [vmem:[#allocation2 + $0x3f0] sm:$0xff]  ;;  %v5344_v23 = vcombine.high %v403_v11, %v407_v12  ;;  %v5343_v27 = vcombine.low %v403_v11, %v407_v12 }
 0x158   :  { %1978 = vmatpush2.bf16.msra.mxu0 %v5277_v20  ;;  %v5216_v20 = vcombine.high %v275_v7, %v279_v8  ;;  %v511_v36 = vld [vmem:[#allocation2 + $0x770] sm:$0xff] }
 0x159   :  { %2029 = vmatprep.subr.bf16.mxu0 %v5272_v22  ;;  %v527_v22 = vld [vmem:[#allocation2 + $0x7f0] sm:$0xff] }
 0x15a   :  { %2019 = vmatpush2.bf16.msra.mxu1 %v5405_v21  ;;  %v523_v21 = vld [vmem:[#allocation2 + $0x7d0] sm:$0xff] }
 0x15b   :  { %2070 = vmatprep.subr.bf16.mxu1 %v5400_v26  ;;  %1980 = vmatmul.mubr.bf16.vlgmr.msra.gmra.mxu0 %v7000_v16  ;;  %v391_v26 = vld [vmem:[#allocation2 + $0x3b0] sm:$0xff] }
 0x15c   :  { %2030 = vmatpush1.bf16.msra.mxu0 %v5271_v53  ;;  %2061 = vmatprep.mubr.bf16.mxu0 %v6990_v58  ;;  %v5336_v53 = vcombine.high %v395_v15, %v399_v17  ;;  %v371_v39 = vld [vmem:[#allocation2 + $0x310] sm:$0xff] }
 0x15d   :  { %2021 = vmatmul.mubr.bf16.vlgmr.msra.gmra.mxu1 %v7004_v19  ;;  %2031 = vmatprep.subr.bf16.mxu0 %v5264_v30  ;;  %v5335_v30 = vcombine.low %v395_v15, %v399_v17  ;;  %v375_v40 = vld [vmem:[#allocation2 + $0x330] sm:$0xff] }
 0x15e   :  { %2071 = vmatpush1.bf16.msra.mxu1 %v5399_v29  ;;  %2102 = vmatprep.mubr.bf16.mxu1 %v6994_v59  ;;  %v5464_v29 = vcombine.high %v523_v21, %v527_v22  ;;  %v499_v43 = vld [vmem:[#allocation2 + $0x710] sm:$0xff] }
 0x15f   :  { %2072 = vmatprep.subr.bf16.mxu1 %v5392_v33  ;;  %v5463_v33 = vcombine.low %v523_v21, %v527_v22  ;;  %v503_v44 = vld [vmem:[#allocation2 + $0x730] sm:$0xff]  ;;  %v332_v21 = vld [vmem:[#allocation2 + $0x1d8] sm:$0xff] }
 0x160   :  { %2032 = vmatpush1.bf16.msra.mxu0 %v5263_v34  ;;  %v5328_v34 = vcombine.high %v387_v25, %v391_v26  ;;  %v363_v47 = vld [vmem:[#allocation2 + $0x2d0] sm:$0xff]  ;;  %v336_v22 = vld [vmem:[#allocation2 + $0x1f8] sm:$0xff] }
 0x161   :  { %2033 = vmatprep.subr.bf16.mxu0 %v5256_v38  ;;  %v5327_v38 = vcombine.low %v387_v25, %v391_v26  ;;  %v367_v48 = vld [vmem:[#allocation2 + $0x2f0] sm:$0xff]  ;;  %v460_v25 = vld [vmem:[#allocation2 + $0x5d8] sm:$0xff] }
 0x162   :  { %2073 = vmatpush1.bf16.msra.mxu1 %v5391_v37  ;;  %v5456_v37 = vcombine.high %v515_v54, %v519_v28  ;;  %v491_v51 = vld [vmem:[#allocation2 + $0x6d0] sm:$0xff]  ;;  %v464_v26 = vld [vmem:[#allocation2 + $0x5f8] sm:$0xff] }
 0x163   :  { %2074 = vmatprep.subr.bf16.mxu1 %v5384_v41  ;;  %v5455_v41 = vcombine.low %v515_v54, %v519_v28  ;;  %v495_v52 = vld [vmem:[#allocation2 + $0x6f0] sm:$0xff]  ;;  %v324_v54 = vld [vmem:[#allocation2 + $0x198] sm:$0xff] }
 0x164   :  { %2034 = vmatpush1.bf16.msra.mxu0 %v5255_v42  ;;  %v5320_v42 = vcombine.high %v379_v31, %v383_v32  ;;  %v355_v57 = vld [vmem:[#allocation2 + $0x290] sm:$0xff]  ;;  %v328_v28 = vld [vmem:[#allocation2 + $0x1b8] sm:$0xff] }
 0x165   :  { %2035 = vmatprep.subr.bf16.mxu0 %v5248_v46  ;;  %v5319_v46 = vcombine.low %v379_v31, %v383_v32  ;;  %v359_v60 = vld [vmem:[#allocation2 + $0x2b0] sm:$0xff]  ;;  %v452_v31 = vld [vmem:[#allocation2 + $0x598] sm:$0xff] }
 0x166   :  { %2075 = vmatpush1.bf16.msra.mxu1 %v5383_v45  ;;  %v5448_v45 = vcombine.high %v507_v35, %v511_v36  ;;  %v483_v63 = vld [vmem:[#allocation2 + $0x690] sm:$0xff]  ;;  %v456_v32 = vld [vmem:[#allocation2 + $0x5b8] sm:$0xff] }
 0x167   :  { %2076 = vmatprep.subr.bf16.mxu1 %v5376_v49  ;;  %v5447_v49 = vcombine.low %v507_v35, %v511_v36  ;;  %v487_v0 = vld [vmem:[#allocation2 + $0x6b0] sm:$0xff]  ;;  %v316_v35 = vld [vmem:[#allocation2 + $0x158] sm:$0xff] }
 0x168   :  { %2036 = vmatpush1.bf16.msra.mxu0 %v5247_v50  ;;  %v5312_v50 = vcombine.high %v371_v39, %v375_v40  ;;  %v347_v3 = vld [vmem:[#allocation2 + $0x250] sm:$0xff]  ;;  %v320_v36 = vld [vmem:[#allocation2 + $0x178] sm:$0xff] }
 0x169   :  { %2037 = vmatprep.subr.bf16.mxu0 %v5240_v56  ;;  %v5311_v56 = vcombine.low %v371_v39, %v375_v40  ;;  %v351_v4 = vld [vmem:[#allocation2 + $0x270] sm:$0xff]  ;;  %v444_v39 = vld [vmem:[#allocation2 + $0x558] sm:$0xff]  ;;  %v5394_v40 = vcombine.high %v452_v31, %v456_v32 }
 0x16a   :  { %2077 = vmatpush1.bf16.msra.mxu1 %v5375_v55  ;;  %v5440_v55 = vcombine.high %v499_v43, %v503_v44  ;;  %v475_v7 = vld [vmem:[#allocation2 + $0x650] sm:$0xff] }
 0x16b   :  { %2078 = vmatprep.subr.bf16.mxu1 %v5368_v61  ;;  %v5439_v61 = vcombine.low %v499_v43, %v503_v44  ;;  %v479_v8 = vld [vmem:[#allocation2 + $0x670] sm:$0xff]  ;;  %v308_v43 = vld [vmem:[#allocation2 + $0x118] sm:$0xff] }
 0x16c   :  { %2038 = vmatpush1.bf16.msra.mxu0 %v5239_v62  ;;  %v5304_v62 = vcombine.high %v363_v47, %v367_v48  ;;  %v339_v11 = vld [vmem:[#allocation2 + $0x210] sm:$0xff]  ;;  %v312_v44 = vld [vmem:[#allocation2 + $0x138] sm:$0xff] }
 0x16d   :  { %2039 = vmatprep.subr.bf16.mxu0 %v5232_v2  ;;  %v5303_v2 = vcombine.low %v363_v47, %v367_v48  ;;  %v343_v12 = vld [vmem:[#allocation2 + $0x230] sm:$0xff]  ;;  %v436_v47 = vld [vmem:[#allocation2 + $0x518] sm:$0xff] }
 0x16e   :  { %2079 = vmatpush1.bf16.msra.mxu1 %v5367_v1  ;;  %v5432_v1 = vcombine.high %v491_v51, %v495_v52  ;;  %v467_v15 = vld [vmem:[#allocation2 + $0x610] sm:$0xff]  ;;  %v440_v48 = vld [vmem:[#allocation2 + $0x538] sm:$0xff] }
 0x16f   :  { %2080 = vmatprep.subr.bf16.mxu1 %v5360_v5  ;;  %v5431_v5 = vcombine.low %v491_v51, %v495_v52  ;;  %v471_v17 = vld [vmem:[#allocation2 + $0x630] sm:$0xff]  ;;  %v300_v51 = vld [vmem:[#allocation2 + $0xd8] sm:$0xff] }
 0x170   :  { %2040 = vmatpush1.bf16.msra.mxu0 %v5231_v6  ;;  %v5296_v6 = vcombine.high %v355_v57, %v359_v60  ;;  %v304_v52 = vld [vmem:[#allocation2 + $0xf8] sm:$0xff] }
 0x171   :  { %2041 = vmatprep.subr.bf16.mxu0 %v5224_v10  ;;  %v5295_v10 = vcombine.low %v355_v57, %v359_v60  ;;  %v428_v57 = vld [vmem:[#allocation2 + $0x4d8] sm:$0xff]  ;;  %v5378_v60 = vcombine.high %v436_v47, %v440_v48 }
 0x172   :  { %2081 = vmatpush1.bf16.msra.mxu1 %v5359_v9  ;;  %v5424_v9 = vcombine.high %v483_v63, %v487_v0 }
 0x173   :  { %2082 = vmatprep.subr.bf16.mxu1 %v5352_v13  ;;  %v5423_v13 = vcombine.low %v483_v63, %v487_v0  ;;  %v292_v63 = vld [vmem:[#allocation2 + $0x98] sm:$0xff] }
 0x174   :  { %2042 = vmatpush1.bf16.msra.mxu0 %v5223_v14  ;;  %v5288_v14 = vcombine.high %v347_v3, %v351_v4  ;;  %v296_v0 = vld [vmem:[#allocation2 + $0xb8] sm:$0xff] }
 0x175   :  { %2043 = vmatprep.subr.bf16.mxu0 %v5216_v20  ;;  %v5287_v20 = vcombine.low %v347_v3, %v351_v4  ;;  %v5241_v4 = vcombine.low %v300_v51, %v304_v52 }
 0x176   :  { %2083 = vmatpush1.bf16.msra.mxu1 %v5351_v18  ;;  %v5416_v18 = vcombine.high %v475_v7, %v479_v8 }
 0x177   :  { %2084 = vmatprep.subr.bf16.mxu1 %v5344_v23  ;;  %v5415_v23 = vcombine.low %v475_v7, %v479_v8  ;;  %v284_v8 = vld [vmem:[#allocation2 + $0x58] sm:$0xff] }
 0x178   :  { %2044 = vmatpush1.bf16.msra.mxu0 %v5215_v24  ;;  %v5280_v24 = vcombine.high %v339_v11, %v343_v12 }
 0x179   :  { %2045 = vmatprep.subr.bf16.mxu0 %v5336_v53  ;;  %v5279_v53 = vcombine.low %v339_v11, %v343_v12  ;;  %v416_v11 = vld [vmem:[#allocation2 + $0x478] sm:$0xff]  ;;  %v5233_v12 = vcombine.low %v292_v63, %v296_v0 }
 0x17a   :  { %2085 = vmatpush1.bf16.msra.mxu1 %v5343_v27  ;;  %v5408_v27 = vcombine.high %v467_v15, %v471_v17 }
 0x17b   :  { %2086 = vmatprep.subr.bf16.mxu1 %v5464_v29  ;;  %v5407_v29 = vcombine.low %v467_v15, %v471_v17  ;;  %v276_v17 = vld [vmem:[#allocation2 + $0x18] sm:$0xff] }
 0x17c   :  { %2046 = vmatpush2.bf16.msra.mxu0 %v5335_v30  ;;  %v5274_v30 = vcombine.high %v332_v21, %v336_v22 }
 0x17d   :  { %2047 = vmatprep.subr.bf16.mxu0 %v5328_v34  ;;  %v5273_v34 = vcombine.low %v332_v21, %v336_v22  ;;  %v408_v21 = vld [vmem:[#allocation2 + $0x438] sm:$0xff] }
 0x17e   :  { %2087 = vmatpush2.bf16.msra.mxu1 %v5463_v33  ;;  %v5402_v33 = vcombine.high %v460_v25, %v464_v26 }
 0x17f   :  { %2088 = vmatprep.subr.bf16.mxu1 %v5456_v37  ;;  %v5401_v37 = vcombine.low %v460_v25, %v464_v26  ;;  %v396_v26 = vld [vmem:[#allocation2 + $0x3d8] sm:$0xff] }
 0x180   :  { %2048 = vmatpush2.bf16.msra.mxu0 %v5327_v38  ;;  %v5266_v38 = vcombine.high %v324_v54, %v328_v28 }
 0x181   :  { %2049 = vmatprep.subr.bf16.mxu0 %v5320_v42  ;;  %v5265_v42 = vcombine.low %v324_v54, %v328_v28  ;;  %v528_v54 = vld [vmem:[#allocation2 + $0x7f8] sm:$0xff] }
 0x182   :  { %2089 = vmatpush2.bf16.msra.mxu1 %v5455_v41  ;;  %v448_v41 = vld [vmem:[#allocation2 + $0x578] sm:$0xff] }
 0x183   :  { %2090 = vmatprep.subr.bf16.mxu1 %v5448_v45  ;;  %v5393_v45 = vcombine.low %v452_v31, %v456_v32  ;;  %v388_v32 = vld [vmem:[#allocation2 + $0x398] sm:$0xff] }
 0x184   :  { %2050 = vmatpush2.bf16.msra.mxu0 %v5319_v46  ;;  %v5258_v46 = vcombine.high %v316_v35, %v320_v36 }
 0x185   :  { %2051 = vmatprep.subr.bf16.mxu0 %v5312_v50  ;;  %v5257_v50 = vcombine.low %v316_v35, %v320_v36  ;;  %v520_v35 = vld [vmem:[#allocation2 + $0x7b8] sm:$0xff] }
 0x186   :  { %2091 = vmatpush2.bf16.msra.mxu1 %v5447_v49  ;;  %v5386_v49 = vcombine.high %v444_v39, %v448_v41 }
 0x187   :  { %2092 = vmatprep.subr.bf16.mxu1 %v5440_v55  ;;  %v5385_v55 = vcombine.low %v444_v39, %v448_v41  ;;  %v384_v41 = vld [vmem:[#allocation2 + $0x378] sm:$0xff] }
 0x188   :  { %2052 = vmatpush2.bf16.msra.mxu0 %v5311_v56  ;;  %v5250_v56 = vcombine.high %v308_v43, %v312_v44 }
 0x189   :  { %2053 = vmatprep.subr.bf16.mxu0 %v5304_v62  ;;  %v5249_v62 = vcombine.low %v308_v43, %v312_v44  ;;  %v512_v43 = vld [vmem:[#allocation2 + $0x778] sm:$0xff] }
 0x18a   :  { %2093 = vmatpush2.bf16.msra.mxu1 %v5439_v61  ;;  %v432_v61 = vld [vmem:[#allocation2 + $0x4f8] sm:$0xff] }
 0x18b   :  { %2094 = vmatprep.subr.bf16.mxu1 %v5432_v1  ;;  %v420_v1 = vld [vmem:[#allocation2 + $0x498] sm:$0xff]  ;;  %v5370_v3 = vcombine.high %v428_v57, %v432_v61 }
 0x18c   :  { %2054 = vmatpush2.bf16.msra.mxu0 %v5303_v2  ;;  %v424_v2 = vld [vmem:[#allocation2 + $0x4b8] sm:$0xff] }
 0x18d   :  { %2055 = vmatprep.subr.bf16.mxu0 %v5296_v6  ;;  %v5234_v6 = vcombine.high %v292_v63, %v296_v0  ;;  %v5362_v7 = vcombine.high %v420_v1, %v424_v2  ;;  %v496_v63 = vld [vmem:[#allocation2 + $0x6f8] sm:$0xff] }
 0x18e   :  { %2095 = vmatpush2.bf16.msra.mxu1 %v5431_v5  ;;  %v5369_v5 = vcombine.low %v428_v57, %v432_v61  ;;  %v368_v61 = vld [vmem:[#allocation2 + $0x2f8] sm:$0xff] }
 0x18f   :  { %2096 = vmatprep.subr.bf16.mxu1 %v5424_v9  ;;  %v288_v9 = vld [vmem:[#allocation2 + $0x78] sm:$0xff] }
 0x190   :  { %2056 = vmatpush2.bf16.msra.mxu0 %v5295_v10  ;;  %v412_v10 = vld [vmem:[#allocation2 + $0x458] sm:$0xff]  ;;  %v5225_v22 = vcombine.low %v284_v8, %v288_v9 }
 0x191   :  { %2057 = vmatprep.subr.bf16.mxu0 %v5288_v14  ;;  %v5226_v14 = vcombine.high %v284_v8, %v288_v9  ;;  %v5354_v15 = vcombine.high %v412_v10, %v416_v11 }
 0x192   :  { %2097 = vmatpush2.bf16.msra.mxu1 %v5423_v13  ;;  %v5361_v13 = vcombine.low %v420_v1, %v424_v2  ;;  %v356_v2 = vld [vmem:[#allocation2 + $0x298] sm:$0xff] }
 0x193   :  { %2098 = vmatprep.subr.bf16.mxu1 %v5416_v18  ;;  %v280_v18 = vld [vmem:[#allocation2 + $0x38] sm:$0xff] }
 0x194   :  { %2058 = vmatpush2.bf16.msra.mxu0 %v5287_v20  ;;  %v404_v20 = vld [vmem:[#allocation2 + $0x418] sm:$0xff]  ;;  %v5217_v28 = vcombine.low %v276_v17, %v280_v18 }
 0x195   :  { %2059 = vmatprep.subr.bf16.mxu0 %v5280_v24  ;;  %v5218_v24 = vcombine.high %v276_v17, %v280_v18  ;;  %v5346_v25 = vcombine.high %v404_v20, %v408_v21 }
 0x196   :  { %2099 = vmatpush2.bf16.msra.mxu1 %v5415_v23  ;;  %v5353_v23 = vcombine.low %v412_v10, %v416_v11  ;;  %v348_v10 = vld [vmem:[#allocation2 + $0x258] sm:$0xff] }
 0x197   :  { %2100 = vmatprep.subr.bf16.mxu1 %v5408_v27  ;;  %v400_v27 = vld [vmem:[#allocation2 + $0x3f8] sm:$0xff] }
 0x198   :  { %2060 = vmatpush2.bf16.msra.mxu0 %v5279_v53  ;;  %v524_v53 = vld [vmem:[#allocation2 + $0x7d8] sm:$0xff]  ;;  %v5337_v36 = vcombine.low %v396_v26, %v400_v27 }
 0x199   :  { %2111 = vmatprep.subr.bf16.mxu0 %v5274_v30  ;;  %v5338_v30 = vcombine.high %v396_v26, %v400_v27  ;;  %v5466_v31 = vcombine.high %v524_v53, %v528_v54  ;;  %v352_v11 = vld [vmem:[#allocation2 + $0x278] sm:$0xff] }
 0x19a   :  { %2101 = vmatpush2.bf16.msra.mxu1 %v5407_v29  ;;  %v5345_v29 = vcombine.low %v404_v20, %v408_v21  ;;  %v5290_v18 = vcombine.high %v348_v10, %v352_v11  ;;  %v340_v21 = vld [vmem:[#allocation2 + $0x218] sm:$0xff] }
 0x19b   :  { %2152 = vmatprep.subr.bf16.mxu1 %v5402_v33  ;;  %2062 = vmatmul.mubr.bf16.vlgmr.msra.gmra.mxu0 %v7000_v16  ;;  %v392_v33 = vld [vmem:[#allocation2 + $0x3b8] sm:$0xff] }
 0x19c   :  { %2112 = vmatpush1.bf16.msra.mxu0 %v5273_v34  ;;  %2143 = vmatprep.mubr.bf16.mxu0 %v6990_v58  ;;  %v5377_v58 = vcombine.low %v436_v47, %v440_v48  ;;  %v516_v34 = vld [vmem:[#allocation2 + $0x798] sm:$0xff]  ;;  %v5329_v44 = vcombine.low %v388_v32, %v392_v33 }
 0x19d   :  { %2103 = vmatmul.mubr.bf16.vlgmr.msra.gmra.mxu1 %v7004_v19  ;;  %2113 = vmatprep.subr.bf16.mxu0 %v5266_v38  ;;  %v5330_v38 = vcombine.high %v388_v32, %v392_v33  ;;  %v5458_v39 = vcombine.high %v516_v34, %v520_v35  ;;  %v372_v48 = vld [vmem:[#allocation2 + $0x318] sm:$0xff] }
 0x19e   :  { %2153 = vmatpush1.bf16.msra.mxu1 %v5401_v37  ;;  %2184 = vmatprep.mubr.bf16.mxu1 %v6994_v59  ;;  %v5242_v59 = vcombine.high %v300_v51, %v304_v52  ;;  %v5465_v37 = vcombine.low %v524_v53, %v528_v54  ;;  %v504_v51 = vld [vmem:[#allocation2 + $0x738] sm:$0xff] }
 0x19f   :  { %2154 = vmatprep.subr.bf16.mxu1 %v5394_v40  ;;  %v380_v40 = vld [vmem:[#allocation2 + $0x358] sm:$0xff] }
 0x1a0   :  { %2114 = vmatpush1.bf16.msra.mxu0 %v5265_v42  ;;  %v508_v42 = vld [vmem:[#allocation2 + $0x758] sm:$0xff]  ;;  %v5321_v52 = vcombine.low %v380_v40, %v384_v41 }
 0x1a1   :  { %2115 = vmatprep.subr.bf16.mxu0 %v5258_v46  ;;  %v5322_v46 = vcombine.high %v380_v40, %v384_v41  ;;  %v5450_v47 = vcombine.high %v508_v42, %v512_v43 }
 0x1a2   :  { %2155 = vmatpush1.bf16.msra.mxu1 %v5393_v45  ;;  %v5457_v45 = vcombine.low %v516_v34, %v520_v35 }
 0x1a3   :  { %2156 = vmatprep.subr.bf16.mxu1 %v5386_v49  ;;  %v376_v49 = vld [vmem:[#allocation2 + $0x338] sm:$0xff] }
 0x1a4   :  { %2116 = vmatpush1.bf16.msra.mxu0 %v5257_v50  ;;  %v500_v50 = vld [vmem:[#allocation2 + $0x718] sm:$0xff]  ;;  %v5313_v0 = vcombine.low %v372_v48, %v376_v49 }
 0x1a5   :  { %2117 = vmatprep.subr.bf16.mxu0 %v5250_v56  ;;  %v5314_v56 = vcombine.high %v372_v48, %v376_v49  ;;  %v5442_v57 = vcombine.high %v500_v50, %v504_v51 }
 0x1a6   :  { %2157 = vmatpush1.bf16.msra.mxu1 %v5385_v55  ;;  %v5449_v55 = vcombine.low %v508_v42, %v512_v43 }
 0x1a7   :  { %2158 = vmatprep.subr.bf16.mxu1 %v5378_v60  ;;  %v364_v60 = vld [vmem:[#allocation2 + $0x2d8] sm:$0xff] }
 0x1a8   :  { %2118 = vmatpush1.bf16.msra.mxu0 %v5249_v62  ;;  %v492_v62 = vld [vmem:[#allocation2 + $0x6d8] sm:$0xff] }
 0x1a9   :  { %2119 = vmatprep.subr.bf16.mxu0 %v5242_v59  ;;  %v5306_v59 = vcombine.high %v364_v60, %v368_v61  ;;  %v5434_v1 = vcombine.high %v492_v62, %v496_v63 }
 0x1aa   :  { %2159 = vmatpush1.bf16.msra.mxu1 %v5377_v58  ;;  %v5441_v58 = vcombine.low %v500_v50, %v504_v51 }
 0x1ab   :  { %2160 = vmatprep.subr.bf16.mxu1 %v5370_v3  ;;  %v360_v3 = vld [vmem:[#allocation2 + $0x2b8] sm:$0xff] }
 0x1ac   :  { %2120 = vmatpush1.bf16.msra.mxu0 %v5241_v4  ;;  %v484_v4 = vld [vmem:[#allocation2 + $0x698] sm:$0xff]  ;;  %v5298_v8 = vcombine.high %v356_v2, %v360_v3 }
 0x1ad   :  { %2121 = vmatprep.subr.bf16.mxu0 %v5234_v6  ;;  %v5305_v6 = vcombine.low %v364_v60, %v368_v61 }
 0x1ae   :  { %2161 = vmatpush1.bf16.msra.mxu1 %v5369_v5  ;;  %v488_v5 = vld [vmem:[#allocation2 + $0x6b8] sm:$0xff] }
 0x1af   :  { %2162 = vmatprep.subr.bf16.mxu1 %v5362_v7  ;;  %v5433_v7 = vcombine.low %v492_v62, %v496_v63  ;;  %v5426_v9 = vcombine.high %v484_v4, %v488_v5  ;;  %v5425_v17 = vcombine.low %v484_v4, %v488_v5 }
 0x1b0   :  { %2122 = vmatpush1.bf16.msra.mxu0 %v5233_v12  ;;  %v476_v12 = vld [vmem:[#allocation2 + $0x658] sm:$0xff] }
 0x1b1   :  { %2123 = vmatprep.subr.bf16.mxu0 %v5226_v14  ;;  %v5297_v14 = vcombine.low %v356_v2, %v360_v3 }
 0x1b2   :  { %2163 = vmatpush1.bf16.msra.mxu1 %v5361_v13  ;;  %v480_v13 = vld [vmem:[#allocation2 + $0x678] sm:$0xff] }
 0x1b3   :  { %2164 = vmatprep.subr.bf16.mxu1 %v5354_v15  ;;  %v531_v15 = vlaneseq  ;;  %v5418_v20 = vcombine.high %v476_v12, %v480_v13  ;;  %v5417_v27 = vcombine.low %v476_v12, %v480_v13 }
 0x1b4   :  { %2124 = vmatpush1.bf16.msra.mxu0 %v5225_v22  ;;  %v344_v22 = vld [vmem:[#allocation2 + $0x238] sm:$0xff] }
 0x1b5   :  { %2125 = vmatprep.subr.bf16.mxu0 %v5218_v24  ;;  %v472_v24 = vld [vmem:[#allocation2 + $0x638] sm:$0xff]  ;;  %v7018_v26 = vshrl.u32 %v531_v15, 7  ;;  %v5282_v53 = vcombine.high %v340_v21, %v344_v22 }
 0x1b6   :  { %2165 = vmatpush1.bf16.msra.mxu1 %v5353_v23  ;;  %v468_v23 = vld [vmem:[#allocation2 + $0x618] sm:$0xff] }
 0x1b7   :  { %2166 = vmatprep.subr.bf16.mxu1 %v5346_v25  ;;  %v5289_v25 = vcombine.low %v348_v10, %v352_v11  ;;  %v5410_v54 = vcombine.high %v468_v23, %v472_v24  ;;  %v7026_v32 = vsub.s32 1, %v7018_v26 }
 0x1b8   :  { %2126 = vmatpush1.bf16.msra.mxu0 %v5217_v28  ;;  %v5281_v28 = vcombine.low %v340_v21, %v344_v22 }
 0x1b9   :  { %2127 = vmatprep.subr.bf16.mxu0 %v5338_v30  ;;  %v5409_v30 = vcombine.low %v468_v23, %v472_v24 }
 0x1ba   :  { %2167 = vmatpush1.bf16.msra.mxu1 %v5345_v29  ;;  %v7021_v29 = vsub.s32 0, %v7018_v26 }
 0x1bb   :  { %2168 = vmatprep.subr.bf16.mxu1 %v5466_v31  ;;  %v7023_v31 = vld [vmem:[#allocation5] sm:$0xff] }
 0x1bc   :  { %2128 = vmatpush2.bf16.msra.mxu0 %v5337_v36  ;;  %v534_v33 = vrot.slane %v7023_v31, %v7021_v29  ;;  %v538_v34 = vrot.slane %v7023_v31, %v7026_v32 }
 0x1bd   :  { %2129 = vmatprep.subr.bf16.mxu0 %v5330_v38 }
 0x1be   :  { %2169 = vmatpush2.bf16.msra.mxu1 %v5465_v37 }
 0x1bf   :  { %2170 = vmatprep.subr.bf16.mxu1 %v5458_v39 }
 0x1c0   :  { %2130 = vmatpush2.bf16.msra.mxu0 %v5329_v44 }
 0x1c1   :  { %2131 = vmatprep.subr.bf16.mxu0 %v5322_v46 }
 0x1c2   :  { %2171 = vmatpush2.bf16.msra.mxu1 %v5457_v45 }
 0x1c3   :  { %2172 = vmatprep.subr.bf16.mxu1 %v5450_v47  ;;  %v7039_v47 = vsub.s32 2, %v7018_v26 }
 0x1c4   :  { %2132 = vmatpush2.bf16.msra.mxu0 %v5321_v52 }
 0x1c5   :  { %2133 = vmatprep.subr.bf16.mxu0 %v5314_v56 }
 0x1c6   :  { %2173 = vmatpush2.bf16.msra.mxu1 %v5449_v55 }
 0x1c7   :  { %2174 = vmatprep.subr.bf16.mxu1 %v5442_v57 }
 0x1c8   :  { %2134 = vmatpush2.bf16.msra.mxu0 %v5313_v0 }
 0x1c9   :  { %2135 = vmatprep.subr.bf16.mxu0 %v5306_v59 }
 0x1ca   :  { %2175 = vmatpush2.bf16.msra.mxu1 %v5441_v58 }
 0x1cb   :  { %2176 = vmatprep.subr.bf16.mxu1 %v5434_v1 }
 0x1cc   :  { %2136 = vmatpush2.bf16.msra.mxu0 %v5305_v6 }
 0x1cd   :  { %2137 = vmatprep.subr.bf16.mxu0 %v5298_v8 }
 0x1ce   :  { %2177 = vmatpush2.bf16.msra.mxu1 %v5433_v7  ;;  %v7053_v7 = vsub.s32 4, %v7018_v26 }
 0x1cf   :  { %2178 = vmatprep.subr.bf16.mxu1 %v5426_v9  ;;  %v7058_v9 = vsub.s32 5, %v7018_v26 }
 0x1d0   :  { %2138 = vmatpush2.bf16.msra.mxu0 %v5297_v14  ;;  %v550_v8 = vrot.slane %v7023_v31, %v7053_v7  ;;  %v7066_v14 = vsub.s32 6, %v7018_v26 }
 0x1d1   :  { %2139 = vmatprep.subr.bf16.mxu0 %v5290_v18  ;;  %v554_v12 = vrot.slane %v7023_v31, %v7058_v9  ;;  %v7071_v18 = vsub.s32 7, %v7018_v26 }
 0x1d2   :  { %2179 = vmatpush2.bf16.msra.mxu1 %v5425_v17  ;;  %v558_v21 = vrot.slane %v7023_v31, %v7066_v14 }
 0x1d3   :  { %2180 = vmatprep.subr.bf16.mxu1 %v5418_v20  ;;  %v562_v24 = vrot.slane %v7023_v31, %v7071_v18 }
 0x1d4   :  { %2140 = vmatpush2.bf16.msra.mxu0 %v5289_v25 }
 0x1d5   :  { %2141 = vmatprep.subr.bf16.mxu0 %v5282_v53 }
 0x1d6   :  { %2181 = vmatpush2.bf16.msra.mxu1 %v5417_v27 }
 0x1d7   :  { %2182 = vmatprep.subr.bf16.mxu1 %v5410_v54 }
 0x1d8   :  { %2142 = vmatpush2.bf16.msra.mxu0 %v5281_v28 }
 0x1da   :  { %2183 = vmatpush2.bf16.msra.mxu1 %v5409_v30 }
 0x1db   :  { %v1899_v35 = vpop.f32.mrf.mxu0  ;;  %2144 = vmatmul.mubr.bf16.vlgmr.msra.gmra.mxu0 %v7000_v16  ;;  %v7042_v16 = vsub.s32 3, %v7018_v26 }
 0x1dc   :  { %v1900_v36 = vadd.f32 %v1899_v35, %v534_v33 }
 0x1dd   :  { %v1940_v37 = vpop.f32.mrf.mxu1  ;;  %2185 = vmatmul.mubr.bf16.vlgmr.msra.gmra.mxu1 %v7004_v19  ;;  %v1901_v38 = vpop.f32.mrf.mxu0  ;;  %v542_v19 = vrot.slane %v7023_v31, %v7039_v47  ;;  %v546_v48 = vrot.slane %v7023_v31, %v7042_v16 }
 0x1de   :  { %v7034_v39 = vadd.f32 %v1940_v37, %v1900_v36  ;;  %v1902_v40 = vadd.f32 %v1901_v38, %v538_v34 }
 0x1df   :  { %v1942_v41 = vpop.f32.mrf.mxu1  ;;  %v1903_v42 = vpop.f32.mrf.mxu0 }
 0x1e0   :  { %v7036_v43 = vadd.f32 %v1942_v41, %v1902_v40  ;;  %v5898_v41 = vld [vmem:[#allocation10 + $0xe0] ss:$16 sps:$4 sm:$0xff]   ;;  %v5900_v42 = vld [vmem:[#allocation10 + $0xe4] ss:$16 sps:$4 sm:$0xff]  }
 0x1e1   :  { %v1944_v44 = vpop.f32.mrf.mxu1  ;;  %v1904_v45 = vpop.f32.mrf.mxu0  ;;  %3913 = vmatprep.subr.bf16.mxu0 %v5900_v42 }
 0x1e2   :  { %v2193_v10 = vadd.f32 %v7036_v43, %v7034_v39  ;;  %v5901_v44 = vld [vmem:[#allocation10 + $0x2e0] ss:$16 sps:$4 sm:$0xff]   ;;  %v5903_v45 = vld [vmem:[#allocation10 + $0x2e4] ss:$16 sps:$4 sm:$0xff]   ;;  %3914 = vmatpush1.bf16.msra.mxu0 %v5898_v41 }
 0x1e3   :  { %v1945_v46 = vpop.f32.mrf.mxu1  ;;  %3954 = vmatprep.subr.bf16.mxu1 %v5903_v45 }
 0x1e4   :  { %v5906_v46 = vld [vmem:[#allocation10 + $0xc4] ss:$16 sps:$4 sm:$0xff]   ;;  %3955 = vmatpush1.bf16.msra.mxu1 %v5901_v44 }
 0x1e5   :  { %3915 = vmatprep.subr.bf16.mxu0 %v5906_v46 }
 0x21b   :  { %v1981_v49 = vpop.f32.mrf.mxu0 }
 0x21c   :  { %v1982_v50 = vadd.f32 %v1981_v49, %v542_v19  ;;  %v5909_v19 = vld [vmem:[#allocation10 + $0x2c4] ss:$16 sps:$4 sm:$0xff]   ;;  %v5907_v49 = vld [vmem:[#allocation10 + $0x2c0] ss:$16 sps:$4 sm:$0xff]  }
 0x21d   :  { %v2022_v51 = vpop.f32.mrf.mxu1  ;;  %v1983_v52 = vpop.f32.mrf.mxu0  ;;  %3956 = vmatprep.subr.bf16.mxu1 %v5909_v19 }
 0x21e   :  { %v7048_v55 = vadd.f32 %v2022_v51, %v1982_v50  ;;  %v1984_v56 = vadd.f32 %v1983_v52, %v546_v48  ;;  %v5904_v48 = vld [vmem:[#allocation10 + $0xc0] ss:$16 sps:$4 sm:$0xff]   ;;  %v5912_v50 = vld [vmem:[#allocation10 + $0xa4] ss:$16 sps:$4 sm:$0xff]   ;;  %3957 = vmatpush1.bf16.msra.mxu1 %v5907_v49 }
 0x21f   :  { %v2024_v57 = vpop.f32.mrf.mxu1  ;;  %v1985_v60 = vpop.f32.mrf.mxu0  ;;  %v5915_v51 = vld [vmem:[#allocation10 + $0x2a4] ss:$16 sps:$4 sm:$0xff]   ;;  %3916 = vmatpush1.bf16.msra.mxu0 %v5904_v48  ;;  %v5910_v52 = vld [vmem:[#allocation10 + $0xa0] ss:$16 sps:$4 sm:$0xff]  }
 0x220   :  { %v7050_v61 = vadd.f32 %v2024_v57, %v1984_v56  ;;  %v2194_v13 = vadd.f32 %v2193_v10, %v7048_v55  ;;  %3917 = vmatprep.subr.bf16.mxu0 %v5912_v50  ;;  %v5913_v56 = vld [vmem:[#allocation10 + $0x2a0] ss:$16 sps:$4 sm:$0xff]   ;;  %v5918_v57 = vld [vmem:[#allocation10 + $0x84] ss:$16 sps:$4 sm:$0xff]   ;;  %3958 = vmatprep.subr.bf16.mxu1 %v5915_v51 }
 0x221   :  { %v2026_v62 = vpop.f32.mrf.mxu1  ;;  %v1986_v63 = vpop.f32.mrf.mxu0  ;;  %v5921_v60 = vld [vmem:[#allocation10 + $0x284] ss:$16 sps:$4 sm:$0xff]   ;;  %v5934_v10 = vld [vmem:[#allocation10 + $0x20] ss:$16 sps:$4 sm:$0xff]  }
 0x222   :  { %v2195_v20 = vadd.f32 %v2194_v13, %v7050_v61  ;;  %v5916_v62 = vld [vmem:[#allocation10 + $0x80] ss:$16 sps:$4 sm:$0xff]   ;;  %3959 = vmatpush1.bf16.msra.mxu1 %v5913_v56  ;;  %v5945_v13 = vld [vmem:[#allocation10 + $0x204] ss:$16 sps:$4 sm:$0xff]  }
 0x223   :  { %v2027_v0 = vpop.f32.mrf.mxu1  ;;  %3918 = vmatpush1.bf16.msra.mxu0 %v5910_v52  ;;  %v5919_v63 = vld [vmem:[#allocation10 + $0x280] ss:$16 sps:$4 sm:$0xff]   ;;  %3960 = vmatprep.subr.bf16.mxu1 %v5921_v60  ;;  %v5954_v48 = vld [vmem:[#allocation10 + $0x1c4] ss:$16 sps:$4 sm:$0xff]  }
 0x224   :  { %3919 = vmatprep.subr.bf16.mxu0 %v5918_v57  ;;  %v5924_v0 = vld [vmem:[#allocation10 + $0x64] ss:$16 sps:$4 sm:$0xff]   ;;  %v5952_v50 = vld [vmem:[#allocation10 + $0x1c0] ss:$16 sps:$4 sm:$0xff]  }
 0x225   :  { %v5957_v49 = vld [vmem:[#allocation10 + $0x3c4] ss:$16 sps:$4 sm:$0xff]   ;;  %v5955_v51 = vld [vmem:[#allocation10 + $0x3c0] ss:$16 sps:$4 sm:$0xff]  }
 0x226   :  { %3961 = vmatpush1.bf16.msra.mxu1 %v5919_v63  ;;  %v5963_v52 = vld [vmem:[#allocation10 + $0x3a4] ss:$16 sps:$4 sm:$0xff]   ;;  %v5958_v56 = vld [vmem:[#allocation10 + $0x1a0] ss:$16 sps:$4 sm:$0xff]  }
 0x227   :  { %3920 = vmatpush1.bf16.msra.mxu0 %v5916_v62  ;;  %v5961_v57 = vld [vmem:[#allocation10 + $0x3a0] ss:$16 sps:$4 sm:$0xff]   ;;  %v5966_v60 = vld [vmem:[#allocation10 + $0x184] ss:$16 sps:$4 sm:$0xff]  }
 0x228   :  { %3921 = vmatprep.subr.bf16.mxu0 %v5924_v0  ;;  %v5969_v62 = vld [vmem:[#allocation10 + $0x384] ss:$16 sps:$4 sm:$0xff]   ;;  %v5964_v63 = vld [vmem:[#allocation10 + $0x180] ss:$16 sps:$4 sm:$0xff]  }
 0x229   :  { %v5967_v0 = vld [vmem:[#allocation10 + $0x380] ss:$16 sps:$4 sm:$0xff]  }
 0x25b   :  { %v2063_v58 = vpop.f32.mrf.mxu0 }
 0x25c   :  { %v2064_v11 = vadd.f32 %v2063_v58, %v550_v8  ;;  %v5927_v58 = vld [vmem:[#allocation10 + $0x264] ss:$16 sps:$4 sm:$0xff]  }
 0x25d   :  { %v2104_v59 = vpop.f32.mrf.mxu1  ;;  %v2065_v1 = vpop.f32.mrf.mxu0  ;;  %3962 = vmatprep.subr.bf16.mxu1 %v5927_v58  ;;  %v5939_v8 = vld [vmem:[#allocation10 + $0x224] ss:$16 sps:$4 sm:$0xff]  }
 0x25e   :  { %v7068_v15 = vadd.f32 %v2104_v59, %v2064_v11  ;;  %v2066_v17 = vadd.f32 %v2065_v1, %v554_v12  ;;  %v5922_v59 = vld [vmem:[#allocation10 + $0x60] ss:$16 sps:$4 sm:$0xff]   ;;  %v5942_v12 = vld [vmem:[#allocation10 + $0x4] ss:$16 sps:$4 sm:$0xff]  }
 0x25f   :  { %v2106_v2 = vpop.f32.mrf.mxu1  ;;  %v2067_v3 = vpop.f32.mrf.mxu0  ;;  %v5925_v1 = vld [vmem:[#allocation10 + $0x260] ss:$16 sps:$4 sm:$0xff]   ;;  %3922 = vmatpush1.bf16.msra.mxu0 %v5922_v59  ;;  %v5972_v58 = vld [vmem:[#allocation10 + $0x164] ss:$16 sps:$4 sm:$0xff]  }
 0x260   :  { %v2196_v22 = vadd.f32 %v2195_v20, %v7068_v15  ;;  %v7077_v23 = vadd.f32 %v2106_v2, %v2066_v17  ;;  %v5930_v2 = vld [vmem:[#allocation10 + $0x44] ss:$16 sps:$4 sm:$0xff]   ;;  %3963 = vmatpush1.bf16.msra.mxu1 %v5925_v1  ;;  %v5937_v11 = vld [vmem:[#allocation10 + $0x220] ss:$16 sps:$4 sm:$0xff]  }
 0x261   :  { %v2108_v4 = vpop.f32.mrf.mxu1  ;;  %v2068_v5 = vpop.f32.mrf.mxu0  ;;  %v5933_v3 = vld [vmem:[#allocation10 + $0x244] ss:$16 sps:$4 sm:$0xff]   ;;  %3923 = vmatprep.subr.bf16.mxu0 %v5930_v2  ;;  %v5940_v17 = vld [vmem:[#allocation10] ss:$16 sps:$4 sm:$0xff]  }
 0x262   :  { %v2197_v28 = vadd.f32 %v2196_v22, %v7077_v23  ;;  %v5928_v4 = vld [vmem:[#allocation10 + $0x40] ss:$16 sps:$4 sm:$0xff]   ;;  %3964 = vmatprep.subr.bf16.mxu1 %v5933_v3  ;;  %v5951_v22 = vld [vmem:[#allocation10 + $0x3e4] ss:$16 sps:$4 sm:$0xff]  }
 0x263   :  { %v2109_v6 = vpop.f32.mrf.mxu1  ;;  %v5931_v5 = vld [vmem:[#allocation10 + $0x240] ss:$16 sps:$4 sm:$0xff]   ;;  %3924 = vmatpush1.bf16.msra.mxu0 %v5928_v4  ;;  %v5975_v59 = vld [vmem:[#allocation10 + $0x364] ss:$16 sps:$4 sm:$0xff]  }
 0x264   :  { %v5936_v6 = vld [vmem:[#allocation10 + $0x24] ss:$16 sps:$4 sm:$0xff]   ;;  %3965 = vmatpush1.bf16.msra.mxu1 %v5931_v5  ;;  %v5943_v20 = vld [vmem:[#allocation10 + $0x200] ss:$16 sps:$4 sm:$0xff]  }
 0x265   :  { %3925 = vmatprep.subr.bf16.mxu0 %v5936_v6  ;;  %3966 = vmatprep.subr.bf16.mxu1 %v5939_v8  ;;  %v5970_v1 = vld [vmem:[#allocation10 + $0x160] ss:$16 sps:$4 sm:$0xff]   ;;  %v5978_v3 = vld [vmem:[#allocation10 + $0x144] ss:$16 sps:$4 sm:$0xff]  }
 0x266   :  { %v5973_v2 = vld [vmem:[#allocation10 + $0x360] ss:$16 sps:$4 sm:$0xff]   ;;  %v5981_v4 = vld [vmem:[#allocation10 + $0x344] ss:$16 sps:$4 sm:$0xff]  }
 0x267   :  { %3926 = vmatpush1.bf16.msra.mxu0 %v5934_v10  ;;  %v5976_v5 = vld [vmem:[#allocation10 + $0x140] ss:$16 sps:$4 sm:$0xff]   ;;  %v5984_v8 = vld [vmem:[#allocation10 + $0x124] ss:$16 sps:$4 sm:$0xff]  }
 0x268   :  { %3967 = vmatpush1.bf16.msra.mxu1 %v5937_v11  ;;  %3927 = vmatprep.subr.bf16.mxu0 %v5942_v12  ;;  %v5979_v6 = vld [vmem:[#allocation10 + $0x340] ss:$16 sps:$4 sm:$0xff]   ;;  %v5987_v10 = vld [vmem:[#allocation10 + $0x324] ss:$16 sps:$4 sm:$0xff]  }
 0x269   :  { %3968 = vmatprep.subr.bf16.mxu1 %v5945_v13  ;;  %v5982_v11 = vld [vmem:[#allocation10 + $0x120] ss:$16 sps:$4 sm:$0xff]   ;;  %v5990_v13 = vld [vmem:[#allocation10 + $0x104] ss:$16 sps:$4 sm:$0xff]  }
 0x26a   :  { %v5985_v12 = vld [vmem:[#allocation10 + $0x320] ss:$16 sps:$4 sm:$0xff]  }
 0x26b   :  { %3928 = vmatpush1.bf16.msra.mxu0 %v5940_v17  ;;  %v5993_v17 = vld [vmem:[#allocation10 + $0x304] ss:$16 sps:$4 sm:$0xff]  }
 0x26c   :  { %3969 = vmatpush1.bf16.msra.mxu1 %v5943_v20  ;;  %v5988_v20 = vld [vmem:[#allocation10 + $0x100] ss:$16 sps:$4 sm:$0xff]  }
 0x26d   :  { %3970 = vmatprep.subr.bf16.mxu1 %v5951_v22  ;;  %v5996_v22 = vld [vmem:[#allocation10 + $0x4e4] ss:$16 sps:$4 sm:$0xff]  }
 0x29b   :  { %v2145_v25 = vpop.f32.mrf.mxu0 }
 0x29c   :  { %v2146_v27 = vadd.f32 %v2145_v25, %v558_v21  ;;  %v5948_v21 = vld [vmem:[#allocation10 + $0x1e4] ss:$16 sps:$4 sm:$0xff]   ;;  %v5949_v25 = vld [vmem:[#allocation10 + $0x3e0] ss:$16 sps:$4 sm:$0xff]  }
 0x29d   :  { %v2186_v53 = vpop.f32.mrf.mxu1  ;;  %v2147_v54 = vpop.f32.mrf.mxu0  ;;  %3929 = vmatprep.subr.bf16.mxu0 %v5948_v21  ;;  %3971 = vmatpush2.bf16.msra.mxu1 %v5949_v25  ;;  %v5991_v21 = vld [vmem:[#allocation10 + $0x300] ss:$16 sps:$4 sm:$0xff]  }
 0x29e   :  { %v7082_v26 = vadd.f32 %v2186_v53, %v2146_v27  ;;  %v2148_v30 = vadd.f32 %v2147_v54, %v562_v24  ;;  %v5946_v24 = vld [vmem:[#allocation10 + $0x1e0] ss:$16 sps:$4 sm:$0xff]   ;;  %3972 = vmatprep.subr.bf16.mxu1 %v5957_v49 }
 0x29f   :  { %v2188_v33 = vpop.f32.mrf.mxu1  ;;  %v2149_v34 = vpop.f32.mrf.mxu0  ;;  %3930 = vmatpush2.bf16.msra.mxu0 %v5946_v24  ;;  %v5999_v24 = vld [vmem:[#allocation10 + $0x6e4] ss:$16 sps:$4 sm:$0xff]  }
 0x2a0   :  { %v7084_v35 = vadd.f32 %v2188_v33, %v2148_v30  ;;  %v2198_v37 = vadd.f32 %v2197_v28, %v7082_v26  ;;  %3931 = vmatprep.subr.bf16.mxu0 %v5954_v48 }
 0x2a1   :  { %v2190_v36 = vpop.f32.mrf.mxu1  ;;  %v2150_v38 = vpop.f32.mrf.mxu0  ;;  %3973 = vmatpush2.bf16.msra.mxu1 %v5955_v51 }
 0x2a2   :  { %v2199_v31 = vadd.f32 %v2198_v37, %v7084_v35  ;;  %3974 = vmatprep.subr.bf16.mxu1 %v5963_v52 }
 0x2a3   :  { %v2191_v40 = vpop.f32.mrf.mxu1  ;;  %3932 = vmatpush2.bf16.msra.mxu0 %v5952_v50 }
 0x2a4   :  { %2200 = vadd.xlane.f32.xlu0 %v2199_v31 }
 0x2a5   :  { %3975 = vmatpush2.bf16.msra.mxu1 %v5961_v57 }
 0x2a6   :  { %3976 = vmatprep.subr.bf16.mxu1 %v5969_v62 }
 0x2a9   :  { %3977 = vmatpush2.bf16.msra.mxu1 %v5967_v0 }
 0x2aa   :  { %3978 = vmatprep.subr.bf16.mxu1 %v5975_v59 }
 0x2ad   :  { %3979 = vmatpush2.bf16.msra.mxu1 %v5973_v2 }
 0x2ae   :  { %3980 = vmatprep.subr.bf16.mxu1 %v5981_v4 }
 0x2b1   :  { %3981 = vmatpush2.bf16.msra.mxu1 %v5979_v6 }
 0x2b2   :  { %3982 = vmatprep.subr.bf16.mxu1 %v5987_v10 }
 0x2b5   :  { %3983 = vmatpush2.bf16.msra.mxu1 %v5985_v12 }
 0x2b6   :  { %3984 = vmatprep.subr.bf16.mxu1 %v5993_v17  ;;  %v5997_v17 = vld [vmem:[#allocation10 + $0x6e0] ss:$16 sps:$4 sm:$0xff]  }
 0x2b9   :  { %3985 = vmatpush2.bf16.msra.mxu1 %v5991_v21 }
 0x2ba   :  { %4036 = vmatprep.subr.bf16.mxu1 %v5999_v24  ;;  %v6005_v24 = vld [vmem:[#allocation10 + $0x6c4] ss:$16 sps:$4 sm:$0xff]  }
 0x32d   :  { %v2201_v27 = vpop.xlane.xlu0 %2200 }
 0x32e   :  { %v2202_v53 = vmul.f32 0.0009765625, %v2201_v27 }
 0x330   :  { %v7089_v54 = vsub.f32 %v7034_v39, %v2202_v53  ;;  %v7092_v28 = vsub.f32 %v7036_v43, %v2202_v53  ;;  %v7095_v30 = vsub.f32 %v7048_v55, %v2202_v53  ;;  %v7098_v33 = vsub.f32 %v7050_v61, %v2202_v53 }
 0x331   :  { %v7105_v37 = vsub.f32 %v7068_v15, %v2202_v53  ;;  %v7110_v38 = vsub.f32 %v7077_v23, %v2202_v53  ;;  %v7115_v40 = vsub.f32 %v7082_v26, %v2202_v53  ;;  %v7120_v15 = vsub.f32 %v7084_v35, %v2202_v53  ;;  %v5960_v35 = vld [vmem:[#allocation10 + $0x1a4] ss:$16 sps:$4 sm:$0xff]  }
 0x332   :  { %v2211_v34 = vmul.f32 %v7089_v54, %v7089_v54  ;;  %v2212_v36 = vmul.f32 %v7092_v28, %v7092_v28  ;;  %v2213_v39 = vmul.f32 %v7095_v30, %v7095_v30  ;;  %v2214_v55 = vmul.f32 %v7098_v33, %v7098_v33  ;;  %3933 = vmatprep.subr.bf16.mxu0 %v5960_v35 }
 0x333   :  { %v2215_v31 = vmul.f32 %v7105_v37, %v7105_v37  ;;  %v2216_v42 = vmul.f32 %v7110_v38, %v7110_v38  ;;  %v2217_v23 = vmul.f32 %v7115_v40, %v7115_v40  ;;  %v2218_v46 = vmul.f32 %v7120_v15, %v7120_v15  ;;  %3934 = vmatpush2.bf16.msra.mxu0 %v5958_v56 }
 0x334   :  { %v2219_v43 = vadd.f32 %v2212_v36, %v2211_v34  ;;  %3935 = vmatprep.subr.bf16.mxu0 %v5966_v60  ;;  %v2239_v34 = vld [vmem:[#allocation7] sm:$0xff]  ;;  %v2289_v36 = vld [vmem:[#allocation8] sm:$0xff] }
 0x335   :  { %v2314_v48 = vrot.slane %v2289_v36, %v7058_v9  ;;  %v2322_v49 = vrot.slane %v2289_v36, %v7071_v18  ;;  %v2310_v50 = vrot.slane %v2289_v36, %v7053_v7  ;;  %v2318_v51 = vrot.slane %v2289_v36, %v7066_v14 }
 0x336   :  { %v2220_v61 = vadd.f32 %v2219_v43, %v2213_v39  ;;  %v2260_v39 = vrot.slane %v2239_v34, %v7053_v7  ;;  %v2268_v43 = vrot.slane %v2239_v34, %v7066_v14 }
 0x337   :  { %3936 = vmatpush2.bf16.msra.mxu0 %v5964_v63 }
 0x338   :  { %v2221_v41 = vadd.f32 %v2220_v61, %v2214_v55  ;;  %3937 = vmatprep.subr.bf16.mxu0 %v5972_v58  ;;  %v2248_v55 = vrot.slane %v2239_v34, %v7026_v32  ;;  %v2256_v61 = vrot.slane %v2239_v34, %v7042_v16 }
 0x33a   :  { %v2222_v44 = vadd.f32 %v2221_v41, %v2215_v31  ;;  %v2244_v31 = vrot.slane %v2239_v34, %v7021_v29  ;;  %v2252_v41 = vrot.slane %v2239_v34, %v7039_v47 }
 0x33b   :  { %3938 = vmatpush2.bf16.msra.mxu0 %v5970_v1 }
 0x33c   :  { %v2223_v45 = vadd.f32 %v2222_v44, %v2216_v42  ;;  %3939 = vmatprep.subr.bf16.mxu0 %v5978_v3  ;;  %v2264_v42 = vrot.slane %v2239_v34, %v7058_v9  ;;  %v2272_v44 = vrot.slane %v2239_v34, %v7071_v18  ;;  %v6003_v34 = vld [vmem:[#allocation10 + $0x6c0] ss:$16 sps:$4 sm:$0xff]  }
 0x33e   :  { %v2224_v26 = vadd.f32 %v2223_v45, %v2217_v23  ;;  %v2298_v23 = vrot.slane %v2289_v36, %v7026_v32  ;;  %v2306_v45 = vrot.slane %v2289_v36, %v7042_v16 }
 0x33f   :  { %3940 = vmatpush2.bf16.msra.mxu0 %v5976_v5 }
 0x340   :  { %v2225_v19 = vadd.f32 %v2224_v26, %v2218_v46  ;;  %3941 = vmatprep.subr.bf16.mxu0 %v5984_v8  ;;  %v2294_v46 = vrot.slane %v2289_v36, %v7021_v29  ;;  %v2302_v26 = vrot.slane %v2289_v36, %v7039_v47  ;;  %v6008_v36 = vld [vmem:[#allocation10 + $0x4a4] ss:$16 sps:$4 sm:$0xff]  }
 0x342   :  { %2226 = vadd.xlane.f32.xlu0 %v2225_v19 }
 0x343   :  { %3942 = vmatpush2.bf16.msra.mxu0 %v5982_v11 }
 0x344   :  { %3943 = vmatprep.subr.bf16.mxu0 %v5990_v13  ;;  %v5994_v13 = vld [vmem:[#allocation10 + $0x4e0] ss:$16 sps:$4 sm:$0xff]  }
 0x347   :  { %3944 = vmatpush2.bf16.msra.mxu0 %v5988_v20 }
 0x348   :  { %3995 = vmatprep.subr.bf16.mxu0 %v5996_v22  ;;  %v6002_v22 = vld [vmem:[#allocation10 + $0x4c4] ss:$16 sps:$4 sm:$0xff]  }
 0x3cb   :  { %v2227_v25 = vpop.xlane.xlu0 %2226 }
 0x3cc   :  { %v2228_v27 = vmul.f32 0.0009765625, %v2227_v25 }
 0x3ce   :  { %v2229_v53 = vadd.f32 1e-05, %v2228_v27 }
 0x3d0   :  { %6402 = vrsqrt.f32 %v2229_v53  ;;  %v6000_v53 = vld [vmem:[#allocation10 + $0x4c0] ss:$16 sps:$4 sm:$0xff]  }
 0x3dd   :  { %v6403_v19 = vpop.eup %6402 }
 0x3de   :  { %v2232_v35 = vmul.f32 %v6403_v19, %v7092_v28  ;;  %v2234_v52 = vmul.f32 %v6403_v19, %v7098_v33  ;;  %v2231_v56 = vmul.f32 %v6403_v19, %v7089_v54  ;;  %v2233_v57 = vmul.f32 %v6403_v19, %v7095_v30 }
 0x3df   :  { %v2236_v60 = vmul.f32 %v6403_v19, %v7110_v38  ;;  %v2238_v62 = vmul.f32 %v6403_v19, %v7120_v15  ;;  %v2235_v9 = vmul.f32 %v6403_v19, %v7105_v37  ;;  %v2237_v18 = vmul.f32 %v6403_v19, %v7115_v40  ;;  %v6029_v19 = vld [vmem:[#allocation10 + $0x644] ss:$16 sps:$4 sm:$0xff]  }
 0x3e0   :  { %v2282_v63 = vmul.f32 %v2248_v55, %v2232_v35  ;;  %v2284_v7 = vmul.f32 %v2256_v61, %v2234_v52  ;;  %v2281_v0 = vmul.f32 %v2244_v31, %v2231_v56  ;;  %v2283_v14 = vmul.f32 %v2252_v41, %v2233_v57  ;;  %v6009_v55 = vld [vmem:[#allocation10 + $0x6a0] ss:$16 sps:$4 sm:$0xff]   ;;  %v6014_v61 = vld [vmem:[#allocation10 + $0x484] ss:$16 sps:$4 sm:$0xff]  }
 0x3e1   :  { %v2286_v58 = vmul.f32 %v2264_v42, %v2236_v60  ;;  %v2288_v28 = vmul.f32 %v2272_v44, %v2238_v62  ;;  %v2285_v59 = vmul.f32 %v2260_v39, %v2235_v9  ;;  %v2287_v33 = vmul.f32 %v2268_v43, %v2237_v18  ;;  %v6011_v39 = vld [vmem:[#allocation10 + $0x6a4] ss:$16 sps:$4 sm:$0xff]   ;;  %v6006_v43 = vld [vmem:[#allocation10 + $0x4a0] ss:$16 sps:$4 sm:$0xff]  }
 0x3e2   :  { %v2332_v1 = vadd.f32 %v2298_v23, %v2282_v63  ;;  %v2334_v54 = vadd.f32 %v2306_v45, %v2284_v7  ;;  %v2331_v2 = vadd.f32 %v2294_v46, %v2281_v0  ;;  %v2333_v30 = vadd.f32 %v2302_v26, %v2283_v14  ;;  %v6017_v31 = vld [vmem:[#allocation10 + $0x684] ss:$16 sps:$4 sm:$0xff]   ;;  %v6012_v41 = vld [vmem:[#allocation10 + $0x480] ss:$16 sps:$4 sm:$0xff]  }
 0x3e3   :  { %v2336_v3 = vadd.f32 %v2314_v48, %v2286_v58  ;;  %v2338_v38 = vadd.f32 %v2322_v49, %v2288_v28  ;;  %v7152_v4 = vadd.f32 %v2310_v50, %v2285_v59  ;;  %v7154_v15 = vadd.f32 %v2318_v51, %v2287_v33  ;;  %v6015_v42 = vld [vmem:[#allocation10 + $0x680] ss:$16 sps:$4 sm:$0xff]   ;;  %v6020_v44 = vld [vmem:[#allocation10 + $0x464] ss:$16 sps:$4 sm:$0xff]  }
 0x3e4   :  { %v2340_v37 = vmax.f32 %v2332_v1, 0.0  ;;  %v2342_v40 = vmax.f32 %v2334_v54, 0.0  ;;  %v2339_v5 = vmax.f32 %v2331_v2, 0.0  ;;  %v2341_v6 = vmax.f32 %v2333_v30, 0.0  ;;  %v6023_v23 = vld [vmem:[#allocation10 + $0x664] ss:$16 sps:$4 sm:$0xff]  }
 0x3e5   :  { %v2344_v8 = vmax.f32 %v2336_v3, 0.0  ;;  %v2346_v10 = vmax.f32 %v2338_v38, 0.0  ;;  %v6018_v45 = vld [vmem:[#allocation10 + $0x460] ss:$16 sps:$4 sm:$0xff]   ;;  %v6026_v26 = vld [vmem:[#allocation10 + $0x444] ss:$16 sps:$4 sm:$0xff]  }
 0x3e6   :  { %v7156_v11 = vpack.c.bf16 %v2340_v37, %v2340_v37  ;;  %v7158_v12 = vpack.c.bf16 %v2342_v40, %v2342_v40  ;;  %v7160_v20 = vpack.c.bf16 %v2339_v5, %v2339_v5  ;;  %v7162_v21 = vpack.c.bf16 %v2341_v6, %v2341_v6  ;;  %v6021_v46 = vld [vmem:[#allocation10 + $0x660] ss:$16 sps:$4 sm:$0xff]   ;;  %v6032_v50 = vld [vmem:[#allocation10 + $0x424] ss:$16 sps:$4 sm:$0xff]  }
 0x3e7   :  { %v7168_v25 = vpack.c.bf16 %v2344_v8, %v2344_v8  ;;  %v7170_v27 = vpack.c.bf16 %v2346_v10, %v2346_v10  ;;  %v6024_v48 = vld [vmem:[#allocation10 + $0x440] ss:$16 sps:$4 sm:$0xff]   ;;  %v6035_v51 = vld [vmem:[#allocation10 + $0x624] ss:$16 sps:$4 sm:$0xff]  }
 0x3e8   :  { %3945 = vmatprep.mubr.bf16.mxu0 %v7156_v11  ;;  %3986 = vmatprep.mubr.bf16.mxu1 %v7158_v12  ;;  %v6027_v49 = vld [vmem:[#allocation10 + $0x640] ss:$16 sps:$4 sm:$0xff]   ;;  %v6038_v56 = vld [vmem:[#allocation10 + $0x404] ss:$16 sps:$4 sm:$0xff]  }
 0x3e9   :  { %3946 = vmatmul.mubr.bf16.vlgmr.msra.gmra.mxu0 %v7160_v20  ;;  %3987 = vmatmul.mubr.bf16.vlgmr.msra.gmra.mxu1 %v7162_v21  ;;  %v6030_v35 = vld [vmem:[#allocation10 + $0x420] ss:$16 sps:$4 sm:$0xff]   ;;  %v6041_v57 = vld [vmem:[#allocation10 + $0x604] ss:$16 sps:$4 sm:$0xff]  }
 0x3ea   :  { %3996 = vmatpush1.bf16.msra.mxu0 %v5994_v13  ;;  %4037 = vmatpush1.bf16.msra.mxu1 %v5997_v17  ;;  %v6033_v52 = vld [vmem:[#allocation10 + $0x620] ss:$16 sps:$4 sm:$0xff]   ;;  %v6044_v9 = vld [vmem:[#allocation10 + $0x5e4] ss:$16 sps:$4 sm:$0xff]  }
 0x3eb   :  { %4027 = vmatprep.mubr.bf16.mxu0 %v7168_v25  ;;  %4068 = vmatprep.mubr.bf16.mxu1 %v7170_v27  ;;  %v6036_v60 = vld [vmem:[#allocation10 + $0x400] ss:$16 sps:$4 sm:$0xff]   ;;  %v6047_v18 = vld [vmem:[#allocation10 + $0x7e4] ss:$16 sps:$4 sm:$0xff]  }
 0x3ec   :  { %3997 = vmatprep.subr.bf16.mxu0 %v6002_v22  ;;  %4038 = vmatprep.subr.bf16.mxu1 %v6005_v24  ;;  %v6039_v62 = vld [vmem:[#allocation10 + $0x600] ss:$16 sps:$4 sm:$0xff]   ;;  %v6050_v0 = vld [vmem:[#allocation10 + $0x5c4] ss:$16 sps:$4 sm:$0xff]  }
 0x3ed   :  { %v6042_v63 = vld [vmem:[#allocation10 + $0x5e0] ss:$16 sps:$4 sm:$0xff]   ;;  %v6053_v14 = vld [vmem:[#allocation10 + $0x7c4] ss:$16 sps:$4 sm:$0xff]  }
 0x3ee   :  { %3998 = vmatpush1.bf16.msra.mxu0 %v6000_v53  ;;  %4039 = vmatpush1.bf16.msra.mxu1 %v6003_v34  ;;  %v6045_v7 = vld [vmem:[#allocation10 + $0x7e0] ss:$16 sps:$4 sm:$0xff]   ;;  %v6056_v59 = vld [vmem:[#allocation10 + $0x5a4] ss:$16 sps:$4 sm:$0xff]  }
 0x3ef   :  { %3999 = vmatprep.subr.bf16.mxu0 %v6008_v36  ;;  %4040 = vmatprep.subr.bf16.mxu1 %v6011_v39  ;;  %v6048_v58 = vld [vmem:[#allocation10 + $0x5c0] ss:$16 sps:$4 sm:$0xff]   ;;  %v6059_v33 = vld [vmem:[#allocation10 + $0x7a4] ss:$16 sps:$4 sm:$0xff]  }
 0x3f0   :  { %v6051_v28 = vld [vmem:[#allocation10 + $0x7c0] ss:$16 sps:$4 sm:$0xff]   ;;  %v6062_v2 = vld [vmem:[#allocation10 + $0x584] ss:$16 sps:$4 sm:$0xff]  }
 0x3f1   :  { %v6054_v1 = vld [vmem:[#allocation10 + $0x5a0] ss:$16 sps:$4 sm:$0xff]   ;;  %v6065_v30 = vld [vmem:[#allocation10 + $0x784] ss:$16 sps:$4 sm:$0xff]  }
 0x3f2   :  { %4000 = vmatpush1.bf16.msra.mxu0 %v6006_v43  ;;  %4041 = vmatpush1.bf16.msra.mxu1 %v6009_v55  ;;  %v6057_v54 = vld [vmem:[#allocation10 + $0x7a0] ss:$16 sps:$4 sm:$0xff]   ;;  %v6068_v37 = vld [vmem:[#allocation10 + $0x564] ss:$16 sps:$4 sm:$0xff]  }
 0x3f3   :  { %4001 = vmatprep.subr.bf16.mxu0 %v6014_v61  ;;  %4042 = vmatprep.subr.bf16.mxu1 %v6017_v31  ;;  %v6060_v3 = vld [vmem:[#allocation10 + $0x580] ss:$16 sps:$4 sm:$0xff]   ;;  %v6071_v40 = vld [vmem:[#allocation10 + $0x764] ss:$16 sps:$4 sm:$0xff]   ;;  %v2343_v61 = vmax.f32 %v7152_v4, 0.0  ;;  %v2345_v31 = vmax.f32 %v7154_v15, 0.0 }
 0x3f4   :  { %v6063_v38 = vld [vmem:[#allocation10 + $0x780] ss:$16 sps:$4 sm:$0xff]   ;;  %v6074_v8 = vld [vmem:[#allocation10 + $0x544] ss:$16 sps:$4 sm:$0xff]   ;;  %v6096_v4 = vld [vmem:[#allocation10 + $0xc8] ss:$16 sps:$4 sm:$0xff]  }
 0x3f5   :  { %v6066_v5 = vld [vmem:[#allocation10 + $0x560] ss:$16 sps:$4 sm:$0xff]   ;;  %v6077_v10 = vld [vmem:[#allocation10 + $0x744] ss:$16 sps:$4 sm:$0xff]   ;;  %v6099_v15 = vld [vmem:[#allocation10 + $0x2c8] ss:$16 sps:$4 sm:$0xff]  }
 0x3f6   :  { %4002 = vmatpush1.bf16.msra.mxu0 %v6012_v41  ;;  %4043 = vmatpush1.bf16.msra.mxu1 %v6015_v42  ;;  %v6069_v6 = vld [vmem:[#allocation10 + $0x760] ss:$16 sps:$4 sm:$0xff]   ;;  %v6080_v22 = vld [vmem:[#allocation10 + $0x524] ss:$16 sps:$4 sm:$0xff]   ;;  %v6092_v41 = vld [vmem:[#allocation10 + $0xec] ss:$16 sps:$4 sm:$0xff]  }
 0x3f7   :  { %4003 = vmatprep.subr.bf16.mxu0 %v6020_v44  ;;  %4044 = vmatprep.subr.bf16.mxu1 %v6023_v23  ;;  %v6072_v13 = vld [vmem:[#allocation10 + $0x540] ss:$16 sps:$4 sm:$0xff]   ;;  %v6083_v24 = vld [vmem:[#allocation10 + $0x724] ss:$16 sps:$4 sm:$0xff]   ;;  %v6095_v42 = vld [vmem:[#allocation10 + $0x2ec] ss:$16 sps:$4 sm:$0xff]   ;;  %v7176_v23 = vpack.c.bf16 %v2343_v61, %v2343_v61 }
 0x3f8   :  { %v6075_v17 = vld [vmem:[#allocation10 + $0x740] ss:$16 sps:$4 sm:$0xff]   ;;  %v6086_v36 = vld [vmem:[#allocation10 + $0x504] ss:$16 sps:$4 sm:$0xff]   ;;  %v6090_v44 = vld [vmem:[#allocation10 + $0xe8] ss:$16 sps:$4 sm:$0xff]  }
 0x3f9   :  { %v6078_v53 = vld [vmem:[#allocation10 + $0x520] ss:$16 sps:$4 sm:$0xff]   ;;  %v6089_v39 = vld [vmem:[#allocation10 + $0x704] ss:$16 sps:$4 sm:$0xff]   ;;  %v6170_v61 = vld [vmem:[#allocation10 + $0x14c] ss:$16 sps:$4 sm:$0xff]  }
 0x3fa   :  { %4004 = vmatpush1.bf16.msra.mxu0 %v6018_v45  ;;  %4045 = vmatpush1.bf16.msra.mxu1 %v6021_v46  ;;  %v6081_v34 = vld [vmem:[#allocation10 + $0x720] ss:$16 sps:$4 sm:$0xff]   ;;  %v7178_v45 = vpack.c.bf16 %v2345_v31, %v2345_v31  ;;  %v6093_v46 = vld [vmem:[#allocation10 + $0x2e8] ss:$16 sps:$4 sm:$0xff]   ;;  %v6173_v31 = vld [vmem:[#allocation10 + $0x34c] ss:$16 sps:$4 sm:$0xff]  }
 0x3fb   :  { %4005 = vmatprep.subr.bf16.mxu0 %v6026_v26  ;;  %4046 = vmatprep.subr.bf16.mxu1 %v6029_v19  ;;  %v6084_v43 = vld [vmem:[#allocation10 + $0x500] ss:$16 sps:$4 sm:$0xff]   ;;  %v6098_v26 = vld [vmem:[#allocation10 + $0xcc] ss:$16 sps:$4 sm:$0xff]  }
 0x3fc   :  { %v6087_v55 = vld [vmem:[#allocation10 + $0x700] ss:$16 sps:$4 sm:$0xff]   ;;  %v6101_v19 = vld [vmem:[#allocation10 + $0x2cc] ss:$16 sps:$4 sm:$0xff]  }
 0x3fe   :  { %4006 = vmatpush1.bf16.msra.mxu0 %v6024_v48  ;;  %4047 = vmatpush1.bf16.msra.mxu1 %v6027_v49  ;;  %v6104_v48 = vld [vmem:[#allocation10 + $0xac] ss:$16 sps:$4 sm:$0xff]  }
 0x3ff   :  { %4007 = vmatprep.subr.bf16.mxu0 %v6032_v50  ;;  %4048 = vmatprep.subr.bf16.mxu1 %v6035_v51  ;;  %v6107_v49 = vld [vmem:[#allocation10 + $0x2ac] ss:$16 sps:$4 sm:$0xff]   ;;  %v6102_v50 = vld [vmem:[#allocation10 + $0xa8] ss:$16 sps:$4 sm:$0xff]  }
 0x400   :  { %v6105_v51 = vld [vmem:[#allocation10 + $0x2a8] ss:$16 sps:$4 sm:$0xff]  }
 0x402   :  { %4008 = vmatpush1.bf16.msra.mxu0 %v6030_v35  ;;  %4049 = vmatpush1.bf16.msra.mxu1 %v6033_v52  ;;  %v6110_v35 = vld [vmem:[#allocation10 + $0x8c] ss:$16 sps:$4 sm:$0xff]  }
 0x403   :  { %4009 = vmatprep.subr.bf16.mxu0 %v6038_v56  ;;  %4050 = vmatprep.subr.bf16.mxu1 %v6041_v57  ;;  %v6113_v52 = vld [vmem:[#allocation10 + $0x28c] ss:$16 sps:$4 sm:$0xff]   ;;  %v6108_v56 = vld [vmem:[#allocation10 + $0x88] ss:$16 sps:$4 sm:$0xff]  }
 0x404   :  { %v6116_v57 = vld [vmem:[#allocation10 + $0x6c] ss:$16 sps:$4 sm:$0xff]  }
 0x406   :  { %4010 = vmatpush1.bf16.msra.mxu0 %v6036_v60  ;;  %4051 = vmatpush1.bf16.msra.mxu1 %v6039_v62  ;;  %v6114_v60 = vld [vmem:[#allocation10 + $0x68] ss:$16 sps:$4 sm:$0xff]  }
 0x407   :  { %4011 = vmatprep.subr.bf16.mxu0 %v6044_v9  ;;  %4052 = vmatprep.subr.bf16.mxu1 %v6047_v18  ;;  %v6117_v62 = vld [vmem:[#allocation10 + $0x268] ss:$16 sps:$4 sm:$0xff]   ;;  %v6122_v9 = vld [vmem:[#allocation10 + $0x4c] ss:$16 sps:$4 sm:$0xff]  }
 0x408   :  { %v6125_v18 = vld [vmem:[#allocation10 + $0x24c] ss:$16 sps:$4 sm:$0xff]  }
 0x40a   :  { %4012 = vmatpush2.bf16.msra.mxu0 %v6042_v63  ;;  %4053 = vmatpush2.bf16.msra.mxu1 %v6045_v7  ;;  %v6120_v63 = vld [vmem:[#allocation10 + $0x48] ss:$16 sps:$4 sm:$0xff]  }
 0x40b   :  { %4013 = vmatprep.subr.bf16.mxu0 %v6050_v0  ;;  %4054 = vmatprep.subr.bf16.mxu1 %v6053_v14  ;;  %v6123_v7 = vld [vmem:[#allocation10 + $0x248] ss:$16 sps:$4 sm:$0xff]   ;;  %v6128_v0 = vld [vmem:[#allocation10 + $0x2c] ss:$16 sps:$4 sm:$0xff]  }
 0x40c   :  { %v6131_v14 = vld [vmem:[#allocation10 + $0x22c] ss:$16 sps:$4 sm:$0xff]  }
 0x40e   :  { %4014 = vmatpush2.bf16.msra.mxu0 %v6048_v58  ;;  %4055 = vmatpush2.bf16.msra.mxu1 %v6051_v28  ;;  %v6126_v58 = vld [vmem:[#allocation10 + $0x28] ss:$16 sps:$4 sm:$0xff]  }
 0x40f   :  { %4015 = vmatprep.subr.bf16.mxu0 %v6056_v59  ;;  %4056 = vmatprep.subr.bf16.mxu1 %v6059_v33  ;;  %v6129_v28 = vld [vmem:[#allocation10 + $0x228] ss:$16 sps:$4 sm:$0xff]   ;;  %v6134_v59 = vld [vmem:[#allocation10 + $0xc] ss:$16 sps:$4 sm:$0xff]  }
 0x410   :  { %v6137_v33 = vld [vmem:[#allocation10 + $0x20c] ss:$16 sps:$4 sm:$0xff]  }
 0x412   :  { %4016 = vmatpush2.bf16.msra.mxu0 %v6054_v1  ;;  %4057 = vmatpush2.bf16.msra.mxu1 %v6057_v54  ;;  %v6132_v1 = vld [vmem:[#allocation10 + $0x8] ss:$16 sps:$4 sm:$0xff]  }
 0x413   :  { %4017 = vmatprep.subr.bf16.mxu0 %v6062_v2  ;;  %4058 = vmatprep.subr.bf16.mxu1 %v6065_v30  ;;  %v6135_v54 = vld [vmem:[#allocation10 + $0x208] ss:$16 sps:$4 sm:$0xff]   ;;  %v6140_v2 = vld [vmem:[#allocation10 + $0x1ec] ss:$16 sps:$4 sm:$0xff]  }
 0x414   :  { %v6143_v30 = vld [vmem:[#allocation10 + $0x3ec] ss:$16 sps:$4 sm:$0xff]  }
 0x416   :  { %4018 = vmatpush2.bf16.msra.mxu0 %v6060_v3  ;;  %4059 = vmatpush2.bf16.msra.mxu1 %v6063_v38  ;;  %v6138_v3 = vld [vmem:[#allocation10 + $0x1e8] ss:$16 sps:$4 sm:$0xff]  }
 0x417   :  { %4019 = vmatprep.subr.bf16.mxu0 %v6068_v37  ;;  %4060 = vmatprep.subr.bf16.mxu1 %v6071_v40  ;;  %v6141_v38 = vld [vmem:[#allocation10 + $0x3e8] ss:$16 sps:$4 sm:$0xff]   ;;  %v6146_v37 = vld [vmem:[#allocation10 + $0x1cc] ss:$16 sps:$4 sm:$0xff]  }
 0x418   :  { %v6149_v40 = vld [vmem:[#allocation10 + $0x3cc] ss:$16 sps:$4 sm:$0xff]  }
 0x41a   :  { %4020 = vmatpush2.bf16.msra.mxu0 %v6066_v5  ;;  %4061 = vmatpush2.bf16.msra.mxu1 %v6069_v6  ;;  %v6144_v5 = vld [vmem:[#allocation10 + $0x1c8] ss:$16 sps:$4 sm:$0xff]  }
 0x41b   :  { %4021 = vmatprep.subr.bf16.mxu0 %v6074_v8  ;;  %4062 = vmatprep.subr.bf16.mxu1 %v6077_v10  ;;  %v6147_v6 = vld [vmem:[#allocation10 + $0x3c8] ss:$16 sps:$4 sm:$0xff]   ;;  %v6152_v8 = vld [vmem:[#allocation10 + $0x1ac] ss:$16 sps:$4 sm:$0xff]  }
 0x41c   :  { %v6155_v10 = vld [vmem:[#allocation10 + $0x3ac] ss:$16 sps:$4 sm:$0xff]  }
 0x41e   :  { %4022 = vmatpush2.bf16.msra.mxu0 %v6072_v13  ;;  %4063 = vmatpush2.bf16.msra.mxu1 %v6075_v17  ;;  %v6150_v13 = vld [vmem:[#allocation10 + $0x1a8] ss:$16 sps:$4 sm:$0xff]  }
 0x41f   :  { %4023 = vmatprep.subr.bf16.mxu0 %v6080_v22  ;;  %4064 = vmatprep.subr.bf16.mxu1 %v6083_v24  ;;  %v6153_v17 = vld [vmem:[#allocation10 + $0x3a8] ss:$16 sps:$4 sm:$0xff]   ;;  %v6158_v22 = vld [vmem:[#allocation10 + $0x18c] ss:$16 sps:$4 sm:$0xff]  }
 0x420   :  { %v6161_v24 = vld [vmem:[#allocation10 + $0x38c] ss:$16 sps:$4 sm:$0xff]  }
 0x422   :  { %4024 = vmatpush2.bf16.msra.mxu0 %v6078_v53  ;;  %4065 = vmatpush2.bf16.msra.mxu1 %v6081_v34  ;;  %v6156_v53 = vld [vmem:[#allocation10 + $0x188] ss:$16 sps:$4 sm:$0xff]  }
 0x423   :  { %4025 = vmatprep.subr.bf16.mxu0 %v6086_v36  ;;  %4066 = vmatprep.subr.bf16.mxu1 %v6089_v39  ;;  %v6159_v34 = vld [vmem:[#allocation10 + $0x388] ss:$16 sps:$4 sm:$0xff]   ;;  %v6164_v36 = vld [vmem:[#allocation10 + $0x16c] ss:$16 sps:$4 sm:$0xff]  }
 0x424   :  { %v6167_v39 = vld [vmem:[#allocation10 + $0x36c] ss:$16 sps:$4 sm:$0xff]  }
 0x426   :  { %4026 = vmatpush2.bf16.msra.mxu0 %v6084_v43  ;;  %4067 = vmatpush2.bf16.msra.mxu1 %v6087_v55  ;;  %v6162_v43 = vld [vmem:[#allocation10 + $0x168] ss:$16 sps:$4 sm:$0xff]  }
 0x427   :  { %4077 = vmatprep.subr.bf16.mxu0 %v6092_v41  ;;  %4118 = vmatprep.subr.bf16.mxu1 %v6095_v42  ;;  %v6165_v55 = vld [vmem:[#allocation10 + $0x368] ss:$16 sps:$4 sm:$0xff]  }
 0x428   :  { %v6168_v41 = vld [vmem:[#allocation10 + $0x148] ss:$16 sps:$4 sm:$0xff]  }
 0x429   :  { %4028 = vmatmul.mubr.bf16.vlgmr.msra.gmra.mxu0 %v7176_v23  ;;  %4069 = vmatmul.mubr.bf16.vlgmr.msra.gmra.mxu1 %v7178_v45  ;;  %v6171_v42 = vld [vmem:[#allocation10 + $0x348] ss:$16 sps:$4 sm:$0xff]  }
 0x42a   :  { %4078 = vmatpush1.bf16.msra.mxu0 %v6090_v44  ;;  %4109 = vmatprep.mubr.bf16.mxu0 %v7156_v11  ;;  %v6111_v11 = vld [vmem:[#allocation10 + $0x288] ss:$16 sps:$4 sm:$0xff]   ;;  %v6176_v44 = vld [vmem:[#allocation10 + $0x12c] ss:$16 sps:$4 sm:$0xff]  }
 0x42b   :  { %4119 = vmatpush1.bf16.msra.mxu1 %v6093_v46  ;;  %4150 = vmatprep.mubr.bf16.mxu1 %v7158_v12  ;;  %v6119_v12 = vld [vmem:[#allocation10 + $0x26c] ss:$16 sps:$4 sm:$0xff]  }
 0x42c   :  { %4079 = vmatprep.subr.bf16.mxu0 %v6098_v26  ;;  %4120 = vmatprep.subr.bf16.mxu1 %v6101_v19  ;;  %v6179_v46 = vld [vmem:[#allocation10 + $0x32c] ss:$16 sps:$4 sm:$0xff]   ;;  %v6174_v26 = vld [vmem:[#allocation10 + $0x128] ss:$16 sps:$4 sm:$0xff]  }
 0x42d   :  { %v6177_v19 = vld [vmem:[#allocation10 + $0x328] ss:$16 sps:$4 sm:$0xff]  }
 0x42e   :  { %4080 = vmatpush1.bf16.msra.mxu0 %v6096_v4  ;;  %v6182_v4 = vld [vmem:[#allocation10 + $0x10c] ss:$16 sps:$4 sm:$0xff]  }
 0x42f   :  { %4121 = vmatpush1.bf16.msra.mxu1 %v6099_v15  ;;  %4081 = vmatprep.subr.bf16.mxu0 %v6104_v48  ;;  %v6185_v15 = vld [vmem:[#allocation10 + $0x30c] ss:$16 sps:$4 sm:$0xff]   ;;  %v6180_v48 = vld [vmem:[#allocation10 + $0x108] ss:$16 sps:$4 sm:$0xff]  }
 0x430   :  { %4122 = vmatprep.subr.bf16.mxu1 %v6107_v49  ;;  %v6183_v49 = vld [vmem:[#allocation10 + $0x308] ss:$16 sps:$4 sm:$0xff]  }
 0x432   :  { %4082 = vmatpush1.bf16.msra.mxu0 %v6102_v50  ;;  %v6188_v50 = vld [vmem:[#allocation10 + $0x4ec] ss:$16 sps:$4 sm:$0xff]  }
 0x433   :  { %4123 = vmatpush1.bf16.msra.mxu1 %v6105_v51  ;;  %4083 = vmatprep.subr.bf16.mxu0 %v6110_v35  ;;  %v6191_v51 = vld [vmem:[#allocation10 + $0x6ec] ss:$16 sps:$4 sm:$0xff]   ;;  %v6186_v35 = vld [vmem:[#allocation10 + $0x4e8] ss:$16 sps:$4 sm:$0xff]  }
 0x434   :  { %4124 = vmatprep.subr.bf16.mxu1 %v6113_v52  ;;  %v6189_v52 = vld [vmem:[#allocation10 + $0x6e8] ss:$16 sps:$4 sm:$0xff]  }
 0x436   :  { %4084 = vmatpush1.bf16.msra.mxu0 %v6108_v56  ;;  %v6194_v56 = vld [vmem:[#allocation10 + $0x4cc] ss:$16 sps:$4 sm:$0xff]  }
 0x437   :  { %4125 = vmatpush1.bf16.msra.mxu1 %v6111_v11  ;;  %4085 = vmatprep.subr.bf16.mxu0 %v6116_v57  ;;  %v6197_v11 = vld [vmem:[#allocation10 + $0x6cc] ss:$16 sps:$4 sm:$0xff]   ;;  %v6192_v57 = vld [vmem:[#allocation10 + $0x4c8] ss:$16 sps:$4 sm:$0xff]  }
 0x438   :  { %4126 = vmatprep.subr.bf16.mxu1 %v6119_v12  ;;  %v6195_v12 = vld [vmem:[#allocation10 + $0x6c8] ss:$16 sps:$4 sm:$0xff]  }
 0x43a   :  { %4086 = vmatpush1.bf16.msra.mxu0 %v6114_v60  ;;  %v6200_v60 = vld [vmem:[#allocation10 + $0x4ac] ss:$16 sps:$4 sm:$0xff]  }
 0x43b   :  { %4127 = vmatpush1.bf16.msra.mxu1 %v6117_v62  ;;  %4087 = vmatprep.subr.bf16.mxu0 %v6122_v9  ;;  %v6203_v62 = vld [vmem:[#allocation10 + $0x6ac] ss:$16 sps:$4 sm:$0xff]   ;;  %v6198_v9 = vld [vmem:[#allocation10 + $0x4a8] ss:$16 sps:$4 sm:$0xff]  }
 0x43c   :  { %4128 = vmatprep.subr.bf16.mxu1 %v6125_v18  ;;  %v6206_v18 = vld [vmem:[#allocation10 + $0x48c] ss:$16 sps:$4 sm:$0xff]  }
 0x43e   :  { %4088 = vmatpush1.bf16.msra.mxu0 %v6120_v63  ;;  %v6204_v63 = vld [vmem:[#allocation10 + $0x488] ss:$16 sps:$4 sm:$0xff]  }
 0x43f   :  { %4129 = vmatpush1.bf16.msra.mxu1 %v6123_v7  ;;  %4089 = vmatprep.subr.bf16.mxu0 %v6128_v0  ;;  %v6212_v7 = vld [vmem:[#allocation10 + $0x46c] ss:$16 sps:$4 sm:$0xff]  }
 0x440   :  { %4130 = vmatprep.subr.bf16.mxu1 %v6131_v14  ;;  %v6215_v0 = vld [vmem:[#allocation10 + $0x66c] ss:$16 sps:$4 sm:$0xff]   ;;  %v6213_v14 = vld [vmem:[#allocation10 + $0x668] ss:$16 sps:$4 sm:$0xff]  }
 0x442   :  { %4090 = vmatpush1.bf16.msra.mxu0 %v6126_v58  ;;  %v6218_v58 = vld [vmem:[#allocation10 + $0x44c] ss:$16 sps:$4 sm:$0xff]  }
 0x443   :  { %4131 = vmatpush1.bf16.msra.mxu1 %v6129_v28  ;;  %4091 = vmatprep.subr.bf16.mxu0 %v6134_v59  ;;  %v6221_v28 = vld [vmem:[#allocation10 + $0x64c] ss:$16 sps:$4 sm:$0xff]   ;;  %v6216_v59 = vld [vmem:[#allocation10 + $0x448] ss:$16 sps:$4 sm:$0xff]  }
 0x444   :  { %4132 = vmatprep.subr.bf16.mxu1 %v6137_v33  ;;  %v6219_v33 = vld [vmem:[#allocation10 + $0x648] ss:$16 sps:$4 sm:$0xff]  }
 0x446   :  { %4092 = vmatpush1.bf16.msra.mxu0 %v6132_v1  ;;  %v6224_v1 = vld [vmem:[#allocation10 + $0x42c] ss:$16 sps:$4 sm:$0xff]  }
 0x447   :  { %4133 = vmatpush1.bf16.msra.mxu1 %v6135_v54  ;;  %4093 = vmatprep.subr.bf16.mxu0 %v6140_v2  ;;  %v6227_v54 = vld [vmem:[#allocation10 + $0x62c] ss:$16 sps:$4 sm:$0xff]   ;;  %v6222_v2 = vld [vmem:[#allocation10 + $0x428] ss:$16 sps:$4 sm:$0xff]  }
 0x448   :  { %4134 = vmatprep.subr.bf16.mxu1 %v6143_v30  ;;  %v6225_v30 = vld [vmem:[#allocation10 + $0x628] ss:$16 sps:$4 sm:$0xff]  }
 0x44a   :  { %4094 = vmatpush2.bf16.msra.mxu0 %v6138_v3  ;;  %v6230_v3 = vld [vmem:[#allocation10 + $0x40c] ss:$16 sps:$4 sm:$0xff]  }
 0x44b   :  { %4135 = vmatpush2.bf16.msra.mxu1 %v6141_v38  ;;  %4095 = vmatprep.subr.bf16.mxu0 %v6146_v37  ;;  %v6233_v38 = vld [vmem:[#allocation10 + $0x60c] ss:$16 sps:$4 sm:$0xff]   ;;  %v6228_v37 = vld [vmem:[#allocation10 + $0x408] ss:$16 sps:$4 sm:$0xff]  }
 0x44c   :  { %4136 = vmatprep.subr.bf16.mxu1 %v6149_v40  ;;  %v6231_v40 = vld [vmem:[#allocation10 + $0x608] ss:$16 sps:$4 sm:$0xff]  }
 0x44e   :  { %4096 = vmatpush2.bf16.msra.mxu0 %v6144_v5  ;;  %v6236_v5 = vld [vmem:[#allocation10 + $0x5ec] ss:$16 sps:$4 sm:$0xff]  }
 0x44f   :  { %4137 = vmatpush2.bf16.msra.mxu1 %v6147_v6  ;;  %4097 = vmatprep.subr.bf16.mxu0 %v6152_v8  ;;  %v6239_v6 = vld [vmem:[#allocation10 + $0x7ec] ss:$16 sps:$4 sm:$0xff]   ;;  %v6234_v8 = vld [vmem:[#allocation10 + $0x5e8] ss:$16 sps:$4 sm:$0xff]  }
 0x450   :  { %4138 = vmatprep.subr.bf16.mxu1 %v6155_v10  ;;  %v6237_v10 = vld [vmem:[#allocation10 + $0x7e8] ss:$16 sps:$4 sm:$0xff]  }
 0x452   :  { %4098 = vmatpush2.bf16.msra.mxu0 %v6150_v13  ;;  %v6242_v13 = vld [vmem:[#allocation10 + $0x5cc] ss:$16 sps:$4 sm:$0xff]  }
 0x453   :  { %4139 = vmatpush2.bf16.msra.mxu1 %v6153_v17  ;;  %4099 = vmatprep.subr.bf16.mxu0 %v6158_v22  ;;  %v6245_v17 = vld [vmem:[#allocation10 + $0x7cc] ss:$16 sps:$4 sm:$0xff]   ;;  %v6240_v22 = vld [vmem:[#allocation10 + $0x5c8] ss:$16 sps:$4 sm:$0xff]  }
 0x454   :  { %4140 = vmatprep.subr.bf16.mxu1 %v6161_v24  ;;  %v6243_v24 = vld [vmem:[#allocation10 + $0x7c8] ss:$16 sps:$4 sm:$0xff]  }
 0x456   :  { %4100 = vmatpush2.bf16.msra.mxu0 %v6156_v53  ;;  %v6248_v53 = vld [vmem:[#allocation10 + $0x5ac] ss:$16 sps:$4 sm:$0xff]  }
 0x457   :  { %4141 = vmatpush2.bf16.msra.mxu1 %v6159_v34  ;;  %4101 = vmatprep.subr.bf16.mxu0 %v6164_v36  ;;  %v6251_v34 = vld [vmem:[#allocation10 + $0x7ac] ss:$16 sps:$4 sm:$0xff]   ;;  %v6246_v36 = vld [vmem:[#allocation10 + $0x5a8] ss:$16 sps:$4 sm:$0xff]  }
 0x458   :  { %4142 = vmatprep.subr.bf16.mxu1 %v6167_v39  ;;  %v6249_v39 = vld [vmem:[#allocation10 + $0x7a8] ss:$16 sps:$4 sm:$0xff]  }
 0x45a   :  { %4102 = vmatpush2.bf16.msra.mxu0 %v6162_v43  ;;  %v6254_v43 = vld [vmem:[#allocation10 + $0x58c] ss:$16 sps:$4 sm:$0xff]  }
 0x45b   :  { %4143 = vmatpush2.bf16.msra.mxu1 %v6165_v55  ;;  %4103 = vmatprep.subr.bf16.mxu0 %v6170_v61  ;;  %v6257_v55 = vld [vmem:[#allocation10 + $0x78c] ss:$16 sps:$4 sm:$0xff]   ;;  %v6252_v61 = vld [vmem:[#allocation10 + $0x588] ss:$16 sps:$4 sm:$0xff]  }
 0x45c   :  { %4144 = vmatprep.subr.bf16.mxu1 %v6173_v31  ;;  %v6255_v31 = vld [vmem:[#allocation10 + $0x788] ss:$16 sps:$4 sm:$0xff]  }
 0x45e   :  { %4104 = vmatpush2.bf16.msra.mxu0 %v6168_v41  ;;  %v6260_v41 = vld [vmem:[#allocation10 + $0x56c] ss:$16 sps:$4 sm:$0xff]  }
 0x45f   :  { %4145 = vmatpush2.bf16.msra.mxu1 %v6171_v42  ;;  %4105 = vmatprep.subr.bf16.mxu0 %v6176_v44  ;;  %v6263_v42 = vld [vmem:[#allocation10 + $0x76c] ss:$16 sps:$4 sm:$0xff]   ;;  %v6258_v44 = vld [vmem:[#allocation10 + $0x568] ss:$16 sps:$4 sm:$0xff]  }
 0x460   :  { %4146 = vmatprep.subr.bf16.mxu1 %v6179_v46  ;;  %v6261_v46 = vld [vmem:[#allocation10 + $0x768] ss:$16 sps:$4 sm:$0xff]  }
 0x462   :  { %4106 = vmatpush2.bf16.msra.mxu0 %v6174_v26  ;;  %v6266_v26 = vld [vmem:[#allocation10 + $0x54c] ss:$16 sps:$4 sm:$0xff]  }
 0x463   :  { %4147 = vmatpush2.bf16.msra.mxu1 %v6177_v19  ;;  %4107 = vmatprep.subr.bf16.mxu0 %v6182_v4  ;;  %v6269_v19 = vld [vmem:[#allocation10 + $0x74c] ss:$16 sps:$4 sm:$0xff]   ;;  %v6264_v4 = vld [vmem:[#allocation10 + $0x548] ss:$16 sps:$4 sm:$0xff]  }
 0x464   :  { %4148 = vmatprep.subr.bf16.mxu1 %v6185_v15  ;;  %v6267_v15 = vld [vmem:[#allocation10 + $0x748] ss:$16 sps:$4 sm:$0xff]  }
 0x466   :  { %4108 = vmatpush2.bf16.msra.mxu0 %v6180_v48  ;;  %v6272_v48 = vld [vmem:[#allocation10 + $0x52c] ss:$16 sps:$4 sm:$0xff]  }
 0x467   :  { %4149 = vmatpush2.bf16.msra.mxu1 %v6183_v49  ;;  %4159 = vmatprep.subr.bf16.mxu0 %v6188_v50  ;;  %v6275_v49 = vld [vmem:[#allocation10 + $0x72c] ss:$16 sps:$4 sm:$0xff]   ;;  %v6270_v50 = vld [vmem:[#allocation10 + $0x528] ss:$16 sps:$4 sm:$0xff]  }
 0x468   :  { %4200 = vmatprep.subr.bf16.mxu1 %v6191_v51  ;;  %v6273_v51 = vld [vmem:[#allocation10 + $0x728] ss:$16 sps:$4 sm:$0xff]  }
 0x469   :  { %4110 = vmatmul.mubr.bf16.vlgmr.msra.gmra.mxu0 %v7160_v20  ;;  %v6201_v20 = vld [vmem:[#allocation10 + $0x6a8] ss:$16 sps:$4 sm:$0xff]  }
 0x46a   :  { %4151 = vmatmul.mubr.bf16.vlgmr.msra.gmra.mxu1 %v7162_v21  ;;  %4160 = vmatpush1.bf16.msra.mxu0 %v6186_v35  ;;  %v6209_v21 = vld [vmem:[#allocation10 + $0x68c] ss:$16 sps:$4 sm:$0xff]  }
 0x46b   :  { %4191 = vmatprep.mubr.bf16.mxu0 %v7168_v25  ;;  %4201 = vmatpush1.bf16.msra.mxu1 %v6189_v52  ;;  %v6207_v25 = vld [vmem:[#allocation10 + $0x688] ss:$16 sps:$4 sm:$0xff]   ;;  %v6278_v35 = vld [vmem:[#allocation10 + $0x50c] ss:$16 sps:$4 sm:$0xff]  }
 0x46c   :  { %4232 = vmatprep.mubr.bf16.mxu1 %v7170_v27  ;;  %4161 = vmatprep.subr.bf16.mxu0 %v6194_v56  ;;  %v6210_v27 = vld [vmem:[#allocation10 + $0x468] ss:$16 sps:$4 sm:$0xff]   ;;  %v6281_v52 = vld [vmem:[#allocation10 + $0x70c] ss:$16 sps:$4 sm:$0xff]  }
 0x46d   :  { %4202 = vmatprep.subr.bf16.mxu1 %v6197_v11  ;;  %v6276_v56 = vld [vmem:[#allocation10 + $0x508] ss:$16 sps:$4 sm:$0xff]  }
 0x46e   :  { %4162 = vmatpush1.bf16.msra.mxu0 %v6192_v57  ;;  %v6279_v11 = vld [vmem:[#allocation10 + $0x708] ss:$16 sps:$4 sm:$0xff]   ;;  %v2611_v57 = vld [vmem:[#allocation11] sm:$0xf] }
 0x46f   :  { %4203 = vmatpush1.bf16.msra.mxu1 %v6195_v12  ;;  %4163 = vmatprep.subr.bf16.mxu0 %v6200_v60  ;;  %v2616_v12 = vrot.slane %v2611_v57, %v7021_v29  ;;  %v2620_v60 = vrot.slane %v2611_v57, %v7026_v32 }
 0x470   :  { %4204 = vmatprep.subr.bf16.mxu1 %v6203_v62 }
 0x472   :  { %4164 = vmatpush1.bf16.msra.mxu0 %v6198_v9 }
 0x473   :  { %4205 = vmatpush1.bf16.msra.mxu1 %v6201_v20  ;;  %4165 = vmatprep.subr.bf16.mxu0 %v6206_v18 }
 0x474   :  { %4206 = vmatprep.subr.bf16.mxu1 %v6209_v21 }
 0x476   :  { %4166 = vmatpush1.bf16.msra.mxu0 %v6204_v63 }
 0x477   :  { %4207 = vmatpush1.bf16.msra.mxu1 %v6207_v25  ;;  %4167 = vmatprep.subr.bf16.mxu0 %v6212_v7 }
 0x478   :  { %4208 = vmatprep.subr.bf16.mxu1 %v6215_v0 }
 0x47a   :  { %4168 = vmatpush1.bf16.msra.mxu0 %v6210_v27 }
 0x47b   :  { %4209 = vmatpush1.bf16.msra.mxu1 %v6213_v14  ;;  %4169 = vmatprep.subr.bf16.mxu0 %v6218_v58 }
 0x47c   :  { %4210 = vmatprep.subr.bf16.mxu1 %v6221_v28 }
 0x47e   :  { %4170 = vmatpush1.bf16.msra.mxu0 %v6216_v59 }
 0x47f   :  { %4211 = vmatpush1.bf16.msra.mxu1 %v6219_v33  ;;  %4171 = vmatprep.subr.bf16.mxu0 %v6224_v1 }
 0x480   :  { %4212 = vmatprep.subr.bf16.mxu1 %v6227_v54 }
 0x482   :  { %4172 = vmatpush1.bf16.msra.mxu0 %v6222_v2 }
 0x483   :  { %4213 = vmatpush1.bf16.msra.mxu1 %v6225_v30  ;;  %4173 = vmatprep.subr.bf16.mxu0 %v6230_v3 }
 0x484   :  { %4214 = vmatprep.subr.bf16.mxu1 %v6233_v38 }
 0x486   :  { %4174 = vmatpush1.bf16.msra.mxu0 %v6228_v37 }
 0x487   :  { %4215 = vmatpush1.bf16.msra.mxu1 %v6231_v40  ;;  %4175 = vmatprep.subr.bf16.mxu0 %v6236_v5 }
 0x488   :  { %4216 = vmatprep.subr.bf16.mxu1 %v6239_v6 }
 0x48a   :  { %4176 = vmatpush2.bf16.msra.mxu0 %v6234_v8 }
 0x48b   :  { %4217 = vmatpush2.bf16.msra.mxu1 %v6237_v10  ;;  %4177 = vmatprep.subr.bf16.mxu0 %v6242_v13 }
 0x48c   :  { %4218 = vmatprep.subr.bf16.mxu1 %v6245_v17 }
 0x48e   :  { %4178 = vmatpush2.bf16.msra.mxu0 %v6240_v22 }
 0x48f   :  { %4219 = vmatpush2.bf16.msra.mxu1 %v6243_v24  ;;  %4179 = vmatprep.subr.bf16.mxu0 %v6248_v53  ;;  %v2624_v24 = vrot.slane %v2611_v57, %v7039_v47  ;;  %v2628_v53 = vrot.slane %v2611_v57, %v7042_v16  ;;  %v6290_v57 = vld [vmem:[#allocation16 + $0x64] ss:$8 sps:$4 sm:$0xff]  }
 0x490   :  { %4220 = vmatprep.subr.bf16.mxu1 %v6251_v34 }
 0x492   :  { %4180 = vmatpush2.bf16.msra.mxu0 %v6246_v36 }
 0x493   :  { %4221 = vmatpush2.bf16.msra.mxu1 %v6249_v39  ;;  %4181 = vmatprep.subr.bf16.mxu0 %v6254_v43 }
 0x494   :  { %4222 = vmatprep.subr.bf16.mxu1 %v6257_v55 }
 0x496   :  { %4182 = vmatpush2.bf16.msra.mxu0 %v6252_v61 }
 0x497   :  { %4223 = vmatpush2.bf16.msra.mxu1 %v6255_v31  ;;  %4183 = vmatprep.subr.bf16.mxu0 %v6260_v41 }
 0x498   :  { %4224 = vmatprep.subr.bf16.mxu1 %v6263_v42 }
 0x49a   :  { %4184 = vmatpush2.bf16.msra.mxu0 %v6258_v44 }
 0x49b   :  { %4225 = vmatpush2.bf16.msra.mxu1 %v6261_v46  ;;  %4185 = vmatprep.subr.bf16.mxu0 %v6266_v26 }
 0x49c   :  { %4226 = vmatprep.subr.bf16.mxu1 %v6269_v19 }
 0x49e   :  { %4186 = vmatpush2.bf16.msra.mxu0 %v6264_v4 }
 0x49f   :  { %4227 = vmatpush2.bf16.msra.mxu1 %v6267_v15  ;;  %4187 = vmatprep.subr.bf16.mxu0 %v6272_v48 }
 0x4a0   :  { %4228 = vmatprep.subr.bf16.mxu1 %v6275_v49 }
 0x4a2   :  { %4188 = vmatpush2.bf16.msra.mxu0 %v6270_v50 }
 0x4a3   :  { %4229 = vmatpush2.bf16.msra.mxu1 %v6273_v51  ;;  %4189 = vmatprep.subr.bf16.mxu0 %v6278_v35  ;;  %v6282_v35 = vld [vmem:[#allocation16 + $0x70] ss:$8 sps:$4 sm:$0xff]  }
 0x4a4   :  { %4230 = vmatprep.subr.bf16.mxu1 %v6281_v52  ;;  %v6284_v52 = vld [vmem:[#allocation16 + $0x74] ss:$8 sps:$4 sm:$0xff]  }
 0x4a6   :  { %4190 = vmatpush2.bf16.msra.mxu0 %v6276_v56  ;;  %v6285_v56 = vld [vmem:[#allocation16 + $0x170] ss:$8 sps:$4 sm:$0xff]  }
 0x4a7   :  { %4231 = vmatpush2.bf16.msra.mxu1 %v6279_v11  ;;  %v6287_v11 = vld [vmem:[#allocation16 + $0x174] ss:$8 sps:$4 sm:$0xff]   ;;  %4723 = vmatprep.subr.bf16.mxu0 %v6284_v52 }
 0x4a8   :  { %4764 = vmatprep.subr.bf16.mxu1 %v6287_v11  ;;  %v6356_v52 = vld [vmem:[#allocation16 + $0xb4] ss:$8 sps:$4 sm:$0xff]   ;;  %v6354_v11 = vld [vmem:[#allocation16 + $0xb0] ss:$8 sps:$4 sm:$0xff]  }
 0x4a9   :  { %4192 = vmatmul.mubr.bf16.vlgmr.msra.gmra.mxu0 %v7176_v23  ;;  %v3947_v62 = vpop.f32.mrf.mxu0  ;;  %v3988_v9 = vpop.f32.mrf.mxu1 }
 0x4aa   :  { %4233 = vmatmul.mubr.bf16.vlgmr.msra.gmra.mxu1 %v7178_v45  ;;  %v3948_v20 = vadd.f32 %v3947_v62, %v2616_v12  ;;  %v6293_v12 = vld [vmem:[#allocation16 + $0x164] ss:$8 sps:$4 sm:$0xff]   ;;  %4724 = vmatpush1.bf16.msra.mxu0 %v6282_v35  ;;  %v6291_v62 = vld [vmem:[#allocation16 + $0x160] ss:$8 sps:$4 sm:$0xff]  }
 0x4ab   :  { %v3949_v18 = vpop.f32.mrf.mxu0  ;;  %v3990_v21 = vpop.f32.mrf.mxu1  ;;  %4765 = vmatpush1.bf16.msra.mxu1 %v6285_v56  ;;  %4725 = vmatprep.subr.bf16.mxu0 %v6290_v57  ;;  %v6351_v35 = vld [vmem:[#allocation16 + $0x1c0] ss:$8 sps:$4 sm:$0xff]   ;;  %v6359_v56 = vld [vmem:[#allocation16 + $0x1b4] ss:$8 sps:$4 sm:$0xff]   ;;  %v6357_v57 = vld [vmem:[#allocation16 + $0x1b0] ss:$8 sps:$4 sm:$0xff]  }
 0x4ac   :  { %v3989_v63 = vadd.f32 %v3988_v9, %v3948_v20  ;;  %v3950_v25 = vadd.f32 %v3949_v18, %v2620_v60  ;;  %v6288_v60 = vld [vmem:[#allocation16 + $0x60] ss:$8 sps:$4 sm:$0xff]   ;;  %v6296_v9 = vld [vmem:[#allocation16 + $0x54] ss:$8 sps:$4 sm:$0xff]   ;;  %4766 = vmatprep.subr.bf16.mxu1 %v6293_v12  ;;  %v6294_v18 = vld [vmem:[#allocation16 + $0x50] ss:$8 sps:$4 sm:$0xff]  }
 0x4ad   :  { %v3951_v7 = vpop.f32.mrf.mxu0  ;;  %v3992_v0 = vpop.f32.mrf.mxu1  ;;  %v6299_v20 = vld [vmem:[#allocation16 + $0x154] ss:$8 sps:$4 sm:$0xff]   ;;  %v6362_v12 = vld [vmem:[#allocation16 + $0xa4] ss:$8 sps:$4 sm:$0xff]  }
 0x4ae   :  { %v3991_v27 = vadd.f32 %v3990_v21, %v3950_v25  ;;  %4726 = vmatpush1.bf16.msra.mxu0 %v6288_v60  ;;  %v6297_v21 = vld [vmem:[#allocation16 + $0x150] ss:$8 sps:$4 sm:$0xff]   ;;  %v6305_v25 = vld [vmem:[#allocation16 + $0x144] ss:$8 sps:$4 sm:$0xff]   ;;  %v6300_v7 = vld [vmem:[#allocation16 + $0x40] ss:$8 sps:$4 sm:$0xff]  }
 0x4af   :  { %v3952_v14 = vpop.f32.mrf.mxu0  ;;  %v3993_v58 = vpop.f32.mrf.mxu1  ;;  %4767 = vmatpush1.bf16.msra.mxu1 %v6291_v62  ;;  %4727 = vmatprep.subr.bf16.mxu0 %v6296_v9  ;;  %v6303_v0 = vld [vmem:[#allocation16 + $0x140] ss:$8 sps:$4 sm:$0xff]   ;;  %v6365_v60 = vld [vmem:[#allocation16 + $0x1a4] ss:$8 sps:$4 sm:$0xff]  }
 0x4b0   :  { %4768 = vmatprep.subr.bf16.mxu1 %v6299_v20  ;;  %v6311_v14 = vld [vmem:[#allocation16 + $0x134] ss:$8 sps:$4 sm:$0xff]   ;;  %v6306_v58 = vld [vmem:[#allocation16 + $0x30] ss:$8 sps:$4 sm:$0xff]   ;;  %v6360_v62 = vld [vmem:[#allocation16 + $0xa0] ss:$8 sps:$4 sm:$0xff]  }
 0x4b1   :  { %v6363_v9 = vld [vmem:[#allocation16 + $0x1a0] ss:$8 sps:$4 sm:$0xff]   ;;  %v6368_v20 = vld [vmem:[#allocation16 + $0x94] ss:$8 sps:$4 sm:$0xff]  }
 0x4b2   :  { %4728 = vmatpush1.bf16.msra.mxu0 %v6294_v18  ;;  %v6371_v18 = vld [vmem:[#allocation16 + $0x194] ss:$8 sps:$4 sm:$0xff]  }
 0x4b3   :  { %4769 = vmatpush1.bf16.msra.mxu1 %v6297_v21  ;;  %v6366_v21 = vld [vmem:[#allocation16 + $0x90] ss:$8 sps:$4 sm:$0xff]  }
 0x4b4   :  { %4770 = vmatprep.subr.bf16.mxu1 %v6305_v25  ;;  %v6374_v25 = vld [vmem:[#allocation16 + $0x84] ss:$8 sps:$4 sm:$0xff]  }
 0x4b7   :  { %4771 = vmatpush1.bf16.msra.mxu1 %v6303_v0  ;;  %v6372_v0 = vld [vmem:[#allocation16 + $0x80] ss:$8 sps:$4 sm:$0xff]  }
 0x4b8   :  { %4772 = vmatprep.subr.bf16.mxu1 %v6311_v14 }
 0x4e9   :  { %v4029_v28 = vpop.f32.mrf.mxu0  ;;  %v4070_v59 = vpop.f32.mrf.mxu1 }
 0x4ea   :  { %v4030_v33 = vadd.f32 %v4029_v28, %v3989_v63  ;;  %v6302_v63 = vld [vmem:[#allocation16 + $0x44] ss:$8 sps:$4 sm:$0xff]   ;;  %v6309_v28 = vld [vmem:[#allocation16 + $0x130] ss:$8 sps:$4 sm:$0xff]  }
 0x4eb   :  { %v4031_v1 = vpop.f32.mrf.mxu0  ;;  %v4072_v54 = vpop.f32.mrf.mxu1  ;;  %4729 = vmatprep.subr.bf16.mxu0 %v6302_v63  ;;  %4773 = vmatpush1.bf16.msra.mxu1 %v6309_v28  ;;  %v6369_v63 = vld [vmem:[#allocation16 + $0x190] ss:$8 sps:$4 sm:$0xff]  }
 0x4ec   :  { %v7192_v23 = vadd.f32 %v4070_v59, %v4030_v33  ;;  %v4032_v2 = vadd.f32 %v4031_v1, %v3991_v27  ;;  %v6308_v27 = vld [vmem:[#allocation16 + $0x34] ss:$8 sps:$4 sm:$0xff]   ;;  %4730 = vmatpush1.bf16.msra.mxu0 %v6300_v7  ;;  %v6314_v59 = vld [vmem:[#allocation16 + $0x24] ss:$8 sps:$4 sm:$0xff]   ;;  %v6312_v1 = vld [vmem:[#allocation16 + $0x20] ss:$8 sps:$4 sm:$0xff]  }
 0x4ed   :  { %v4033_v30 = vpop.f32.mrf.mxu0  ;;  %v4074_v45 = vpop.f32.mrf.mxu1  ;;  %4731 = vmatprep.subr.bf16.mxu0 %v6308_v27  ;;  %v6317_v33 = vld [vmem:[#allocation16 + $0x124] ss:$8 sps:$4 sm:$0xff]   ;;  %v6375_v27 = vld [vmem:[#allocation16 + $0x180] ss:$8 sps:$4 sm:$0xff]  }
 0x4ee   :  { %v7194_v3 = vadd.f32 %v4072_v54, %v4032_v2  ;;  %v6315_v54 = vld [vmem:[#allocation16 + $0x120] ss:$8 sps:$4 sm:$0xff]   ;;  %v6320_v2 = vld [vmem:[#allocation16 + $0x14] ss:$8 sps:$4 sm:$0xff]   ;;  %4774 = vmatprep.subr.bf16.mxu1 %v6317_v33  ;;  %v6318_v45 = vld [vmem:[#allocation16 + $0x10] ss:$8 sps:$4 sm:$0xff]  }
 0x4ef   :  { %v4034_v38 = vpop.f32.mrf.mxu0  ;;  %v4075_v37 = vpop.f32.mrf.mxu1  ;;  %v6323_v30 = vld [vmem:[#allocation16 + $0x114] ss:$8 sps:$4 sm:$0xff]   ;;  %4775 = vmatpush1.bf16.msra.mxu1 %v6315_v54  ;;  %v6377_v7 = vld [vmem:[#allocation16 + $0x184] ss:$8 sps:$4 sm:$0xff]  }
 0x4f0   :  { %v4241_v42 = vadd.f32 %v7194_v3, %v7192_v23  ;;  %4732 = vmatpush1.bf16.msra.mxu0 %v6306_v58  ;;  %v6321_v38 = vld [vmem:[#allocation16 + $0x110] ss:$8 sps:$4 sm:$0xff]   ;;  %v6326_v37 = vld [vmem:[#allocation16 + $0x4] ss:$8 sps:$4 sm:$0xff]   ;;  %4776 = vmatprep.subr.bf16.mxu1 %v6323_v30  ;;  %v4293_v33 = vld [vmem:[#allocation14] sm:$0xf] }
 0x4f1   :  { %4733 = vmatprep.subr.bf16.mxu0 %v6314_v59  ;;  %v4267_v59 = vld [vmem:[#allocation13] sm:$0xf] }
 0x4f2   :  { %v4284_v54 = vrot.slane %v4267_v59, %v7042_v16  ;;  %v4280_v30 = vrot.slane %v4267_v59, %v7039_v47 }
 0x4f3   :  { %4777 = vmatpush1.bf16.msra.mxu1 %v6321_v38  ;;  %v4302_v38 = vrot.slane %v4293_v33, %v7026_v32 }
 0x4f4   :  { %4734 = vmatpush1.bf16.msra.mxu0 %v6312_v1  ;;  %v4276_v1 = vrot.slane %v4267_v59, %v7026_v32 }
 0x4f5   :  { %4735 = vmatprep.subr.bf16.mxu0 %v6320_v2  ;;  %v4272_v2 = vrot.slane %v4267_v59, %v7021_v29  ;;  %v6386_v59 = vld [vmem:[%s7312_s14 + $0x58] sm:$0xff]  }
 0x4f8   :  { %4736 = vmatpush1.bf16.msra.mxu0 %v6318_v45 }
 0x4f9   :  { %4737 = vmatprep.subr.bf16.mxu0 %v6326_v37  ;;  %v4310_v37 = vrot.slane %v4293_v33, %v7042_v16 }
 0x529   :  { %v4111_v40 = vpop.f32.mrf.mxu0 }
 0x52a   :  { %v4152_v5 = vpop.f32.mrf.mxu1  ;;  %v4112_v34 = vadd.f32 %v4111_v40, %v2624_v24  ;;  %v6329_v40 = vld [vmem:[#allocation16 + $0x104] ss:$8 sps:$4 sm:$0xff]  }
 0x52b   :  { %v4113_v6 = vpop.f32.mrf.mxu0  ;;  %4778 = vmatprep.subr.bf16.mxu1 %v6329_v40  ;;  %v4298_v40 = vrot.slane %v4293_v33, %v7021_v29 }
 0x52c   :  { %v4154_v8 = vpop.f32.mrf.mxu1  ;;  %v4114_v36 = vadd.f32 %v4113_v6, %v2628_v53  ;;  %v4153_v39 = vadd.f32 %v4152_v5, %v4112_v34  ;;  %v6324_v5 = vld [vmem:[#allocation16] ss:$8 sps:$4 sm:$0xff]  }
 0x52d   :  { %v4115_v10 = vpop.f32.mrf.mxu0  ;;  %v6327_v6 = vld [vmem:[#allocation16 + $0x100] ss:$8 sps:$4 sm:$0xff]   ;;  %4738 = vmatpush1.bf16.msra.mxu0 %v6324_v5  ;;  %v4306_v5 = vrot.slane %v4293_v33, %v7039_v47  ;;  %v6387_v33 = vld [vmem:[%s7312_s14 + $0x18] sm:$0xff]  }
 0x52e   :  { %v4156_v13 = vpop.f32.mrf.mxu1  ;;  %v4155_v55 = vadd.f32 %v4154_v8, %v4114_v36  ;;  %v6332_v8 = vld [vmem:[#allocation16 + $0xf4] ss:$8 sps:$4 sm:$0xff]   ;;  %4779 = vmatpush1.bf16.msra.mxu1 %v6327_v6 }
 0x52f   :  { %v4116_v17 = vpop.f32.mrf.mxu0  ;;  %v6335_v10 = vld [vmem:[#allocation16 + $0x1f4] ss:$8 sps:$4 sm:$0xff]   ;;  %v6330_v13 = vld [vmem:[#allocation16 + $0xf0] ss:$8 sps:$4 sm:$0xff]   ;;  %4739 = vmatprep.subr.bf16.mxu0 %v6332_v8 }
 0x530   :  { %v4157_v22 = vpop.f32.mrf.mxu1  ;;  %v6333_v17 = vld [vmem:[#allocation16 + $0x1f0] ss:$8 sps:$4 sm:$0xff]   ;;  %4780 = vmatprep.subr.bf16.mxu1 %v6335_v10 }
 0x531   :  { %4740 = vmatpush2.bf16.msra.mxu0 %v6330_v13 }
 0x532   :  { %4781 = vmatpush2.bf16.msra.mxu1 %v6333_v17 }
 0x569   :  { %v4193_v43 = vpop.f32.mrf.mxu0 }
 0x56a   :  { %v4194_v61 = vadd.f32 %v4193_v43, %v4153_v39  ;;  %v4234_v31 = vpop.f32.mrf.mxu1 }
 0x56b   :  { %v4195_v41 = vpop.f32.mrf.mxu0 }
 0x56c   :  { %v7200_v44 = vadd.f32 %v4234_v31, %v4194_v61  ;;  %v4196_v46 = vadd.f32 %v4195_v41, %v4155_v55  ;;  %v4236_v26 = vpop.f32.mrf.mxu1 }
 0x56d   :  { %v4197_v19 = vpop.f32.mrf.mxu0 }
 0x56e   :  { %v7202_v4 = vadd.f32 %v4236_v26, %v4196_v46  ;;  %v4238_v15 = vpop.f32.mrf.mxu1  ;;  %v4242_v48 = vadd.f32 %v4241_v42, %v7200_v44  ;;  %v6338_v42 = vld [vmem:[#allocation16 + $0xe4] ss:$8 sps:$4 sm:$0xff]   ;;  %v6336_v46 = vld [vmem:[#allocation16 + $0xe0] ss:$8 sps:$4 sm:$0xff]   ;;  %v6342_v19 = vld [vmem:[#allocation16 + $0xd0] ss:$8 sps:$4 sm:$0xff]  }
 0x56f   :  { %v4198_v49 = vpop.f32.mrf.mxu0  ;;  %v6339_v26 = vld [vmem:[#allocation16 + $0x1e0] ss:$8 sps:$4 sm:$0xff]   ;;  %4741 = vmatprep.subr.bf16.mxu0 %v6338_v42  ;;  %v6345_v15 = vld [vmem:[#allocation16 + $0x1d0] ss:$8 sps:$4 sm:$0xff]  }
 0x570   :  { %v4239_v50 = vpop.f32.mrf.mxu1  ;;  %v4243_v51 = vadd.f32 %v4242_v48, %v7202_v4  ;;  %4742 = vmatpush2.bf16.msra.mxu0 %v6336_v46  ;;  %v6347_v48 = vld [vmem:[#allocation16 + $0x1d4] ss:$8 sps:$4 sm:$0xff]   ;;  %v6350_v49 = vld [vmem:[#allocation16 + $0xc4] ss:$8 sps:$4 sm:$0xff]  }
 0x571   :  { %v6353_v50 = vld [vmem:[#allocation16 + $0x1c4] ss:$8 sps:$4 sm:$0xff]  }
 0x572   :  { %4244 = vadd.xlane.f32.xlu1 %v4243_v51  ;;  %v6348_v51 = vld [vmem:[#allocation16 + $0xc0] ss:$8 sps:$4 sm:$0xff]  }
 0x5fb   :  { %v4245_v22 = vpop.xlane.xlu1 %4244 }
 0x5fc   :  { %v4246_v24 = vmul.f32 0.001953125, %v4245_v22 }
 0x5fe   :  { %v7207_v53 = vsub.f32 %v7192_v23, %v4246_v24  ;;  %v7210_v34 = vsub.f32 %v7194_v3, %v4246_v24  ;;  %v7213_v36 = vsub.f32 %v7200_v44, %v4246_v24  ;;  %v7216_v39 = vsub.f32 %v7202_v4, %v4246_v24  ;;  %v6341_v44 = vld [vmem:[#allocation16 + $0x1e4] ss:$8 sps:$4 sm:$0xff]   ;;  %v6344_v4 = vld [vmem:[#allocation16 + $0xd4] ss:$8 sps:$4 sm:$0xff]  }
 0x5ff   :  { %4782 = vmatprep.subr.bf16.mxu1 %v6341_v44  ;;  %4743 = vmatprep.subr.bf16.mxu0 %v6344_v4 }
 0x600   :  { %v4251_v43 = vmul.f32 %v7207_v53, %v7207_v53  ;;  %v4252_v55 = vmul.f32 %v7210_v34, %v7210_v34  ;;  %v4253_v61 = vmul.f32 %v7213_v36, %v7213_v36  ;;  %v4254_v3 = vmul.f32 %v7216_v39, %v7216_v39  ;;  %4783 = vmatpush2.bf16.msra.mxu1 %v6339_v26 }
 0x601   :  { %4784 = vmatprep.subr.bf16.mxu1 %v6347_v48  ;;  %4744 = vmatpush2.bf16.msra.mxu0 %v6342_v19 }
 0x602   :  { %v4255_v23 = vadd.f32 %v4252_v55, %v4251_v43  ;;  %4745 = vmatprep.subr.bf16.mxu0 %v6350_v49 }
 0x604   :  { %v4256_v31 = vadd.f32 %v4255_v23, %v4253_v61  ;;  %4785 = vmatpush2.bf16.msra.mxu1 %v6345_v15 }
 0x605   :  { %4786 = vmatprep.subr.bf16.mxu1 %v6353_v50  ;;  %4746 = vmatpush2.bf16.msra.mxu0 %v6348_v51 }
 0x606   :  { %v4257_v41 = vadd.f32 %v4256_v31, %v4254_v3  ;;  %4747 = vmatprep.subr.bf16.mxu0 %v6356_v52 }
 0x608   :  { %4258 = vadd.xlane.f32.xlu1 %v4257_v41  ;;  %4787 = vmatpush2.bf16.msra.mxu1 %v6351_v35 }
 0x609   :  { %4788 = vmatprep.subr.bf16.mxu1 %v6359_v56  ;;  %4748 = vmatpush2.bf16.msra.mxu0 %v6354_v11 }
 0x60a   :  { %4749 = vmatprep.subr.bf16.mxu0 %v6362_v12  ;;  %v6378_v12 = vld [vmem:[%s7312_s14 + $0x78] sm:$0xff]  }
 0x60c   :  { %4789 = vmatpush2.bf16.msra.mxu1 %v6357_v57 }
 0x60d   :  { %4790 = vmatprep.subr.bf16.mxu1 %v6365_v60  ;;  %4750 = vmatpush2.bf16.msra.mxu0 %v6360_v62  ;;  %v6379_v60 = vld [vmem:[%s7312_s14 + $0x38] sm:$0xff]  }
 0x60e   :  { %4751 = vmatprep.subr.bf16.mxu0 %v6368_v20 }
 0x610   :  { %4791 = vmatpush2.bf16.msra.mxu1 %v6363_v9 }
 0x611   :  { %4792 = vmatprep.subr.bf16.mxu1 %v6371_v18  ;;  %4752 = vmatpush2.bf16.msra.mxu0 %v6366_v21 }
 0x612   :  { %4753 = vmatprep.subr.bf16.mxu0 %v6374_v25 }
 0x614   :  { %4793 = vmatpush2.bf16.msra.mxu1 %v6369_v63 }
 0x615   :  { %4794 = vmatprep.subr.bf16.mxu1 %v6377_v7  ;;  %4754 = vmatpush2.bf16.msra.mxu0 %v6372_v0  ;;  %v6380_v7 = vld [vmem:[%s7312_s14 + $0x70] sm:$0xff]  }
 0x616   :  { %5815 = vmatprep.subr.bf16.mxu0 %v6378_v12  ;;  %v6381_v0 = vld [vmem:[%s7312_s14 + $0x30] sm:$0xff]  }
 0x618   :  { %4795 = vmatpush2.bf16.msra.mxu1 %v6375_v27  ;;  %v6382_v27 = vld [vmem:[%s7312_s14 + $0x68] sm:$0xff]  }
 0x691   :  { %v4259_v14 = vpop.xlane.xlu1 %4258 }
 0x692   :  { %v4260_v58 = vmul.f32 0.001953125, %v4259_v14  ;;  %v6383_v14 = vld [vmem:[%s7312_s14 + $0x28] sm:$0xff]  }
 0x694   :  { %v4261_v28 = vadd.f32 1e-05, %v4260_v58  ;;  %v6384_v58 = vld [vmem:[%s7312_s14 + $0x60] sm:$0xff]  }
 0x696   :  { %6404 = vrsqrt.f32 %v4261_v28  ;;  %v6385_v28 = vld [vmem:[%s7312_s14 + $0x20] sm:$0xff]  }
 0x6a3   :  { %v6405_v45 = vpop.eup %6404 }
 0x6a4   :  { %v4264_v6 = vmul.f32 %v6405_v45, %v7210_v34  ;;  %v4266_v8 = vmul.f32 %v6405_v45, %v7216_v39  ;;  %v4263_v10 = vmul.f32 %v6405_v45, %v7207_v53  ;;  %v4265_v13 = vmul.f32 %v6405_v45, %v7213_v36  ;;  %v4391_v53 = vld [vmem:[#allocation17] sm:$0x3] }
 0x6a5   :  { %v4396_v36 = vrot.slane %v4391_v53, %v7021_v29  ;;  %v4400_v46 = vrot.slane %v4391_v53, %v7026_v32  ;;  %v6392_v45 = vld [vmem:[%s7312_s14 + $0x40] sm:$0xff]  }
 0x6a6   :  { %v4290_v17 = vmul.f32 %v4276_v1, %v4264_v6  ;;  %v4292_v22 = vmul.f32 %v4284_v54, %v4266_v8  ;;  %v4289_v24 = vmul.f32 %v4272_v2, %v4263_v10  ;;  %v4291_v43 = vmul.f32 %v4280_v30, %v4265_v13  ;;  %v6388_v1 = vld [vmem:[%s7312_s14 + $0x50] sm:$0xff]   ;;  %v6390_v2 = vld [vmem:[%s7312_s14 + $0x48] sm:$0xff]   ;;  %v4821_v6 = vld [vmem:[#allocation19] sm:$0x3] }
 0x6a7   :  { %v6389_v54 = vld [vmem:[%s7312_s14 + $0x10] sm:$0xff]   ;;  %v6391_v30 = vld [vmem:[%s7312_s14 + $0x8] sm:$0xff]   ;;  %v4826_v10 = vrot.slane %v4821_v6, %v7021_v29  ;;  %v4830_v13 = vrot.slane %v4821_v6, %v7026_v32 }
 0x6a8   :  { %v4316_v55 = vadd.f32 %v4302_v38, %v4290_v17  ;;  %v4318_v61 = vadd.f32 %v4310_v37, %v4292_v22  ;;  %v4315_v23 = vadd.f32 %v4298_v40, %v4289_v24  ;;  %v4317_v16 = vadd.f32 %v4306_v5, %v4291_v43  ;;  %v6393_v38 = vld [vmem:[%s7312_s14] sm:$0xff]   ;;  %v4835_v8 = vld [vmem:[#allocation20] sm:$0x3] }
 0x6a9   :  { %v4840_v24 = vrot.slane %v4835_v8, %v7021_v29  ;;  %v4844_v43 = vrot.slane %v4835_v8, %v7026_v32  ;;  %v6394_v32 = vld [vmem:[#allocation26 + $0x38] sm:$0xff]  }
 0x6aa   :  { %v4320_v3 = vmax.f32 %v4316_v55, 0.0  ;;  %v4322_v31 = vmax.f32 %v4318_v61, 0.0  ;;  %v4319_v41 = vmax.f32 %v4315_v23, 0.0  ;;  %v4321_v47 = vmax.f32 %v4317_v16, 0.0 }
 0x6ac   :  { %v4324_v42 = vpack.c.bf16 %v4320_v3, %v4320_v3  ;;  %v4326_v34 = vpack.c.bf16 %v4322_v31, %v4322_v31  ;;  %v4323_v44 = vpack.c.bf16 %v4319_v41, %v4319_v41  ;;  %v4325_v39 = vpack.c.bf16 %v4321_v47, %v4321_v47 }
 0x6ae   :  { %4755 = vmatprep.mubr.bf16.mxu0 %v4324_v42  ;;  %4796 = vmatprep.mubr.bf16.mxu1 %v4326_v34 }
 0x6af   :  { %4756 = vmatmul.mubr.bf16.vlgmr.msra.gmra.mxu0 %v4323_v44  ;;  %4797 = vmatmul.mubr.bf16.vlgmr.msra.gmra.mxu1 %v4325_v39  ;;  %v5787_v39 = vld [vmem:[#allocation22] ss:$0 sm:$0xff] }
 0x6b0   :  { %5816 = vmatpush3.bf16.msra.mxu0 %v6379_v60 }
 0x6b1   :  { %5817 = vmatprep.subr.bf16.mxu0 %v6380_v7 }
 0x6b4   :  { %5818 = vmatpush3.bf16.msra.mxu0 %v6381_v0  ;;  %v5168_v0 = vld [vmem:[%s7329_s23] sm:$0xf] }
 0x6b5   :  { %5819 = vmatprep.subr.bf16.mxu0 %v6382_v27  ;;  %v5806_v27 = vld [vmem:[#allocation28] ss:$0 sm:$0xff] }
 0x6b8   :  { %5820 = vmatpush3.bf16.msra.mxu0 %v6383_v14  ;;  %v5169_v14 = vunpack.c.l.bf16 %v5168_v0 }
 0x6b9   :  { %5821 = vmatprep.subr.bf16.mxu0 %v6384_v58 }
 0x6bc   :  { %5822 = vmatpush3.bf16.msra.mxu0 %v6385_v28 }
 0x6bd   :  { %5823 = vmatprep.subr.bf16.mxu0 %v6386_v59 }
 0x6c0   :  { %5824 = vmatpush3.bf16.msra.mxu0 %v6387_v33 }
 0x6c1   :  { %5825 = vmatprep.subr.bf16.mxu0 %v6388_v1 }
 0x6c4   :  { %5826 = vmatpush3.bf16.msra.mxu0 %v6389_v54 }
 0x6c5   :  { %5827 = vmatprep.subr.bf16.mxu0 %v6390_v2 }
 0x6c8   :  { %5828 = vmatpush3.bf16.msra.mxu0 %v6391_v30 }
 0x6c9   :  { %5829 = vmatprep.subr.bf16.mxu0 %v6392_v45 }
 0x6cc   :  { %5830 = vmatpush3.bf16.msra.mxu0 %v6393_v38 }
 0x76f   :  { %v4757_v26 = vpop.f32.mrf.mxu0  ;;  %v4798_v19 = vpop.f32.mrf.mxu1 }
 0x770   :  { %v4758_v4 = vadd.f32 %v4757_v26, %v4396_v36  ;;  %v6819_v26 = vmov 0.0  }
 0x771   :  { %v4759_v15 = vpop.f32.mrf.mxu0  ;;  %v4800_v48 = vpop.f32.mrf.mxu1  ;;  %5846 = vmatprep.subr.bf16.mxu1 %v6819_v26  ;;  %5862 = vmatprep.mubr.msk.bf16.mxu1 %vm6820_vm0, %v6819_v26 }
 0x772   :  { %v4760_v49 = vadd.f32 %v4759_v15, %v4400_v46  ;;  %v4799_v35 = vadd.f32 %v4798_v19, %v4758_v4  ;;  %5847 = vmatpush3.bf16.msra.mxu1 %v6394_v32 }
 0x773   :  { %v4761_v50 = vpop.f32.mrf.mxu0  ;;  %v4802_v51 = vpop.f32.mrf.mxu1  ;;  %5848 = vmatprep.subr.bf16.mxu1 %v6819_v26 }
 0x774   :  { %v4801_v52 = vadd.f32 %v4800_v48, %v4760_v49  ;;  %v6395_v49 = vld [vmem:[#allocation26 + $0x30] sm:$0xff]   ;;  %v6396_v50 = vld [vmem:[#allocation26 + $0x28] sm:$0xff]   ;;  %v6397_v51 = vld [vmem:[#allocation26 + $0x20] sm:$0xff]  }
 0x775   :  { %v4762_v56 = vpop.f32.mrf.mxu0  ;;  %v4803_v11 = vpop.f32.mrf.mxu1 }
 0x776   :  { %v4805_v57 = vadd.f32 %v4801_v52, %v4799_v35  ;;  %5849 = vmatpush3.bf16.msra.mxu1 %v6395_v49  ;;  %v6400_v56 = vld [vmem:[#allocation26 + $0x8] sm:$0xff]   ;;  %v6401_v11 = vld [vmem:[#allocation26] sm:$0xff]  }
 0x777   :  { %5850 = vmatprep.subr.bf16.mxu1 %v6819_v26 }
 0x778   :  { %4806 = vadd.xlane.f32.xlu0 %v4805_v57 }
 0x77a   :  { %5851 = vmatpush3.bf16.msra.mxu1 %v6396_v50 }
 0x77b   :  { %5852 = vmatprep.subr.bf16.mxu1 %v6819_v26 }
 0x77e   :  { %5853 = vmatpush3.bf16.msra.mxu1 %v6397_v51 }
 0x77f   :  { %5854 = vmatprep.subr.bf16.mxu1 %v6819_v26 }
 0x801   :  { %v4807_v62 = vpop.xlane.xlu0 %4806 }
 0x802   :  { %v4808_v9 = vmul.f32 0.00390625, %v4807_v62 }
 0x804   :  { %v4809_v20 = vsub.f32 %v4799_v35, %v4808_v9  ;;  %v4810_v18 = vsub.f32 %v4801_v52, %v4808_v9  ;;  %v6398_v35 = vld [vmem:[#allocation26 + $0x18] sm:$0xff]   ;;  %v6399_v52 = vld [vmem:[#allocation26 + $0x10] sm:$0xff]  }
 0x805   :  { %5855 = vmatpush3.bf16.msra.mxu1 %v6398_v35  ;;  %v5804_v9 = vld [vmem:[#allocation23] ss:$0 sm:$0xff] }
 0x806   :  { %v4811_v21 = vmul.f32 %v4809_v20, %v4809_v20  ;;  %v4812_v63 = vmul.f32 %v4810_v18, %v4810_v18  ;;  %5856 = vmatprep.subr.bf16.mxu1 %v6819_v26 }
 0x808   :  { %v4813_v25 = vadd.f32 %v4812_v63, %v4811_v21 }
 0x809   :  { %5857 = vmatpush3.bf16.msra.mxu1 %v6399_v52 }
 0x80a   :  { %4814 = vadd.xlane.f32.xlu1 %v4813_v25  ;;  %5858 = vmatprep.subr.bf16.mxu1 %v6819_v26 }
 0x80d   :  { %5859 = vmatpush3.bf16.msra.mxu1 %v6400_v56 }
 0x80e   :  { %5860 = vmatprep.subr.bf16.mxu1 %v6819_v26 }
 0x811   :  { %5861 = vmatpush3.bf16.msra.mxu1 %v6401_v11 }
 0x893   :  { %v4815_v37 = vpop.xlane.xlu1 %4814 }
 0x894   :  { %v4816_v40 = vmul.f32 0.00390625, %v4815_v37 }
 0x896   :  { %v4817_v5 = vadd.f32 1e-05, %v4816_v40 }
 0x898   :  { %6406 = vrsqrt.f32 %v4817_v5 }
 0x8a5   :  { %v6407_v17 = vpop.eup %6406 }
 0x8a6   :  { %v4820_v22 = vmul.f32 %v6407_v17, %v4810_v18  ;;  %v4819_v55 = vmul.f32 %v6407_v17, %v4809_v20  ;;  %v5805_v18 = vld [vmem:[#allocation25] ss:$0 sm:$0xff] }
 0x8a8   :  { %v4834_v61 = vmul.f32 %v4830_v13, %v4820_v22  ;;  %v4833_v23 = vmul.f32 %v4826_v10, %v4819_v55 }
 0x8aa   :  { %v4848_v16 = vadd.f32 %v4844_v43, %v4834_v61  ;;  %v4847_v3 = vadd.f32 %v4840_v24, %v4833_v23 }
 0x8ac   :  { %v4850_v31 = vmax.f32 %v4848_v16, 0.0  ;;  %v4849_v41 = vmax.f32 %v4847_v3, 0.0 }
 0x8ae   :  { %v4852_v47 = vpack.c.bf16 %v4850_v31, %v4850_v31  ;;  %v4851_v42 = vpack.c.bf16 %v4849_v41, %v4849_v41 }
 0x8b0   :  { %5020 = vmatprep.mubr.bf16.mxu0 %v4852_v47 }
 0x8b1   :  { %5021 = vmatmul.mubr.bf16.vlgmr.msra.gmra.mxu0 %v4851_v42 }
 0x971   :  { %v5831_v34 = vpop.f32.mrf.mxu0 }
 0x973   :  { %v5832_v44 = vpop.f32.mrf.mxu0 }
 0x974   :  { %v5833_v53 = vadd.f32 %v5832_v44, %v5831_v34 }
 0x975   :  { %v5834_v36 = vpop.f32.mrf.mxu0 }
 0x976   :  { %v5023_v46 = vadd.f32 %v5833_v53, %v5787_v39 }
 0x977   :  { %v5835_v29 = vpop.f32.mrf.mxu0 }
 0x978   :  { %5028 = vadd.xlane.f32.xlu0 %v5023_v46 }
 0xa01   :  { %v5029_v19 = vpop.xlane.xlu0 %5028 }
 0xa02   :  { %v5030_v4 = vmul.f32 0.0078125, %v5029_v19 }
 0xa04   :  { %v5031_v15 = vsub.f32 %v5023_v46, %v5030_v4 }
 0xa06   :  { %v5032_v48 = vmul.f32 %v5031_v15, %v5031_v15 }
 0xa08   :  { %5033 = vadd.xlane.f32.xlu1 %v5032_v48 }
 0xa91   :  { %v5034_v57 = vpop.xlane.xlu1 %5033 }
 0xa92   :  { %v5035_v12 = vmul.f32 0.0078125, %v5034_v57 }
 0xa94   :  { %v5036_v60 = vadd.f32 1e-05, %v5035_v12 }
 0xa96   :  { %6408 = vrsqrt.f32 %v5036_v60 }
 0xaa3   :  { %v6409_v62 = vpop.eup %6408 }
 0xaa4   :  { %v5038_v20 = vmul.f32 %v6409_v62, %v5031_v15 }
 0xaa6   :  { %v5046_v21 = vmul.f32 %v5804_v9, %v5038_v20 }
 0xaa8   :  { %v5054_v63 = vadd.f32 %v5805_v18, %v5046_v21 }
 0xaaa   :  { %v5055_v25 = vmax.f32 %v5054_v63, 0.0 }
 0xaac   :  { %v5056_v7 = vpack.c.bf16 %v5055_v25, %v5055_v25 }
 0xaae   :  { %5863 = vmatmul.mubr.bf16.vlgmr.msra.gmra.mxu1 %v5056_v7 }
 0xb6e   :  { %v5162_v58 = vpop.f32.mrf.mxu1 }
 0xb6f   :  { %v5163_v28 = vadd.f32 %v5806_v27, %v5162_v58 }
 0xb70   :  { %v5864_v59 = vpop.f32.mrf.mxu1 }
 0xb71   :  { %v5170_v33 = vadd.f32 %v5169_v14, %v5163_v28 }
 0xb72   :  { %v5165_v1 = vpop.f32.mrf.mxu1 }
 0xb73   :  { %5171 = vmax.xlane.f32.xlu0 %v5170_v33 }
 0xb74   :  { %v5865_v54 = vpop.f32.mrf.mxu1 }
 0xbfc   :  { %v5172_v2 = vpop.xlane.xlu0 %5171 }
 0xbfd   :  { %v5173_v30 = vsub.f32 %v5170_v33, %v5172_v2 }
 0xbff   :  { %v5174_v45 = vmul.f32 1.442695, %v5173_v30 }
 0xc01   :  { %6410 = vpow2.f32 %v5174_v45 }
 0xc0e   :  { %v6411_v38 = vpop.eup %6410 }
 0xc0f   :  { %5176 = vadd.xlane.f32.xlu1 %v6411_v38 }
 0xc98   :  { %v5177_v37 = vpop.xlane.xlu1 %5176 }
 0xc99   :  { %6412 = vrcp.f32 %v5177_v37 }
 0xca6   :  { %v6413_v40 = vpop.eup %6412 }
 0xca7   :  { %v5179_v5 = vmul.f32 %v6413_v40, %v5177_v37 }
 0xca9   :  { %v5180_v6 = vsub.f32 2.0, %v5179_v5 }
 0xcab   :  { %v5181_v8 = vmul.f32 %v6413_v40, %v5180_v6 }
 0xcad   :  { %v5182_v10 = vmul.f32 %v6411_v38, %v5181_v8 }
 0xcaf   :  { %5183 = vst [vmem:[#allocation29] sm:$0xff] %v5182_v10 }
 0xcb0   :  { %6765 = shalt.err (!%p6762_p5)
}
 0xcb1   :  { %5193 = dma.vmem_to_hbm [thread:$0]  %s5191_s11, 128, %s7318_s20, [#allocation4]  }
 0xcb2   :  { %6792 = dma.done.wait [#allocation4], 128  }
 0xcb3   :  { %6793 = vsyncadd [#allocation4], 4294967168 }
 0xcb4   :  { %5197 = vsyncpa [#allocation3], 1 }
 0xcb5   :  { %5198 = vsyncpa [#allocation6], 1 }
 0xcb6   :  { %5199 = vsyncpa [#allocation9], 1 }
 0xcb7   :  { %5200 = vsyncpa [#allocation12], 1 }
 0xcb8   :  { %5201 = vsyncpa [#allocation15], 1 }
 0xcb9   :  { %5202 = vsyncpa [#allocation18], 1 }
 0xcba   :  { %5203 = vsyncpa [#allocation21], 1 }
 0xcbb   :  { %5204 = vsyncpa [#allocation24], 1 }
 0xcbc   :  { %5205 = vsyncpa [#allocation27], 1 }
 0xcbd   :  { %5206 = vsyncpa [#allocation4], 1 }

</bundles_post_ra>
